<compile_context>
chip_gen: v5e
topology: v5e:2x2
jax: 0.10.0
libtpu: 0.0.40
codegen_flags: <defaults>
</compile_context>

<pallas_src>
import jax
import jax.numpy as jnp
from jax.experimental import pallas as pl
from jax.experimental.pallas import tpu as pltpu


# Fused contraction length: 8192 + 131072 + 82944 = 222208 = 31 * 7168.
K_TOTAL = 8192 + 131072 + 82944
TK = 7168                  # K tile -> 31 grid steps, 7 MiB contiguous weight DMA/step
N_HIDDEN = 512
N_TILES = 2                # hidden columns split in 2 -> "parallel" axis for v7x megacore
TN = N_HIDDEN // N_TILES   # 256


def _ensemble_kernel(x_ref, w_ref, b_ref, w4_ref, o_ref, h_acc):
    """Grid = (N_TILES, K_TOTAL // TK).

    Per (j, k) step: h_acc += x[k-slab] @ W[k-slab, j-cols].
    At the last k step: add the hidden bias slice and apply fc4's matching
    row slice, writing this column tile's partial output.
    """
    k = pl.program_id(1)

    @pl.when(k == 0)
    def _():
        h_acc[...] = jnp.zeros_like(h_acc)

    # x is resident in VMEM as (K//TK, M, TK); dynamic index on leading axis.
    h_acc[...] += jnp.dot(x_ref[k], w_ref[0],
                          preferred_element_type=jnp.float32)

    @pl.when(k == pl.num_programs(1) - 1)
    def _():
        h = h_acc[...] + b_ref[0]                       # (M, TN)
        o_ref[0] = jnp.dot(h, w4_ref[0],
                           preferred_element_type=jnp.float32).astype(o_ref.dtype)


def _fused_forward(x_blocks, w_packed, b_packed, w4_packed):
    nk, m, tk = x_blocks.shape
    n_tiles, _, tn = w_packed.shape
    out_size = w4_packed.shape[-1]

    return pl.pallas_call(
        _ensemble_kernel,
        out_shape=jax.ShapeDtypeStruct((n_tiles, m, out_size), jnp.float32),
        grid_spec=pltpu.PrefetchScalarGridSpec(
            num_scalar_prefetch=0,
            grid=(n_tiles, nk),
            in_specs=[
                # activations: ~1.7 MiB, kept resident (constant index map)
                pl.BlockSpec((nk, m, tk), lambda j, k: (0, 0, 0)),
                # weights: the only large stream; contiguous (TK, TN) slabs
                pl.BlockSpec((1, tk, tn), lambda j, k: (j, k, 0)),
                # hidden-bias slice for this column tile
                pl.BlockSpec((1, 1, tn), lambda j, k: (j, 0, 0)),
                # fc4 weight rows matching this column tile
                pl.BlockSpec((1, tn, out_size), lambda j, k: (j, 0, 0)),
            ],
            out_specs=pl.BlockSpec((1, m, out_size), lambda j, k: (j, 0, 0)),
            scratch_shapes=[pltpu.VMEM((m, tn), jnp.float32)],
        ),
        compiler_params=pltpu.CompilerParams(
            dimension_semantics=("parallel", "arbitrary"),
            vmem_limit_bytes=48 * 1024 * 1024,
        ),
    )(x_blocks, w_packed, b_packed, w4_packed)


def pack_params(w1, b1, w2, b2, w3, b3, w4, b4):
    """One-time parameter-setup transform (NOT part of the per-call forward).

    Weights are stored transposed vs PyTorch, i.e. (in_features, out_features).
    """
    w_cat = jnp.concatenate([w1, w2, w3], axis=0)                 # (K_TOTAL, 512)
    b_cat = b1 + b2 + b3                                          # (512,)
    out_size = w4.shape[1]
    # Split hidden columns into N_TILES contiguous halves for contiguous DMAs.
    w_packed = w_cat.reshape(K_TOTAL, N_TILES, TN).transpose(1, 0, 2)  # (2, K, 256)
    b_packed = b_cat.reshape(N_TILES, 1, TN)                            # (2, 1, 256)
    w4_packed = w4.reshape(N_TILES, TN, out_size)                       # (2, 256, out)
    return (w_packed, b_packed, w4_packed, b4)


@jax.jit
def ensemble_forward(x1, x2, x3, packed):
    """Eval-mode forward pass of EnsembleModel (dropout == identity)."""
    w_packed, b_packed, w4_packed, b4 = packed
    m = x1.shape[0]
    # Per-call activation packing is tiny (~1.7 MB) vs ~455 MB of weights.
    x_cat = jnp.concatenate([x1, x2, x3], axis=1)                 # (M, K_TOTAL)
    x_blocks = x_cat.reshape(m, K_TOTAL // TK, TK).transpose(1, 0, 2)  # (31, M, TK)
    partial = _fused_forward(x_blocks, w_packed, b_packed, w4_packed)  # (2, M, out)
    return partial.sum(axis=0) + b4


def _init_linear(kw, kb, fan_in, fan_out):
    w = jax.random.normal(kw, (fan_in, fan_out), jnp.float32) / jnp.sqrt(
        jnp.float32(fan_in)
    )
    b = jax.random.normal(kb, (fan_out,), jnp.float32) * 0.01
    return w, b


if __name__ == "__main__":
    out_size = 128   # constructor arg; chosen lane-aligned
    batch = 2

    key = jax.random.PRNGKey(0)
    ks = jax.random.split(key, 11)

    w1, b1 = _init_linear(ks[0], ks[1], 8192, 512)
    w2, b2 = _init_linear(ks[2], ks[3], 131072, 512)
    w3, b3 = _init_linear(ks[4], ks[5], 82944, 512)
    w4, b4 = _init_linear(ks[6], ks[7], 512, out_size)

    # One-time parameter packing (setup time, not per forward call).
    packed = jax.block_until_ready(pack_params(w1, b1, w2, b2, w3, b3, w4, b4))

    x1 = jax.random.normal(ks[8], (batch, 8192), jnp.float32)
    x2 = jax.random.normal(ks[9], (batch, 131072), jnp.float32)
    x3 = jax.random.normal(ks[10], (batch, 82944), jnp.float32)

    out = jax.block_until_ready(ensemble_forward(x1, x2, x3, packed))

    # Pure-JAX reference (eval-mode EnsembleModel.forward).
    ref_h = (x1 @ w1 + b1) + (x2 @ w2 + b2) + (x3 @ w3 + b3)
    ref = ref_h @ w4 + b4

    assert out.shape == (batch, out_size), out.shape
    err = float(jnp.max(jnp.abs(out - ref)))
    assert jnp.allclose(out, ref, rtol=1e-3, atol=1e-3), err
    print("KERNEL_OK")
</pallas_src>

<mosaic_0001>
module attributes {stable_mosaic.version = 11 : i64} {
  func.func @_ensemble_kernel(%arg0: i32, %arg1: i32, %arg2: memref<31x2x7168xf32, #tpu.memory_space<vmem>>, %arg3: memref<1x7168x256xf32, #tpu.memory_space<vmem>>, %arg4: memref<1x1x256xf32, #tpu.memory_space<vmem>>, %arg5: memref<1x256x128xf32, #tpu.memory_space<vmem>>, %arg6: memref<1x2x128xf32, #tpu.memory_space<vmem>>, %arg7: memref<2x256xf32, #tpu.memory_space<vmem>>) attributes {dimension_semantics = [#tpu.dimension_semantics<parallel>, #tpu.dimension_semantics<arbitrary>], iteration_bounds = array<i64: 2, 31>, scalar_prefetch = 0 : i64, scratch_operands = 1 : i64, tpu.core_type = #tpu.core_type<tc>, window_params = [{pipeline_mode = #tpu.pipeline_mode<synchronous>, transform_indices = @transform_0, window_bounds = array<i64: 31, 2, 7168>}, {transform_indices = @transform_1, window_bounds = array<i64: 1, 7168, 256>}, {transform_indices = @transform_2, window_bounds = array<i64: 1, 1, 256>}, {transform_indices = @transform_3, window_bounds = array<i64: 1, 256, 128>}, {transform_indices = @transform_4, window_bounds = array<i64: 1, 2, 128>}]} {
    %c0_i32 = arith.constant 0 : i32
    %0 = arith.cmpi eq, %arg1, %c0_i32 : i32
    %1 = arith.extui %0 : i1 to i32
    %c0_i32_0 = arith.constant 0 : i32
    %2 = arith.cmpi ne, %1, %c0_i32_0 : i32
    scf.if %2 {
      %cst_10 = arith.constant 0.000000e+00 : f32
      %15 = vector.broadcast %cst_10 : f32 to vector<2x256xf32>
      %c0_11 = arith.constant 0 : index
      %c0_12 = arith.constant 0 : index
      %16 = vector.load %arg7[%c0_11, %c0_12] : memref<2x256xf32, #tpu.memory_space<vmem>>, vector<2x256xf32>
      tpu.vector_store %arg7[%c0_11, %c0_12], %15 {strides = array<i32>} : memref<2x256xf32, #tpu.memory_space<vmem>>, vector<2x256xf32>,
    } else {
    }
    %c0 = arith.constant 0 : index
    %c0_1 = arith.constant 0 : index
    %3 = vector.load %arg7[%c0, %c0_1] : memref<2x256xf32, #tpu.memory_space<vmem>>, vector<2x256xf32>
    %4 = arith.index_cast %arg1 : i32 to index
    %c0_2 = arith.constant 0 : index
    %c0_3 = arith.constant 0 : index
    %5 = vector.load %arg2[%4, %c0_2, %c0_3] : memref<31x2x7168xf32, #tpu.memory_space<vmem>>, vector<1x2x7168xf32>
    %6 = vector.shape_cast %5 : vector<1x2x7168xf32> to vector<2x7168xf32>
    %c0_4 = arith.constant 0 : index
    %c0_5 = arith.constant 0 : index
    %c0_6 = arith.constant 0 : index
    %7 = vector.load %arg3[%c0_4, %c0_5, %c0_6] : memref<1x7168x256xf32, #tpu.memory_space<vmem>>, vector<1x7168x256xf32>
    %8 = vector.shape_cast %7 : vector<1x7168x256xf32> to vector<7168x256xf32>
    %cst = arith.constant dense<0.000000e+00> : vector<2x256xf32>
    %9 = tpu.matmul %6, %8, %cst {dimension_numbers = #tpu.dot_dimension_numbers<[1], [0], [0], [1], [0, 0, 1, 1], [], []>} : vector<2x7168xf32>, vector<7168x256xf32>, vector<2x256xf32> -> vector<2x256xf32>
    %10 = arith.addf %3, %9 : vector<2x256xf32>
    %c0_7 = arith.constant 0 : index
    %c0_8 = arith.constant 0 : index
    %11 = vector.load %arg7[%c0_7, %c0_8] : memref<2x256xf32, #tpu.memory_space<vmem>>, vector<2x256xf32>
    tpu.vector_store %arg7[%c0_7, %c0_8], %10 {strides = array<i32>} : memref<2x256xf32, #tpu.memory_space<vmem>>, vector<2x256xf32>,
    %c30_i32 = arith.constant 30 : i32
    %12 = arith.cmpi eq, %arg1, %c30_i32 : i32
    %13 = arith.extui %12 : i1 to i32
    %c0_i32_9 = arith.constant 0 : i32
    %14 = arith.cmpi ne, %13, %c0_i32_9 : i32
    scf.if %14 {
      %c0_10 = arith.constant 0 : index
      %c0_11 = arith.constant 0 : index
      %15 = vector.load %arg7[%c0_10, %c0_11] : memref<2x256xf32, #tpu.memory_space<vmem>>, vector<2x256xf32>
      %c0_12 = arith.constant 0 : index
      %c0_13 = arith.constant 0 : index
      %c0_14 = arith.constant 0 : index
      %16 = vector.load %arg4[%c0_12, %c0_13, %c0_14] : memref<1x1x256xf32, #tpu.memory_space<vmem>>, vector<1x1x256xf32>
      %17 = vector.shape_cast %16 : vector<1x1x256xf32> to vector<1x256xf32>
      %18 = vector.broadcast %17 : vector<1x256xf32> to vector<2x256xf32>
      %19 = arith.addf %15, %18 : vector<2x256xf32>
      %c0_15 = arith.constant 0 : index
      %c0_16 = arith.constant 0 : index
      %c0_17 = arith.constant 0 : index
      %20 = vector.load %arg5[%c0_15, %c0_16, %c0_17] : memref<1x256x128xf32, #tpu.memory_space<vmem>>, vector<1x256x128xf32>
      %21 = vector.shape_cast %20 : vector<1x256x128xf32> to vector<256x128xf32>
      %cst_18 = arith.constant dense<0.000000e+00> : vector<2x128xf32>
      %22 = tpu.matmul %19, %21, %cst_18 {dimension_numbers = #tpu.dot_dimension_numbers<[1], [0], [0], [1], [0, 0, 1, 1], [], []>} : vector<2x256xf32>, vector<256x128xf32>, vector<2x128xf32> -> vector<2x128xf32>
      %c0_19 = arith.constant 0 : index
      %c0_20 = arith.constant 0 : index
      %c0_21 = arith.constant 0 : index
      %23 = vector.load %arg6[%c0_19, %c0_20, %c0_21] : memref<1x2x128xf32, #tpu.memory_space<vmem>>, vector<1x2x128xf32>
      %24 = vector.shape_cast %23 : vector<1x2x128xf32> to vector<2x128xf32>
      %25 = vector.shape_cast %22 : vector<2x128xf32> to vector<1x2x128xf32>
      tpu.vector_store %arg6[%c0_19, %c0_20, %c0_21], %25 {strides = array<i32>} : memref<1x2x128xf32, #tpu.memory_space<vmem>>, vector<1x2x128xf32>,
    } else {
    }
    return
  }
  func.func @transform_0(%arg0: i32, %arg1: i32) -> (i32, i32, i32) {
    %c0_i32 = arith.constant 0 : i32
    %c0_i32_0 = arith.constant 0 : i32
    %c0_i32_1 = arith.constant 0 : i32
    %c0_i32_2 = arith.constant 0 : i32
    return %c0_i32, %c0_i32_0, %c0_i32_1 : i32, i32, i32
  }
  func.func @transform_1(%arg0: i32, %arg1: i32) -> (i32, i32, i32) {
    %c0_i32 = arith.constant 0 : i32
    %c0_i32_0 = arith.constant 0 : i32
    return %arg0, %arg1, %c0_i32 : i32, i32, i32
  }
  func.func @transform_2(%arg0: i32, %arg1: i32) -> (i32, i32, i32) {
    %c0_i32 = arith.constant 0 : i32
    %c0_i32_0 = arith.constant 0 : i32
    %c0_i32_1 = arith.constant 0 : i32
    return %arg0, %c0_i32, %c0_i32_0 : i32, i32, i32
  }
  func.func @transform_3(%arg0: i32, %arg1: i32) -> (i32, i32, i32) {
    %c0_i32 = arith.constant 0 : i32
    %c0_i32_0 = arith.constant 0 : i32
    %c0_i32_1 = arith.constant 0 : i32
    return %arg0, %c0_i32, %c0_i32_0 : i32, i32, i32
  }
  func.func @transform_4(%arg0: i32, %arg1: i32) -> (i32, i32, i32) {
    %c0_i32 = arith.constant 0 : i32
    %c0_i32_0 = arith.constant 0 : i32
    %c0_i32_1 = arith.constant 0 : i32
    return %arg0, %c0_i32, %c0_i32_0 : i32, i32, i32
  }
}

</mosaic_0001>

<bundles_post_ra>
// kernel: ensemble_forward.1
= control target key start
LH: loop header
LB: loop body
LE: loop exit
PB: predicated region body
PF: predicated region fallthrough
CT: control target
= control target key end

     0   :  { %9 = vsyncpa [#allocation4], 0  ;;  %s7101_s0 = inlined_call_operand.vmem [shape: f32[31,2,7168], index: 0, kind: input, shape index: {}]   ;;  %s7102_s1 = inlined_call_operand.hbm [shape: f32[2,222208,256], index: 1, kind: input, shape index: {}]   ;;  %s7103_s2 = inlined_call_operand.vmem [shape: f32[2,1,256], index: 2, kind: input, shape index: {}]   ;;  %s7104_s3 = inlined_call_operand.vmem [shape: f32[2,256,128], index: 3, kind: input, shape index: {}]   ;;  %s7105_s4 = inlined_call_operand.vmem [shape: f32[2,2,128], index: 4, kind: output, shape index: {}]  }
   0x1   :  { %11 = vsyncpa [#allocation4 + $0x1], 0  ;;  %s4904_s15 = smov 0   ;;  %s4906_s16 = smov 0  }
   0x2   :  { %s4908_s17 = smov 0   ;;  %s4910_s18 = smov 0  }
   0x3   :  { %s4912_s19 = smov 0   ;;  %s4914_s20 = smov 0  }
   0x4   :  { %s4916_s21 = smov 0   ;;  %s4918_s22 = smov 0  }
   0x5 LB: > { %s4674_s23 = sadd.s32 4294967295, %s4874_s22   ;;  %s26_s24 = sadd.s32 1, %s4866_s20  ;;  %s4874_s22 = sphi %s4918_s22, %s17_s22   ;;  %s4870_s21 = sphi %s4916_s21, %s7120_s21   ;;  %s4866_s20 = sphi %s4914_s20, %s7119_s20   ;;  %s4862_s19 = sphi %s4912_s19, %s7118_s19   ;;  %s4858_s18 = sphi %s4910_s18, %s7117_s18   ;;  %s4854_s17 = sphi %s4908_s17, %s7116_s17   ;;  %s4850_s16 = sphi %s4906_s16, %s7115_s16   ;;  %s4846_s15 = sphi %s4904_s15, %s7114_s15  }
   0x6   : > { %p27_p0 = scmp.ge.s32.totalorder %s26_s24, 31  ;;  %s29_s25 = sadd.s32 1, %s4870_s21 }
   0x7   : > { %s59_s26 = sadd.s32 1, %s4854_s17  ;;  %p66_p1 = scmp.ne.s32.totalorder %s4854_s17, %s4850_s16 }
   0x8   : > { %s7122_s24 = smov (%p27_p0, %s26_s24), 0  ;;  %s7124_s25 = smov (!%p27_p0, %s29_s25), %s4870_s21 }
   0x9   : > { %s55_s27 = ssub.s32 %s4866_s20, %s7122_s24  ;;  %p67_p2 = scmp.eq.s32.totalorder %s4874_s22, 0 }
   0xa   : > { %p31_p3 = scmp.ge.s32.totalorder %s7124_s25, 2  ;;  %p72_p4 = scmp.ne.s32.totalorder %s4850_s16, %s4846_s15 }
   0xb   : > { %p68_p5 = por %p67_p2, %p66_p1  ;;  %p73_p6 = scmp.eq.s32.totalorder %s4674_s23, 0 }
   0xc   : > { %s7126_s25 = smov (%p31_p3, %s7124_s25), 0  ;;  %p4702_p8 = scmp.lt.s32.totalorder %s4874_s22, 62 }
   0xd   : > { %7108 = sst [smem:[#allocation6_spill]] %s7126_s25  ;;  %p4957_p7 = por %p73_p6, %p72_p4 }
   0xe   : > { %s54_s29 = ssub.s32 %s4870_s21, %s7126_s25  ;;  %s177_s5 = sand.u32 1, %s4854_s17  }
   0xf   : > { %s56_s30 = sor.u32 %s55_s27, %s54_s29  ;;  %s4693_s6 = smul.u32 14336, %s177_s5 }
  0x10   : > { %p57_p9 = scmp.eq.s32.totalorder %s56_s30, 0  ;;  %p4965_p10 = pnand %p4702_p8, %p68_p5 }
  0x11   : > { %s4690_s9 = smul.u32 1792, %s4866_s20  ;;  %s181_s11 = scalar_lea.vmem [#allocation3], %s4693_s6 }
  0x12   : > { %s4970_s8 = scalar_select %p57_p9, %s4854_s17, %s59_s26  }
  0x13   : > { %s4694_s10 = smul.u32 55552, %s4870_s21  ;;  %s192_s12 = sshll.u32 %s181_s11, 4  ;;  %s193_s12 = int_to_ptr.vmem [resolvable:$true] %s192_s12 }
  0x14   : > { %p4680_p11 = scmp.ge.s32.totalorder %s4874_s22, 1  ;;  %p215_p12 = scmp.lt.s32.totalorder %s4874_s22, 63 }
  0x15   : > { %s187_s13 = sadd.s32 %s4694_s10, %s4690_s9  ;;  %s178_s30 = scalar_lea.sflag [#allocation4], %s177_s5 }
  0x16   : > { %s4679_s14 = sshll.u32 %s187_s13, 3  ;;  %s4876_s25 = smov 256  }
  0x17   : > { %s189_s27 = scalar_lea.hbm %s7102_s1, %s4679_s14  ;;  %s4877_s26 = smov 16  }
  0x18   : > { %s190_s29 = sshll.u32 %s189_s27, 4  ;;  %p216_p13 = pnand %p4680_p11, %p215_p12  ;;  %s191_s29 = int_to_ptr.hbm [resolvable:$true] %s190_s29 }
  0x19   : > { %4701 = dma.hbm_to_vmem [thread:$0]  (!%p4965_p10), %s191_s29, 229376, %s193_s12, %s178_s30, %s4876_s25, %s4876_s25, %s4877_s26  }
  0x1a   : > { %219 = sbr.rel (%p216_p13) target bundleno = 1304 (0x518), region = 36 }
  0x1f   : > { %s221_s6 = sand.u32 1, %s4850_s16  }
  0x20   : > { %s4695_s9 = smul.u32 14336, %s221_s6  ;;  %s222_s10 = scalar_lea.sflag [#allocation4], %s221_s6 }
  0x22   : > { %s4982_s11 = scalar_lea.vmem [#allocation3], %s4695_s9 }
  0x23   : > { %4841 = dma.done.wait (%p4957_p7), %s222_s10, 229376  }
  0x24   : > { %4843 = vsyncadd (%p4957_p7), %s222_s10, 4294737920  ;;  %p260_p0 = scmp.lt.s32.totalorder %s4862_s19, 1  ;;  %p4685_p1 = scmp.ne.s32.totalorder %s4858_s18, 0 }
  0x26   : > { %s7128_s19 = smov (!%p260_p0, %s4862_s19), 1  ;;  %276 = sbr.rel (%p4685_p1) target bundleno = 45 (0x2d), region = 44 }
  0x27   : > { %s4681_s5 = sshll.u32 %s7128_s19, 1  ;;  %s4691_s25 = sshll.u32 %s7128_s19, 8 }
  0x28   : > { %s4993_s13 = scalar_lea.vmem %s7103_s2, %s4681_s5  ;;  %s4998_s23 = scalar_lea.vmem %s7104_s3, %s4691_s25 }
  0x29   : > { %s5003_s28 = scalar_lea.vmem %s7105_s4, %s4681_s5 }
  0x2b   : > { %v4878_v0 = vmov 0.0  }
  0x2c   : > { %277 = vst [vmem:[#allocation2] sm:$0xf] %v4878_v0 }
  0x2d PF: > { %v326_v1 = vld [vmem:[%s4982_s11 + $0xf0] sm:$0xff]  ;;  %v324_v3 = vld [vmem:[%s4982_s11 + $0xe0] sm:$0xff]  ;;  %s4692_s19 = smul.u32 112, %s4858_s18  ;;  %vm4472_vm0 = vcmask 1041408   ;;  %p4687_p2 = scmp.ne.s32.totalorder %s4858_s18, 30 }
  0x2e   : > { %v390_v2 = vld [vmem:[%s4982_s11 + $0x2f0] sm:$0xff]  ;;  %2229 = vmatpush.msra.mxu0 %v326_v1  ;;  %v388_v5 = vld [vmem:[%s4982_s11 + $0x2e0] sm:$0xff] }
  0x2f   : > { %2269 = vmatpush.msra.mxu2 %v390_v2  ;;  %v358_v4 = vld [vmem:[%s4982_s11 + $0x1f0] sm:$0xff]  ;;  %v356_v8 = vld [vmem:[%s4982_s11 + $0x1e0] sm:$0xff]  ;;  %s5090_s6 = scalar_lea.vmem %s7101_s0, %s4692_s19 }
  0x30   : > { %v422_v6 = vld [vmem:[%s4982_s11 + $0x3f0] sm:$0xff]  ;;  %2249 = vmatpush.msra.mxu1 %v358_v4  ;;  %2230 = vmatpush.msra.mxu0 %v324_v3  ;;  %v420_v10 = vld [vmem:[%s4982_s11 + $0x3e0] sm:$0xff] }
  0x31   : > { %2289 = vmatpush.msra.mxu3 %v422_v6  ;;  %v322_v7 = vld [vmem:[%s4982_s11 + $0xd0] sm:$0xff]  ;;  %2270 = vmatpush.msra.mxu2 %v388_v5  ;;  %v320_v12 = vld [vmem:[%s4982_s11 + $0xc0] sm:$0xff] }
  0x32   : > { %v386_v9 = vld [vmem:[%s4982_s11 + $0x2d0] sm:$0xff]  ;;  %2250 = vmatpush.msra.mxu1 %v356_v8  ;;  %v384_v13 = vld [vmem:[%s4982_s11 + $0x2c0] sm:$0xff]  ;;  %2231 = vmatpush.msra.mxu0 %v322_v7 }
  0x33   : > { %v354_v11 = vld [vmem:[%s4982_s11 + $0x1d0] sm:$0xff]  ;;  %2290 = vmatpush.msra.mxu3 %v420_v10  ;;  %2271 = vmatpush.msra.mxu2 %v386_v9  ;;  %v352_v15 = vld [vmem:[%s4982_s11 + $0x1c0] sm:$0xff] }
  0x34   : > { %v418_v14 = vld [vmem:[%s4982_s11 + $0x3d0] sm:$0xff]  ;;  %v416_v16 = vld [vmem:[%s4982_s11 + $0x3c0] sm:$0xff]  ;;  %2251 = vmatpush.msra.mxu1 %v354_v11  ;;  %2232 = vmatpush.msra.mxu0 %v320_v12 }
  0x35   : > { %2291 = vmatpush.msra.mxu3 %v418_v14  ;;  %v318_v17 = vld [vmem:[%s4982_s11 + $0xb0] sm:$0xff]  ;;  %2272 = vmatpush.msra.mxu2 %v384_v13  ;;  %v316_v21 = vld [vmem:[%s4982_s11 + $0xa0] sm:$0xff] }
  0x36   : > { %v382_v18 = vld [vmem:[%s4982_s11 + $0x2b0] sm:$0xff]  ;;  %2252 = vmatpush.msra.mxu1 %v352_v15  ;;  %v380_v22 = vld [vmem:[%s4982_s11 + $0x2a0] sm:$0xff]  ;;  %2233 = vmatpush.msra.mxu0 %v318_v17 }
  0x37   : > { %v350_v19 = vld [vmem:[%s4982_s11 + $0x1b0] sm:$0xff]  ;;  %2292 = vmatpush.msra.mxu3 %v416_v16  ;;  %2273 = vmatpush.msra.mxu2 %v382_v18  ;;  %v348_v23 = vld [vmem:[%s4982_s11 + $0x1a0] sm:$0xff] }
  0x38   : > { %v414_v20 = vld [vmem:[%s4982_s11 + $0x3b0] sm:$0xff]  ;;  %v412_v24 = vld [vmem:[%s4982_s11 + $0x3a0] sm:$0xff]  ;;  %2253 = vmatpush.msra.mxu1 %v350_v19  ;;  %2234 = vmatpush.msra.mxu0 %v316_v21 }
  0x39   : > { %2293 = vmatpush.msra.mxu3 %v414_v20  ;;  %v314_v25 = vld [vmem:[%s4982_s11 + $0x90] sm:$0xff]  ;;  %2274 = vmatpush.msra.mxu2 %v380_v22  ;;  %v312_v29 = vld [vmem:[%s4982_s11 + $0x80] sm:$0xff] }
  0x3a   : > { %v378_v26 = vld [vmem:[%s4982_s11 + $0x290] sm:$0xff]  ;;  %2254 = vmatpush.msra.mxu1 %v348_v23  ;;  %v376_v30 = vld [vmem:[%s4982_s11 + $0x280] sm:$0xff]  ;;  %2235 = vmatpush.msra.mxu0 %v314_v25 }
  0x3b   : > { %v346_v27 = vld [vmem:[%s4982_s11 + $0x190] sm:$0xff]  ;;  %2294 = vmatpush.msra.mxu3 %v412_v24  ;;  %2275 = vmatpush.msra.mxu2 %v378_v26  ;;  %v344_v31 = vld [vmem:[%s4982_s11 + $0x180] sm:$0xff] }
  0x3c   : > { %v410_v28 = vld [vmem:[%s4982_s11 + $0x390] sm:$0xff]  ;;  %v408_v32 = vld [vmem:[%s4982_s11 + $0x380] sm:$0xff]  ;;  %2255 = vmatpush.msra.mxu1 %v346_v27  ;;  %2236 = vmatpush.msra.mxu0 %v312_v29 }
  0x3d   : > { %2295 = vmatpush.msra.mxu3 %v410_v28  ;;  %v310_v33 = vld [vmem:[%s4982_s11 + $0x70] sm:$0xff]  ;;  %2276 = vmatpush.msra.mxu2 %v376_v30  ;;  %v308_v37 = vld [vmem:[%s4982_s11 + $0x60] sm:$0xff] }
  0x3e   : > { %v374_v34 = vld [vmem:[%s4982_s11 + $0x270] sm:$0xff]  ;;  %2256 = vmatpush.msra.mxu1 %v344_v31  ;;  %v372_v38 = vld [vmem:[%s4982_s11 + $0x260] sm:$0xff]  ;;  %2237 = vmatpush.msra.mxu0 %v310_v33 }
  0x3f   : > { %v342_v35 = vld [vmem:[%s4982_s11 + $0x170] sm:$0xff]  ;;  %2296 = vmatpush.msra.mxu3 %v408_v32  ;;  %2277 = vmatpush.msra.mxu2 %v374_v34  ;;  %v340_v39 = vld [vmem:[%s4982_s11 + $0x160] sm:$0xff] }
  0x40   : > { %v406_v36 = vld [vmem:[%s4982_s11 + $0x370] sm:$0xff]  ;;  %v404_v40 = vld [vmem:[%s4982_s11 + $0x360] sm:$0xff]  ;;  %2257 = vmatpush.msra.mxu1 %v342_v35  ;;  %2238 = vmatpush.msra.mxu0 %v308_v37 }
  0x41   : > { %2297 = vmatpush.msra.mxu3 %v406_v36  ;;  %v306_v41 = vld [vmem:[%s4982_s11 + $0x50] sm:$0xff]  ;;  %2278 = vmatpush.msra.mxu2 %v372_v38  ;;  %v304_v45 = vld [vmem:[%s4982_s11 + $0x40] sm:$0xff] }
  0x42   : > { %v370_v42 = vld [vmem:[%s4982_s11 + $0x250] sm:$0xff]  ;;  %2258 = vmatpush.msra.mxu1 %v340_v39  ;;  %v368_v46 = vld [vmem:[%s4982_s11 + $0x240] sm:$0xff]  ;;  %2239 = vmatpush.msra.mxu0 %v306_v41 }
  0x43   : > { %v338_v43 = vld [vmem:[%s4982_s11 + $0x150] sm:$0xff]  ;;  %2298 = vmatpush.msra.mxu3 %v404_v40  ;;  %2279 = vmatpush.msra.mxu2 %v370_v42  ;;  %v336_v47 = vld [vmem:[%s4982_s11 + $0x140] sm:$0xff] }
  0x44   : > { %v402_v44 = vld [vmem:[%s4982_s11 + $0x350] sm:$0xff]  ;;  %v400_v48 = vld [vmem:[%s4982_s11 + $0x340] sm:$0xff]  ;;  %2259 = vmatpush.msra.mxu1 %v338_v43  ;;  %2240 = vmatpush.msra.mxu0 %v304_v45 }
  0x45   : > { %2299 = vmatpush.msra.mxu3 %v402_v44  ;;  %v302_v49 = vld [vmem:[%s4982_s11 + $0x30] sm:$0xff]  ;;  %2280 = vmatpush.msra.mxu2 %v368_v46  ;;  %v300_v53 = vld [vmem:[%s4982_s11 + $0x20] sm:$0xff] }
  0x46   : > { %v366_v50 = vld [vmem:[%s4982_s11 + $0x230] sm:$0xff]  ;;  %2260 = vmatpush.msra.mxu1 %v336_v47  ;;  %v364_v54 = vld [vmem:[%s4982_s11 + $0x220] sm:$0xff]  ;;  %2241 = vmatpush.msra.mxu0 %v302_v49 }
  0x47   : > { %v334_v51 = vld [vmem:[%s4982_s11 + $0x130] sm:$0xff]  ;;  %2300 = vmatpush.msra.mxu3 %v400_v48  ;;  %2281 = vmatpush.msra.mxu2 %v366_v50  ;;  %v332_v55 = vld [vmem:[%s4982_s11 + $0x120] sm:$0xff] }
  0x48   : > { %v398_v52 = vld [vmem:[%s4982_s11 + $0x330] sm:$0xff]  ;;  %v396_v56 = vld [vmem:[%s4982_s11 + $0x320] sm:$0xff]  ;;  %2261 = vmatpush.msra.mxu1 %v334_v51  ;;  %2242 = vmatpush.msra.mxu0 %v300_v53 }
  0x49   : > { %2301 = vmatpush.msra.mxu3 %v398_v52  ;;  %v298_v57 = vld [vmem:[%s4982_s11 + $0x10] sm:$0xff]  ;;  %2282 = vmatpush.msra.mxu2 %v364_v54  ;;  %v296_v61 = vld [vmem:[%s4982_s11] sm:$0xff] }
  0x4a   : > { %v362_v58 = vld [vmem:[%s4982_s11 + $0x210] sm:$0xff]  ;;  %2262 = vmatpush.msra.mxu1 %v332_v55  ;;  %v360_v62 = vld [vmem:[%s4982_s11 + $0x200] sm:$0xff]  ;;  %2243 = vmatpush.msra.mxu0 %v298_v57 }
  0x4b   : > { %v330_v59 = vld [vmem:[%s4982_s11 + $0x110] sm:$0xff]  ;;  %2302 = vmatpush.msra.mxu3 %v396_v56  ;;  %2283 = vmatpush.msra.mxu2 %v362_v58  ;;  %v328_v1 = vld [vmem:[%s4982_s11 + $0x100] sm:$0xff] }
  0x4c   : > { %v394_v60 = vld [vmem:[%s4982_s11 + $0x310] sm:$0xff]  ;;  %2263 = vmatpush.msra.mxu1 %v330_v59  ;;  %v392_v2 = vld [vmem:[%s4982_s11 + $0x300] sm:$0xff]  ;;  %2244 = vmatpush.msra.mxu0 %v296_v61 }
  0x4d   : > { %v454_v63 = vld [vmem:[%s4982_s11 + $0x4f0] sm:$0xff]  ;;  %2303 = vmatpush.msra.mxu3 %v394_v60  ;;  %2284 = vmatpush.msra.mxu2 %v360_v62  ;;  %v452_v3 = vld [vmem:[%s4982_s11 + $0x4e0] sm:$0xff] }
  0x4e   : > { %v518_v0 = vld [vmem:[%s4982_s11 + $0x6f0] sm:$0xff]  ;;  %2309 = vmatpush.msrb.mxu0 %v454_v63  ;;  %v516_v5 = vld [vmem:[%s4982_s11 + $0x6e0] sm:$0xff]  ;;  %2264 = vmatpush.msra.mxu1 %v328_v1 }
  0x4f   : > { %v486_v4 = vld [vmem:[%s4982_s11 + $0x5f0] sm:$0xff]  ;;  %2349 = vmatpush.msrb.mxu2 %v518_v0  ;;  %2304 = vmatpush.msra.mxu3 %v392_v2  ;;  %v484_v8 = vld [vmem:[%s4982_s11 + $0x5e0] sm:$0xff] }
  0x50   : > { %v550_v6 = vld [vmem:[%s4982_s11 + $0x7f0] sm:$0xff]  ;;  %2310 = vmatpush.msrb.mxu0 %v452_v3  ;;  %2329 = vmatpush.msrb.mxu1 %v486_v4  ;;  %v548_v10 = vld [vmem:[%s4982_s11 + $0x7e0] sm:$0xff] }
  0x51   : > { %v450_v7 = vld [vmem:[%s4982_s11 + $0x4d0] sm:$0xff]  ;;  %2350 = vmatpush.msrb.mxu2 %v516_v5  ;;  %2369 = vmatpush.msrb.mxu3 %v550_v6  ;;  %v448_v11 = vld [vmem:[%s4982_s11 + $0x4c0] sm:$0xff] }
  0x52   : > { %v514_v9 = vld [vmem:[%s4982_s11 + $0x6d0] sm:$0xff]  ;;  %2311 = vmatpush.msrb.mxu0 %v450_v7  ;;  %2330 = vmatpush.msrb.mxu1 %v484_v8  ;;  %v512_v13 = vld [vmem:[%s4982_s11 + $0x6c0] sm:$0xff] }
  0x53   : > { %v482_v12 = vld [vmem:[%s4982_s11 + $0x5d0] sm:$0xff]  ;;  %2351 = vmatpush.msrb.mxu2 %v514_v9  ;;  %2370 = vmatpush.msrb.mxu3 %v548_v10  ;;  %v480_v16 = vld [vmem:[%s4982_s11 + $0x5c0] sm:$0xff] }
  0x54   : > { %v546_v14 = vld [vmem:[%s4982_s11 + $0x7d0] sm:$0xff]  ;;  %2312 = vmatpush.msrb.mxu0 %v448_v11  ;;  %2331 = vmatpush.msrb.mxu1 %v482_v12  ;;  %v544_v18 = vld [vmem:[%s4982_s11 + $0x7c0] sm:$0xff] }
  0x55   : > { %v446_v15 = vld [vmem:[%s4982_s11 + $0x4b0] sm:$0xff]  ;;  %2352 = vmatpush.msrb.mxu2 %v512_v13  ;;  %2371 = vmatpush.msrb.mxu3 %v546_v14  ;;  %v444_v19 = vld [vmem:[%s4982_s11 + $0x4a0] sm:$0xff] }
  0x56   : > { %v510_v17 = vld [vmem:[%s4982_s11 + $0x6b0] sm:$0xff]  ;;  %2313 = vmatpush.msrb.mxu0 %v446_v15  ;;  %2332 = vmatpush.msrb.mxu1 %v480_v16  ;;  %v508_v21 = vld [vmem:[%s4982_s11 + $0x6a0] sm:$0xff] }
  0x57   : > { %v478_v20 = vld [vmem:[%s4982_s11 + $0x5b0] sm:$0xff]  ;;  %2353 = vmatpush.msrb.mxu2 %v510_v17  ;;  %2372 = vmatpush.msrb.mxu3 %v544_v18  ;;  %v476_v25 = vld [vmem:[%s4982_s11 + $0x5a0] sm:$0xff] }
  0x58   : > { %v542_v22 = vld [vmem:[%s4982_s11 + $0x7b0] sm:$0xff]  ;;  %2314 = vmatpush.msrb.mxu0 %v444_v19  ;;  %2333 = vmatpush.msrb.mxu1 %v478_v20  ;;  %v540_v27 = vld [vmem:[%s4982_s11 + $0x7a0] sm:$0xff] }
  0x59   : > { %v282_v23 = vld [vmem:[%s5090_s6] sm:$0xff]  ;;  %2354 = vmatpush.msrb.mxu2 %v508_v21  ;;  %2373 = vmatpush.msrb.mxu3 %v542_v22  ;;  %v440_v28 = vld [vmem:[%s4982_s11 + $0x480] sm:$0xff]  ;;  %v285_v3 = vld [vmem:[%s5090_s6 + $0x18] sm:$0xff] }
  0x5a   : > { %v442_v24 = vld [vmem:[%s4982_s11 + $0x490] sm:$0xff]  ;;  %2102 = vst [vmem:[#allocation1] ss:$4 sm:$0xff] %v282_v23  ;;  %v504_v30 = vld [vmem:[%s4982_s11 + $0x680] sm:$0xff]  ;;  %2334 = vmatpush.msrb.mxu1 %v476_v25 }
  0x5b   : > { %v506_v26 = vld [vmem:[%s4982_s11 + $0x690] sm:$0xff]  ;;  %2315 = vmatpush.msrb.mxu0 %v442_v24  ;;  %v472_v33 = vld [vmem:[%s4982_s11 + $0x580] sm:$0xff]  ;;  %2374 = vmatpush.msrb.mxu3 %v540_v27 }
  0x5c   : > { %v474_v29 = vld [vmem:[%s4982_s11 + $0x590] sm:$0xff]  ;;  %2355 = vmatpush.msrb.mxu2 %v506_v26  ;;  %v536_v35 = vld [vmem:[%s4982_s11 + $0x780] sm:$0xff] }
  0x5d   : > { %v538_v31 = vld [vmem:[%s4982_s11 + $0x790] sm:$0xff]  ;;  %v436_v36 = vld [vmem:[%s4982_s11 + $0x460] sm:$0xff]  ;;  %2316 = vmatpush.msrb.mxu0 %v440_v28  ;;  %2335 = vmatpush.msrb.mxu1 %v474_v29 }
  0x5e   : > { %v438_v32 = vld [vmem:[%s4982_s11 + $0x470] sm:$0xff]  ;;  %v500_v38 = vld [vmem:[%s4982_s11 + $0x660] sm:$0xff]  ;;  %2356 = vmatpush.msrb.mxu2 %v504_v30  ;;  %2375 = vmatpush.msrb.mxu3 %v538_v31 }
  0x5f   : > { %v502_v34 = vld [vmem:[%s4982_s11 + $0x670] sm:$0xff]  ;;  %v468_v41 = vld [vmem:[%s4982_s11 + $0x560] sm:$0xff]  ;;  %2317 = vmatpush.msrb.mxu0 %v438_v32  ;;  %2336 = vmatpush.msrb.mxu1 %v472_v33 }
  0x60   : > { %v470_v37 = vld [vmem:[%s4982_s11 + $0x570] sm:$0xff]  ;;  %v284_v42 = vld [vmem:[%s5090_s6 + $0x10] sm:$0xff]  ;;  %2357 = vmatpush.msrb.mxu2 %v502_v34  ;;  %2376 = vmatpush.msrb.mxu3 %v536_v35  ;;  %v283_v49 = vld [vmem:[%s5090_s6 + $0x8] sm:$0xff] }
  0x61   : > { %v534_v39 = vld [vmem:[%s4982_s11 + $0x770] sm:$0xff]  ;;  %v5118_v43 = vld.sshfl [vmem:[#allocation1 + $0x10] sm:$0xff pattern:$0x73625140]  ;;  %2318 = vmatpush.msrb.mxu0 %v436_v36  ;;  %2337 = vmatpush.msrb.mxu1 %v470_v37  ;;  %2104 = vst [vmem:[#allocation1 + $0x20] ss:$4 sm:$0xff] %v283_v49 }
  0x62   : > { %v434_v40 = vld [vmem:[%s4982_s11 + $0x450] sm:$0xff]  ;;  %v5124_v46 = vld.sshfl [vmem:[#allocation1 + $0x8] sm:$0xff pattern:$0x73625140]  ;;  %2358 = vmatpush.msrb.mxu2 %v500_v38  ;;  %2377 = vmatpush.msrb.mxu3 %v534_v39 }
  0x63   : > { %v5120_v44 = vld.sshfl [vmem:[#allocation1] sm:$0xff pattern:$0x73625140]  ;;  %v5122_v45 = vld.sshfl [vmem:[#allocation1 + $0x18] sm:$0xff pattern:$0x73625140]  ;;  %2319 = vmatpush.msrb.mxu0 %v434_v40  ;;  %2338 = vmatpush.msrb.mxu1 %v468_v41 }
  0x64   : > { %v498_v47 = vld [vmem:[%s4982_s11 + $0x650] sm:$0xff]  ;;  %v532_v48 = vld [vmem:[%s4982_s11 + $0x760] sm:$0xff]  ;;  %2113 = vst [vmem:[#allocation1] ss:$4 sm:$0xff] %v284_v42  ;;  %2285 = vmatmul.f32.vlgmr.msra.gmra.mxu2 %v5118_v43  ;;  %2245 = vmatmul.f32.vlgmr.msra.gmra.mxu0 %v5120_v44 }
  0x65   : > { %v432_v50 = vld [vmem:[%s4982_s11 + $0x440] sm:$0xff]  ;;  %v466_v51 = vld [vmem:[%s4982_s11 + $0x550] sm:$0xff]  ;;  %2359 = vmatpush.msrb.mxu2 %v498_v47  ;;  %2378 = vmatpush.msrb.mxu3 %v532_v48 }
  0x66   : > { %v496_v52 = vld [vmem:[%s4982_s11 + $0x640] sm:$0xff]  ;;  %v530_v53 = vld [vmem:[%s4982_s11 + $0x750] sm:$0xff]  ;;  %2320 = vmatpush.msrb.mxu0 %v432_v50  ;;  %2339 = vmatpush.msrb.mxu1 %v466_v51 }
  0x67   : > { %v430_v54 = vld [vmem:[%s4982_s11 + $0x430] sm:$0xff]  ;;  %v464_v55 = vld [vmem:[%s4982_s11 + $0x540] sm:$0xff]  ;;  %2360 = vmatpush.msrb.mxu2 %v496_v52  ;;  %2379 = vmatpush.msrb.mxu3 %v530_v53 }
  0x68   : > { %v494_v56 = vld [vmem:[%s4982_s11 + $0x630] sm:$0xff]  ;;  %v528_v57 = vld [vmem:[%s4982_s11 + $0x740] sm:$0xff]  ;;  %2321 = vmatpush.msrb.mxu0 %v430_v54  ;;  %2340 = vmatpush.msrb.mxu1 %v464_v55 }
  0x69   : > { %v428_v58 = vld [vmem:[%s4982_s11 + $0x420] sm:$0xff]  ;;  %v462_v59 = vld [vmem:[%s4982_s11 + $0x530] sm:$0xff]  ;;  %2361 = vmatpush.msrb.mxu2 %v494_v56  ;;  %2380 = vmatpush.msrb.mxu3 %v528_v57 }
  0x6a   : > { %v492_v60 = vld [vmem:[%s4982_s11 + $0x620] sm:$0xff]  ;;  %v526_v61 = vld [vmem:[%s4982_s11 + $0x730] sm:$0xff]  ;;  %2322 = vmatpush.msrb.mxu0 %v428_v58  ;;  %2341 = vmatpush.msrb.mxu1 %v462_v59 }
  0x6b   : > { %v426_v62 = vld [vmem:[%s4982_s11 + $0x410] sm:$0xff]  ;;  %v460_v63 = vld [vmem:[%s4982_s11 + $0x520] sm:$0xff]  ;;  %2362 = vmatpush.msrb.mxu2 %v492_v60  ;;  %2381 = vmatpush.msrb.mxu3 %v526_v61 }
  0x6c   : > { %v490_v0 = vld [vmem:[%s4982_s11 + $0x610] sm:$0xff]  ;;  %v524_v1 = vld [vmem:[%s4982_s11 + $0x720] sm:$0xff]  ;;  %2323 = vmatpush.msrb.mxu0 %v426_v62  ;;  %2342 = vmatpush.msrb.mxu1 %v460_v63 }
  0x6d   : > { %v424_v2 = vld [vmem:[%s4982_s11 + $0x400] sm:$0xff]  ;;  %v5149_v5 = vld.sshfl [vmem:[#allocation1 + $0x20] sm:$0xff pattern:$0x73625140]  ;;  %2363 = vmatpush.msrb.mxu2 %v490_v0  ;;  %2382 = vmatpush.msrb.mxu3 %v524_v1 }
  0x6e   : > { %v5147_v4 = vld.sshfl [vmem:[#allocation1 + $0x30] sm:$0xff pattern:$0x73625140]  ;;  %v5151_v6 = vld.sshfl [vmem:[#allocation1 + $0x38] sm:$0xff pattern:$0x73625140]  ;;  %2324 = vmatpush.msrb.mxu0 %v424_v2  ;;  %2305 = vmatmul.f32.vlgmr.msra.gmra.mxu3 %v5122_v45 }
  0x6f   : > { %v5153_v7 = vld.sshfl [vmem:[#allocation1 + $0x28] sm:$0xff pattern:$0x73625140]  ;;  %v458_v8 = vld [vmem:[%s4982_s11 + $0x510] sm:$0xff]  ;;  %2265 = vmatmul.f32.vlgmr.msra.gmra.mxu1 %v5124_v46  ;;  %2325 = vmatmul.f32.vlgmr.msrb.gmra.mxu0 %v5149_v5 }
  0x70   : > { %v488_v9 = vld [vmem:[%s4982_s11 + $0x600] sm:$0xff]  ;;  %2114 = vst [vmem:[#allocation1 + $0x20] ss:$4 sm:$0xff] %v285_v3  ;;  %v522_v10 = vld [vmem:[%s4982_s11 + $0x710] sm:$0xff]  ;;  %2343 = vmatpush.msrb.mxu1 %v458_v8 }
  0x71   : > { %v582_v11 = vld [vmem:[%s4982_s11 + $0x8f0] sm:$0xff]  ;;  %2364 = vmatpush.msrb.mxu2 %v488_v9  ;;  %v456_v13 = vld [vmem:[%s4982_s11 + $0x500] sm:$0xff]  ;;  %2383 = vmatpush.msrb.mxu3 %v522_v10 }
  0x72   : > { %v646_v12 = vld [vmem:[%s4982_s11 + $0xaf0] sm:$0xff]  ;;  %v520_v14 = vld [vmem:[%s4982_s11 + $0x700] sm:$0xff]  ;;  %2389 = vmatpush.msra.mxu0 %v582_v11  ;;  %2344 = vmatpush.msrb.mxu1 %v456_v13 }
  0x73   : > { %v580_v15 = vld [vmem:[%s4982_s11 + $0x8e0] sm:$0xff]  ;;  %v614_v16 = vld [vmem:[%s4982_s11 + $0x9f0] sm:$0xff]  ;;  %2429 = vmatpush.msra.mxu2 %v646_v12  ;;  %2384 = vmatpush.msrb.mxu3 %v520_v14 }
  0x74   : > { %v644_v17 = vld [vmem:[%s4982_s11 + $0xae0] sm:$0xff]  ;;  %v678_v18 = vld [vmem:[%s4982_s11 + $0xbf0] sm:$0xff]  ;;  %2390 = vmatpush.msra.mxu0 %v580_v15  ;;  %2409 = vmatpush.msra.mxu1 %v614_v16 }
  0x75   : > { %v578_v19 = vld [vmem:[%s4982_s11 + $0x8d0] sm:$0xff]  ;;  %v612_v20 = vld [vmem:[%s4982_s11 + $0x9e0] sm:$0xff]  ;;  %2430 = vmatpush.msra.mxu2 %v644_v17  ;;  %2449 = vmatpush.msra.mxu3 %v678_v18 }
  0x76   : > { %v642_v21 = vld [vmem:[%s4982_s11 + $0xad0] sm:$0xff]  ;;  %v676_v22 = vld [vmem:[%s4982_s11 + $0xbe0] sm:$0xff]  ;;  %2391 = vmatpush.msra.mxu0 %v578_v19  ;;  %2410 = vmatpush.msra.mxu1 %v612_v20 }
  0x77   : > { %v576_v23 = vld [vmem:[%s4982_s11 + $0x8c0] sm:$0xff]  ;;  %v610_v24 = vld [vmem:[%s4982_s11 + $0x9d0] sm:$0xff]  ;;  %2431 = vmatpush.msra.mxu2 %v642_v21  ;;  %2450 = vmatpush.msra.mxu3 %v676_v22 }
  0x78   : > { %v640_v25 = vld [vmem:[%s4982_s11 + $0xac0] sm:$0xff]  ;;  %v674_v26 = vld [vmem:[%s4982_s11 + $0xbd0] sm:$0xff]  ;;  %2365 = vmatmul.f32.vlgmr.msrb.gmra.mxu2 %v5147_v4  ;;  %2392 = vmatpush.msra.mxu0 %v576_v23 }
  0x79   : > { %v574_v27 = vld [vmem:[%s4982_s11 + $0x8b0] sm:$0xff]  ;;  %v608_v28 = vld [vmem:[%s4982_s11 + $0x9c0] sm:$0xff]  ;;  %2411 = vmatpush.msra.mxu1 %v610_v24  ;;  %2432 = vmatpush.msra.mxu2 %v640_v25 }
  0x7a   : > { %v5180_v29 = vld.sshfl [vmem:[#allocation1] sm:$0xff pattern:$0x73625140]  ;;  %v5184_v31 = vld.sshfl [vmem:[#allocation1 + $0x10] sm:$0xff pattern:$0x73625140]  ;;  %2451 = vmatpush.msra.mxu3 %v674_v26  ;;  %2393 = vmatpush.msra.mxu0 %v574_v27 }
  0x7b   : > { %v638_v30 = vld [vmem:[%s4982_s11 + $0xab0] sm:$0xff]  ;;  %v5187_v33 = vld.sshfl [vmem:[#allocation1 + $0x8] sm:$0xff pattern:$0x73625140]  ;;  %2385 = vmatmul.f32.vlgmr.msrb.gmra.mxu3 %v5151_v6  ;;  %2412 = vmatpush.msra.mxu1 %v608_v28 }
  0x7c   : > { %v286_v32 = vld [vmem:[%s5090_s6 + $0x20] sm:$0xff]  ;;  %v5189_v34 = vld.sshfl [vmem:[#allocation1 + $0x18] sm:$0xff pattern:$0x73625140]  ;;  %v672_v35 = vld [vmem:[%s4982_s11 + $0xbc0] sm:$0xff]  ;;  %2433 = vmatpush.msra.mxu2 %v638_v30  ;;  %2345 = vmatmul.f32.vlgmr.msrb.gmra.mxu1 %v5153_v7 }
  0x7d   : > { %2123 = vst [vmem:[#allocation1] ss:$4 sm:$0xff] %v286_v32  ;;  %v572_v36 = vld [vmem:[%s4982_s11 + $0x8a0] sm:$0xff]  ;;  %v606_v37 = vld [vmem:[%s4982_s11 + $0x9b0] sm:$0xff]  ;;  %2452 = vmatpush.msra.mxu3 %v672_v35 }
  0x7e   : > { %v636_v38 = vld [vmem:[%s4982_s11 + $0xaa0] sm:$0xff]  ;;  %v670_v39 = vld [vmem:[%s4982_s11 + $0xbb0] sm:$0xff]  ;;  %2394 = vmatpush.msra.mxu0 %v572_v36  ;;  %2413 = vmatpush.msra.mxu1 %v606_v37 }
  0x7f   : > { %v570_v40 = vld [vmem:[%s4982_s11 + $0x890] sm:$0xff]  ;;  %v604_v41 = vld [vmem:[%s4982_s11 + $0x9a0] sm:$0xff]  ;;  %2434 = vmatpush.msra.mxu2 %v636_v38  ;;  %2453 = vmatpush.msra.mxu3 %v670_v39 }
  0x80   : > { %v634_v42 = vld [vmem:[%s4982_s11 + $0xa90] sm:$0xff]  ;;  %v668_v47 = vld [vmem:[%s4982_s11 + $0xba0] sm:$0xff]  ;;  %2395 = vmatpush.msra.mxu0 %v570_v40  ;;  %2414 = vmatpush.msra.mxu1 %v604_v41 }
  0x81   : > { %v568_v48 = vld [vmem:[%s4982_s11 + $0x880] sm:$0xff]  ;;  %v602_v49 = vld [vmem:[%s4982_s11 + $0x990] sm:$0xff]  ;;  %2435 = vmatpush.msra.mxu2 %v634_v42  ;;  %2454 = vmatpush.msra.mxu3 %v668_v47 }
  0x82   : > { %v632_v50 = vld [vmem:[%s4982_s11 + $0xa80] sm:$0xff]  ;;  %v666_v51 = vld [vmem:[%s4982_s11 + $0xb90] sm:$0xff]  ;;  %2396 = vmatpush.msra.mxu0 %v568_v48  ;;  %2415 = vmatpush.msra.mxu1 %v602_v49 }
  0x83   : > { %v566_v52 = vld [vmem:[%s4982_s11 + $0x870] sm:$0xff]  ;;  %v600_v53 = vld [vmem:[%s4982_s11 + $0x980] sm:$0xff]  ;;  %2436 = vmatpush.msra.mxu2 %v632_v50  ;;  %2455 = vmatpush.msra.mxu3 %v666_v51 }
  0x84   : > { %v630_v54 = vld [vmem:[%s4982_s11 + $0xa70] sm:$0xff]  ;;  %v664_v55 = vld [vmem:[%s4982_s11 + $0xb80] sm:$0xff]  ;;  %2397 = vmatpush.msra.mxu0 %v566_v52  ;;  %2416 = vmatpush.msra.mxu1 %v600_v53 }
  0x85   : > { %v564_v56 = vld [vmem:[%s4982_s11 + $0x860] sm:$0xff]  ;;  %v598_v57 = vld [vmem:[%s4982_s11 + $0x970] sm:$0xff]  ;;  %2437 = vmatpush.msra.mxu2 %v630_v54  ;;  %2456 = vmatpush.msra.mxu3 %v664_v55 }
  0x86   : > { %v628_v58 = vld [vmem:[%s4982_s11 + $0xa60] sm:$0xff]  ;;  %v662_v59 = vld [vmem:[%s4982_s11 + $0xb70] sm:$0xff]  ;;  %2398 = vmatpush.msra.mxu0 %v564_v56  ;;  %2417 = vmatpush.msra.mxu1 %v598_v57 }
  0x87   : > { %v562_v60 = vld [vmem:[%s4982_s11 + $0x850] sm:$0xff]  ;;  %v596_v61 = vld [vmem:[%s4982_s11 + $0x960] sm:$0xff]  ;;  %2438 = vmatpush.msra.mxu2 %v628_v58  ;;  %2457 = vmatpush.msra.mxu3 %v662_v59 }
  0x88   : > { %v626_v62 = vld [vmem:[%s4982_s11 + $0xa50] sm:$0xff]  ;;  %v660_v63 = vld [vmem:[%s4982_s11 + $0xb60] sm:$0xff]  ;;  %2399 = vmatpush.msra.mxu0 %v562_v60  ;;  %2418 = vmatpush.msra.mxu1 %v596_v61 }
  0x89   : > { %v560_v0 = vld [vmem:[%s4982_s11 + $0x840] sm:$0xff]  ;;  %v594_v1 = vld [vmem:[%s4982_s11 + $0x950] sm:$0xff]  ;;  %2439 = vmatpush.msra.mxu2 %v626_v62  ;;  %2458 = vmatpush.msra.mxu3 %v660_v63 }
  0x8a   : > { %v624_v2 = vld [vmem:[%s4982_s11 + $0xa40] sm:$0xff]  ;;  %v658_v3 = vld [vmem:[%s4982_s11 + $0xb50] sm:$0xff]  ;;  %2400 = vmatpush.msra.mxu0 %v560_v0  ;;  %2419 = vmatpush.msra.mxu1 %v594_v1 }
  0x8b   : > { %v558_v8 = vld [vmem:[%s4982_s11 + $0x830] sm:$0xff]  ;;  %v592_v9 = vld [vmem:[%s4982_s11 + $0x940] sm:$0xff]  ;;  %2440 = vmatpush.msra.mxu2 %v624_v2  ;;  %2459 = vmatpush.msra.mxu3 %v658_v3 }
  0x8c   : > { %v622_v10 = vld [vmem:[%s4982_s11 + $0xa30] sm:$0xff]  ;;  %v656_v11 = vld [vmem:[%s4982_s11 + $0xb40] sm:$0xff]  ;;  %2401 = vmatpush.msra.mxu0 %v558_v8  ;;  %2420 = vmatpush.msra.mxu1 %v592_v9 }
  0x8d   : > { %v556_v12 = vld [vmem:[%s4982_s11 + $0x820] sm:$0xff]  ;;  %v590_v13 = vld [vmem:[%s4982_s11 + $0x930] sm:$0xff]  ;;  %2441 = vmatpush.msra.mxu2 %v622_v10  ;;  %2460 = vmatpush.msra.mxu3 %v656_v11 }
  0x8e   : > { %v620_v14 = vld [vmem:[%s4982_s11 + $0xa20] sm:$0xff]  ;;  %v654_v15 = vld [vmem:[%s4982_s11 + $0xb30] sm:$0xff]  ;;  %2402 = vmatpush.msra.mxu0 %v556_v12  ;;  %2421 = vmatpush.msra.mxu1 %v590_v13 }
  0x8f   : > { %v554_v16 = vld [vmem:[%s4982_s11 + $0x810] sm:$0xff]  ;;  %v588_v17 = vld [vmem:[%s4982_s11 + $0x920] sm:$0xff]  ;;  %2442 = vmatpush.msra.mxu2 %v620_v14  ;;  %2461 = vmatpush.msra.mxu3 %v654_v15 }
  0x90   : > { %v618_v18 = vld [vmem:[%s4982_s11 + $0xa10] sm:$0xff]  ;;  %v652_v19 = vld [vmem:[%s4982_s11 + $0xb20] sm:$0xff]  ;;  %2403 = vmatpush.msra.mxu0 %v554_v16  ;;  %2422 = vmatpush.msra.mxu1 %v588_v17 }
  0x91   : > { %v552_v20 = vld [vmem:[%s4982_s11 + $0x800] sm:$0xff]  ;;  %v586_v21 = vld [vmem:[%s4982_s11 + $0x910] sm:$0xff]  ;;  %2443 = vmatpush.msra.mxu2 %v618_v18  ;;  %2462 = vmatpush.msra.mxu3 %v652_v19 }
  0x92   : > { %v616_v22 = vld [vmem:[%s4982_s11 + $0xa00] sm:$0xff]  ;;  %v650_v23 = vld [vmem:[%s4982_s11 + $0xb10] sm:$0xff]  ;;  %2404 = vmatpush.msra.mxu0 %v552_v20  ;;  %2423 = vmatpush.msra.mxu1 %v586_v21 }
  0x93   : > { %v710_v24 = vld [vmem:[%s4982_s11 + $0xcf0] sm:$0xff]  ;;  %2444 = vmatpush.msra.mxu2 %v616_v22  ;;  %2463 = vmatpush.msra.mxu3 %v650_v23  ;;  %v584_v26 = vld [vmem:[%s4982_s11 + $0x900] sm:$0xff] }
  0x94   : > { %v774_v25 = vld [vmem:[%s4982_s11 + $0xef0] sm:$0xff]  ;;  %v648_v27 = vld [vmem:[%s4982_s11 + $0xb00] sm:$0xff]  ;;  %2405 = vmatmul.f32.vlgmr.msra.gmra.mxu0 %v5180_v29  ;;  %2445 = vmatmul.f32.vlgmr.msra.gmra.mxu2 %v5184_v31 }
  0x95   : > { %v708_v28 = vld [vmem:[%s4982_s11 + $0xce0] sm:$0xff]  ;;  %2469 = vmatpush.msrb.mxu0 %v710_v24  ;;  %2509 = vmatpush.msrb.mxu2 %v774_v25  ;;  %v742_v30 = vld [vmem:[%s4982_s11 + $0xdf0] sm:$0xff] }
  0x96   : > { %v772_v32 = vld [vmem:[%s4982_s11 + $0xee0] sm:$0xff]  ;;  %v806_v35 = vld [vmem:[%s4982_s11 + $0xff0] sm:$0xff]  ;;  %2424 = vmatpush.msra.mxu1 %v584_v26  ;;  %2464 = vmatpush.msra.mxu3 %v648_v27 }
  0x97   : > { %v706_v36 = vld [vmem:[%s4982_s11 + $0xcd0] sm:$0xff]  ;;  %v740_v37 = vld [vmem:[%s4982_s11 + $0xde0] sm:$0xff]  ;;  %2425 = vmatmul.f32.vlgmr.msra.gmra.mxu1 %v5187_v33  ;;  %2465 = vmatmul.f32.vlgmr.msra.gmra.mxu3 %v5189_v34 }
  0x98   : > { %v770_v38 = vld [vmem:[%s4982_s11 + $0xed0] sm:$0xff]  ;;  %v804_v39 = vld [vmem:[%s4982_s11 + $0xfe0] sm:$0xff]  ;;  %2470 = vmatpush.msrb.mxu0 %v708_v28  ;;  %2489 = vmatpush.msrb.mxu1 %v742_v30 }
  0x99   : > { %v704_v40 = vld [vmem:[%s4982_s11 + $0xcc0] sm:$0xff]  ;;  %v5256_v41 = vld.sshfl [vmem:[#allocation1 + $0x20] sm:$0xff pattern:$0x73625140]  ;;  %2510 = vmatpush.msrb.mxu2 %v772_v32  ;;  %2529 = vmatpush.msrb.mxu3 %v806_v35 }
  0x9a   : > { %v5258_v42 = vld.sshfl [vmem:[#allocation1 + $0x30] sm:$0xff pattern:$0x73625140]  ;;  %v5260_v47 = vld.sshfl [vmem:[#allocation1 + $0x28] sm:$0xff pattern:$0x73625140]  ;;  %2471 = vmatpush.msrb.mxu0 %v706_v36  ;;  %2490 = vmatpush.msrb.mxu1 %v740_v37 }
  0x9b   : > { %v738_v48 = vld [vmem:[%s4982_s11 + $0xdd0] sm:$0xff]  ;;  %v287_v49 = vld [vmem:[%s5090_s6 + $0x28] sm:$0xff]  ;;  %2511 = vmatpush.msrb.mxu2 %v770_v38  ;;  %2530 = vmatpush.msrb.mxu3 %v804_v39 }
  0x9c   : > { %v5264_v50 = vld.sshfl [vmem:[#allocation1 + $0x38] sm:$0xff pattern:$0x73625140]  ;;  %v768_v51 = vld [vmem:[%s4982_s11 + $0xec0] sm:$0xff]  ;;  %2472 = vmatpush.msrb.mxu0 %v704_v40  ;;  %2491 = vmatpush.msrb.mxu1 %v738_v48 }
  0x9d   : > { %v802_v52 = vld [vmem:[%s4982_s11 + $0xfd0] sm:$0xff]  ;;  %2124 = vst [vmem:[#allocation1 + $0x20] ss:$4 sm:$0xff] %v287_v49  ;;  %v736_v54 = vld [vmem:[%s4982_s11 + $0xdc0] sm:$0xff]  ;;  %2512 = vmatpush.msrb.mxu2 %v768_v51 }
  0x9e   : > { %v702_v53 = vld [vmem:[%s4982_s11 + $0xcb0] sm:$0xff]  ;;  %v800_v56 = vld [vmem:[%s4982_s11 + $0xfc0] sm:$0xff]  ;;  %2531 = vmatpush.msrb.mxu3 %v802_v52  ;;  %2492 = vmatpush.msrb.mxu1 %v736_v54 }
  0x9f   : > { %v766_v55 = vld [vmem:[%s4982_s11 + $0xeb0] sm:$0xff]  ;;  %v700_v57 = vld [vmem:[%s4982_s11 + $0xca0] sm:$0xff]  ;;  %2473 = vmatpush.msrb.mxu0 %v702_v53 }
  0xa0   : > { %v734_v58 = vld [vmem:[%s4982_s11 + $0xdb0] sm:$0xff]  ;;  %v764_v59 = vld [vmem:[%s4982_s11 + $0xea0] sm:$0xff]  ;;  %2513 = vmatpush.msrb.mxu2 %v766_v55  ;;  %2532 = vmatpush.msrb.mxu3 %v800_v56 }
  0xa1   : > { %v798_v60 = vld [vmem:[%s4982_s11 + $0xfb0] sm:$0xff]  ;;  %v732_v62 = vld [vmem:[%s4982_s11 + $0xda0] sm:$0xff]  ;;  %2474 = vmatpush.msrb.mxu0 %v700_v57  ;;  %2493 = vmatpush.msrb.mxu1 %v734_v58 }
  0xa2   : > { %v698_v61 = vld [vmem:[%s4982_s11 + $0xc90] sm:$0xff]  ;;  %v796_v0 = vld [vmem:[%s4982_s11 + $0xfa0] sm:$0xff]  ;;  %2514 = vmatpush.msrb.mxu2 %v764_v59  ;;  %2533 = vmatpush.msrb.mxu3 %v798_v60 }
  0xa3   : > { %v762_v63 = vld [vmem:[%s4982_s11 + $0xe90] sm:$0xff]  ;;  %v696_v1 = vld [vmem:[%s4982_s11 + $0xc80] sm:$0xff]  ;;  %2475 = vmatpush.msrb.mxu0 %v698_v61  ;;  %2494 = vmatpush.msrb.mxu1 %v732_v62 }
  0xa4   : > { %v730_v2 = vld [vmem:[%s4982_s11 + $0xd90] sm:$0xff]  ;;  %v760_v3 = vld [vmem:[%s4982_s11 + $0xe80] sm:$0xff]  ;;  %2515 = vmatpush.msrb.mxu2 %v762_v63  ;;  %2534 = vmatpush.msrb.mxu3 %v796_v0 }
  0xa5   : > { %v794_v8 = vld [vmem:[%s4982_s11 + $0xf90] sm:$0xff]  ;;  %v728_v10 = vld [vmem:[%s4982_s11 + $0xd80] sm:$0xff]  ;;  %2476 = vmatpush.msrb.mxu0 %v696_v1  ;;  %2495 = vmatpush.msrb.mxu1 %v730_v2 }
  0xa6   : > { %v694_v9 = vld [vmem:[%s4982_s11 + $0xc70] sm:$0xff]  ;;  %v792_v12 = vld [vmem:[%s4982_s11 + $0xf80] sm:$0xff]  ;;  %2516 = vmatpush.msrb.mxu2 %v760_v3  ;;  %2535 = vmatpush.msrb.mxu3 %v794_v8 }
  0xa7   : > { %v758_v11 = vld [vmem:[%s4982_s11 + $0xe70] sm:$0xff]  ;;  %v692_v13 = vld [vmem:[%s4982_s11 + $0xc60] sm:$0xff]  ;;  %2477 = vmatpush.msrb.mxu0 %v694_v9  ;;  %2496 = vmatpush.msrb.mxu1 %v728_v10 }
  0xa8   : > { %v726_v14 = vld [vmem:[%s4982_s11 + $0xd70] sm:$0xff]  ;;  %v756_v15 = vld [vmem:[%s4982_s11 + $0xe60] sm:$0xff]  ;;  %2517 = vmatpush.msrb.mxu2 %v758_v11  ;;  %2536 = vmatpush.msrb.mxu3 %v792_v12 }
  0xa9   : > { %v790_v16 = vld [vmem:[%s4982_s11 + $0xf70] sm:$0xff]  ;;  %v724_v18 = vld [vmem:[%s4982_s11 + $0xd60] sm:$0xff]  ;;  %2478 = vmatpush.msrb.mxu0 %v692_v13  ;;  %2497 = vmatpush.msrb.mxu1 %v726_v14 }
  0xaa   : > { %v690_v17 = vld [vmem:[%s4982_s11 + $0xc50] sm:$0xff]  ;;  %v788_v20 = vld [vmem:[%s4982_s11 + $0xf60] sm:$0xff]  ;;  %2518 = vmatpush.msrb.mxu2 %v756_v15  ;;  %2537 = vmatpush.msrb.mxu3 %v790_v16 }
  0xab   : > { %v754_v19 = vld [vmem:[%s4982_s11 + $0xe50] sm:$0xff]  ;;  %v688_v21 = vld [vmem:[%s4982_s11 + $0xc40] sm:$0xff]  ;;  %2479 = vmatpush.msrb.mxu0 %v690_v17  ;;  %2498 = vmatpush.msrb.mxu1 %v724_v18 }
  0xac   : > { %v722_v22 = vld [vmem:[%s4982_s11 + $0xd50] sm:$0xff]  ;;  %v752_v23 = vld [vmem:[%s4982_s11 + $0xe40] sm:$0xff]  ;;  %2519 = vmatpush.msrb.mxu2 %v754_v19  ;;  %2538 = vmatpush.msrb.mxu3 %v788_v20 }
  0xad   : > { %v786_v24 = vld [vmem:[%s4982_s11 + $0xf50] sm:$0xff]  ;;  %v720_v26 = vld [vmem:[%s4982_s11 + $0xd40] sm:$0xff]  ;;  %2480 = vmatpush.msrb.mxu0 %v688_v21  ;;  %2499 = vmatpush.msrb.mxu1 %v722_v22 }
  0xae   : > { %v686_v25 = vld [vmem:[%s4982_s11 + $0xc30] sm:$0xff]  ;;  %v784_v28 = vld [vmem:[%s4982_s11 + $0xf40] sm:$0xff]  ;;  %2520 = vmatpush.msrb.mxu2 %v752_v23  ;;  %2539 = vmatpush.msrb.mxu3 %v786_v24 }
  0xaf   : > { %v750_v27 = vld [vmem:[%s4982_s11 + $0xe30] sm:$0xff]  ;;  %v684_v30 = vld [vmem:[%s4982_s11 + $0xc20] sm:$0xff]  ;;  %2481 = vmatpush.msrb.mxu0 %v686_v25  ;;  %2500 = vmatpush.msrb.mxu1 %v720_v26 }
  0xb0   : > { %v718_v32 = vld [vmem:[%s4982_s11 + $0xd30] sm:$0xff]  ;;  %v748_v35 = vld [vmem:[%s4982_s11 + $0xe20] sm:$0xff]  ;;  %2521 = vmatpush.msrb.mxu2 %v750_v27  ;;  %2540 = vmatpush.msrb.mxu3 %v784_v28 }
  0xb1   : > { %v782_v36 = vld [vmem:[%s4982_s11 + $0xf30] sm:$0xff]  ;;  %v716_v38 = vld [vmem:[%s4982_s11 + $0xd20] sm:$0xff]  ;;  %2482 = vmatpush.msrb.mxu0 %v684_v30  ;;  %2501 = vmatpush.msrb.mxu1 %v718_v32 }
  0xb2   : > { %v682_v37 = vld [vmem:[%s4982_s11 + $0xc10] sm:$0xff]  ;;  %v780_v40 = vld [vmem:[%s4982_s11 + $0xf20] sm:$0xff]  ;;  %2522 = vmatpush.msrb.mxu2 %v748_v35  ;;  %2541 = vmatpush.msrb.mxu3 %v782_v36 }
  0xb3   : > { %v746_v39 = vld [vmem:[%s4982_s11 + $0xe10] sm:$0xff]  ;;  %v680_v48 = vld [vmem:[%s4982_s11 + $0xc00] sm:$0xff]  ;;  %2483 = vmatpush.msrb.mxu0 %v682_v37  ;;  %2502 = vmatpush.msrb.mxu1 %v716_v38 }
  0xb4   : > { %v714_v49 = vld [vmem:[%s4982_s11 + $0xd10] sm:$0xff]  ;;  %v744_v51 = vld [vmem:[%s4982_s11 + $0xe00] sm:$0xff]  ;;  %2523 = vmatpush.msrb.mxu2 %v746_v39  ;;  %2542 = vmatpush.msrb.mxu3 %v780_v40 }
  0xb5   : > { %v778_v52 = vld [vmem:[%s4982_s11 + $0xf10] sm:$0xff]  ;;  %2484 = vmatpush.msrb.mxu0 %v680_v48  ;;  %2503 = vmatpush.msrb.mxu1 %v714_v49  ;;  %v712_v55 = vld [vmem:[%s4982_s11 + $0xd00] sm:$0xff] }
  0xb6   : > { %v838_v53 = vld [vmem:[%s4982_s11 + $0x10f0] sm:$0xff]  ;;  %2524 = vmatpush.msrb.mxu2 %v744_v51  ;;  %2543 = vmatpush.msrb.mxu3 %v778_v52  ;;  %v776_v56 = vld [vmem:[%s4982_s11 + $0xf00] sm:$0xff] }
  0xb7   : > { %v902_v54 = vld [vmem:[%s4982_s11 + $0x12f0] sm:$0xff]  ;;  %2485 = vmatmul.f32.vlgmr.msrb.gmra.mxu0 %v5256_v41  ;;  %2525 = vmatmul.f32.vlgmr.msrb.gmra.mxu2 %v5258_v42  ;;  %v836_v57 = vld [vmem:[%s4982_s11 + $0x10e0] sm:$0xff] }
  0xb8   : > { %2549 = vmatpush.msra.mxu0 %v838_v53  ;;  %2589 = vmatpush.msra.mxu2 %v902_v54  ;;  %v870_v58 = vld [vmem:[%s4982_s11 + $0x11f0] sm:$0xff]  ;;  %v900_v59 = vld [vmem:[%s4982_s11 + $0x12e0] sm:$0xff] }
  0xb9   : > { %2504 = vmatpush.msrb.mxu1 %v712_v55  ;;  %2544 = vmatpush.msrb.mxu3 %v776_v56  ;;  %v934_v60 = vld [vmem:[%s4982_s11 + $0x13f0] sm:$0xff]  ;;  %v868_v62 = vld [vmem:[%s4982_s11 + $0x11e0] sm:$0xff] }
  0xba   : > { %2505 = vmatmul.f32.vlgmr.msrb.gmra.mxu1 %v5260_v47  ;;  %2545 = vmatmul.f32.vlgmr.msrb.gmra.mxu3 %v5264_v50  ;;  %v834_v61 = vld [vmem:[%s4982_s11 + $0x10d0] sm:$0xff]  ;;  %v932_v0 = vld [vmem:[%s4982_s11 + $0x13e0] sm:$0xff] }
  0xbb   : > { %2550 = vmatpush.msra.mxu0 %v836_v57  ;;  %2569 = vmatpush.msra.mxu1 %v870_v58  ;;  %v898_v63 = vld [vmem:[%s4982_s11 + $0x12d0] sm:$0xff]  ;;  %v832_v1 = vld [vmem:[%s4982_s11 + $0x10c0] sm:$0xff] }
  0xbc   : > { %2590 = vmatpush.msra.mxu2 %v900_v59  ;;  %2609 = vmatpush.msra.mxu3 %v934_v60  ;;  %v866_v2 = vld [vmem:[%s4982_s11 + $0x11d0] sm:$0xff]  ;;  %v896_v3 = vld [vmem:[%s4982_s11 + $0x12c0] sm:$0xff] }
  0xbd   : > { %2551 = vmatpush.msra.mxu0 %v834_v61  ;;  %2570 = vmatpush.msra.mxu1 %v868_v62  ;;  %v930_v8 = vld [vmem:[%s4982_s11 + $0x13d0] sm:$0xff]  ;;  %v864_v10 = vld [vmem:[%s4982_s11 + $0x11c0] sm:$0xff] }
  0xbe   : > { %2591 = vmatpush.msra.mxu2 %v898_v63  ;;  %2610 = vmatpush.msra.mxu3 %v932_v0  ;;  %v830_v9 = vld [vmem:[%s4982_s11 + $0x10b0] sm:$0xff]  ;;  %v928_v12 = vld [vmem:[%s4982_s11 + $0x13c0] sm:$0xff] }
  0xbf   : > { %2552 = vmatpush.msra.mxu0 %v832_v1  ;;  %2571 = vmatpush.msra.mxu1 %v866_v2  ;;  %v894_v11 = vld [vmem:[%s4982_s11 + $0x12b0] sm:$0xff]  ;;  %v828_v13 = vld [vmem:[%s4982_s11 + $0x10a0] sm:$0xff] }
  0xc0   : > { %2592 = vmatpush.msra.mxu2 %v896_v3  ;;  %2611 = vmatpush.msra.mxu3 %v930_v8  ;;  %v862_v14 = vld [vmem:[%s4982_s11 + $0x11b0] sm:$0xff]  ;;  %v892_v15 = vld [vmem:[%s4982_s11 + $0x12a0] sm:$0xff] }
  0xc1   : > { %2553 = vmatpush.msra.mxu0 %v830_v9  ;;  %2572 = vmatpush.msra.mxu1 %v864_v10  ;;  %v926_v16 = vld [vmem:[%s4982_s11 + $0x13b0] sm:$0xff]  ;;  %v860_v18 = vld [vmem:[%s4982_s11 + $0x11a0] sm:$0xff] }
  0xc2   : > { %2593 = vmatpush.msra.mxu2 %v894_v11  ;;  %2612 = vmatpush.msra.mxu3 %v928_v12  ;;  %v826_v17 = vld [vmem:[%s4982_s11 + $0x1090] sm:$0xff]  ;;  %v924_v20 = vld [vmem:[%s4982_s11 + $0x13a0] sm:$0xff] }
  0xc3   : > { %2554 = vmatpush.msra.mxu0 %v828_v13  ;;  %2573 = vmatpush.msra.mxu1 %v862_v14  ;;  %v890_v19 = vld [vmem:[%s4982_s11 + $0x1290] sm:$0xff]  ;;  %v824_v21 = vld [vmem:[%s4982_s11 + $0x1080] sm:$0xff] }
  0xc4   : > { %2594 = vmatpush.msra.mxu2 %v892_v15  ;;  %2613 = vmatpush.msra.mxu3 %v926_v16  ;;  %v858_v22 = vld [vmem:[%s4982_s11 + $0x1190] sm:$0xff]  ;;  %v888_v23 = vld [vmem:[%s4982_s11 + $0x1280] sm:$0xff] }
  0xc5   : > { %2555 = vmatpush.msra.mxu0 %v826_v17  ;;  %2574 = vmatpush.msra.mxu1 %v860_v18  ;;  %v922_v24 = vld [vmem:[%s4982_s11 + $0x1390] sm:$0xff]  ;;  %v856_v26 = vld [vmem:[%s4982_s11 + $0x1180] sm:$0xff] }
  0xc6   : > { %2595 = vmatpush.msra.mxu2 %v890_v19  ;;  %2614 = vmatpush.msra.mxu3 %v924_v20  ;;  %v822_v25 = vld [vmem:[%s4982_s11 + $0x1070] sm:$0xff]  ;;  %v920_v28 = vld [vmem:[%s4982_s11 + $0x1380] sm:$0xff] }
  0xc7   : > { %2556 = vmatpush.msra.mxu0 %v824_v21  ;;  %2575 = vmatpush.msra.mxu1 %v858_v22  ;;  %v886_v27 = vld [vmem:[%s4982_s11 + $0x1270] sm:$0xff]  ;;  %v820_v30 = vld [vmem:[%s4982_s11 + $0x1060] sm:$0xff] }
  0xc8   : > { %2596 = vmatpush.msra.mxu2 %v888_v23  ;;  %2615 = vmatpush.msra.mxu3 %v922_v24  ;;  %v854_v32 = vld [vmem:[%s4982_s11 + $0x1170] sm:$0xff]  ;;  %v884_v35 = vld [vmem:[%s4982_s11 + $0x1260] sm:$0xff] }
  0xc9   : > { %2557 = vmatpush.msra.mxu0 %v822_v25  ;;  %2576 = vmatpush.msra.mxu1 %v856_v26  ;;  %v918_v36 = vld [vmem:[%s4982_s11 + $0x1370] sm:$0xff]  ;;  %v852_v38 = vld [vmem:[%s4982_s11 + $0x1160] sm:$0xff] }
  0xca   : > { %2597 = vmatpush.msra.mxu2 %v886_v27  ;;  %2616 = vmatpush.msra.mxu3 %v920_v28  ;;  %v818_v37 = vld [vmem:[%s4982_s11 + $0x1050] sm:$0xff]  ;;  %v916_v40 = vld [vmem:[%s4982_s11 + $0x1360] sm:$0xff] }
  0xcb   : > { %2558 = vmatpush.msra.mxu0 %v820_v30  ;;  %2577 = vmatpush.msra.mxu1 %v854_v32  ;;  %v882_v39 = vld [vmem:[%s4982_s11 + $0x1250] sm:$0xff]  ;;  %v816_v48 = vld [vmem:[%s4982_s11 + $0x1040] sm:$0xff] }
  0xcc   : > { %2598 = vmatpush.msra.mxu2 %v884_v35  ;;  %2617 = vmatpush.msra.mxu3 %v918_v36  ;;  %v850_v49 = vld [vmem:[%s4982_s11 + $0x1150] sm:$0xff]  ;;  %v880_v51 = vld [vmem:[%s4982_s11 + $0x1240] sm:$0xff] }
  0xcd   : > { %2559 = vmatpush.msra.mxu0 %v818_v37  ;;  %2578 = vmatpush.msra.mxu1 %v852_v38  ;;  %v914_v52 = vld [vmem:[%s4982_s11 + $0x1350] sm:$0xff]  ;;  %v848_v54 = vld [vmem:[%s4982_s11 + $0x1140] sm:$0xff] }
  0xce   : > { %2599 = vmatpush.msra.mxu2 %v882_v39  ;;  %2618 = vmatpush.msra.mxu3 %v916_v40  ;;  %v814_v53 = vld [vmem:[%s4982_s11 + $0x1030] sm:$0xff]  ;;  %v912_v56 = vld [vmem:[%s4982_s11 + $0x1340] sm:$0xff] }
  0xcf   : > { %2560 = vmatpush.msra.mxu0 %v816_v48  ;;  %2579 = vmatpush.msra.mxu1 %v850_v49  ;;  %v878_v55 = vld [vmem:[%s4982_s11 + $0x1230] sm:$0xff]  ;;  %v812_v57 = vld [vmem:[%s4982_s11 + $0x1020] sm:$0xff] }
  0xd0   : > { %2600 = vmatpush.msra.mxu2 %v880_v51  ;;  %2619 = vmatpush.msra.mxu3 %v914_v52  ;;  %v846_v58 = vld [vmem:[%s4982_s11 + $0x1130] sm:$0xff]  ;;  %v876_v59 = vld [vmem:[%s4982_s11 + $0x1220] sm:$0xff] }
  0xd1   : > { %2561 = vmatpush.msra.mxu0 %v814_v53  ;;  %2580 = vmatpush.msra.mxu1 %v848_v54  ;;  %v910_v60 = vld [vmem:[%s4982_s11 + $0x1330] sm:$0xff]  ;;  %v844_v62 = vld [vmem:[%s4982_s11 + $0x1120] sm:$0xff] }
  0xd2   : > { %2601 = vmatpush.msra.mxu2 %v878_v55  ;;  %2620 = vmatpush.msra.mxu3 %v912_v56  ;;  %v810_v61 = vld [vmem:[%s4982_s11 + $0x1010] sm:$0xff]  ;;  %v908_v0 = vld [vmem:[%s4982_s11 + $0x1320] sm:$0xff] }
  0xd3   : > { %2562 = vmatpush.msra.mxu0 %v812_v57  ;;  %2581 = vmatpush.msra.mxu1 %v846_v58  ;;  %v874_v63 = vld [vmem:[%s4982_s11 + $0x1210] sm:$0xff]  ;;  %v808_v1 = vld [vmem:[%s4982_s11 + $0x1000] sm:$0xff] }
  0xd4   : > { %2602 = vmatpush.msra.mxu2 %v876_v59  ;;  %2621 = vmatpush.msra.mxu3 %v910_v60  ;;  %v842_v2 = vld [vmem:[%s4982_s11 + $0x1110] sm:$0xff]  ;;  %v872_v3 = vld [vmem:[%s4982_s11 + $0x1200] sm:$0xff] }
  0xd5   : > { %2563 = vmatpush.msra.mxu0 %v810_v61  ;;  %2582 = vmatpush.msra.mxu1 %v844_v62  ;;  %v906_v8 = vld [vmem:[%s4982_s11 + $0x1310] sm:$0xff]  ;;  %v5386_v10 = vld.sshfl [vmem:[#allocation1 + $0x10] sm:$0xff pattern:$0x73625140] }
  0xd6   : > { %2603 = vmatpush.msra.mxu2 %v874_v63  ;;  %2622 = vmatpush.msra.mxu3 %v908_v0  ;;  %v5384_v9 = vld.sshfl [vmem:[#allocation1] sm:$0xff pattern:$0x73625140]  ;;  %v840_v13 = vld [vmem:[%s4982_s11 + $0x1100] sm:$0xff] }
  0xd7   : > { %2564 = vmatpush.msra.mxu0 %v808_v1  ;;  %2583 = vmatpush.msra.mxu1 %v842_v2  ;;  %v966_v11 = vld [vmem:[%s4982_s11 + $0x14f0] sm:$0xff]  ;;  %v904_v14 = vld [vmem:[%s4982_s11 + $0x1300] sm:$0xff] }
  0xd8   : > { %v1030_v12 = vld [vmem:[%s4982_s11 + $0x16f0] sm:$0xff]  ;;  %2604 = vmatpush.msra.mxu2 %v872_v3  ;;  %2623 = vmatpush.msra.mxu3 %v906_v8  ;;  %v5394_v15 = vld.sshfl [vmem:[#allocation1 + $0x8] sm:$0xff pattern:$0x73625140] }
  0xd9   : > { %2565 = vmatmul.f32.vlgmr.msra.gmra.mxu0 %v5384_v9  ;;  %2605 = vmatmul.f32.vlgmr.msra.gmra.mxu2 %v5386_v10  ;;  %v5396_v16 = vld.sshfl [vmem:[#allocation1 + $0x18] sm:$0xff pattern:$0x73625140]  ;;  %v964_v17 = vld [vmem:[%s4982_s11 + $0x14e0] sm:$0xff] }
  0xda   : > { %2629 = vmatpush.msrb.mxu0 %v966_v11  ;;  %2669 = vmatpush.msrb.mxu2 %v1030_v12  ;;  %v998_v18 = vld [vmem:[%s4982_s11 + $0x15f0] sm:$0xff]  ;;  %v1028_v19 = vld [vmem:[%s4982_s11 + $0x16e0] sm:$0xff] }
  0xdb   : > { %2584 = vmatpush.msra.mxu1 %v840_v13  ;;  %2624 = vmatpush.msra.mxu3 %v904_v14  ;;  %v1062_v20 = vld [vmem:[%s4982_s11 + $0x17f0] sm:$0xff]  ;;  %v996_v22 = vld [vmem:[%s4982_s11 + $0x15e0] sm:$0xff] }
  0xdc   : > { %2585 = vmatmul.f32.vlgmr.msra.gmra.mxu1 %v5394_v15  ;;  %2625 = vmatmul.f32.vlgmr.msra.gmra.mxu3 %v5396_v16  ;;  %v962_v21 = vld [vmem:[%s4982_s11 + $0x14d0] sm:$0xff]  ;;  %v1060_v24 = vld [vmem:[%s4982_s11 + $0x17e0] sm:$0xff] }
  0xdd   : > { %2630 = vmatpush.msrb.mxu0 %v964_v17  ;;  %2649 = vmatpush.msrb.mxu1 %v998_v18  ;;  %v1026_v23 = vld [vmem:[%s4982_s11 + $0x16d0] sm:$0xff]  ;;  %v960_v25 = vld [vmem:[%s4982_s11 + $0x14c0] sm:$0xff] }
  0xde   : > { %2670 = vmatpush.msrb.mxu2 %v1028_v19  ;;  %2689 = vmatpush.msrb.mxu3 %v1062_v20  ;;  %v994_v26 = vld [vmem:[%s4982_s11 + $0x15d0] sm:$0xff]  ;;  %v1024_v27 = vld [vmem:[%s4982_s11 + $0x16c0] sm:$0xff] }
  0xdf   : > { %2631 = vmatpush.msrb.mxu0 %v962_v21  ;;  %2650 = vmatpush.msrb.mxu1 %v996_v22  ;;  %v1058_v28 = vld [vmem:[%s4982_s11 + $0x17d0] sm:$0xff]  ;;  %v992_v32 = vld [vmem:[%s4982_s11 + $0x15c0] sm:$0xff] }
  0xe0   : > { %2671 = vmatpush.msrb.mxu2 %v1026_v23  ;;  %2690 = vmatpush.msrb.mxu3 %v1060_v24  ;;  %v958_v30 = vld [vmem:[%s4982_s11 + $0x14b0] sm:$0xff]  ;;  %v1056_v36 = vld [vmem:[%s4982_s11 + $0x17c0] sm:$0xff] }
  0xe1   : > { %2632 = vmatpush.msrb.mxu0 %v960_v25  ;;  %2651 = vmatpush.msrb.mxu1 %v994_v26  ;;  %v1022_v35 = vld [vmem:[%s4982_s11 + $0x16b0] sm:$0xff]  ;;  %v956_v37 = vld [vmem:[%s4982_s11 + $0x14a0] sm:$0xff] }
  0xe2   : > { %2672 = vmatpush.msrb.mxu2 %v1024_v27  ;;  %2691 = vmatpush.msrb.mxu3 %v1058_v28  ;;  %v990_v38 = vld [vmem:[%s4982_s11 + $0x15b0] sm:$0xff]  ;;  %v1020_v39 = vld [vmem:[%s4982_s11 + $0x16a0] sm:$0xff] }
  0xe3   : > { %2633 = vmatpush.msrb.mxu0 %v958_v30  ;;  %2652 = vmatpush.msrb.mxu1 %v992_v32  ;;  %v1054_v40 = vld [vmem:[%s4982_s11 + $0x17b0] sm:$0xff]  ;;  %v988_v49 = vld [vmem:[%s4982_s11 + $0x15a0] sm:$0xff] }
  0xe4   : > { %2673 = vmatpush.msrb.mxu2 %v1022_v35  ;;  %2692 = vmatpush.msrb.mxu3 %v1056_v36  ;;  %v954_v48 = vld [vmem:[%s4982_s11 + $0x1490] sm:$0xff]  ;;  %v1052_v52 = vld [vmem:[%s4982_s11 + $0x17a0] sm:$0xff] }
  0xe5   : > { %2634 = vmatpush.msrb.mxu0 %v956_v37  ;;  %2653 = vmatpush.msrb.mxu1 %v990_v38  ;;  %v1018_v51 = vld [vmem:[%s4982_s11 + $0x1690] sm:$0xff]  ;;  %v952_v53 = vld [vmem:[%s4982_s11 + $0x1480] sm:$0xff] }
  0xe6   : > { %2674 = vmatpush.msrb.mxu2 %v1020_v39  ;;  %2693 = vmatpush.msrb.mxu3 %v1054_v40  ;;  %v986_v54 = vld [vmem:[%s4982_s11 + $0x1590] sm:$0xff]  ;;  %v1016_v55 = vld [vmem:[%s4982_s11 + $0x1680] sm:$0xff] }
  0xe7   : > { %2635 = vmatpush.msrb.mxu0 %v954_v48  ;;  %2654 = vmatpush.msrb.mxu1 %v988_v49  ;;  %v1050_v56 = vld [vmem:[%s4982_s11 + $0x1790] sm:$0xff]  ;;  %v984_v58 = vld [vmem:[%s4982_s11 + $0x1580] sm:$0xff] }
  0xe8   : > { %2675 = vmatpush.msrb.mxu2 %v1018_v51  ;;  %2694 = vmatpush.msrb.mxu3 %v1052_v52  ;;  %v950_v57 = vld [vmem:[%s4982_s11 + $0x1470] sm:$0xff]  ;;  %v1048_v60 = vld [vmem:[%s4982_s11 + $0x1780] sm:$0xff] }
  0xe9   : > { %2636 = vmatpush.msrb.mxu0 %v952_v53  ;;  %2655 = vmatpush.msrb.mxu1 %v986_v54  ;;  %v1014_v59 = vld [vmem:[%s4982_s11 + $0x1670] sm:$0xff]  ;;  %v948_v61 = vld [vmem:[%s4982_s11 + $0x1460] sm:$0xff] }
  0xea   : > { %2676 = vmatpush.msrb.mxu2 %v1016_v55  ;;  %2695 = vmatpush.msrb.mxu3 %v1050_v56  ;;  %v982_v62 = vld [vmem:[%s4982_s11 + $0x1570] sm:$0xff]  ;;  %v1012_v63 = vld [vmem:[%s4982_s11 + $0x1660] sm:$0xff] }
  0xeb   : > { %2637 = vmatpush.msrb.mxu0 %v950_v57  ;;  %2656 = vmatpush.msrb.mxu1 %v984_v58  ;;  %v1046_v0 = vld [vmem:[%s4982_s11 + $0x1770] sm:$0xff]  ;;  %v980_v2 = vld [vmem:[%s4982_s11 + $0x1560] sm:$0xff] }
  0xec   : > { %2677 = vmatpush.msrb.mxu2 %v1014_v59  ;;  %2696 = vmatpush.msrb.mxu3 %v1048_v60  ;;  %v946_v1 = vld [vmem:[%s4982_s11 + $0x1450] sm:$0xff]  ;;  %v1044_v8 = vld [vmem:[%s4982_s11 + $0x1760] sm:$0xff] }
  0xed   : > { %2638 = vmatpush.msrb.mxu0 %v948_v61  ;;  %2657 = vmatpush.msrb.mxu1 %v982_v62  ;;  %v1010_v3 = vld [vmem:[%s4982_s11 + $0x1650] sm:$0xff]  ;;  %v944_v11 = vld [vmem:[%s4982_s11 + $0x1440] sm:$0xff] }
  0xee   : > { %2678 = vmatpush.msrb.mxu2 %v1012_v63  ;;  %2697 = vmatpush.msrb.mxu3 %v1046_v0  ;;  %v978_v12 = vld [vmem:[%s4982_s11 + $0x1550] sm:$0xff]  ;;  %v1008_v13 = vld [vmem:[%s4982_s11 + $0x1640] sm:$0xff] }
  0xef   : > { %2639 = vmatpush.msrb.mxu0 %v946_v1  ;;  %2658 = vmatpush.msrb.mxu1 %v980_v2  ;;  %v1042_v14 = vld [vmem:[%s4982_s11 + $0x1750] sm:$0xff]  ;;  %v976_v18 = vld [vmem:[%s4982_s11 + $0x1540] sm:$0xff] }
  0xf0   : > { %2679 = vmatpush.msrb.mxu2 %v1010_v3  ;;  %2698 = vmatpush.msrb.mxu3 %v1044_v8  ;;  %v942_v17 = vld [vmem:[%s4982_s11 + $0x1430] sm:$0xff]  ;;  %v1040_v20 = vld [vmem:[%s4982_s11 + $0x1740] sm:$0xff] }
  0xf1   : > { %2640 = vmatpush.msrb.mxu0 %v944_v11  ;;  %2659 = vmatpush.msrb.mxu1 %v978_v12  ;;  %v1006_v19 = vld [vmem:[%s4982_s11 + $0x1630] sm:$0xff]  ;;  %v940_v21 = vld [vmem:[%s4982_s11 + $0x1420] sm:$0xff] }
  0xf2   : > { %2680 = vmatpush.msrb.mxu2 %v1008_v13  ;;  %2699 = vmatpush.msrb.mxu3 %v1042_v14  ;;  %v974_v22 = vld [vmem:[%s4982_s11 + $0x1530] sm:$0xff]  ;;  %v1004_v23 = vld [vmem:[%s4982_s11 + $0x1620] sm:$0xff] }
  0xf3   : > { %2641 = vmatpush.msrb.mxu0 %v942_v17  ;;  %2660 = vmatpush.msrb.mxu1 %v976_v18  ;;  %v1038_v24 = vld [vmem:[%s4982_s11 + $0x1730] sm:$0xff]  ;;  %v972_v26 = vld [vmem:[%s4982_s11 + $0x1520] sm:$0xff] }
  0xf4   : > { %2681 = vmatpush.msrb.mxu2 %v1006_v19  ;;  %2700 = vmatpush.msrb.mxu3 %v1040_v20  ;;  %v938_v25 = vld [vmem:[%s4982_s11 + $0x1410] sm:$0xff]  ;;  %v288_v27 = vld [vmem:[%s5090_s6 + $0x30] sm:$0xff]  ;;  %v5471_v52 = vld.sshfl [vmem:[#allocation1 + $0x28] sm:$0xff pattern:$0x73625140] }
  0xf5   : > { %2642 = vmatpush.msrb.mxu0 %v940_v21  ;;  %2661 = vmatpush.msrb.mxu1 %v974_v22  ;;  %v1002_v28 = vld [vmem:[%s4982_s11 + $0x1610] sm:$0xff]  ;;  %v1036_v30 = vld [vmem:[%s4982_s11 + $0x1720] sm:$0xff]  ;;  %2133 = vst [vmem:[#allocation1] ss:$4 sm:$0xff] %v288_v27 }
  0xf6   : > { %2682 = vmatpush.msrb.mxu2 %v1004_v23  ;;  %2701 = vmatpush.msrb.mxu3 %v1038_v24  ;;  %v936_v32 = vld [vmem:[%s4982_s11 + $0x1400] sm:$0xff]  ;;  %v970_v35 = vld [vmem:[%s4982_s11 + $0x1510] sm:$0xff] }
  0xf7   : > { %2643 = vmatpush.msrb.mxu0 %v938_v25  ;;  %2662 = vmatpush.msrb.mxu1 %v972_v26  ;;  %v1000_v36 = vld [vmem:[%s4982_s11 + $0x1600] sm:$0xff]  ;;  %v1034_v37 = vld [vmem:[%s4982_s11 + $0x1710] sm:$0xff] }
  0xf8   : > { %2683 = vmatpush.msrb.mxu2 %v1002_v28  ;;  %2702 = vmatpush.msrb.mxu3 %v1036_v30  ;;  %v5461_v38 = vld.sshfl [vmem:[#allocation1 + $0x20] sm:$0xff pattern:$0x73625140]  ;;  %v5463_v39 = vld.sshfl [vmem:[#allocation1 + $0x30] sm:$0xff pattern:$0x73625140] }
  0xf9   : > { %2644 = vmatpush.msrb.mxu0 %v936_v32  ;;  %2663 = vmatpush.msrb.mxu1 %v970_v35  ;;  %v1094_v40 = vld [vmem:[%s4982_s11 + $0x18f0] sm:$0xff]  ;;  %v968_v49 = vld [vmem:[%s4982_s11 + $0x1500] sm:$0xff] }
  0xfa   : > { %v1158_v48 = vld [vmem:[%s4982_s11 + $0x1af0] sm:$0xff]  ;;  %2684 = vmatpush.msrb.mxu2 %v1000_v36  ;;  %2703 = vmatpush.msrb.mxu3 %v1034_v37  ;;  %v1032_v51 = vld [vmem:[%s4982_s11 + $0x1700] sm:$0xff] }
  0xfb   : > { %2645 = vmatmul.f32.vlgmr.msrb.gmra.mxu0 %v5461_v38  ;;  %2685 = vmatmul.f32.vlgmr.msrb.gmra.mxu2 %v5463_v39  ;;  %v5473_v53 = vld.sshfl [vmem:[#allocation1 + $0x38] sm:$0xff pattern:$0x73625140]  ;;  %v1092_v54 = vld [vmem:[%s4982_s11 + $0x18e0] sm:$0xff] }
  0xfc   : > { %2709 = vmatpush.msra.mxu0 %v1094_v40  ;;  %2749 = vmatpush.msra.mxu2 %v1158_v48  ;;  %v1126_v55 = vld [vmem:[%s4982_s11 + $0x19f0] sm:$0xff]  ;;  %v1156_v56 = vld [vmem:[%s4982_s11 + $0x1ae0] sm:$0xff] }
  0xfd   : > { %2664 = vmatpush.msrb.mxu1 %v968_v49  ;;  %2704 = vmatpush.msrb.mxu3 %v1032_v51  ;;  %v1190_v57 = vld [vmem:[%s4982_s11 + $0x1bf0] sm:$0xff]  ;;  %v1124_v59 = vld [vmem:[%s4982_s11 + $0x19e0] sm:$0xff] }
  0xfe   : > { %2665 = vmatmul.f32.vlgmr.msrb.gmra.mxu1 %v5471_v52  ;;  %2705 = vmatmul.f32.vlgmr.msrb.gmra.mxu3 %v5473_v53  ;;  %v1090_v58 = vld [vmem:[%s4982_s11 + $0x18d0] sm:$0xff]  ;;  %v1188_v61 = vld [vmem:[%s4982_s11 + $0x1be0] sm:$0xff] }
  0xff   : > { %2710 = vmatpush.msra.mxu0 %v1092_v54  ;;  %2729 = vmatpush.msra.mxu1 %v1126_v55  ;;  %v1154_v60 = vld [vmem:[%s4982_s11 + $0x1ad0] sm:$0xff]  ;;  %v1088_v62 = vld [vmem:[%s4982_s11 + $0x18c0] sm:$0xff] }
 0x100   : > { %2750 = vmatpush.msra.mxu2 %v1156_v56  ;;  %2769 = vmatpush.msra.mxu3 %v1190_v57  ;;  %v1122_v63 = vld [vmem:[%s4982_s11 + $0x19d0] sm:$0xff]  ;;  %v1152_v0 = vld [vmem:[%s4982_s11 + $0x1ac0] sm:$0xff] }
 0x101   : > { %2711 = vmatpush.msra.mxu0 %v1090_v58  ;;  %2730 = vmatpush.msra.mxu1 %v1124_v59  ;;  %v1186_v1 = vld [vmem:[%s4982_s11 + $0x1bd0] sm:$0xff]  ;;  %v1120_v3 = vld [vmem:[%s4982_s11 + $0x19c0] sm:$0xff] }
 0x102   : > { %2751 = vmatpush.msra.mxu2 %v1154_v60  ;;  %2770 = vmatpush.msra.mxu3 %v1188_v61  ;;  %v1086_v2 = vld [vmem:[%s4982_s11 + $0x18b0] sm:$0xff]  ;;  %v1184_v11 = vld [vmem:[%s4982_s11 + $0x1bc0] sm:$0xff] }
 0x103   : > { %2712 = vmatpush.msra.mxu0 %v1088_v62  ;;  %2731 = vmatpush.msra.mxu1 %v1122_v63  ;;  %v1150_v8 = vld [vmem:[%s4982_s11 + $0x1ab0] sm:$0xff]  ;;  %v1084_v12 = vld [vmem:[%s4982_s11 + $0x18a0] sm:$0xff] }
 0x104   : > { %2752 = vmatpush.msra.mxu2 %v1152_v0  ;;  %2771 = vmatpush.msra.mxu3 %v1186_v1  ;;  %v1118_v13 = vld [vmem:[%s4982_s11 + $0x19b0] sm:$0xff]  ;;  %v1148_v14 = vld [vmem:[%s4982_s11 + $0x1aa0] sm:$0xff] }
 0x105   : > { %2713 = vmatpush.msra.mxu0 %v1086_v2  ;;  %2732 = vmatpush.msra.mxu1 %v1120_v3  ;;  %v1182_v17 = vld [vmem:[%s4982_s11 + $0x1bb0] sm:$0xff]  ;;  %v1116_v19 = vld [vmem:[%s4982_s11 + $0x19a0] sm:$0xff] }
 0x106   : > { %2753 = vmatpush.msra.mxu2 %v1150_v8  ;;  %2772 = vmatpush.msra.mxu3 %v1184_v11  ;;  %v1082_v18 = vld [vmem:[%s4982_s11 + $0x1890] sm:$0xff]  ;;  %v1180_v21 = vld [vmem:[%s4982_s11 + $0x1ba0] sm:$0xff] }
 0x107   : > { %2714 = vmatpush.msra.mxu0 %v1084_v12  ;;  %2733 = vmatpush.msra.mxu1 %v1118_v13  ;;  %v1146_v20 = vld [vmem:[%s4982_s11 + $0x1a90] sm:$0xff]  ;;  %v1080_v22 = vld [vmem:[%s4982_s11 + $0x1880] sm:$0xff] }
 0x108   : > { %2754 = vmatpush.msra.mxu2 %v1148_v14  ;;  %2773 = vmatpush.msra.mxu3 %v1182_v17  ;;  %v1114_v23 = vld [vmem:[%s4982_s11 + $0x1990] sm:$0xff]  ;;  %v1144_v24 = vld [vmem:[%s4982_s11 + $0x1a80] sm:$0xff] }
 0x109   : > { %2715 = vmatpush.msra.mxu0 %v1082_v18  ;;  %2734 = vmatpush.msra.mxu1 %v1116_v19  ;;  %v1178_v25 = vld [vmem:[%s4982_s11 + $0x1b90] sm:$0xff]  ;;  %v1112_v27 = vld [vmem:[%s4982_s11 + $0x1980] sm:$0xff] }
 0x10a   : > { %2755 = vmatpush.msra.mxu2 %v1146_v20  ;;  %2774 = vmatpush.msra.mxu3 %v1180_v21  ;;  %v1078_v26 = vld [vmem:[%s4982_s11 + $0x1870] sm:$0xff]  ;;  %v1176_v30 = vld [vmem:[%s4982_s11 + $0x1b80] sm:$0xff] }
 0x10b   : > { %2716 = vmatpush.msra.mxu0 %v1080_v22  ;;  %2735 = vmatpush.msra.mxu1 %v1114_v23  ;;  %v1142_v28 = vld [vmem:[%s4982_s11 + $0x1a70] sm:$0xff]  ;;  %v1076_v32 = vld [vmem:[%s4982_s11 + $0x1860] sm:$0xff] }
 0x10c   : > { %2756 = vmatpush.msra.mxu2 %v1144_v24  ;;  %2775 = vmatpush.msra.mxu3 %v1178_v25  ;;  %v1110_v35 = vld [vmem:[%s4982_s11 + $0x1970] sm:$0xff]  ;;  %v1140_v36 = vld [vmem:[%s4982_s11 + $0x1a60] sm:$0xff] }
 0x10d   : > { %2717 = vmatpush.msra.mxu0 %v1078_v26  ;;  %2736 = vmatpush.msra.mxu1 %v1112_v27  ;;  %v1174_v37 = vld [vmem:[%s4982_s11 + $0x1b70] sm:$0xff]  ;;  %v1108_v48 = vld [vmem:[%s4982_s11 + $0x1960] sm:$0xff] }
 0x10e   : > { %2757 = vmatpush.msra.mxu2 %v1142_v28  ;;  %2776 = vmatpush.msra.mxu3 %v1176_v30  ;;  %v1074_v40 = vld [vmem:[%s4982_s11 + $0x1850] sm:$0xff]  ;;  %v1172_v51 = vld [vmem:[%s4982_s11 + $0x1b60] sm:$0xff] }
 0x10f   : > { %2718 = vmatpush.msra.mxu0 %v1076_v32  ;;  %2737 = vmatpush.msra.mxu1 %v1110_v35  ;;  %v1138_v49 = vld [vmem:[%s4982_s11 + $0x1a50] sm:$0xff]  ;;  %v1072_v54 = vld [vmem:[%s4982_s11 + $0x1840] sm:$0xff] }
 0x110   : > { %2758 = vmatpush.msra.mxu2 %v1140_v36  ;;  %2777 = vmatpush.msra.mxu3 %v1174_v37  ;;  %v1106_v55 = vld [vmem:[%s4982_s11 + $0x1950] sm:$0xff]  ;;  %v1136_v56 = vld [vmem:[%s4982_s11 + $0x1a40] sm:$0xff] }
 0x111   : > { %2719 = vmatpush.msra.mxu0 %v1074_v40  ;;  %2738 = vmatpush.msra.mxu1 %v1108_v48  ;;  %v1170_v57 = vld [vmem:[%s4982_s11 + $0x1b50] sm:$0xff]  ;;  %v1104_v59 = vld [vmem:[%s4982_s11 + $0x1940] sm:$0xff]  ;;  %v2266_v48 = vpop.f32.mrf.mxu1 }
 0x112   : > { %2759 = vmatpush.msra.mxu2 %v1138_v49  ;;  %2778 = vmatpush.msra.mxu3 %v1172_v51  ;;  %v1070_v58 = vld [vmem:[%s4982_s11 + $0x1830] sm:$0xff]  ;;  %v1168_v61 = vld [vmem:[%s4982_s11 + $0x1b40] sm:$0xff] }
 0x113   : > { %2720 = vmatpush.msra.mxu0 %v1072_v54  ;;  %2739 = vmatpush.msra.mxu1 %v1106_v55  ;;  %v1134_v60 = vld [vmem:[%s4982_s11 + $0x1a30] sm:$0xff]  ;;  %v1068_v62 = vld [vmem:[%s4982_s11 + $0x1820] sm:$0xff] }
 0x114   : > { %2760 = vmatpush.msra.mxu2 %v1136_v56  ;;  %2779 = vmatpush.msra.mxu3 %v1170_v57  ;;  %v1102_v63 = vld [vmem:[%s4982_s11 + $0x1930] sm:$0xff]  ;;  %v1132_v0 = vld [vmem:[%s4982_s11 + $0x1a20] sm:$0xff]  ;;  %v2246_v56 = vpop.f32.mrf.mxu0 }
 0x115   : > { %2721 = vmatpush.msra.mxu0 %v1070_v58  ;;  %2740 = vmatpush.msra.mxu1 %v1104_v59  ;;  %v1166_v1 = vld [vmem:[%s4982_s11 + $0x1b30] sm:$0xff]  ;;  %v1100_v3 = vld [vmem:[%s4982_s11 + $0x1920] sm:$0xff]  ;;  %v2267_v59 = vadd.f32 %v2266_v48, %v2246_v56 }
 0x116   : > { %2761 = vmatpush.msra.mxu2 %v1134_v60  ;;  %2780 = vmatpush.msra.mxu3 %v1168_v61  ;;  %v1066_v2 = vld [vmem:[%s4982_s11 + $0x1810] sm:$0xff]  ;;  %v1164_v12 = vld [vmem:[%s4982_s11 + $0x1b20] sm:$0xff] }
 0x117   : > { %v289_v8 = vld [vmem:[%s5090_s6 + $0x38] sm:$0xff]  ;;  %2722 = vmatpush.msra.mxu0 %v1068_v62  ;;  %2741 = vmatpush.msra.mxu1 %v1102_v63  ;;  %v1064_v13 = vld [vmem:[%s4982_s11 + $0x1800] sm:$0xff]  ;;  %v5538_v19 = vld.sshfl [vmem:[#allocation1] sm:$0xff pattern:$0x73625140]  ;;  %v2286_v62 = vpop.f32.mrf.mxu2 }
 0x118   : > { %v1130_v11 = vld [vmem:[%s4982_s11 + $0x1a10] sm:$0xff]  ;;  %2134 = vst [vmem:[#allocation1 + $0x20] ss:$4 sm:$0xff] %v289_v8  ;;  %2762 = vmatpush.msra.mxu2 %v1132_v0  ;;  %2781 = vmatpush.msra.mxu3 %v1166_v1  ;;  %v1128_v17 = vld [vmem:[%s4982_s11 + $0x1a00] sm:$0xff] }
 0x119   : > { %v1098_v14 = vld [vmem:[%s4982_s11 + $0x1910] sm:$0xff]  ;;  %2723 = vmatpush.msra.mxu0 %v1066_v2  ;;  %2742 = vmatpush.msra.mxu1 %v1100_v3  ;;  %v5540_v20 = vld.sshfl [vmem:[#allocation1 + $0x10] sm:$0xff pattern:$0x73625140]  ;;  %v2346_v56 = vpop.f32.mrf.mxu1 }
 0x11a   : > { %v1162_v18 = vld [vmem:[%s4982_s11 + $0x1b10] sm:$0xff]  ;;  %2763 = vmatpush.msra.mxu2 %v1130_v11  ;;  %2782 = vmatpush.msra.mxu3 %v1164_v12  ;;  %v1096_v23 = vld [vmem:[%s4982_s11 + $0x1900] sm:$0xff]  ;;  %v2287_v11 = vadd.f32 %v2286_v62, %v2267_v59 }
 0x11b   : > { %2724 = vmatpush.msra.mxu0 %v1064_v13  ;;  %2743 = vmatpush.msra.mxu1 %v1098_v14  ;;  %v1222_v21 = vld [vmem:[%s4982_s11 + $0x1cf0] sm:$0xff]  ;;  %v1160_v24 = vld [vmem:[%s4982_s11 + $0x1b00] sm:$0xff]  ;;  %v2306_v14 = vpop.f32.mrf.mxu3 }
 0x11c   : > { %v1286_v22 = vld [vmem:[%s4982_s11 + $0x1ef0] sm:$0xff]  ;;  %2764 = vmatpush.msra.mxu2 %v1128_v17  ;;  %2783 = vmatpush.msra.mxu3 %v1162_v18  ;;  %v5548_v25 = vld.sshfl [vmem:[#allocation1 + $0x8] sm:$0xff pattern:$0x73625140] }
 0x11d   : > { %2725 = vmatmul.f32.vlgmr.msra.gmra.mxu0 %v5538_v19  ;;  %2765 = vmatmul.f32.vlgmr.msra.gmra.mxu2 %v5540_v20  ;;  %v5550_v26 = vld.sshfl [vmem:[#allocation1 + $0x18] sm:$0xff pattern:$0x73625140]  ;;  %v1220_v27 = vld [vmem:[%s4982_s11 + $0x1ce0] sm:$0xff] }
 0x11e   : > { %2789 = vmatpush.msrb.mxu0 %v1222_v21  ;;  %2829 = vmatpush.msrb.mxu2 %v1286_v22  ;;  %v1254_v28 = vld [vmem:[%s4982_s11 + $0x1df0] sm:$0xff]  ;;  %v1284_v30 = vld [vmem:[%s4982_s11 + $0x1ee0] sm:$0xff] }
 0x11f   : > { %2744 = vmatpush.msra.mxu1 %v1096_v23  ;;  %2784 = vmatpush.msra.mxu3 %v1160_v24  ;;  %v1318_v32 = vld [vmem:[%s4982_s11 + $0x1ff0] sm:$0xff]  ;;  %v1252_v36 = vld [vmem:[%s4982_s11 + $0x1de0] sm:$0xff] }
 0x120   : > { %2745 = vmatmul.f32.vlgmr.msra.gmra.mxu1 %v5548_v25  ;;  %2785 = vmatmul.f32.vlgmr.msra.gmra.mxu3 %v5550_v26  ;;  %v1218_v35 = vld [vmem:[%s4982_s11 + $0x1cd0] sm:$0xff]  ;;  %v1316_v40 = vld [vmem:[%s4982_s11 + $0x1fe0] sm:$0xff] }
 0x121   : > { %2790 = vmatpush.msrb.mxu0 %v1220_v27  ;;  %2809 = vmatpush.msrb.mxu1 %v1254_v28  ;;  %v1282_v37 = vld [vmem:[%s4982_s11 + $0x1ed0] sm:$0xff]  ;;  %v1216_v49 = vld [vmem:[%s4982_s11 + $0x1cc0] sm:$0xff]  ;;  %v2307_v27 = vadd.f32 %v2306_v14, %v2287_v11 }
 0x122   : > { %2830 = vmatpush.msrb.mxu2 %v1284_v30  ;;  %2849 = vmatpush.msrb.mxu3 %v1318_v32  ;;  %v1250_v51 = vld [vmem:[%s4982_s11 + $0x1dd0] sm:$0xff]  ;;  %v1280_v54 = vld [vmem:[%s4982_s11 + $0x1ec0] sm:$0xff]  ;;  %v2326_v32 = vpop.f32.mrf.mxu0 }
 0x123   : > { %2791 = vmatpush.msrb.mxu0 %v1218_v35  ;;  %2810 = vmatpush.msrb.mxu1 %v1252_v36  ;;  %v1314_v55 = vld [vmem:[%s4982_s11 + $0x1fd0] sm:$0xff]  ;;  %v1248_v58 = vld [vmem:[%s4982_s11 + $0x1dc0] sm:$0xff] }
 0x124   : > { %2831 = vmatpush.msrb.mxu2 %v1282_v37  ;;  %2850 = vmatpush.msrb.mxu3 %v1316_v40  ;;  %v1214_v57 = vld [vmem:[%s4982_s11 + $0x1cb0] sm:$0xff]  ;;  %v1312_v61 = vld [vmem:[%s4982_s11 + $0x1fc0] sm:$0xff] }
 0x125   : > { %2792 = vmatpush.msrb.mxu0 %v1216_v49  ;;  %2811 = vmatpush.msrb.mxu1 %v1250_v51  ;;  %v1278_v60 = vld [vmem:[%s4982_s11 + $0x1eb0] sm:$0xff]  ;;  %v1212_v63 = vld [vmem:[%s4982_s11 + $0x1ca0] sm:$0xff]  ;;  %v2327_v51 = vadd.f32 %v2326_v32, %v2307_v27 }
 0x126   : > { %2832 = vmatpush.msrb.mxu2 %v1280_v54  ;;  %2851 = vmatpush.msrb.mxu3 %v1314_v55  ;;  %v1246_v0 = vld [vmem:[%s4982_s11 + $0x1db0] sm:$0xff]  ;;  %v1276_v1 = vld [vmem:[%s4982_s11 + $0x1ea0] sm:$0xff] }
 0x127   : > { %2793 = vmatpush.msrb.mxu0 %v1214_v57  ;;  %2812 = vmatpush.msrb.mxu1 %v1248_v58  ;;  %v1310_v2 = vld [vmem:[%s4982_s11 + $0x1fb0] sm:$0xff]  ;;  %v1244_v8 = vld [vmem:[%s4982_s11 + $0x1da0] sm:$0xff] }
 0x128   : > { %2833 = vmatpush.msrb.mxu2 %v1278_v60  ;;  %2852 = vmatpush.msrb.mxu3 %v1312_v61  ;;  %v1210_v3 = vld [vmem:[%s4982_s11 + $0x1c90] sm:$0xff]  ;;  %v1308_v13 = vld [vmem:[%s4982_s11 + $0x1fa0] sm:$0xff] }
 0x129   : > { %2794 = vmatpush.msrb.mxu0 %v1212_v63  ;;  %2813 = vmatpush.msrb.mxu1 %v1246_v0  ;;  %v1274_v12 = vld [vmem:[%s4982_s11 + $0x1e90] sm:$0xff]  ;;  %v1208_v17 = vld [vmem:[%s4982_s11 + $0x1c80] sm:$0xff]  ;;  %v2347_v63 = vadd.f32 %v2346_v56, %v2327_v51 }
 0x12a   : > { %2834 = vmatpush.msrb.mxu2 %v1276_v1  ;;  %2853 = vmatpush.msrb.mxu3 %v1310_v2  ;;  %v1242_v18 = vld [vmem:[%s4982_s11 + $0x1d90] sm:$0xff]  ;;  %v1272_v21 = vld [vmem:[%s4982_s11 + $0x1e80] sm:$0xff]  ;;  %v2366_v2 = vpop.f32.mrf.mxu2  ;;  %v2406_v32 = vpop.f32.mrf.mxu0 }
 0x12b   : > { %2795 = vmatpush.msrb.mxu0 %v1210_v3  ;;  %2814 = vmatpush.msrb.mxu1 %v1244_v8  ;;  %v1306_v22 = vld [vmem:[%s4982_s11 + $0x1f90] sm:$0xff]  ;;  %v1240_v24 = vld [vmem:[%s4982_s11 + $0x1d80] sm:$0xff] }
 0x12c   : > { %2835 = vmatpush.msrb.mxu2 %v1274_v12  ;;  %2854 = vmatpush.msrb.mxu3 %v1308_v13  ;;  %v1206_v23 = vld [vmem:[%s4982_s11 + $0x1c70] sm:$0xff]  ;;  %v1304_v30 = vld [vmem:[%s4982_s11 + $0x1f80] sm:$0xff] }
 0x12d   : > { %2796 = vmatpush.msrb.mxu0 %v1208_v17  ;;  %2815 = vmatpush.msrb.mxu1 %v1242_v18  ;;  %v1270_v28 = vld [vmem:[%s4982_s11 + $0x1e70] sm:$0xff]  ;;  %v1204_v35 = vld [vmem:[%s4982_s11 + $0x1c60] sm:$0xff]  ;;  %v2367_v18 = vadd.f32 %v2366_v2, %v2347_v63 }
 0x12e   : > { %2836 = vmatpush.msrb.mxu2 %v1272_v21  ;;  %2855 = vmatpush.msrb.mxu3 %v1306_v22  ;;  %v1238_v36 = vld [vmem:[%s4982_s11 + $0x1d70] sm:$0xff]  ;;  %v1268_v37 = vld [vmem:[%s4982_s11 + $0x1e60] sm:$0xff] }
 0x12f   : > { %2797 = vmatpush.msrb.mxu0 %v1206_v23  ;;  %2816 = vmatpush.msrb.mxu1 %v1240_v24  ;;  %v1302_v40 = vld [vmem:[%s4982_s11 + $0x1f70] sm:$0xff]  ;;  %v1236_v49 = vld [vmem:[%s4982_s11 + $0x1d60] sm:$0xff]  ;;  %v2386_v23 = vpop.f32.mrf.mxu3 }
 0x130   : > { %2837 = vmatpush.msrb.mxu2 %v1270_v28  ;;  %2856 = vmatpush.msrb.mxu3 %v1304_v30  ;;  %v1202_v48 = vld [vmem:[%s4982_s11 + $0x1c50] sm:$0xff]  ;;  %v1300_v55 = vld [vmem:[%s4982_s11 + $0x1f60] sm:$0xff] }
 0x131   : > { %2798 = vmatpush.msrb.mxu0 %v1204_v35  ;;  %2817 = vmatpush.msrb.mxu1 %v1238_v36  ;;  %v1266_v54 = vld [vmem:[%s4982_s11 + $0x1e50] sm:$0xff]  ;;  %v1200_v57 = vld [vmem:[%s4982_s11 + $0x1c40] sm:$0xff] }
 0x132   : > { %2838 = vmatpush.msrb.mxu2 %v1268_v37  ;;  %2857 = vmatpush.msrb.mxu3 %v1302_v40  ;;  %v1234_v58 = vld [vmem:[%s4982_s11 + $0x1d50] sm:$0xff]  ;;  %v1264_v59 = vld [vmem:[%s4982_s11 + $0x1e40] sm:$0xff]  ;;  %v2387_v37 = vadd.f32 %v2386_v23, %v2367_v18 }
 0x133   : > { %2799 = vmatpush.msrb.mxu0 %v1202_v48  ;;  %2818 = vmatpush.msrb.mxu1 %v1236_v49  ;;  %v1298_v60 = vld [vmem:[%s4982_s11 + $0x1f50] sm:$0xff]  ;;  %v1232_v62 = vld [vmem:[%s4982_s11 + $0x1d40] sm:$0xff] }
 0x134   : > { %2839 = vmatpush.msrb.mxu2 %v1266_v54  ;;  %2858 = vmatpush.msrb.mxu3 %v1300_v55  ;;  %v1198_v61 = vld [vmem:[%s4982_s11 + $0x1c30] sm:$0xff]  ;;  %v1296_v1 = vld [vmem:[%s4982_s11 + $0x1f40] sm:$0xff]  ;;  %v2407_v56 = vadd.f32 %v2406_v32, %v2387_v37  ;;  %v2486_v37 = vpop.f32.mrf.mxu0 }
 0x135   : > { %2800 = vmatpush.msrb.mxu0 %v1200_v57  ;;  %2819 = vmatpush.msrb.mxu1 %v1234_v58  ;;  %v1262_v0 = vld [vmem:[%s4982_s11 + $0x1e30] sm:$0xff]  ;;  %v1196_v3 = vld [vmem:[%s4982_s11 + $0x1c20] sm:$0xff] }
 0x136   : > { %2840 = vmatpush.msrb.mxu2 %v1264_v59  ;;  %2859 = vmatpush.msrb.mxu3 %v1298_v60  ;;  %v1230_v8 = vld [vmem:[%s4982_s11 + $0x1d30] sm:$0xff]  ;;  %v1260_v11 = vld [vmem:[%s4982_s11 + $0x1e20] sm:$0xff]  ;;  %v2426_v60 = vpop.f32.mrf.mxu1 }
 0x137   : > { %2801 = vmatpush.msrb.mxu0 %v1198_v61  ;;  %2820 = vmatpush.msrb.mxu1 %v1232_v62  ;;  %v1294_v12 = vld [vmem:[%s4982_s11 + $0x1f30] sm:$0xff]  ;;  %v1228_v14 = vld [vmem:[%s4982_s11 + $0x1d20] sm:$0xff] }
 0x138   : > { %2841 = vmatpush.msrb.mxu2 %v1262_v0  ;;  %2860 = vmatpush.msrb.mxu3 %v1296_v1  ;;  %v1194_v13 = vld [vmem:[%s4982_s11 + $0x1c10] sm:$0xff]  ;;  %v1292_v22 = vld [vmem:[%s4982_s11 + $0x1f20] sm:$0xff] }
 0x139   : > { %v290_v17 = vld [vmem:[%s5090_s6 + $0x40] sm:$0xff]  ;;  %2802 = vmatpush.msrb.mxu0 %v1196_v3  ;;  %2821 = vmatpush.msrb.mxu1 %v1230_v8  ;;  %v1192_v24 = vld [vmem:[%s4982_s11 + $0x1c00] sm:$0xff]  ;;  %v5628_v57 = vld.sshfl [vmem:[#allocation1 + $0x38] sm:$0xff pattern:$0x73625140]  ;;  %v2446_v3 = vpop.f32.mrf.mxu2 }
 0x13a   : > { %v1258_v21 = vld [vmem:[%s4982_s11 + $0x1e10] sm:$0xff]  ;;  %2143 = vst [vmem:[#allocation1] ss:$4 sm:$0xff] %v290_v17  ;;  %2842 = vmatpush.msrb.mxu2 %v1260_v11  ;;  %2861 = vmatpush.msrb.mxu3 %v1294_v12  ;;  %v1256_v28 = vld [vmem:[%s4982_s11 + $0x1e00] sm:$0xff]  ;;  %v2427_v12 = vadd.f32 %v2426_v60, %v2407_v56 }
 0x13b   : > { %v1226_v27 = vld [vmem:[%s4982_s11 + $0x1d10] sm:$0xff]  ;;  %2803 = vmatpush.msrb.mxu0 %v1194_v13  ;;  %2822 = vmatpush.msrb.mxu1 %v1228_v14  ;;  %v5617_v36 = vld.sshfl [vmem:[#allocation1 + $0x30] sm:$0xff pattern:$0x73625140] }
 0x13c   : > { %v1290_v30 = vld [vmem:[%s4982_s11 + $0x1f10] sm:$0xff]  ;;  %2843 = vmatpush.msrb.mxu2 %v1258_v21  ;;  %2862 = vmatpush.msrb.mxu3 %v1292_v22  ;;  %v1224_v49 = vld [vmem:[%s4982_s11 + $0x1d00] sm:$0xff]  ;;  %v2447_v21 = vadd.f32 %v2446_v3, %v2427_v12 }
 0x13d   : > { %v5615_v35 = vld.sshfl [vmem:[#allocation1 + $0x20] sm:$0xff pattern:$0x73625140]  ;;  %2804 = vmatpush.msrb.mxu0 %v1192_v24  ;;  %2823 = vmatpush.msrb.mxu1 %v1226_v27  ;;  %v1288_v51 = vld [vmem:[%s4982_s11 + $0x1f00] sm:$0xff]  ;;  %v2466_v24 = vpop.f32.mrf.mxu3 }
 0x13e   : > { %v1350_v40 = vld [vmem:[%s4982_s11 + $0x20f0] sm:$0xff]  ;;  %2844 = vmatpush.msrb.mxu2 %v1256_v28  ;;  %2863 = vmatpush.msrb.mxu3 %v1290_v30  ;;  %v5623_v54 = vld.sshfl [vmem:[#allocation1 + $0x28] sm:$0xff pattern:$0x73625140]  ;;  %v292_v55 = vld [vmem:[%s5090_s6 + $0x50] sm:$0xff] }
 0x13f   : > { %v1414_v48 = vld [vmem:[%s4982_s11 + $0x22f0] sm:$0xff]  ;;  %2805 = vmatmul.f32.vlgmr.msrb.gmra.mxu0 %v5615_v35  ;;  %2845 = vmatmul.f32.vlgmr.msrb.gmra.mxu2 %v5617_v36  ;;  %v1348_v58 = vld [vmem:[%s4982_s11 + $0x20e0] sm:$0xff] }
 0x140   : > { %v1382_v59 = vld [vmem:[%s4982_s11 + $0x21f0] sm:$0xff]  ;;  %2869 = vmatpush.msra.mxu0 %v1350_v40  ;;  %2909 = vmatpush.msra.mxu2 %v1414_v48  ;;  %v1412_v61 = vld [vmem:[%s4982_s11 + $0x22e0] sm:$0xff] }
 0x141   : > { %v1446_v62 = vld [vmem:[%s4982_s11 + $0x23f0] sm:$0xff]  ;;  %2824 = vmatpush.msrb.mxu1 %v1224_v49  ;;  %2864 = vmatpush.msrb.mxu3 %v1288_v51  ;;  %v1380_v0 = vld [vmem:[%s4982_s11 + $0x21e0] sm:$0xff]  ;;  %v2467_v49 = vadd.f32 %v2466_v24, %v2447_v21  ;;  %v2526_v3 = vpop.f32.mrf.mxu2 }
 0x142   : > { %v1346_v63 = vld [vmem:[%s4982_s11 + $0x20d0] sm:$0xff]  ;;  %v1444_v2 = vld [vmem:[%s4982_s11 + $0x23e0] sm:$0xff]  ;;  %2825 = vmatmul.f32.vlgmr.msrb.gmra.mxu1 %v5623_v54  ;;  %2865 = vmatmul.f32.vlgmr.msrb.gmra.mxu3 %v5628_v57 }
 0x143   : > { %v1410_v1 = vld [vmem:[%s4982_s11 + $0x22d0] sm:$0xff]  ;;  %v5642_v11 = vld.sshfl [vmem:[#allocation1 + $0x10] sm:$0xff pattern:$0x73625140]  ;;  %2870 = vmatpush.msra.mxu0 %v1348_v58  ;;  %2889 = vmatpush.msra.mxu1 %v1382_v59  ;;  %v2487_v59 = vadd.f32 %v2486_v37, %v2467_v49 }
 0x144   : > { %v5640_v8 = vld.sshfl [vmem:[#allocation1] sm:$0xff pattern:$0x73625140]  ;;  %v5644_v13 = vld.sshfl [vmem:[#allocation1 + $0x8] sm:$0xff pattern:$0x73625140]  ;;  %2910 = vmatpush.msra.mxu2 %v1412_v61  ;;  %2929 = vmatpush.msra.mxu3 %v1446_v62  ;;  %v2506_v62 = vpop.f32.mrf.mxu1 }
 0x145   : > { %v5646_v14 = vld.sshfl [vmem:[#allocation1 + $0x18] sm:$0xff pattern:$0x73625140]  ;;  %v1344_v17 = vld [vmem:[%s4982_s11 + $0x20c0] sm:$0xff]  ;;  %2871 = vmatpush.msra.mxu0 %v1346_v63  ;;  %2890 = vmatpush.msra.mxu1 %v1380_v0 }
 0x146   : > { %v1378_v18 = vld [vmem:[%s4982_s11 + $0x21d0] sm:$0xff]  ;;  %2153 = vst [vmem:[#allocation1] ss:$4 sm:$0xff] %v292_v55  ;;  %v1408_v22 = vld [vmem:[%s4982_s11 + $0x22c0] sm:$0xff]  ;;  %2911 = vmatpush.msra.mxu2 %v1410_v1  ;;  %2930 = vmatpush.msra.mxu3 %v1444_v2 }
 0x147   : > { %v1442_v23 = vld [vmem:[%s4982_s11 + $0x23d0] sm:$0xff]  ;;  %v1376_v28 = vld [vmem:[%s4982_s11 + $0x21c0] sm:$0xff]  ;;  %2872 = vmatpush.msra.mxu0 %v1344_v17  ;;  %2891 = vmatpush.msra.mxu1 %v1378_v18  ;;  %v2507_v18 = vadd.f32 %v2506_v62, %v2487_v59 }
 0x148   : > { %v1342_v27 = vld [vmem:[%s4982_s11 + $0x20b0] sm:$0xff]  ;;  %v1440_v32 = vld [vmem:[%s4982_s11 + $0x23c0] sm:$0xff]  ;;  %2912 = vmatpush.msra.mxu2 %v1408_v22  ;;  %2931 = vmatpush.msra.mxu3 %v1442_v23 }
 0x149   : > { %v1406_v30 = vld [vmem:[%s4982_s11 + $0x22b0] sm:$0xff]  ;;  %v1340_v40 = vld [vmem:[%s4982_s11 + $0x20a0] sm:$0xff]  ;;  %2873 = vmatpush.msra.mxu0 %v1342_v27  ;;  %2892 = vmatpush.msra.mxu1 %v1376_v28  ;;  %v2527_v27 = vadd.f32 %v2526_v3, %v2507_v18 }
 0x14a   : > { %v1374_v48 = vld [vmem:[%s4982_s11 + $0x21b0] sm:$0xff]  ;;  %v1404_v51 = vld [vmem:[%s4982_s11 + $0x22a0] sm:$0xff]  ;;  %2913 = vmatpush.msra.mxu2 %v1406_v30  ;;  %2932 = vmatpush.msra.mxu3 %v1440_v32  ;;  %v2546_v32 = vpop.f32.mrf.mxu3 }
 0x14b   : > { %v1438_v55 = vld [vmem:[%s4982_s11 + $0x23b0] sm:$0xff]  ;;  %v1372_v58 = vld [vmem:[%s4982_s11 + $0x21a0] sm:$0xff]  ;;  %2874 = vmatpush.msra.mxu0 %v1340_v40  ;;  %2893 = vmatpush.msra.mxu1 %v1374_v48 }
 0x14c   : > { %v1338_v56 = vld [vmem:[%s4982_s11 + $0x2090] sm:$0xff]  ;;  %v1436_v61 = vld [vmem:[%s4982_s11 + $0x23a0] sm:$0xff]  ;;  %2914 = vmatpush.msra.mxu2 %v1404_v51  ;;  %2933 = vmatpush.msra.mxu3 %v1438_v55 }
 0x14d   : > { %v1402_v60 = vld [vmem:[%s4982_s11 + $0x2290] sm:$0xff]  ;;  %v1336_v63 = vld [vmem:[%s4982_s11 + $0x2080] sm:$0xff]  ;;  %2875 = vmatpush.msra.mxu0 %v1338_v56  ;;  %2894 = vmatpush.msra.mxu1 %v1372_v58  ;;  %v2547_v56 = vadd.f32 %v2546_v32, %v2527_v27 }
 0x14e   : > { %v1370_v0 = vld [vmem:[%s4982_s11 + $0x2190] sm:$0xff]  ;;  %v1400_v1 = vld [vmem:[%s4982_s11 + $0x2280] sm:$0xff]  ;;  %2915 = vmatpush.msra.mxu2 %v1402_v60  ;;  %2934 = vmatpush.msra.mxu3 %v1436_v61 }
 0x14f   : > { %v1434_v2 = vld [vmem:[%s4982_s11 + $0x2390] sm:$0xff]  ;;  %v1368_v17 = vld [vmem:[%s4982_s11 + $0x2180] sm:$0xff]  ;;  %2876 = vmatpush.msra.mxu0 %v1336_v63  ;;  %2895 = vmatpush.msra.mxu1 %v1370_v0 }
 0x150   : > { %v1334_v12 = vld [vmem:[%s4982_s11 + $0x2070] sm:$0xff]  ;;  %v1432_v22 = vld [vmem:[%s4982_s11 + $0x2380] sm:$0xff]  ;;  %2916 = vmatpush.msra.mxu2 %v1400_v1  ;;  %2935 = vmatpush.msra.mxu3 %v1434_v2 }
 0x151   : > { %v1398_v21 = vld [vmem:[%s4982_s11 + $0x2270] sm:$0xff]  ;;  %v1332_v23 = vld [vmem:[%s4982_s11 + $0x2060] sm:$0xff]  ;;  %2877 = vmatpush.msra.mxu0 %v1334_v12  ;;  %2896 = vmatpush.msra.mxu1 %v1368_v17 }
 0x152   : > { %v1366_v24 = vld [vmem:[%s4982_s11 + $0x2170] sm:$0xff]  ;;  %v1396_v28 = vld [vmem:[%s4982_s11 + $0x2260] sm:$0xff]  ;;  %2917 = vmatpush.msra.mxu2 %v1398_v21  ;;  %2936 = vmatpush.msra.mxu3 %v1432_v22 }
 0x153   : > { %v1430_v30 = vld [vmem:[%s4982_s11 + $0x2370] sm:$0xff]  ;;  %v1364_v40 = vld [vmem:[%s4982_s11 + $0x2160] sm:$0xff]  ;;  %2878 = vmatpush.msra.mxu0 %v1332_v23  ;;  %2897 = vmatpush.msra.mxu1 %v1366_v24 }
 0x154   : > { %v1330_v37 = vld [vmem:[%s4982_s11 + $0x2050] sm:$0xff]  ;;  %v1428_v49 = vld [vmem:[%s4982_s11 + $0x2360] sm:$0xff]  ;;  %2918 = vmatpush.msra.mxu2 %v1396_v28  ;;  %2937 = vmatpush.msra.mxu3 %v1430_v30 }
 0x155   : > { %v1394_v48 = vld [vmem:[%s4982_s11 + $0x2250] sm:$0xff]  ;;  %v1328_v51 = vld [vmem:[%s4982_s11 + $0x2040] sm:$0xff]  ;;  %2879 = vmatpush.msra.mxu0 %v1330_v37  ;;  %2898 = vmatpush.msra.mxu1 %v1364_v40 }
 0x156   : > { %v1362_v55 = vld [vmem:[%s4982_s11 + $0x2150] sm:$0xff]  ;;  %v1392_v58 = vld [vmem:[%s4982_s11 + $0x2240] sm:$0xff]  ;;  %2919 = vmatpush.msra.mxu2 %v1394_v48  ;;  %2938 = vmatpush.msra.mxu3 %v1428_v49  ;;  %v2566_v62 = vpop.f32.mrf.mxu0 }
 0x157   : > { %v1426_v59 = vld [vmem:[%s4982_s11 + $0x2350] sm:$0xff]  ;;  %v1360_v61 = vld [vmem:[%s4982_s11 + $0x2140] sm:$0xff]  ;;  %2880 = vmatpush.msra.mxu0 %v1328_v51  ;;  %2899 = vmatpush.msra.mxu1 %v1362_v55  ;;  %v2567_v1 = vadd.f32 %v2566_v62, %v2547_v56 }
 0x158   : > { %v1326_v60 = vld [vmem:[%s4982_s11 + $0x2030] sm:$0xff]  ;;  %v1424_v0 = vld [vmem:[%s4982_s11 + $0x2340] sm:$0xff]  ;;  %2920 = vmatpush.msra.mxu2 %v1392_v58  ;;  %2939 = vmatpush.msra.mxu3 %v1426_v59 }
 0x159   : > { %v1390_v63 = vld [vmem:[%s4982_s11 + $0x2230] sm:$0xff]  ;;  %v1324_v2 = vld [vmem:[%s4982_s11 + $0x2020] sm:$0xff]  ;;  %2881 = vmatpush.msra.mxu0 %v1326_v60  ;;  %2900 = vmatpush.msra.mxu1 %v1360_v61  ;;  %v2586_v18 = vpop.f32.mrf.mxu1 }
 0x15a   : > { %v1358_v3 = vld [vmem:[%s4982_s11 + $0x2130] sm:$0xff]  ;;  %v1388_v12 = vld [vmem:[%s4982_s11 + $0x2220] sm:$0xff]  ;;  %2921 = vmatpush.msra.mxu2 %v1390_v63  ;;  %2940 = vmatpush.msra.mxu3 %v1424_v0  ;;  %v2587_v23 = vadd.f32 %v2586_v18, %v2567_v1 }
 0x15b   : > { %v1422_v17 = vld [vmem:[%s4982_s11 + $0x2330] sm:$0xff]  ;;  %v1356_v22 = vld [vmem:[%s4982_s11 + $0x2120] sm:$0xff]  ;;  %2882 = vmatpush.msra.mxu0 %v1324_v2  ;;  %2901 = vmatpush.msra.mxu1 %v1358_v3 }
 0x15c   : > { %v1322_v21 = vld [vmem:[%s4982_s11 + $0x2010] sm:$0xff]  ;;  %v291_v24 = vld [vmem:[%s5090_s6 + $0x48] sm:$0xff]  ;;  %2922 = vmatpush.msra.mxu2 %v1388_v12  ;;  %2941 = vmatpush.msra.mxu3 %v1422_v17  ;;  %v2606_v37 = vpop.f32.mrf.mxu2 }
 0x15d   : > { %v1386_v27 = vld [vmem:[%s4982_s11 + $0x2210] sm:$0xff]  ;;  %v1420_v28 = vld [vmem:[%s4982_s11 + $0x2320] sm:$0xff]  ;;  %2144 = vst [vmem:[#allocation1 + $0x20] ss:$4 sm:$0xff] %v291_v24  ;;  %2883 = vmatpush.msra.mxu0 %v1322_v21  ;;  %2902 = vmatpush.msra.mxu1 %v1356_v22  ;;  %v2607_v49 = vadd.f32 %v2606_v37, %v2587_v23 }
 0x15e   : > { %v1320_v30 = vld [vmem:[%s4982_s11 + $0x2000] sm:$0xff]  ;;  %v1354_v32 = vld [vmem:[%s4982_s11 + $0x2110] sm:$0xff]  ;;  %2923 = vmatpush.msra.mxu2 %v1386_v27  ;;  %2942 = vmatpush.msra.mxu3 %v1420_v28 }
 0x15f   : > { %v1384_v40 = vld [vmem:[%s4982_s11 + $0x2200] sm:$0xff]  ;;  %v1418_v48 = vld [vmem:[%s4982_s11 + $0x2310] sm:$0xff]  ;;  %2884 = vmatpush.msra.mxu0 %v1320_v30  ;;  %2903 = vmatpush.msra.mxu1 %v1354_v32  ;;  %v2626_v56 = vpop.f32.mrf.mxu3 }
 0x160   : > { %v1478_v51 = vld [vmem:[%s4982_s11 + $0x24f0] sm:$0xff]  ;;  %2924 = vmatpush.msra.mxu2 %v1384_v40  ;;  %2943 = vmatpush.msra.mxu3 %v1418_v48  ;;  %v1352_v58 = vld [vmem:[%s4982_s11 + $0x2100] sm:$0xff]  ;;  %v5705_v60 = vadd.f32 %v2626_v56, %v2607_v49 }
 0x161   : > { %v1542_v55 = vld [vmem:[%s4982_s11 + $0x26f0] sm:$0xff]  ;;  %v1416_v59 = vld [vmem:[%s4982_s11 + $0x2300] sm:$0xff]  ;;  %2885 = vmatmul.f32.vlgmr.msra.gmra.mxu0 %v5640_v8  ;;  %2925 = vmatmul.f32.vlgmr.msra.gmra.mxu2 %v5642_v11 }
 0x162   : > { %v293_v61 = vld [vmem:[%s5090_s6 + $0x58] sm:$0xff]  ;;  %v1476_v62 = vld [vmem:[%s4982_s11 + $0x24e0] sm:$0xff]  ;;  %2949 = vmatpush.msrb.mxu0 %v1478_v51  ;;  %2989 = vmatpush.msrb.mxu2 %v1542_v55 }
 0x163   : > { %v1510_v63 = vld [vmem:[%s4982_s11 + $0x25f0] sm:$0xff]  ;;  %v1540_v0 = vld [vmem:[%s4982_s11 + $0x26e0] sm:$0xff]  ;;  %2904 = vmatpush.msra.mxu1 %v1352_v58  ;;  %2944 = vmatpush.msra.mxu3 %v1416_v59 }
 0x164   : > { %v1574_v1 = vld [vmem:[%s4982_s11 + $0x27f0] sm:$0xff]  ;;  %v1508_v3 = vld [vmem:[%s4982_s11 + $0x25e0] sm:$0xff]  ;;  %2905 = vmatmul.f32.vlgmr.msra.gmra.mxu1 %v5644_v13  ;;  %2945 = vmatmul.f32.vlgmr.msra.gmra.mxu3 %v5646_v14 }
 0x165   : > { %v1474_v2 = vld [vmem:[%s4982_s11 + $0x24d0] sm:$0xff]  ;;  %v1572_v17 = vld [vmem:[%s4982_s11 + $0x27e0] sm:$0xff]  ;;  %2950 = vmatpush.msrb.mxu0 %v1476_v62  ;;  %2969 = vmatpush.msrb.mxu1 %v1510_v63 }
 0x166   : > { %v1538_v12 = vld [vmem:[%s4982_s11 + $0x26d0] sm:$0xff]  ;;  %v5722_v21 = vld.sshfl [vmem:[#allocation1 + $0x30] sm:$0xff pattern:$0x73625140]  ;;  %2990 = vmatpush.msrb.mxu2 %v1540_v0  ;;  %3009 = vmatpush.msrb.mxu3 %v1574_v1 }
 0x167   : > { %v5720_v18 = vld.sshfl [vmem:[#allocation1 + $0x20] sm:$0xff pattern:$0x73625140]  ;;  %v5724_v22 = vld.sshfl [vmem:[#allocation1 + $0x28] sm:$0xff pattern:$0x73625140]  ;;  %2951 = vmatpush.msrb.mxu0 %v1474_v2  ;;  %2970 = vmatpush.msrb.mxu1 %v1508_v3 }
 0x168   : > { %v5726_v23 = vld.sshfl [vmem:[#allocation1 + $0x38] sm:$0xff pattern:$0x73625140]  ;;  %v1472_v24 = vld [vmem:[%s4982_s11 + $0x24c0] sm:$0xff]  ;;  %2991 = vmatpush.msrb.mxu2 %v1538_v12  ;;  %3010 = vmatpush.msrb.mxu3 %v1572_v17 }
 0x169   : > { %v1506_v27 = vld [vmem:[%s4982_s11 + $0x25d0] sm:$0xff]  ;;  %2154 = vst [vmem:[#allocation1 + $0x20] ss:$4 sm:$0xff] %v293_v61  ;;  %v1536_v28 = vld [vmem:[%s4982_s11 + $0x26c0] sm:$0xff]  ;;  %2952 = vmatpush.msrb.mxu0 %v1472_v24 }
 0x16a   : > { %v1570_v30 = vld [vmem:[%s4982_s11 + $0x27d0] sm:$0xff]  ;;  %v1504_v37 = vld [vmem:[%s4982_s11 + $0x25c0] sm:$0xff]  ;;  %2971 = vmatpush.msrb.mxu1 %v1506_v27  ;;  %2992 = vmatpush.msrb.mxu2 %v1536_v28 }
 0x16b   : > { %v1470_v32 = vld [vmem:[%s4982_s11 + $0x24b0] sm:$0xff]  ;;  %v1568_v48 = vld [vmem:[%s4982_s11 + $0x27c0] sm:$0xff]  ;;  %3011 = vmatpush.msrb.mxu3 %v1570_v30 }
 0x16c   : > { %v1534_v40 = vld [vmem:[%s4982_s11 + $0x26b0] sm:$0xff]  ;;  %v1468_v49 = vld [vmem:[%s4982_s11 + $0x24a0] sm:$0xff]  ;;  %2953 = vmatpush.msrb.mxu0 %v1470_v32  ;;  %2972 = vmatpush.msrb.mxu1 %v1504_v37 }
 0x16d   : > { %v1502_v51 = vld [vmem:[%s4982_s11 + $0x25b0] sm:$0xff]  ;;  %v1532_v55 = vld [vmem:[%s4982_s11 + $0x26a0] sm:$0xff]  ;;  %2993 = vmatpush.msrb.mxu2 %v1534_v40  ;;  %3012 = vmatpush.msrb.mxu3 %v1568_v48 }
 0x16e   : > { %v1566_v56 = vld [vmem:[%s4982_s11 + $0x27b0] sm:$0xff]  ;;  %v1500_v59 = vld [vmem:[%s4982_s11 + $0x25a0] sm:$0xff]  ;;  %2954 = vmatpush.msrb.mxu0 %v1468_v49  ;;  %2973 = vmatpush.msrb.mxu1 %v1502_v51 }
 0x16f   : > { %v1466_v58 = vld [vmem:[%s4982_s11 + $0x2490] sm:$0xff]  ;;  %v1564_v62 = vld [vmem:[%s4982_s11 + $0x27a0] sm:$0xff]  ;;  %2994 = vmatpush.msrb.mxu2 %v1532_v55  ;;  %3013 = vmatpush.msrb.mxu3 %v1566_v56 }
 0x170   : > { %v1530_v61 = vld [vmem:[%s4982_s11 + $0x2690] sm:$0xff]  ;;  %v1464_v63 = vld [vmem:[%s4982_s11 + $0x2480] sm:$0xff]  ;;  %2955 = vmatpush.msrb.mxu0 %v1466_v58  ;;  %2974 = vmatpush.msrb.mxu1 %v1500_v59 }
 0x171   : > { %v1498_v0 = vld [vmem:[%s4982_s11 + $0x2590] sm:$0xff]  ;;  %v1528_v1 = vld [vmem:[%s4982_s11 + $0x2680] sm:$0xff]  ;;  %2995 = vmatpush.msrb.mxu2 %v1530_v61  ;;  %3014 = vmatpush.msrb.mxu3 %v1564_v62 }
 0x172   : > { %v1562_v2 = vld [vmem:[%s4982_s11 + $0x2790] sm:$0xff]  ;;  %v1496_v12 = vld [vmem:[%s4982_s11 + $0x2580] sm:$0xff]  ;;  %2956 = vmatpush.msrb.mxu0 %v1464_v63  ;;  %2975 = vmatpush.msrb.mxu1 %v1498_v0 }
 0x173   : > { %v1462_v3 = vld [vmem:[%s4982_s11 + $0x2470] sm:$0xff]  ;;  %v1560_v24 = vld [vmem:[%s4982_s11 + $0x2780] sm:$0xff]  ;;  %2996 = vmatpush.msrb.mxu2 %v1528_v1  ;;  %3015 = vmatpush.msrb.mxu3 %v1562_v2 }
 0x174   : > { %v1526_v17 = vld [vmem:[%s4982_s11 + $0x2670] sm:$0xff]  ;;  %v1460_v27 = vld [vmem:[%s4982_s11 + $0x2460] sm:$0xff]  ;;  %2957 = vmatpush.msrb.mxu0 %v1462_v3  ;;  %2976 = vmatpush.msrb.mxu1 %v1496_v12 }
 0x175   : > { %v1494_v28 = vld [vmem:[%s4982_s11 + $0x2570] sm:$0xff]  ;;  %v1524_v30 = vld [vmem:[%s4982_s11 + $0x2660] sm:$0xff]  ;;  %2997 = vmatpush.msrb.mxu2 %v1526_v17  ;;  %3016 = vmatpush.msrb.mxu3 %v1560_v24 }
 0x176   : > { %v1558_v32 = vld [vmem:[%s4982_s11 + $0x2770] sm:$0xff]  ;;  %v1492_v40 = vld [vmem:[%s4982_s11 + $0x2560] sm:$0xff]  ;;  %2958 = vmatpush.msrb.mxu0 %v1460_v27  ;;  %2977 = vmatpush.msrb.mxu1 %v1494_v28 }
 0x177   : > { %v1458_v37 = vld [vmem:[%s4982_s11 + $0x2450] sm:$0xff]  ;;  %v1556_v49 = vld [vmem:[%s4982_s11 + $0x2760] sm:$0xff]  ;;  %2998 = vmatpush.msrb.mxu2 %v1524_v30  ;;  %3017 = vmatpush.msrb.mxu3 %v1558_v32 }
 0x178   : > { %v1522_v48 = vld [vmem:[%s4982_s11 + $0x2650] sm:$0xff]  ;;  %v1456_v51 = vld [vmem:[%s4982_s11 + $0x2440] sm:$0xff]  ;;  %2959 = vmatpush.msrb.mxu0 %v1458_v37  ;;  %2978 = vmatpush.msrb.mxu1 %v1492_v40  ;;  %v2646_v62 = vpop.f32.mrf.mxu0 }
 0x179   : > { %v1490_v55 = vld [vmem:[%s4982_s11 + $0x2550] sm:$0xff]  ;;  %v1520_v56 = vld [vmem:[%s4982_s11 + $0x2640] sm:$0xff]  ;;  %2999 = vmatpush.msrb.mxu2 %v1522_v48  ;;  %3018 = vmatpush.msrb.mxu3 %v1556_v49  ;;  %v2647_v1 = vadd.f32 %v2646_v62, %v5705_v60 }
 0x17a   : > { %v1554_v58 = vld [vmem:[%s4982_s11 + $0x2750] sm:$0xff]  ;;  %v1488_v61 = vld [vmem:[%s4982_s11 + $0x2540] sm:$0xff]  ;;  %2960 = vmatpush.msrb.mxu0 %v1456_v51  ;;  %2979 = vmatpush.msrb.mxu1 %v1490_v55 }
 0x17b   : > { %v1454_v59 = vld [vmem:[%s4982_s11 + $0x2430] sm:$0xff]  ;;  %v1552_v0 = vld [vmem:[%s4982_s11 + $0x2740] sm:$0xff]  ;;  %3000 = vmatpush.msrb.mxu2 %v1520_v56  ;;  %3019 = vmatpush.msrb.mxu3 %v1554_v58  ;;  %v2666_v24 = vpop.f32.mrf.mxu1 }
 0x17c   : > { %v1518_v63 = vld [vmem:[%s4982_s11 + $0x2630] sm:$0xff]  ;;  %v1452_v2 = vld [vmem:[%s4982_s11 + $0x2420] sm:$0xff]  ;;  %2961 = vmatpush.msrb.mxu0 %v1454_v59  ;;  %2980 = vmatpush.msrb.mxu1 %v1488_v61  ;;  %v2667_v60 = vadd.f32 %v2666_v24, %v2647_v1 }
 0x17d   : > { %v1486_v3 = vld [vmem:[%s4982_s11 + $0x2530] sm:$0xff]  ;;  %v1516_v12 = vld [vmem:[%s4982_s11 + $0x2620] sm:$0xff]  ;;  %3001 = vmatpush.msrb.mxu2 %v1518_v63  ;;  %3020 = vmatpush.msrb.mxu3 %v1552_v0 }
 0x17e   : > { %v1550_v17 = vld [vmem:[%s4982_s11 + $0x2730] sm:$0xff]  ;;  %v1484_v28 = vld [vmem:[%s4982_s11 + $0x2520] sm:$0xff]  ;;  %2962 = vmatpush.msrb.mxu0 %v1452_v2  ;;  %2981 = vmatpush.msrb.mxu1 %v1486_v3  ;;  %v2686_v48 = vpop.f32.mrf.mxu2 }
 0x17f   : > { %v1450_v27 = vld [vmem:[%s4982_s11 + $0x2410] sm:$0xff]  ;;  %v1548_v32 = vld [vmem:[%s4982_s11 + $0x2720] sm:$0xff]  ;;  %3002 = vmatpush.msrb.mxu2 %v1516_v12  ;;  %3021 = vmatpush.msrb.mxu3 %v1550_v17  ;;  %v2687_v55 = vadd.f32 %v2686_v48, %v2667_v60 }
 0x180   : > { %v1514_v30 = vld [vmem:[%s4982_s11 + $0x2610] sm:$0xff]  ;;  %v1448_v37 = vld [vmem:[%s4982_s11 + $0x2400] sm:$0xff]  ;;  %2963 = vmatpush.msrb.mxu0 %v1450_v27  ;;  %2982 = vmatpush.msrb.mxu1 %v1484_v28 }
 0x181   : > { %v1482_v40 = vld [vmem:[%s4982_s11 + $0x2510] sm:$0xff]  ;;  %v1512_v49 = vld [vmem:[%s4982_s11 + $0x2600] sm:$0xff]  ;;  %3003 = vmatpush.msrb.mxu2 %v1514_v30  ;;  %3022 = vmatpush.msrb.mxu3 %v1548_v32  ;;  %v2706_v59 = vpop.f32.mrf.mxu3 }
 0x182   : > { %v1546_v51 = vld [vmem:[%s4982_s11 + $0x2710] sm:$0xff]  ;;  %2964 = vmatpush.msrb.mxu0 %v1448_v37  ;;  %2983 = vmatpush.msrb.mxu1 %v1482_v40  ;;  %v1480_v61 = vld [vmem:[%s4982_s11 + $0x2500] sm:$0xff]  ;;  %v5785_v63 = vadd.f32 %v2706_v59, %v2687_v55 }
 0x183   : > { %v1606_v56 = vld [vmem:[%s4982_s11 + $0x28f0] sm:$0xff]  ;;  %3004 = vmatpush.msrb.mxu2 %v1512_v49  ;;  %3023 = vmatpush.msrb.mxu3 %v1546_v51  ;;  %v1544_v62 = vld [vmem:[%s4982_s11 + $0x2700] sm:$0xff] }
 0x184   : > { %v1670_v58 = vld [vmem:[%s4982_s11 + $0x2af0] sm:$0xff]  ;;  %2965 = vmatmul.f32.vlgmr.msrb.gmra.mxu0 %v5720_v18  ;;  %3005 = vmatmul.f32.vlgmr.msrb.gmra.mxu2 %v5722_v21  ;;  %v1604_v1 = vld [vmem:[%s4982_s11 + $0x28e0] sm:$0xff] }
 0x185   : > { %v294_v0 = vld [vmem:[%s5090_s6 + $0x60] sm:$0xff]  ;;  %3029 = vmatpush.msra.mxu0 %v1606_v56  ;;  %3069 = vmatpush.msra.mxu2 %v1670_v58  ;;  %v1668_v3 = vld [vmem:[%s4982_s11 + $0x2ae0] sm:$0xff]  ;;  %v5806_v37 = vld.sshfl [vmem:[#allocation1 + $0x18] sm:$0xff pattern:$0x73625140] }
 0x186   : > { %v1638_v2 = vld [vmem:[%s4982_s11 + $0x29f0] sm:$0xff]  ;;  %2984 = vmatpush.msrb.mxu1 %v1480_v61  ;;  %3024 = vmatpush.msrb.mxu3 %v1544_v62  ;;  %v1636_v24 = vld [vmem:[%s4982_s11 + $0x29e0] sm:$0xff]  ;;  %7111 = vst [vmem:[#allocation7_spill] sm:$0xff] %v5806_v37 }
 0x187   : > { %v1702_v12 = vld [vmem:[%s4982_s11 + $0x2bf0] sm:$0xff]  ;;  %v1700_v28 = vld [vmem:[%s4982_s11 + $0x2be0] sm:$0xff]  ;;  %2985 = vmatmul.f32.vlgmr.msrb.gmra.mxu1 %v5724_v22  ;;  %3025 = vmatmul.f32.vlgmr.msrb.gmra.mxu3 %v5726_v23 }
 0x188   : > { %v1602_v17 = vld [vmem:[%s4982_s11 + $0x28d0] sm:$0xff]  ;;  %v5802_v30 = vld.sshfl [vmem:[#allocation1 + $0x10] sm:$0xff pattern:$0x73625140]  ;;  %3030 = vmatpush.msra.mxu0 %v1604_v1  ;;  %3049 = vmatpush.msra.mxu1 %v1638_v2 }
 0x189   : > { %v1666_v27 = vld [vmem:[%s4982_s11 + $0x2ad0] sm:$0xff]  ;;  %v5804_v32 = vld.sshfl [vmem:[#allocation1 + $0x8] sm:$0xff pattern:$0x73625140]  ;;  %3070 = vmatpush.msra.mxu2 %v1668_v3  ;;  %3089 = vmatpush.msra.mxu3 %v1702_v12 }
 0x18a   : > { %v5800_v60 = vld.sshfl [vmem:[#allocation1] sm:$0xff pattern:$0x73625140]  ;;  %v1600_v40 = vld [vmem:[%s4982_s11 + $0x28c0] sm:$0xff]  ;;  %3031 = vmatpush.msra.mxu0 %v1602_v17  ;;  %3050 = vmatpush.msra.mxu1 %v1636_v24 }
 0x18b   : > { %v1634_v48 = vld [vmem:[%s4982_s11 + $0x29d0] sm:$0xff]  ;;  %2163 = vst [vmem:[#allocation1] ss:$4 sm:$0xff] %v294_v0  ;;  %v1664_v49 = vld [vmem:[%s4982_s11 + $0x2ac0] sm:$0xff]  ;;  %3071 = vmatpush.msra.mxu2 %v1666_v27  ;;  %3090 = vmatpush.msra.mxu3 %v1700_v28 }
 0x18c   : > { %v1698_v51 = vld [vmem:[%s4982_s11 + $0x2bd0] sm:$0xff]  ;;  %v1632_v56 = vld [vmem:[%s4982_s11 + $0x29c0] sm:$0xff]  ;;  %3032 = vmatpush.msra.mxu0 %v1600_v40  ;;  %3051 = vmatpush.msra.mxu1 %v1634_v48 }
 0x18d   : > { %v1598_v55 = vld [vmem:[%s4982_s11 + $0x28b0] sm:$0xff]  ;;  %v1696_v59 = vld [vmem:[%s4982_s11 + $0x2bc0] sm:$0xff]  ;;  %3072 = vmatpush.msra.mxu2 %v1664_v49  ;;  %3091 = vmatpush.msra.mxu3 %v1698_v51 }
 0x18e   : > { %v1662_v58 = vld [vmem:[%s4982_s11 + $0x2ab0] sm:$0xff]  ;;  %v1596_v61 = vld [vmem:[%s4982_s11 + $0x28a0] sm:$0xff]  ;;  %3033 = vmatpush.msra.mxu0 %v1598_v55  ;;  %3052 = vmatpush.msra.mxu1 %v1632_v56 }
 0x18f   : > { %v1630_v62 = vld [vmem:[%s4982_s11 + $0x29b0] sm:$0xff]  ;;  %v1660_v0 = vld [vmem:[%s4982_s11 + $0x2aa0] sm:$0xff]  ;;  %3073 = vmatpush.msra.mxu2 %v1662_v58  ;;  %3092 = vmatpush.msra.mxu3 %v1696_v59 }
 0x190   : > { %v1694_v1 = vld [vmem:[%s4982_s11 + $0x2bb0] sm:$0xff]  ;;  %v1628_v3 = vld [vmem:[%s4982_s11 + $0x29a0] sm:$0xff]  ;;  %3034 = vmatpush.msra.mxu0 %v1596_v61  ;;  %3053 = vmatpush.msra.mxu1 %v1630_v62 }
 0x191   : > { %v1594_v2 = vld [vmem:[%s4982_s11 + $0x2890] sm:$0xff]  ;;  %v1692_v17 = vld [vmem:[%s4982_s11 + $0x2ba0] sm:$0xff]  ;;  %3074 = vmatpush.msra.mxu2 %v1660_v0  ;;  %3093 = vmatpush.msra.mxu3 %v1694_v1 }
 0x192   : > { %v1658_v12 = vld [vmem:[%s4982_s11 + $0x2a90] sm:$0xff]  ;;  %v1592_v24 = vld [vmem:[%s4982_s11 + $0x2880] sm:$0xff]  ;;  %3035 = vmatpush.msra.mxu0 %v1594_v2  ;;  %3054 = vmatpush.msra.mxu1 %v1628_v3 }
 0x193   : > { %v1626_v27 = vld [vmem:[%s4982_s11 + $0x2990] sm:$0xff]  ;;  %v1656_v28 = vld [vmem:[%s4982_s11 + $0x2a80] sm:$0xff]  ;;  %3075 = vmatpush.msra.mxu2 %v1658_v12  ;;  %3094 = vmatpush.msra.mxu3 %v1692_v17 }
 0x194   : > { %v1690_v40 = vld [vmem:[%s4982_s11 + $0x2b90] sm:$0xff]  ;;  %v1624_v49 = vld [vmem:[%s4982_s11 + $0x2980] sm:$0xff]  ;;  %3036 = vmatpush.msra.mxu0 %v1592_v24  ;;  %3055 = vmatpush.msra.mxu1 %v1626_v27 }
 0x195   : > { %v1590_v48 = vld [vmem:[%s4982_s11 + $0x2870] sm:$0xff]  ;;  %v1688_v55 = vld [vmem:[%s4982_s11 + $0x2b80] sm:$0xff]  ;;  %3076 = vmatpush.msra.mxu2 %v1656_v28  ;;  %3095 = vmatpush.msra.mxu3 %v1690_v40 }
 0x196   : > { %v1654_v51 = vld [vmem:[%s4982_s11 + $0x2a70] sm:$0xff]  ;;  %v1588_v56 = vld [vmem:[%s4982_s11 + $0x2860] sm:$0xff]  ;;  %3037 = vmatpush.msra.mxu0 %v1590_v48  ;;  %3056 = vmatpush.msra.mxu1 %v1624_v49 }
 0x197   : > { %v1622_v58 = vld [vmem:[%s4982_s11 + $0x2970] sm:$0xff]  ;;  %v1652_v59 = vld [vmem:[%s4982_s11 + $0x2a60] sm:$0xff]  ;;  %3077 = vmatpush.msra.mxu2 %v1654_v51  ;;  %3096 = vmatpush.msra.mxu3 %v1688_v55 }
 0x198   : > { %v1686_v61 = vld [vmem:[%s4982_s11 + $0x2b70] sm:$0xff]  ;;  %v1620_v0 = vld [vmem:[%s4982_s11 + $0x2960] sm:$0xff]  ;;  %3038 = vmatpush.msra.mxu0 %v1588_v56  ;;  %3057 = vmatpush.msra.mxu1 %v1622_v58 }
 0x199   : > { %v1586_v62 = vld [vmem:[%s4982_s11 + $0x2850] sm:$0xff]  ;;  %v1684_v2 = vld [vmem:[%s4982_s11 + $0x2b60] sm:$0xff]  ;;  %3078 = vmatpush.msra.mxu2 %v1652_v59  ;;  %3097 = vmatpush.msra.mxu3 %v1686_v61 }
 0x19a   : > { %v1650_v1 = vld [vmem:[%s4982_s11 + $0x2a50] sm:$0xff]  ;;  %v1584_v3 = vld [vmem:[%s4982_s11 + $0x2840] sm:$0xff]  ;;  %3039 = vmatpush.msra.mxu0 %v1586_v62  ;;  %3058 = vmatpush.msra.mxu1 %v1620_v0  ;;  %v2726_v40 = vpop.f32.mrf.mxu0 }
 0x19b   : > { %v1618_v12 = vld [vmem:[%s4982_s11 + $0x2950] sm:$0xff]  ;;  %v1648_v17 = vld [vmem:[%s4982_s11 + $0x2a40] sm:$0xff]  ;;  %3079 = vmatpush.msra.mxu2 %v1650_v1  ;;  %3098 = vmatpush.msra.mxu3 %v1684_v2  ;;  %v2727_v51 = vadd.f32 %v2726_v40, %v5785_v63 }
 0x19c   : > { %v1682_v24 = vld [vmem:[%s4982_s11 + $0x2b50] sm:$0xff]  ;;  %v1616_v28 = vld [vmem:[%s4982_s11 + $0x2940] sm:$0xff]  ;;  %3040 = vmatpush.msra.mxu0 %v1584_v3  ;;  %3059 = vmatpush.msra.mxu1 %v1618_v12 }
 0x19d   : > { %v1582_v27 = vld [vmem:[%s4982_s11 + $0x2830] sm:$0xff]  ;;  %v1680_v49 = vld [vmem:[%s4982_s11 + $0x2b40] sm:$0xff]  ;;  %3080 = vmatpush.msra.mxu2 %v1648_v17  ;;  %3099 = vmatpush.msra.mxu3 %v1682_v24  ;;  %v2746_v61 = vpop.f32.mrf.mxu1 }
 0x19e   : > { %v1646_v48 = vld [vmem:[%s4982_s11 + $0x2a30] sm:$0xff]  ;;  %v1580_v55 = vld [vmem:[%s4982_s11 + $0x2820] sm:$0xff]  ;;  %3041 = vmatpush.msra.mxu0 %v1582_v27  ;;  %3060 = vmatpush.msra.mxu1 %v1616_v28  ;;  %v2747_v63 = vadd.f32 %v2746_v61, %v2727_v51 }
 0x19f   : > { %v1614_v56 = vld [vmem:[%s4982_s11 + $0x2930] sm:$0xff]  ;;  %v1644_v58 = vld [vmem:[%s4982_s11 + $0x2a20] sm:$0xff]  ;;  %3081 = vmatpush.msra.mxu2 %v1646_v48  ;;  %3100 = vmatpush.msra.mxu3 %v1680_v49 }
 0x1a0   : > { %v1678_v59 = vld [vmem:[%s4982_s11 + $0x2b30] sm:$0xff]  ;;  %v1612_v0 = vld [vmem:[%s4982_s11 + $0x2920] sm:$0xff]  ;;  %3042 = vmatpush.msra.mxu0 %v1580_v55  ;;  %3061 = vmatpush.msra.mxu1 %v1614_v56  ;;  %v2766_v17 = vpop.f32.mrf.mxu2 }
 0x1a1   : > { %v1578_v62 = vld [vmem:[%s4982_s11 + $0x2810] sm:$0xff]  ;;  %v1676_v2 = vld [vmem:[%s4982_s11 + $0x2b20] sm:$0xff]  ;;  %3082 = vmatpush.msra.mxu2 %v1644_v58  ;;  %3101 = vmatpush.msra.mxu3 %v1678_v59  ;;  %v2767_v28 = vadd.f32 %v2766_v17, %v2747_v63 }
 0x1a2   : > { %v1642_v1 = vld [vmem:[%s4982_s11 + $0x2a10] sm:$0xff]  ;;  %v1576_v3 = vld [vmem:[%s4982_s11 + $0x2800] sm:$0xff]  ;;  %3043 = vmatpush.msra.mxu0 %v1578_v62  ;;  %3062 = vmatpush.msra.mxu1 %v1612_v0 }
 0x1a3   : > { %v1610_v12 = vld [vmem:[%s4982_s11 + $0x2910] sm:$0xff]  ;;  %v1640_v24 = vld [vmem:[%s4982_s11 + $0x2a00] sm:$0xff]  ;;  %3083 = vmatpush.msra.mxu2 %v1642_v1  ;;  %3102 = vmatpush.msra.mxu3 %v1676_v2  ;;  %v2786_v49 = vpop.f32.mrf.mxu3 }
 0x1a4   : > { %v1674_v27 = vld [vmem:[%s4982_s11 + $0x2b10] sm:$0xff]  ;;  %3044 = vmatpush.msra.mxu0 %v1576_v3  ;;  %3063 = vmatpush.msra.mxu1 %v1610_v12  ;;  %v1608_v51 = vld [vmem:[%s4982_s11 + $0x2900] sm:$0xff]  ;;  %v5865_v56 = vadd.f32 %v2786_v49, %v2767_v28 }
 0x1a5   : > { %v1734_v40 = vld [vmem:[%s4982_s11 + $0x2cf0] sm:$0xff]  ;;  %3084 = vmatpush.msra.mxu2 %v1640_v24  ;;  %3103 = vmatpush.msra.mxu3 %v1674_v27  ;;  %v1672_v55 = vld [vmem:[%s4982_s11 + $0x2b00] sm:$0xff] }
 0x1a6   : > { %v1798_v48 = vld [vmem:[%s4982_s11 + $0x2ef0] sm:$0xff]  ;;  %v295_v58 = vld [vmem:[%s5090_s6 + $0x68] sm:$0xff]  ;;  %3045 = vmatmul.f32.vlgmr.msra.gmra.mxu0 %v5800_v60  ;;  %3085 = vmatmul.f32.vlgmr.msra.gmra.mxu2 %v5802_v30  ;;  %v5882_v17 = vld.sshfl [vmem:[#allocation1 + $0x30] sm:$0xff pattern:$0x73625140] }
 0x1a7   : > { %v1732_v59 = vld [vmem:[%s4982_s11 + $0x2ce0] sm:$0xff]  ;;  %v1766_v61 = vld [vmem:[%s4982_s11 + $0x2df0] sm:$0xff]  ;;  %3109 = vmatpush.msrb.mxu0 %v1734_v40  ;;  %3149 = vmatpush.msrb.mxu2 %v1798_v48 }
 0x1a8   : > { %v1796_v62 = vld [vmem:[%s4982_s11 + $0x2ee0] sm:$0xff]  ;;  %v1830_v0 = vld [vmem:[%s4982_s11 + $0x2ff0] sm:$0xff]  ;;  %3064 = vmatpush.msra.mxu1 %v1608_v51  ;;  %3104 = vmatpush.msra.mxu3 %v1672_v55 }
 0x1a9   : > { %v1730_v63 = vld [vmem:[%s4982_s11 + $0x2cd0] sm:$0xff]  ;;  %v1764_v1 = vld [vmem:[%s4982_s11 + $0x2de0] sm:$0xff]  ;;  %3065 = vmatmul.f32.vlgmr.msra.gmra.mxu1 %v5804_v32  ;;  %3105 = vmatmul.f32.vlgmr.msra.gmra.mxu3 %v5806_v37 }
 0x1aa   : > { %v1794_v2 = vld [vmem:[%s4982_s11 + $0x2ed0] sm:$0xff]  ;;  %v1828_v3 = vld [vmem:[%s4982_s11 + $0x2fe0] sm:$0xff]  ;;  %3110 = vmatpush.msrb.mxu0 %v1732_v59  ;;  %3129 = vmatpush.msrb.mxu1 %v1766_v61 }
 0x1ab   : > { %v5880_v12 = vld.sshfl [vmem:[#allocation1 + $0x20] sm:$0xff pattern:$0x73625140]  ;;  %v5884_v24 = vld.sshfl [vmem:[#allocation1 + $0x28] sm:$0xff pattern:$0x73625140]  ;;  %3150 = vmatpush.msrb.mxu2 %v1796_v62  ;;  %3169 = vmatpush.msrb.mxu3 %v1830_v0 }
 0x1ac   : > { %v5886_v27 = vld.sshfl [vmem:[#allocation1 + $0x38] sm:$0xff pattern:$0x73625140]  ;;  %v1728_v28 = vld [vmem:[%s4982_s11 + $0x2cc0] sm:$0xff]  ;;  %3111 = vmatpush.msrb.mxu0 %v1730_v63  ;;  %3130 = vmatpush.msrb.mxu1 %v1764_v1 }
 0x1ad   : > { %v1762_v40 = vld [vmem:[%s4982_s11 + $0x2dd0] sm:$0xff]  ;;  %2164 = vst [vmem:[#allocation1 + $0x20] ss:$4 sm:$0xff] %v295_v58  ;;  %v1792_v48 = vld [vmem:[%s4982_s11 + $0x2ec0] sm:$0xff]  ;;  %3151 = vmatpush.msrb.mxu2 %v1794_v2  ;;  %3170 = vmatpush.msrb.mxu3 %v1828_v3 }
 0x1ae   : > { %v1826_v49 = vld [vmem:[%s4982_s11 + $0x2fd0] sm:$0xff]  ;;  %v1760_v55 = vld [vmem:[%s4982_s11 + $0x2dc0] sm:$0xff]  ;;  %3112 = vmatpush.msrb.mxu0 %v1728_v28  ;;  %3131 = vmatpush.msrb.mxu1 %v1762_v40 }
 0x1af   : > { %v1726_v51 = vld [vmem:[%s4982_s11 + $0x2cb0] sm:$0xff]  ;;  %v1824_v61 = vld [vmem:[%s4982_s11 + $0x2fc0] sm:$0xff]  ;;  %3152 = vmatpush.msrb.mxu2 %v1792_v48  ;;  %3171 = vmatpush.msrb.mxu3 %v1826_v49 }
 0x1b0   : > { %v1790_v59 = vld [vmem:[%s4982_s11 + $0x2eb0] sm:$0xff]  ;;  %v1724_v58 = vld [vmem:[%s4982_s11 + $0x2ca0] sm:$0xff]  ;;  %3113 = vmatpush.msrb.mxu0 %v1726_v51  ;;  %3132 = vmatpush.msrb.mxu1 %v1760_v55 }
 0x1b1   : > { %v1758_v62 = vld [vmem:[%s4982_s11 + $0x2db0] sm:$0xff]  ;;  %v1788_v0 = vld [vmem:[%s4982_s11 + $0x2ea0] sm:$0xff]  ;;  %3153 = vmatpush.msrb.mxu2 %v1790_v59  ;;  %3172 = vmatpush.msrb.mxu3 %v1824_v61 }
 0x1b2   : > { %v1822_v63 = vld [vmem:[%s4982_s11 + $0x2fb0] sm:$0xff]  ;;  %v1756_v2 = vld [vmem:[%s4982_s11 + $0x2da0] sm:$0xff]  ;;  %3114 = vmatpush.msrb.mxu0 %v1724_v58  ;;  %3133 = vmatpush.msrb.mxu1 %v1758_v62 }
 0x1b3   : > { %v1722_v1 = vld [vmem:[%s4982_s11 + $0x2c90] sm:$0xff]  ;;  %v1820_v28 = vld [vmem:[%s4982_s11 + $0x2fa0] sm:$0xff]  ;;  %3154 = vmatpush.msrb.mxu2 %v1788_v0  ;;  %3173 = vmatpush.msrb.mxu3 %v1822_v63 }
 0x1b4   : > { %v1786_v3 = vld [vmem:[%s4982_s11 + $0x2e90] sm:$0xff]  ;;  %v1720_v40 = vld [vmem:[%s4982_s11 + $0x2c80] sm:$0xff]  ;;  %3115 = vmatpush.msrb.mxu0 %v1722_v1  ;;  %3134 = vmatpush.msrb.mxu1 %v1756_v2 }
 0x1b5   : > { %v1754_v48 = vld [vmem:[%s4982_s11 + $0x2d90] sm:$0xff]  ;;  %v1784_v49 = vld [vmem:[%s4982_s11 + $0x2e80] sm:$0xff]  ;;  %3155 = vmatpush.msrb.mxu2 %v1786_v3  ;;  %3174 = vmatpush.msrb.mxu3 %v1820_v28 }
 0x1b6   : > { %v1818_v51 = vld [vmem:[%s4982_s11 + $0x2f90] sm:$0xff]  ;;  %v1752_v59 = vld [vmem:[%s4982_s11 + $0x2d80] sm:$0xff]  ;;  %3116 = vmatpush.msrb.mxu0 %v1720_v40  ;;  %3135 = vmatpush.msrb.mxu1 %v1754_v48 }
 0x1b7   : > { %v1718_v55 = vld [vmem:[%s4982_s11 + $0x2c70] sm:$0xff]  ;;  %v1816_v58 = vld [vmem:[%s4982_s11 + $0x2f80] sm:$0xff]  ;;  %3156 = vmatpush.msrb.mxu2 %v1784_v49  ;;  %3175 = vmatpush.msrb.mxu3 %v1818_v51 }
 0x1b8   : > { %v1782_v61 = vld [vmem:[%s4982_s11 + $0x2e70] sm:$0xff]  ;;  %v1716_v62 = vld [vmem:[%s4982_s11 + $0x2c60] sm:$0xff]  ;;  %3117 = vmatpush.msrb.mxu0 %v1718_v55  ;;  %3136 = vmatpush.msrb.mxu1 %v1752_v59 }
 0x1b9   : > { %v1750_v0 = vld [vmem:[%s4982_s11 + $0x2d70] sm:$0xff]  ;;  %v1780_v63 = vld [vmem:[%s4982_s11 + $0x2e60] sm:$0xff]  ;;  %3157 = vmatpush.msrb.mxu2 %v1782_v61  ;;  %3176 = vmatpush.msrb.mxu3 %v1816_v58 }
 0x1ba   : > { %v1814_v1 = vld [vmem:[%s4982_s11 + $0x2f70] sm:$0xff]  ;;  %v1748_v3 = vld [vmem:[%s4982_s11 + $0x2d60] sm:$0xff]  ;;  %3118 = vmatpush.msrb.mxu0 %v1716_v62  ;;  %3137 = vmatpush.msrb.mxu1 %v1750_v0 }
 0x1bb   : > { %v1714_v2 = vld [vmem:[%s4982_s11 + $0x2c50] sm:$0xff]  ;;  %v1812_v40 = vld [vmem:[%s4982_s11 + $0x2f60] sm:$0xff]  ;;  %3158 = vmatpush.msrb.mxu2 %v1780_v63  ;;  %3177 = vmatpush.msrb.mxu3 %v1814_v1 }
 0x1bc   : > { %v1778_v28 = vld [vmem:[%s4982_s11 + $0x2e50] sm:$0xff]  ;;  %v1712_v48 = vld [vmem:[%s4982_s11 + $0x2c40] sm:$0xff]  ;;  %3119 = vmatpush.msrb.mxu0 %v1714_v2  ;;  %3138 = vmatpush.msrb.mxu1 %v1748_v3  ;;  %v2806_v58 = vpop.f32.mrf.mxu0 }
 0x1bd   : > { %v1746_v49 = vld [vmem:[%s4982_s11 + $0x2d50] sm:$0xff]  ;;  %v1776_v51 = vld [vmem:[%s4982_s11 + $0x2e40] sm:$0xff]  ;;  %3159 = vmatpush.msrb.mxu2 %v1778_v28  ;;  %3178 = vmatpush.msrb.mxu3 %v1812_v40  ;;  %v2807_v63 = vadd.f32 %v2806_v58, %v5865_v56 }
 0x1be   : > { %v1810_v55 = vld [vmem:[%s4982_s11 + $0x2f50] sm:$0xff]  ;;  %v1744_v61 = vld [vmem:[%s4982_s11 + $0x2d40] sm:$0xff]  ;;  %3120 = vmatpush.msrb.mxu0 %v1712_v48  ;;  %3139 = vmatpush.msrb.mxu1 %v1746_v49 }
 0x1bf   : > { %v1710_v59 = vld [vmem:[%s4982_s11 + $0x2c30] sm:$0xff]  ;;  %v1808_v0 = vld [vmem:[%s4982_s11 + $0x2f40] sm:$0xff]  ;;  %3160 = vmatpush.msrb.mxu2 %v1776_v51  ;;  %3179 = vmatpush.msrb.mxu3 %v1810_v55  ;;  %v2826_v40 = vpop.f32.mrf.mxu1 }
 0x1c0   : > { %v1774_v62 = vld [vmem:[%s4982_s11 + $0x2e30] sm:$0xff]  ;;  %v1708_v1 = vld [vmem:[%s4982_s11 + $0x2c20] sm:$0xff]  ;;  %3121 = vmatpush.msrb.mxu0 %v1710_v59  ;;  %3140 = vmatpush.msrb.mxu1 %v1744_v61  ;;  %v2827_v56 = vadd.f32 %v2826_v40, %v2807_v63 }
 0x1c1   : > { %v1742_v2 = vld [vmem:[%s4982_s11 + $0x2d30] sm:$0xff]  ;;  %v1772_v3 = vld [vmem:[%s4982_s11 + $0x2e20] sm:$0xff]  ;;  %3161 = vmatpush.msrb.mxu2 %v1774_v62  ;;  %3180 = vmatpush.msrb.mxu3 %v1808_v0 }
 0x1c2   : > { %v1806_v28 = vld [vmem:[%s4982_s11 + $0x2f30] sm:$0xff]  ;;  %v1740_v49 = vld [vmem:[%s4982_s11 + $0x2d20] sm:$0xff]  ;;  %3122 = vmatpush.msrb.mxu0 %v1708_v1  ;;  %3141 = vmatpush.msrb.mxu1 %v1742_v2  ;;  %v2846_v58 = vpop.f32.mrf.mxu2 }
 0x1c3   : > { %v1706_v48 = vld [vmem:[%s4982_s11 + $0x2c10] sm:$0xff]  ;;  %v1804_v55 = vld [vmem:[%s4982_s11 + $0x2f20] sm:$0xff]  ;;  %3162 = vmatpush.msrb.mxu2 %v1772_v3  ;;  %3181 = vmatpush.msrb.mxu3 %v1806_v28  ;;  %v2847_v37 = vadd.f32 %v2846_v58, %v2827_v56 }
 0x1c4   : > { %v1770_v51 = vld [vmem:[%s4982_s11 + $0x2e10] sm:$0xff]  ;;  %v1704_v59 = vld [vmem:[%s4982_s11 + $0x2c00] sm:$0xff]  ;;  %3123 = vmatpush.msrb.mxu0 %v1706_v48  ;;  %3142 = vmatpush.msrb.mxu1 %v1740_v49 }
 0x1c5   : > { %v1738_v61 = vld [vmem:[%s4982_s11 + $0x2d10] sm:$0xff]  ;;  %v1768_v62 = vld [vmem:[%s4982_s11 + $0x2e00] sm:$0xff]  ;;  %3163 = vmatpush.msrb.mxu2 %v1770_v51  ;;  %3182 = vmatpush.msrb.mxu3 %v1804_v55  ;;  %v2866_v2 = vpop.f32.mrf.mxu3 }
 0x1c6   : > { %v1802_v0 = vld [vmem:[%s4982_s11 + $0x2f10] sm:$0xff]  ;;  %3124 = vmatpush.msrb.mxu0 %v1704_v59  ;;  %3143 = vmatpush.msrb.mxu1 %v1738_v61  ;;  %v1736_v3 = vld [vmem:[%s4982_s11 + $0x2d00] sm:$0xff]  ;;  %v5945_v40 = vadd.f32 %v2866_v2, %v2847_v37 }
 0x1c7   : > { %v1862_v63 = vld [vmem:[%s4982_s11 + $0x30f0] sm:$0xff]  ;;  %3164 = vmatpush.msrb.mxu2 %v1768_v62  ;;  %3183 = vmatpush.msrb.mxu3 %v1802_v0  ;;  %v1800_v28 = vld [vmem:[%s4982_s11 + $0x2f00] sm:$0xff] }
 0x1c8   : > { %v1926_v1 = vld [vmem:[%s4982_s11 + $0x32f0] sm:$0xff]  ;;  %3125 = vmatmul.f32.vlgmr.msrb.gmra.mxu0 %v5880_v12  ;;  %3165 = vmatmul.f32.vlgmr.msrb.gmra.mxu2 %v5882_v17  ;;  %v1860_v48 = vld [vmem:[%s4982_s11 + $0x30e0] sm:$0xff] }
 0x1c9   : > { %3189 = vmatpush.msra.mxu0 %v1862_v63  ;;  %3229 = vmatpush.msra.mxu2 %v1926_v1  ;;  %v1894_v49 = vld [vmem:[%s4982_s11 + $0x31f0] sm:$0xff]  ;;  %v1924_v56 = vld [vmem:[%s4982_s11 + $0x32e0] sm:$0xff] }
 0x1ca   : > { %3144 = vmatpush.msrb.mxu1 %v1736_v3  ;;  %3184 = vmatpush.msrb.mxu3 %v1800_v28  ;;  %v1958_v51 = vld [vmem:[%s4982_s11 + $0x33f0] sm:$0xff]  ;;  %v1892_v55 = vld [vmem:[%s4982_s11 + $0x31e0] sm:$0xff] }
 0x1cb   : > { %3145 = vmatmul.f32.vlgmr.msrb.gmra.mxu1 %v5884_v24  ;;  %3185 = vmatmul.f32.vlgmr.msrb.gmra.mxu3 %v5886_v27  ;;  %v1858_v37 = vld [vmem:[%s4982_s11 + $0x30d0] sm:$0xff]  ;;  %v1956_v61 = vld [vmem:[%s4982_s11 + $0x33e0] sm:$0xff] }
 0x1cc   : > { %3190 = vmatpush.msra.mxu0 %v1860_v48  ;;  %3209 = vmatpush.msra.mxu1 %v1894_v49  ;;  %v1922_v59 = vld [vmem:[%s4982_s11 + $0x32d0] sm:$0xff]  ;;  %v1856_v58 = vld [vmem:[%s4982_s11 + $0x30c0] sm:$0xff] }
 0x1cd   : > { %3230 = vmatpush.msra.mxu2 %v1924_v56  ;;  %3249 = vmatpush.msra.mxu3 %v1958_v51  ;;  %v1890_v62 = vld [vmem:[%s4982_s11 + $0x31d0] sm:$0xff]  ;;  %v1920_v0 = vld [vmem:[%s4982_s11 + $0x32c0] sm:$0xff] }
 0x1ce   : > { %3191 = vmatpush.msra.mxu0 %v1858_v37  ;;  %3210 = vmatpush.msra.mxu1 %v1892_v55  ;;  %v1954_v63 = vld [vmem:[%s4982_s11 + $0x33d0] sm:$0xff]  ;;  %v1888_v2 = vld [vmem:[%s4982_s11 + $0x31c0] sm:$0xff] }
 0x1cf   : > { %3231 = vmatpush.msra.mxu2 %v1922_v59  ;;  %3250 = vmatpush.msra.mxu3 %v1956_v61  ;;  %v1854_v1 = vld [vmem:[%s4982_s11 + $0x30b0] sm:$0xff]  ;;  %v1952_v28 = vld [vmem:[%s4982_s11 + $0x33c0] sm:$0xff] }
 0x1d0   : > { %3192 = vmatpush.msra.mxu0 %v1856_v58  ;;  %3211 = vmatpush.msra.mxu1 %v1890_v62  ;;  %v1918_v3 = vld [vmem:[%s4982_s11 + $0x32b0] sm:$0xff]  ;;  %v1852_v48 = vld [vmem:[%s4982_s11 + $0x30a0] sm:$0xff] }
 0x1d1   : > { %3232 = vmatpush.msra.mxu2 %v1920_v0  ;;  %3251 = vmatpush.msra.mxu3 %v1954_v63  ;;  %v1886_v49 = vld [vmem:[%s4982_s11 + $0x31b0] sm:$0xff]  ;;  %v1916_v56 = vld [vmem:[%s4982_s11 + $0x32a0] sm:$0xff] }
 0x1d2   : > { %3193 = vmatpush.msra.mxu0 %v1854_v1  ;;  %3212 = vmatpush.msra.mxu1 %v1888_v2  ;;  %v1950_v51 = vld [vmem:[%s4982_s11 + $0x33b0] sm:$0xff]  ;;  %v1884_v55 = vld [vmem:[%s4982_s11 + $0x31a0] sm:$0xff] }
 0x1d3   : > { %3233 = vmatpush.msra.mxu2 %v1918_v3  ;;  %3252 = vmatpush.msra.mxu3 %v1952_v28  ;;  %v1850_v37 = vld [vmem:[%s4982_s11 + $0x3090] sm:$0xff]  ;;  %v1948_v61 = vld [vmem:[%s4982_s11 + $0x33a0] sm:$0xff] }
 0x1d4   : > { %3194 = vmatpush.msra.mxu0 %v1852_v48  ;;  %3213 = vmatpush.msra.mxu1 %v1886_v49  ;;  %v1914_v59 = vld [vmem:[%s4982_s11 + $0x3290] sm:$0xff]  ;;  %v1848_v58 = vld [vmem:[%s4982_s11 + $0x3080] sm:$0xff] }
 0x1d5   : > { %3234 = vmatpush.msra.mxu2 %v1916_v56  ;;  %3253 = vmatpush.msra.mxu3 %v1950_v51  ;;  %v1882_v62 = vld [vmem:[%s4982_s11 + $0x3190] sm:$0xff]  ;;  %v1912_v0 = vld [vmem:[%s4982_s11 + $0x3280] sm:$0xff] }
 0x1d6   : > { %3195 = vmatpush.msra.mxu0 %v1850_v37  ;;  %3214 = vmatpush.msra.mxu1 %v1884_v55  ;;  %v1946_v63 = vld [vmem:[%s4982_s11 + $0x3390] sm:$0xff]  ;;  %v1880_v2 = vld [vmem:[%s4982_s11 + $0x3180] sm:$0xff] }
 0x1d7   : > { %3235 = vmatpush.msra.mxu2 %v1914_v59  ;;  %3254 = vmatpush.msra.mxu3 %v1948_v61  ;;  %v1846_v1 = vld [vmem:[%s4982_s11 + $0x3070] sm:$0xff]  ;;  %v1944_v28 = vld [vmem:[%s4982_s11 + $0x3380] sm:$0xff] }
 0x1d8   : > { %3196 = vmatpush.msra.mxu0 %v1848_v58  ;;  %3215 = vmatpush.msra.mxu1 %v1882_v62  ;;  %v1910_v3 = vld [vmem:[%s4982_s11 + $0x3270] sm:$0xff]  ;;  %v1844_v48 = vld [vmem:[%s4982_s11 + $0x3060] sm:$0xff] }
 0x1d9   : > { %3236 = vmatpush.msra.mxu2 %v1912_v0  ;;  %3255 = vmatpush.msra.mxu3 %v1946_v63  ;;  %v1878_v49 = vld [vmem:[%s4982_s11 + $0x3170] sm:$0xff]  ;;  %v1908_v56 = vld [vmem:[%s4982_s11 + $0x3260] sm:$0xff] }
 0x1da   : > { %3197 = vmatpush.msra.mxu0 %v1846_v1  ;;  %3216 = vmatpush.msra.mxu1 %v1880_v2  ;;  %v1942_v51 = vld [vmem:[%s4982_s11 + $0x3370] sm:$0xff]  ;;  %v1876_v55 = vld [vmem:[%s4982_s11 + $0x3160] sm:$0xff] }
 0x1db   : > { %3237 = vmatpush.msra.mxu2 %v1910_v3  ;;  %3256 = vmatpush.msra.mxu3 %v1944_v28  ;;  %v1842_v37 = vld [vmem:[%s4982_s11 + $0x3050] sm:$0xff]  ;;  %v1940_v61 = vld [vmem:[%s4982_s11 + $0x3360] sm:$0xff] }
 0x1dc   : > { %3198 = vmatpush.msra.mxu0 %v1844_v48  ;;  %3217 = vmatpush.msra.mxu1 %v1878_v49  ;;  %v1906_v59 = vld [vmem:[%s4982_s11 + $0x3250] sm:$0xff]  ;;  %v1840_v58 = vld [vmem:[%s4982_s11 + $0x3040] sm:$0xff] }
 0x1dd   : > { %3238 = vmatpush.msra.mxu2 %v1908_v56  ;;  %3257 = vmatpush.msra.mxu3 %v1942_v51  ;;  %v1874_v62 = vld [vmem:[%s4982_s11 + $0x3150] sm:$0xff]  ;;  %v1904_v0 = vld [vmem:[%s4982_s11 + $0x3240] sm:$0xff] }
 0x1de   : > { %3199 = vmatpush.msra.mxu0 %v1842_v37  ;;  %3218 = vmatpush.msra.mxu1 %v1876_v55  ;;  %v1938_v63 = vld [vmem:[%s4982_s11 + $0x3350] sm:$0xff]  ;;  %v1872_v2 = vld [vmem:[%s4982_s11 + $0x3140] sm:$0xff]  ;;  %v2886_v3 = vpop.f32.mrf.mxu0 }
 0x1df   : > { %3239 = vmatpush.msra.mxu2 %v1906_v59  ;;  %3258 = vmatpush.msra.mxu3 %v1940_v61  ;;  %v1838_v1 = vld [vmem:[%s4982_s11 + $0x3030] sm:$0xff]  ;;  %v1936_v48 = vld [vmem:[%s4982_s11 + $0x3340] sm:$0xff]  ;;  %v2887_v49 = vadd.f32 %v2886_v3, %v5945_v40 }
 0x1e0   : > { %3200 = vmatpush.msra.mxu0 %v1840_v58  ;;  %3219 = vmatpush.msra.mxu1 %v1874_v62  ;;  %v1902_v28 = vld [vmem:[%s4982_s11 + $0x3230] sm:$0xff]  ;;  %v1836_v56 = vld [vmem:[%s4982_s11 + $0x3020] sm:$0xff] }
 0x1e1   : > { %3240 = vmatpush.msra.mxu2 %v1904_v0  ;;  %3259 = vmatpush.msra.mxu3 %v1938_v63  ;;  %v1870_v51 = vld [vmem:[%s4982_s11 + $0x3130] sm:$0xff]  ;;  %v1900_v37 = vld [vmem:[%s4982_s11 + $0x3220] sm:$0xff]  ;;  %v2906_v59 = vpop.f32.mrf.mxu1 }
 0x1e2   : > { %3201 = vmatpush.msra.mxu0 %v1838_v1  ;;  %3220 = vmatpush.msra.mxu1 %v1872_v2  ;;  %v1934_v55 = vld [vmem:[%s4982_s11 + $0x3330] sm:$0xff]  ;;  %v1868_v58 = vld [vmem:[%s4982_s11 + $0x3120] sm:$0xff]  ;;  %v2907_v40 = vadd.f32 %v2906_v59, %v2887_v49 }
 0x1e3   : > { %3241 = vmatpush.msra.mxu2 %v1902_v28  ;;  %3260 = vmatpush.msra.mxu3 %v1936_v48  ;;  %v1834_v61 = vld [vmem:[%s4982_s11 + $0x3010] sm:$0xff]  ;;  %v1932_v0 = vld [vmem:[%s4982_s11 + $0x3320] sm:$0xff] }
 0x1e4   : > { %3202 = vmatpush.msra.mxu0 %v1836_v56  ;;  %3221 = vmatpush.msra.mxu1 %v1870_v51  ;;  %v1898_v62 = vld [vmem:[%s4982_s11 + $0x3210] sm:$0xff]  ;;  %v1832_v63 = vld [vmem:[%s4982_s11 + $0x3000] sm:$0xff]  ;;  %v2926_v2 = vpop.f32.mrf.mxu2 }
 0x1e5   : > { %3242 = vmatpush.msra.mxu2 %v1900_v37  ;;  %3261 = vmatpush.msra.mxu3 %v1934_v55  ;;  %v1866_v1 = vld [vmem:[%s4982_s11 + $0x3110] sm:$0xff]  ;;  %v1896_v3 = vld [vmem:[%s4982_s11 + $0x3200] sm:$0xff]  ;;  %v2927_v48 = vadd.f32 %v2926_v2, %v2907_v40 }
 0x1e6   : > { %3203 = vmatpush.msra.mxu0 %v1834_v61  ;;  %3222 = vmatpush.msra.mxu1 %v1868_v58  ;;  %v1930_v28 = vld [vmem:[%s4982_s11 + $0x3310] sm:$0xff]  ;;  %v2167_v56 = vld.sshfl [vmem:[#allocation1 + $0x10] sm:$0xff pattern:$0x73625140] }
 0x1e7   : > { %3243 = vmatpush.msra.mxu2 %v1898_v62  ;;  %3262 = vmatpush.msra.mxu3 %v1932_v0  ;;  %v2165_v49 = vld.sshfl [vmem:[#allocation1] sm:$0xff pattern:$0x73625140]  ;;  %v2946_v55 = vpop.f32.mrf.mxu3  ;;  %v1864_v59 = vld [vmem:[%s4982_s11 + $0x3100] sm:$0xff] }
 0x1e8   : > { %3204 = vmatpush.msra.mxu0 %v1832_v63  ;;  %3223 = vmatpush.msra.mxu1 %v1866_v1  ;;  %v1990_v51 = vld [vmem:[%s4982_s11 + $0x34f0] sm:$0xff]  ;;  %v1928_v61 = vld [vmem:[%s4982_s11 + $0x3300] sm:$0xff]  ;;  %v6016_v58 = vadd.f32 %v2946_v55, %v2927_v48 }
 0x1e9   : > { %v2054_v37 = vld [vmem:[%s4982_s11 + $0x36f0] sm:$0xff]  ;;  %3244 = vmatpush.msra.mxu2 %v1896_v3  ;;  %3263 = vmatpush.msra.mxu3 %v1930_v28  ;;  %v2166_v40 = vld.sshfl [vmem:[#allocation1 + $0x8] sm:$0xff pattern:$0x73625140] }
 0x1ea   : > { %3205 = vmatmul.f32.vlgmr.msra.gmra.mxu0 %v2165_v49  ;;  %3245 = vmatmul.f32.vlgmr.msra.gmra.mxu2 %v2167_v56  ;;  %v2168_v62 = vld.sshfl [vmem:[#allocation1 + $0x18] sm:$0xff pattern:$0x73625140]  ;;  %v1988_v0 = vld [vmem:[%s4982_s11 + $0x34e0] sm:$0xff] }
 0x1eb   : > { %3269 = vmatpush.msrb.mxu0 %v1990_v51  ;;  %3309 = vmatpush.msrb.mxu2 %v2054_v37  ;;  %v2022_v63 = vld [vmem:[%s4982_s11 + $0x35f0] sm:$0xff]  ;;  %v2052_v1 = vld [vmem:[%s4982_s11 + $0x36e0] sm:$0xff] }
 0x1ec   : > { %3224 = vmatpush.msra.mxu1 %v1864_v59  ;;  %3264 = vmatpush.msra.mxu3 %v1928_v61  ;;  %v2086_v2 = vld [vmem:[%s4982_s11 + $0x37f0] sm:$0xff]  ;;  %v2020_v28 = vld [vmem:[%s4982_s11 + $0x35e0] sm:$0xff] }
 0x1ed   : > { %3225 = vmatmul.f32.vlgmr.msra.gmra.mxu1 %v2166_v40  ;;  %3265 = vmatmul.f32.vlgmr.msra.gmra.mxu3 %v2168_v62  ;;  %v1986_v3 = vld [vmem:[%s4982_s11 + $0x34d0] sm:$0xff]  ;;  %v2084_v49 = vld [vmem:[%s4982_s11 + $0x37e0] sm:$0xff] }
 0x1ee   : > { %3270 = vmatpush.msrb.mxu0 %v1988_v0  ;;  %3289 = vmatpush.msrb.mxu1 %v2022_v63  ;;  %v2050_v48 = vld [vmem:[%s4982_s11 + $0x36d0] sm:$0xff]  ;;  %v1984_v56 = vld [vmem:[%s4982_s11 + $0x34c0] sm:$0xff] }
 0x1ef   : > { %3310 = vmatpush.msrb.mxu2 %v2052_v1  ;;  %3329 = vmatpush.msrb.mxu3 %v2086_v2  ;;  %v2018_v51 = vld [vmem:[%s4982_s11 + $0x35d0] sm:$0xff]  ;;  %v2048_v37 = vld [vmem:[%s4982_s11 + $0x36c0] sm:$0xff] }
 0x1f0   : > { %3271 = vmatpush.msrb.mxu0 %v1986_v3  ;;  %3290 = vmatpush.msrb.mxu1 %v2020_v28  ;;  %v2082_v55 = vld [vmem:[%s4982_s11 + $0x37d0] sm:$0xff]  ;;  %v2016_v61 = vld [vmem:[%s4982_s11 + $0x35c0] sm:$0xff] }
 0x1f1   : > { %3311 = vmatpush.msrb.mxu2 %v2050_v48  ;;  %3330 = vmatpush.msrb.mxu3 %v2084_v49  ;;  %v1982_v59 = vld [vmem:[%s4982_s11 + $0x34b0] sm:$0xff]  ;;  %v2080_v62 = vld [vmem:[%s4982_s11 + $0x37c0] sm:$0xff] }
 0x1f2   : > { %3272 = vmatpush.msrb.mxu0 %v1984_v56  ;;  %3291 = vmatpush.msrb.mxu1 %v2018_v51  ;;  %v2046_v40 = vld [vmem:[%s4982_s11 + $0x36b0] sm:$0xff]  ;;  %v1980_v0 = vld [vmem:[%s4982_s11 + $0x34a0] sm:$0xff] }
 0x1f3   : > { %3312 = vmatpush.msrb.mxu2 %v2048_v37  ;;  %3331 = vmatpush.msrb.mxu3 %v2082_v55  ;;  %v2014_v63 = vld [vmem:[%s4982_s11 + $0x35b0] sm:$0xff]  ;;  %v2044_v1 = vld [vmem:[%s4982_s11 + $0x36a0] sm:$0xff] }
 0x1f4   : > { %3273 = vmatpush.msrb.mxu0 %v1982_v59  ;;  %3292 = vmatpush.msrb.mxu1 %v2016_v61  ;;  %v2078_v2 = vld [vmem:[%s4982_s11 + $0x37b0] sm:$0xff]  ;;  %v2012_v28 = vld [vmem:[%s4982_s11 + $0x35a0] sm:$0xff] }
 0x1f5   : > { %3313 = vmatpush.msrb.mxu2 %v2046_v40  ;;  %3332 = vmatpush.msrb.mxu3 %v2080_v62  ;;  %v1978_v3 = vld [vmem:[%s4982_s11 + $0x3490] sm:$0xff]  ;;  %v2076_v49 = vld [vmem:[%s4982_s11 + $0x37a0] sm:$0xff] }
 0x1f6   : > { %3274 = vmatpush.msrb.mxu0 %v1980_v0  ;;  %3293 = vmatpush.msrb.mxu1 %v2014_v63  ;;  %v2042_v48 = vld [vmem:[%s4982_s11 + $0x3690] sm:$0xff]  ;;  %v1976_v56 = vld [vmem:[%s4982_s11 + $0x3480] sm:$0xff] }
 0x1f7   : > { %3314 = vmatpush.msrb.mxu2 %v2044_v1  ;;  %3333 = vmatpush.msrb.mxu3 %v2078_v2  ;;  %v2010_v51 = vld [vmem:[%s4982_s11 + $0x3590] sm:$0xff]  ;;  %v2040_v37 = vld [vmem:[%s4982_s11 + $0x3680] sm:$0xff] }
 0x1f8   : > { %3275 = vmatpush.msrb.mxu0 %v1978_v3  ;;  %3294 = vmatpush.msrb.mxu1 %v2012_v28  ;;  %v2074_v55 = vld [vmem:[%s4982_s11 + $0x3790] sm:$0xff]  ;;  %v2008_v61 = vld [vmem:[%s4982_s11 + $0x3580] sm:$0xff] }
 0x1f9   : > { %3315 = vmatpush.msrb.mxu2 %v2042_v48  ;;  %3334 = vmatpush.msrb.mxu3 %v2076_v49  ;;  %v1974_v59 = vld [vmem:[%s4982_s11 + $0x3470] sm:$0xff]  ;;  %v2072_v62 = vld [vmem:[%s4982_s11 + $0x3780] sm:$0xff] }
 0x1fa   : > { %3276 = vmatpush.msrb.mxu0 %v1976_v56  ;;  %3295 = vmatpush.msrb.mxu1 %v2010_v51  ;;  %v2038_v40 = vld [vmem:[%s4982_s11 + $0x3670] sm:$0xff]  ;;  %v1972_v0 = vld [vmem:[%s4982_s11 + $0x3460] sm:$0xff] }
 0x1fb   : > { %3316 = vmatpush.msrb.mxu2 %v2040_v37  ;;  %3335 = vmatpush.msrb.mxu3 %v2074_v55  ;;  %v2006_v63 = vld [vmem:[%s4982_s11 + $0x3570] sm:$0xff]  ;;  %v2036_v1 = vld [vmem:[%s4982_s11 + $0x3660] sm:$0xff] }
 0x1fc   : > { %3277 = vmatpush.msrb.mxu0 %v1974_v59  ;;  %3296 = vmatpush.msrb.mxu1 %v2008_v61  ;;  %v2070_v2 = vld [vmem:[%s4982_s11 + $0x3770] sm:$0xff]  ;;  %v2004_v28 = vld [vmem:[%s4982_s11 + $0x3560] sm:$0xff] }
 0x1fd   : > { %3317 = vmatpush.msrb.mxu2 %v2038_v40  ;;  %3336 = vmatpush.msrb.mxu3 %v2072_v62  ;;  %v1970_v3 = vld [vmem:[%s4982_s11 + $0x3450] sm:$0xff]  ;;  %v2068_v49 = vld [vmem:[%s4982_s11 + $0x3760] sm:$0xff] }
 0x1fe   : > { %3278 = vmatpush.msrb.mxu0 %v1972_v0  ;;  %3297 = vmatpush.msrb.mxu1 %v2006_v63  ;;  %v2034_v48 = vld [vmem:[%s4982_s11 + $0x3650] sm:$0xff]  ;;  %v1968_v56 = vld [vmem:[%s4982_s11 + $0x3440] sm:$0xff] }
 0x1ff   : > { %3318 = vmatpush.msrb.mxu2 %v2036_v1  ;;  %3337 = vmatpush.msrb.mxu3 %v2070_v2  ;;  %v2002_v51 = vld [vmem:[%s4982_s11 + $0x3550] sm:$0xff]  ;;  %v2032_v37 = vld [vmem:[%s4982_s11 + $0x3640] sm:$0xff] }
 0x200   : > { %3279 = vmatpush.msrb.mxu0 %v1970_v3  ;;  %3298 = vmatpush.msrb.mxu1 %v2004_v28  ;;  %v2066_v55 = vld [vmem:[%s4982_s11 + $0x3750] sm:$0xff]  ;;  %v2000_v61 = vld [vmem:[%s4982_s11 + $0x3540] sm:$0xff] }
 0x201   : > { %3319 = vmatpush.msrb.mxu2 %v2034_v48  ;;  %3338 = vmatpush.msrb.mxu3 %v2068_v49  ;;  %v1966_v59 = vld [vmem:[%s4982_s11 + $0x3430] sm:$0xff]  ;;  %v2966_v40 = vpop.f32.mrf.mxu0  ;;  %v2064_v0 = vld [vmem:[%s4982_s11 + $0x3740] sm:$0xff] }
 0x202   : > { %3280 = vmatpush.msrb.mxu0 %v1968_v56  ;;  %3299 = vmatpush.msrb.mxu1 %v2002_v51  ;;  %v2030_v62 = vld [vmem:[%s4982_s11 + $0x3630] sm:$0xff]  ;;  %v2967_v63 = vadd.f32 %v2966_v40, %v6016_v58  ;;  %v1964_v1 = vld [vmem:[%s4982_s11 + $0x3420] sm:$0xff] }
 0x203   : > { %3320 = vmatpush.msrb.mxu2 %v2032_v37  ;;  %3339 = vmatpush.msrb.mxu3 %v2066_v55  ;;  %v1998_v2 = vld [vmem:[%s4982_s11 + $0x3530] sm:$0xff]  ;;  %v2028_v3 = vld [vmem:[%s4982_s11 + $0x3620] sm:$0xff] }
 0x204   : > { %3281 = vmatpush.msrb.mxu0 %v1966_v59  ;;  %3300 = vmatpush.msrb.mxu1 %v2000_v61  ;;  %v2062_v28 = vld [vmem:[%s4982_s11 + $0x3730] sm:$0xff]  ;;  %v2986_v48 = vpop.f32.mrf.mxu1  ;;  %v1996_v56 = vld [vmem:[%s4982_s11 + $0x3520] sm:$0xff] }
 0x205   : > { %3321 = vmatpush.msrb.mxu2 %v2030_v62  ;;  %3340 = vmatpush.msrb.mxu3 %v2064_v0  ;;  %v1962_v49 = vld [vmem:[%s4982_s11 + $0x3410] sm:$0xff]  ;;  %v2987_v58 = vadd.f32 %v2986_v48, %v2967_v63  ;;  %v2060_v37 = vld [vmem:[%s4982_s11 + $0x3720] sm:$0xff] }
 0x206   : > { %3282 = vmatpush.msrb.mxu0 %v1964_v1  ;;  %3301 = vmatpush.msrb.mxu1 %v1998_v2  ;;  %v2026_v51 = vld [vmem:[%s4982_s11 + $0x3610] sm:$0xff]  ;;  %v1960_v55 = vld [vmem:[%s4982_s11 + $0x3400] sm:$0xff]  ;;  %v327_v2 = vld [vmem:[%s4982_s11 + $0xf8] sm:$0xff] }
 0x207   : > { %3322 = vmatpush.msrb.mxu2 %v2028_v3  ;;  %3341 = vmatpush.msrb.mxu3 %v2062_v28  ;;  %v1994_v59 = vld [vmem:[%s4982_s11 + $0x3510] sm:$0xff]  ;;  %v3006_v61 = vpop.f32.mrf.mxu2  ;;  %v2024_v40 = vld [vmem:[%s4982_s11 + $0x3600] sm:$0xff]  ;;  %v391_v3 = vld [vmem:[%s4982_s11 + $0x2f8] sm:$0xff] }
 0x208   : > { %3283 = vmatpush.msrb.mxu0 %v1962_v49  ;;  %3302 = vmatpush.msrb.mxu1 %v1996_v56  ;;  %v2058_v62 = vld [vmem:[%s4982_s11 + $0x3710] sm:$0xff]  ;;  %v3007_v0 = vadd.f32 %v3006_v61, %v2987_v58  ;;  %v2171_v1 = vld.sshfl [vmem:[#allocation1 + $0x30] sm:$0xff pattern:$0x73625140]  ;;  %v423_v61 = vld [vmem:[%s4982_s11 + $0x3f8] sm:$0xff] }
 0x209   : > { %3323 = vmatpush.msrb.mxu2 %v2026_v51  ;;  %3342 = vmatpush.msrb.mxu3 %v2060_v37  ;;  %v2169_v63 = vld.sshfl [vmem:[#allocation1 + $0x20] sm:$0xff pattern:$0x73625140]  ;;  %v1992_v48 = vld [vmem:[%s4982_s11 + $0x3500] sm:$0xff]  ;;  %v325_v37 = vld [vmem:[%s4982_s11 + $0xe8] sm:$0xff] }
 0x20a   : > { %3284 = vmatpush.msrb.mxu0 %v1960_v55  ;;  %3303 = vmatpush.msrb.mxu1 %v1994_v59  ;;  %v3026_v28 = vpop.f32.mrf.mxu3  ;;  %v2056_v49 = vld [vmem:[%s4982_s11 + $0x3700] sm:$0xff]  ;;  %v2172_v51 = vld.sshfl [vmem:[#allocation1 + $0x38] sm:$0xff pattern:$0x73625140]  ;;  %v359_v55 = vld [vmem:[%s4982_s11 + $0x1f8] sm:$0xff] }
 0x20b   : > { %3324 = vmatpush.msrb.mxu2 %v2024_v40  ;;  %3343 = vmatpush.msrb.mxu3 %v2058_v62  ;;  %v6083_v56 = vadd.f32 %v3026_v28, %v3007_v0  ;;  %v2170_v58 = vld.sshfl [vmem:[#allocation1 + $0x28] sm:$0xff pattern:$0x73625140]  ;;  %v389_v59 = vld [vmem:[%s4982_s11 + $0x2e8] sm:$0xff] }
 0x20c   : > { %3285 = vmatmul.f32.vlgmr.msrb.gmra.mxu0 %v2169_v63  ;;  %3325 = vmatmul.f32.vlgmr.msrb.gmra.mxu2 %v2171_v1  ;;  %v323_v40 = vld [vmem:[%s4982_s11 + $0xd8] sm:$0xff]  ;;  %v357_v62 = vld [vmem:[%s4982_s11 + $0x1e8] sm:$0xff] }
 0x20d   : > { %3349 = vmatpush.msra.mxu0 %v327_v2  ;;  %3389 = vmatpush.msra.mxu2 %v391_v3  ;;  %v387_v0 = vld [vmem:[%s4982_s11 + $0x2d8] sm:$0xff]  ;;  %v421_v63 = vld [vmem:[%s4982_s11 + $0x3e8] sm:$0xff] }
 0x20e   : > { %3304 = vmatpush.msrb.mxu1 %v1992_v48  ;;  %3344 = vmatpush.msrb.mxu3 %v2056_v49  ;;  %v321_v1 = vld [vmem:[%s4982_s11 + $0xc8] sm:$0xff]  ;;  %v355_v2 = vld [vmem:[%s4982_s11 + $0x1d8] sm:$0xff] }
 0x20f   : > { %3305 = vmatmul.f32.vlgmr.msrb.gmra.mxu1 %v2170_v58  ;;  %3345 = vmatmul.f32.vlgmr.msrb.gmra.mxu3 %v2172_v51  ;;  %v385_v3 = vld [vmem:[%s4982_s11 + $0x2c8] sm:$0xff]  ;;  %v419_v28 = vld [vmem:[%s4982_s11 + $0x3d8] sm:$0xff] }
 0x210   : > { %3350 = vmatpush.msra.mxu0 %v325_v37  ;;  %3369 = vmatpush.msra.mxu1 %v359_v55  ;;  %v319_v48 = vld [vmem:[%s4982_s11 + $0xb8] sm:$0xff]  ;;  %v353_v49 = vld [vmem:[%s4982_s11 + $0x1c8] sm:$0xff] }
 0x211   : > { %3390 = vmatpush.msra.mxu2 %v389_v59  ;;  %3409 = vmatpush.msra.mxu3 %v423_v61  ;;  %v383_v58 = vld [vmem:[%s4982_s11 + $0x2b8] sm:$0xff]  ;;  %v417_v51 = vld [vmem:[%s4982_s11 + $0x3c8] sm:$0xff] }
 0x212   : > { %3351 = vmatpush.msra.mxu0 %v323_v40  ;;  %3370 = vmatpush.msra.mxu1 %v357_v62  ;;  %v317_v37 = vld [vmem:[%s4982_s11 + $0xa8] sm:$0xff]  ;;  %v351_v55 = vld [vmem:[%s4982_s11 + $0x1b8] sm:$0xff] }
 0x213   : > { %3391 = vmatpush.msra.mxu2 %v387_v0  ;;  %3410 = vmatpush.msra.mxu3 %v421_v63  ;;  %v381_v59 = vld [vmem:[%s4982_s11 + $0x2a8] sm:$0xff]  ;;  %v415_v61 = vld [vmem:[%s4982_s11 + $0x3b8] sm:$0xff] }
 0x214   : > { %3352 = vmatpush.msra.mxu0 %v321_v1  ;;  %3371 = vmatpush.msra.mxu1 %v355_v2  ;;  %v315_v40 = vld [vmem:[%s4982_s11 + $0x98] sm:$0xff]  ;;  %v349_v62 = vld [vmem:[%s4982_s11 + $0x1a8] sm:$0xff] }
 0x215   : > { %3392 = vmatpush.msra.mxu2 %v385_v3  ;;  %3411 = vmatpush.msra.mxu3 %v419_v28  ;;  %v379_v0 = vld [vmem:[%s4982_s11 + $0x298] sm:$0xff]  ;;  %v413_v63 = vld [vmem:[%s4982_s11 + $0x3a8] sm:$0xff] }
 0x216   : > { %3353 = vmatpush.msra.mxu0 %v319_v48  ;;  %3372 = vmatpush.msra.mxu1 %v353_v49  ;;  %v313_v1 = vld [vmem:[%s4982_s11 + $0x88] sm:$0xff]  ;;  %v347_v2 = vld [vmem:[%s4982_s11 + $0x198] sm:$0xff] }
 0x217   : > { %3393 = vmatpush.msra.mxu2 %v383_v58  ;;  %3412 = vmatpush.msra.mxu3 %v417_v51  ;;  %v377_v3 = vld [vmem:[%s4982_s11 + $0x288] sm:$0xff]  ;;  %v411_v28 = vld [vmem:[%s4982_s11 + $0x398] sm:$0xff] }
 0x218   : > { %3354 = vmatpush.msra.mxu0 %v317_v37  ;;  %3373 = vmatpush.msra.mxu1 %v351_v55  ;;  %v311_v48 = vld [vmem:[%s4982_s11 + $0x78] sm:$0xff]  ;;  %v345_v49 = vld [vmem:[%s4982_s11 + $0x188] sm:$0xff] }
 0x219   : > { %3394 = vmatpush.msra.mxu2 %v381_v59  ;;  %3413 = vmatpush.msra.mxu3 %v415_v61  ;;  %v375_v58 = vld [vmem:[%s4982_s11 + $0x278] sm:$0xff]  ;;  %v409_v51 = vld [vmem:[%s4982_s11 + $0x388] sm:$0xff] }
 0x21a   : > { %3355 = vmatpush.msra.mxu0 %v315_v40  ;;  %3374 = vmatpush.msra.mxu1 %v349_v62  ;;  %v309_v37 = vld [vmem:[%s4982_s11 + $0x68] sm:$0xff]  ;;  %v343_v55 = vld [vmem:[%s4982_s11 + $0x178] sm:$0xff] }
 0x21b   : > { %3395 = vmatpush.msra.mxu2 %v379_v0  ;;  %3414 = vmatpush.msra.mxu3 %v413_v63  ;;  %v373_v59 = vld [vmem:[%s4982_s11 + $0x268] sm:$0xff]  ;;  %v407_v61 = vld [vmem:[%s4982_s11 + $0x378] sm:$0xff] }
 0x21c   : > { %3356 = vmatpush.msra.mxu0 %v313_v1  ;;  %3375 = vmatpush.msra.mxu1 %v347_v2  ;;  %v307_v40 = vld [vmem:[%s4982_s11 + $0x58] sm:$0xff]  ;;  %v341_v62 = vld [vmem:[%s4982_s11 + $0x168] sm:$0xff] }
 0x21d   : > { %3396 = vmatpush.msra.mxu2 %v377_v3  ;;  %3415 = vmatpush.msra.mxu3 %v411_v28  ;;  %v371_v0 = vld [vmem:[%s4982_s11 + $0x258] sm:$0xff]  ;;  %v405_v63 = vld [vmem:[%s4982_s11 + $0x368] sm:$0xff] }
 0x21e   : > { %3357 = vmatpush.msra.mxu0 %v311_v48  ;;  %3376 = vmatpush.msra.mxu1 %v345_v49  ;;  %v305_v1 = vld [vmem:[%s4982_s11 + $0x48] sm:$0xff]  ;;  %v339_v2 = vld [vmem:[%s4982_s11 + $0x158] sm:$0xff] }
 0x21f   : > { %3397 = vmatpush.msra.mxu2 %v375_v58  ;;  %3416 = vmatpush.msra.mxu3 %v409_v51  ;;  %v369_v3 = vld [vmem:[%s4982_s11 + $0x248] sm:$0xff]  ;;  %v403_v28 = vld [vmem:[%s4982_s11 + $0x358] sm:$0xff] }
 0x220   : > { %3358 = vmatpush.msra.mxu0 %v309_v37  ;;  %3377 = vmatpush.msra.mxu1 %v343_v55  ;;  %v303_v48 = vld [vmem:[%s4982_s11 + $0x38] sm:$0xff]  ;;  %v337_v49 = vld [vmem:[%s4982_s11 + $0x148] sm:$0xff] }
 0x221   : > { %3398 = vmatpush.msra.mxu2 %v373_v59  ;;  %3417 = vmatpush.msra.mxu3 %v407_v61  ;;  %v367_v51 = vld [vmem:[%s4982_s11 + $0x238] sm:$0xff]  ;;  %v401_v37 = vld [vmem:[%s4982_s11 + $0x348] sm:$0xff] }
 0x222   : > { %3359 = vmatpush.msra.mxu0 %v307_v40  ;;  %3378 = vmatpush.msra.mxu1 %v341_v62  ;;  %v301_v59 = vld [vmem:[%s4982_s11 + $0x28] sm:$0xff]  ;;  %v335_v61 = vld [vmem:[%s4982_s11 + $0x138] sm:$0xff] }
 0x223   : > { %3399 = vmatpush.msra.mxu2 %v371_v0  ;;  %3418 = vmatpush.msra.mxu3 %v405_v63  ;;  %v3046_v58 = vpop.f32.mrf.mxu0  ;;  %v365_v40 = vld [vmem:[%s4982_s11 + $0x228] sm:$0xff]  ;;  %v399_v62 = vld [vmem:[%s4982_s11 + $0x338] sm:$0xff] }
 0x224   : > { %3360 = vmatpush.msra.mxu0 %v305_v1  ;;  %3379 = vmatpush.msra.mxu1 %v339_v2  ;;  %v3047_v55 = vadd.f32 %v3046_v58, %v6083_v56  ;;  %v299_v63 = vld [vmem:[%s4982_s11 + $0x18] sm:$0xff]  ;;  %v333_v1 = vld [vmem:[%s4982_s11 + $0x128] sm:$0xff] }
 0x225   : > { %3400 = vmatpush.msra.mxu2 %v369_v3  ;;  %3419 = vmatpush.msra.mxu3 %v403_v28  ;;  %v363_v2 = vld [vmem:[%s4982_s11 + $0x218] sm:$0xff]  ;;  %v397_v3 = vld [vmem:[%s4982_s11 + $0x328] sm:$0xff] }
 0x226   : > { %3361 = vmatpush.msra.mxu0 %v303_v48  ;;  %3380 = vmatpush.msra.mxu1 %v337_v49  ;;  %v3066_v0 = vpop.f32.mrf.mxu1  ;;  %v297_v28 = vld [vmem:[%s4982_s11 + $0x8] sm:$0xff]  ;;  %v331_v48 = vld [vmem:[%s4982_s11 + $0x118] sm:$0xff] }
 0x227   : > { %3401 = vmatpush.msra.mxu2 %v367_v51  ;;  %3420 = vmatpush.msra.mxu3 %v401_v37  ;;  %v3067_v56 = vadd.f32 %v3066_v0, %v3047_v55  ;;  %v361_v58 = vld [vmem:[%s4982_s11 + $0x208] sm:$0xff]  ;;  %v395_v51 = vld [vmem:[%s4982_s11 + $0x318] sm:$0xff] }
 0x228   : > { %3362 = vmatpush.msra.mxu0 %v301_v59  ;;  %3381 = vmatpush.msra.mxu1 %v335_v61  ;;  %v455_v55 = vld [vmem:[%s4982_s11 + $0x4f8] sm:$0xff]  ;;  %v329_v61 = vld [vmem:[%s4982_s11 + $0x108] sm:$0xff] }
 0x229   : > { %3402 = vmatpush.msra.mxu2 %v365_v40  ;;  %3421 = vmatpush.msra.mxu3 %v399_v62  ;;  %v3086_v49 = vpop.f32.mrf.mxu2  ;;  %v519_v59 = vld [vmem:[%s4982_s11 + $0x6f8] sm:$0xff]  ;;  %v393_v40 = vld [vmem:[%s4982_s11 + $0x308] sm:$0xff] }
 0x22a   : > { %3363 = vmatpush.msra.mxu0 %v299_v63  ;;  %3382 = vmatpush.msra.mxu1 %v333_v1  ;;  %v3087_v37 = vadd.f32 %v3086_v49, %v3067_v56  ;;  %v453_v0 = vld [vmem:[%s4982_s11 + $0x4e8] sm:$0xff]  ;;  %v487_v63 = vld [vmem:[%s4982_s11 + $0x5f8] sm:$0xff] }
 0x22b   : > { %3403 = vmatpush.msra.mxu2 %v363_v2  ;;  %3422 = vmatpush.msra.mxu3 %v397_v3  ;;  %v517_v56 = vld [vmem:[%s4982_s11 + $0x6e8] sm:$0xff]  ;;  %v551_v2 = vld [vmem:[%s4982_s11 + $0x7f8] sm:$0xff] }
 0x22c   : > { %3364 = vmatpush.msra.mxu0 %v297_v28  ;;  %3383 = vmatpush.msra.mxu1 %v331_v48  ;;  %v3106_v62 = vpop.f32.mrf.mxu3  ;;  %v451_v3 = vld [vmem:[%s4982_s11 + $0x4d8] sm:$0xff]  ;;  %v485_v28 = vld [vmem:[%s4982_s11 + $0x5e8] sm:$0xff] }
 0x22d   : > { %3404 = vmatpush.msra.mxu2 %v361_v58  ;;  %3423 = vmatpush.msra.mxu3 %v395_v51  ;;  %v6152_v1 = vadd.f32 %v3106_v62, %v3087_v37  ;;  %v515_v48 = vld [vmem:[%s4982_s11 + $0x6d8] sm:$0xff]  ;;  %v549_v49 = vld [vmem:[%s4982_s11 + $0x7e8] sm:$0xff] }
 0x22e   : > { %3429 = vmatpush.msrb.mxu0 %v455_v55  ;;  %3384 = vmatpush.msra.mxu1 %v329_v61  ;;  %v449_v58 = vld [vmem:[%s4982_s11 + $0x4c8] sm:$0xff]  ;;  %v483_v51 = vld [vmem:[%s4982_s11 + $0x5d8] sm:$0xff] }
 0x22f   : > { %3469 = vmatpush.msrb.mxu2 %v519_v59  ;;  %3424 = vmatpush.msra.mxu3 %v393_v40  ;;  %v513_v37 = vld [vmem:[%s4982_s11 + $0x6c8] sm:$0xff]  ;;  %v547_v55 = vld [vmem:[%s4982_s11 + $0x7d8] sm:$0xff] }
 0x230   : > { %3430 = vmatpush.msrb.mxu0 %v453_v0  ;;  %3449 = vmatpush.msrb.mxu1 %v487_v63  ;;  %v447_v59 = vld [vmem:[%s4982_s11 + $0x4b8] sm:$0xff]  ;;  %v481_v61 = vld [vmem:[%s4982_s11 + $0x5c8] sm:$0xff] }
 0x231   : > { %3470 = vmatpush.msrb.mxu2 %v517_v56  ;;  %3489 = vmatpush.msrb.mxu3 %v551_v2  ;;  %v511_v40 = vld [vmem:[%s4982_s11 + $0x6b8] sm:$0xff]  ;;  %v545_v62 = vld [vmem:[%s4982_s11 + $0x7c8] sm:$0xff] }
 0x232   : > { %3431 = vmatpush.msrb.mxu0 %v451_v3  ;;  %3450 = vmatpush.msrb.mxu1 %v485_v28  ;;  %v445_v0 = vld [vmem:[%s4982_s11 + $0x4a8] sm:$0xff]  ;;  %v479_v63 = vld [vmem:[%s4982_s11 + $0x5b8] sm:$0xff] }
 0x233   : > { %3471 = vmatpush.msrb.mxu2 %v515_v48  ;;  %3490 = vmatpush.msrb.mxu3 %v549_v49  ;;  %v509_v56 = vld [vmem:[%s4982_s11 + $0x6a8] sm:$0xff]  ;;  %v543_v2 = vld [vmem:[%s4982_s11 + $0x7b8] sm:$0xff] }
 0x234   : > { %3432 = vmatpush.msrb.mxu0 %v449_v58  ;;  %3451 = vmatpush.msrb.mxu1 %v483_v51  ;;  %v443_v3 = vld [vmem:[%s4982_s11 + $0x498] sm:$0xff]  ;;  %v477_v28 = vld [vmem:[%s4982_s11 + $0x5a8] sm:$0xff] }
 0x235   : > { %3472 = vmatpush.msrb.mxu2 %v513_v37  ;;  %3491 = vmatpush.msrb.mxu3 %v547_v55  ;;  %v507_v48 = vld [vmem:[%s4982_s11 + $0x698] sm:$0xff]  ;;  %v541_v49 = vld [vmem:[%s4982_s11 + $0x7a8] sm:$0xff] }
 0x236   : > { %3433 = vmatpush.msrb.mxu0 %v447_v59  ;;  %3452 = vmatpush.msrb.mxu1 %v481_v61  ;;  %v441_v58 = vld [vmem:[%s4982_s11 + $0x488] sm:$0xff]  ;;  %v475_v51 = vld [vmem:[%s4982_s11 + $0x598] sm:$0xff] }
 0x237   : > { %3473 = vmatpush.msrb.mxu2 %v511_v40  ;;  %3492 = vmatpush.msrb.mxu3 %v545_v62  ;;  %v505_v37 = vld [vmem:[%s4982_s11 + $0x688] sm:$0xff]  ;;  %v539_v55 = vld [vmem:[%s4982_s11 + $0x798] sm:$0xff] }
 0x238   : > { %3434 = vmatpush.msrb.mxu0 %v445_v0  ;;  %3453 = vmatpush.msrb.mxu1 %v479_v63  ;;  %v439_v59 = vld [vmem:[%s4982_s11 + $0x478] sm:$0xff]  ;;  %v473_v61 = vld [vmem:[%s4982_s11 + $0x588] sm:$0xff] }
 0x239   : > { %3474 = vmatpush.msrb.mxu2 %v509_v56  ;;  %3493 = vmatpush.msrb.mxu3 %v543_v2  ;;  %v503_v40 = vld [vmem:[%s4982_s11 + $0x678] sm:$0xff]  ;;  %v537_v62 = vld [vmem:[%s4982_s11 + $0x788] sm:$0xff] }
 0x23a   : > { %3435 = vmatpush.msrb.mxu0 %v443_v3  ;;  %3454 = vmatpush.msrb.mxu1 %v477_v28  ;;  %v437_v0 = vld [vmem:[%s4982_s11 + $0x468] sm:$0xff]  ;;  %v471_v63 = vld [vmem:[%s4982_s11 + $0x578] sm:$0xff] }
 0x23b   : > { %3475 = vmatpush.msrb.mxu2 %v507_v48  ;;  %3494 = vmatpush.msrb.mxu3 %v541_v49  ;;  %v501_v56 = vld [vmem:[%s4982_s11 + $0x668] sm:$0xff]  ;;  %v535_v2 = vld [vmem:[%s4982_s11 + $0x778] sm:$0xff] }
 0x23c   : > { %3436 = vmatpush.msrb.mxu0 %v441_v58  ;;  %3455 = vmatpush.msrb.mxu1 %v475_v51  ;;  %v435_v3 = vld [vmem:[%s4982_s11 + $0x458] sm:$0xff]  ;;  %v469_v28 = vld [vmem:[%s4982_s11 + $0x568] sm:$0xff] }
 0x23d   : > { %3476 = vmatpush.msrb.mxu2 %v505_v37  ;;  %3495 = vmatpush.msrb.mxu3 %v539_v55  ;;  %v499_v48 = vld [vmem:[%s4982_s11 + $0x658] sm:$0xff]  ;;  %v533_v49 = vld [vmem:[%s4982_s11 + $0x768] sm:$0xff] }
 0x23e   : > { %3437 = vmatpush.msrb.mxu0 %v439_v59  ;;  %3456 = vmatpush.msrb.mxu1 %v473_v61  ;;  %v433_v58 = vld [vmem:[%s4982_s11 + $0x448] sm:$0xff]  ;;  %v467_v51 = vld [vmem:[%s4982_s11 + $0x558] sm:$0xff] }
 0x23f   : > { %3477 = vmatpush.msrb.mxu2 %v503_v40  ;;  %3496 = vmatpush.msrb.mxu3 %v537_v62  ;;  %v497_v37 = vld [vmem:[%s4982_s11 + $0x648] sm:$0xff]  ;;  %v531_v55 = vld [vmem:[%s4982_s11 + $0x758] sm:$0xff] }
 0x240   : > { %3438 = vmatpush.msrb.mxu0 %v437_v0  ;;  %3457 = vmatpush.msrb.mxu1 %v471_v63  ;;  %v431_v59 = vld [vmem:[%s4982_s11 + $0x438] sm:$0xff]  ;;  %v465_v61 = vld [vmem:[%s4982_s11 + $0x548] sm:$0xff] }
 0x241   : > { %3478 = vmatpush.msrb.mxu2 %v501_v56  ;;  %3497 = vmatpush.msrb.mxu3 %v535_v2  ;;  %v495_v40 = vld [vmem:[%s4982_s11 + $0x638] sm:$0xff]  ;;  %v529_v62 = vld [vmem:[%s4982_s11 + $0x748] sm:$0xff] }
 0x242   : > { %3439 = vmatpush.msrb.mxu0 %v435_v3  ;;  %3458 = vmatpush.msrb.mxu1 %v469_v28  ;;  %v429_v0 = vld [vmem:[%s4982_s11 + $0x428] sm:$0xff]  ;;  %v463_v63 = vld [vmem:[%s4982_s11 + $0x538] sm:$0xff] }
 0x243   : > { %3479 = vmatpush.msrb.mxu2 %v499_v48  ;;  %3498 = vmatpush.msrb.mxu3 %v533_v49  ;;  %v493_v2 = vld [vmem:[%s4982_s11 + $0x628] sm:$0xff]  ;;  %v527_v3 = vld [vmem:[%s4982_s11 + $0x738] sm:$0xff] }
 0x244   : > { %3440 = vmatpush.msrb.mxu0 %v433_v58  ;;  %3459 = vmatpush.msrb.mxu1 %v467_v51  ;;  %v427_v48 = vld [vmem:[%s4982_s11 + $0x418] sm:$0xff]  ;;  %v461_v49 = vld [vmem:[%s4982_s11 + $0x528] sm:$0xff] }
 0x245   : > { %3480 = vmatpush.msrb.mxu2 %v497_v37  ;;  %3499 = vmatpush.msrb.mxu3 %v531_v55  ;;  %v3126_v56 = vpop.f32.mrf.mxu0  ;;  %v491_v58 = vld [vmem:[%s4982_s11 + $0x618] sm:$0xff]  ;;  %v525_v51 = vld [vmem:[%s4982_s11 + $0x728] sm:$0xff] }
 0x246   : > { %3441 = vmatpush.msrb.mxu0 %v431_v59  ;;  %3460 = vmatpush.msrb.mxu1 %v465_v61  ;;  %v3127_v28 = vadd.f32 %v3126_v56, %v6152_v1  ;;  %v425_v55 = vld [vmem:[%s4982_s11 + $0x408] sm:$0xff]  ;;  %v459_v1 = vld [vmem:[%s4982_s11 + $0x518] sm:$0xff] }
 0x247   : > { %3481 = vmatpush.msrb.mxu2 %v495_v40  ;;  %3500 = vmatpush.msrb.mxu3 %v529_v62  ;;  %v489_v61 = vld [vmem:[%s4982_s11 + $0x608] sm:$0xff]  ;;  %v523_v40 = vld [vmem:[%s4982_s11 + $0x718] sm:$0xff] }
 0x248   : > { %3442 = vmatpush.msrb.mxu0 %v429_v0  ;;  %3461 = vmatpush.msrb.mxu1 %v463_v63  ;;  %v3146_v37 = vpop.f32.mrf.mxu1  ;;  %v583_v0 = vld [vmem:[%s4982_s11 + $0x8f8] sm:$0xff] }
 0x249   : > { %3482 = vmatpush.msrb.mxu2 %v493_v2  ;;  %3501 = vmatpush.msrb.mxu3 %v527_v3  ;;  %v3147_v59 = vadd.f32 %v3146_v37, %v3127_v28  ;;  %v647_v56 = vld [vmem:[%s4982_s11 + $0xaf8] sm:$0xff]  ;;  %v457_v2 = vld [vmem:[%s4982_s11 + $0x508] sm:$0xff] }
 0x24a   : > { %3443 = vmatpush.msrb.mxu0 %v427_v48  ;;  %3462 = vmatpush.msrb.mxu1 %v461_v49  ;;  %v521_v3 = vld [vmem:[%s4982_s11 + $0x708] sm:$0xff]  ;;  %v615_v48 = vld [vmem:[%s4982_s11 + $0x9f8] sm:$0xff] }
 0x24b   : > { %3483 = vmatpush.msrb.mxu2 %v491_v58  ;;  %3502 = vmatpush.msrb.mxu3 %v525_v51  ;;  %v3166_v62 = vpop.f32.mrf.mxu2  ;;  %v645_v58 = vld [vmem:[%s4982_s11 + $0xae8] sm:$0xff]  ;;  %v679_v51 = vld [vmem:[%s4982_s11 + $0xbf8] sm:$0xff] }
 0x24c   : > { %3405 = vmatmul.f32.vlgmr.msra.gmra.mxu2 %v5118_v43  ;;  %3444 = vmatpush.msrb.mxu0 %v425_v55  ;;  %v3167_v63 = vadd.f32 %v3166_v62, %v3147_v59  ;;  %v581_v43 = vld [vmem:[%s4982_s11 + $0x8e8] sm:$0xff] }
 0x24d   : > { %3463 = vmatpush.msrb.mxu1 %v459_v1  ;;  %3484 = vmatpush.msrb.mxu2 %v489_v61  ;;  %v613_v37 = vld [vmem:[%s4982_s11 + $0x9e8] sm:$0xff]  ;;  %v611_v1 = vld [vmem:[%s4982_s11 + $0x9d8] sm:$0xff] }
 0x24e   : > { %3503 = vmatpush.msrb.mxu3 %v523_v40  ;;  %3365 = vmatmul.f32.vlgmr.msra.gmra.mxu0 %v5120_v44  ;;  %v3186_v28 = vpop.f32.mrf.mxu3  ;;  %v579_v44 = vld [vmem:[%s4982_s11 + $0x8d8] sm:$0xff]  ;;  %v677_v55 = vld [vmem:[%s4982_s11 + $0xbe8] sm:$0xff] }
 0x24f   : > { %3425 = vmatmul.f32.vlgmr.msra.gmra.mxu3 %v5122_v45  ;;  %3509 = vmatpush.msra.mxu0 %v583_v0  ;;  %v6222_v49 = vadd.f32 %v3186_v28, %v3167_v63  ;;  %v643_v45 = vld [vmem:[%s4982_s11 + $0xad8] sm:$0xff]  ;;  %v577_v59 = vld [vmem:[%s4982_s11 + $0x8c8] sm:$0xff] }
 0x250   : > { %3549 = vmatpush.msra.mxu2 %v647_v56  ;;  %3464 = vmatpush.msrb.mxu1 %v457_v2  ;;  %v641_v61 = vld [vmem:[%s4982_s11 + $0xac8] sm:$0xff]  ;;  %v575_v40 = vld [vmem:[%s4982_s11 + $0x8b8] sm:$0xff] }
 0x251   : > { %3504 = vmatpush.msrb.mxu3 %v521_v3  ;;  %3385 = vmatmul.f32.vlgmr.msra.gmra.mxu1 %v5124_v46  ;;  %v675_v46 = vld [vmem:[%s4982_s11 + $0xbd8] sm:$0xff]  ;;  %v609_v62 = vld [vmem:[%s4982_s11 + $0x9c8] sm:$0xff] }
 0x252   : > { %3510 = vmatpush.msra.mxu0 %v581_v43  ;;  %3529 = vmatpush.msra.mxu1 %v615_v48  ;;  %v639_v0 = vld [vmem:[%s4982_s11 + $0xab8] sm:$0xff]  ;;  %v673_v63 = vld [vmem:[%s4982_s11 + $0xbc8] sm:$0xff] }
 0x253   : > { %3550 = vmatpush.msra.mxu2 %v645_v58  ;;  %3569 = vmatpush.msra.mxu3 %v679_v51  ;;  %v607_v56 = vld [vmem:[%s4982_s11 + $0x9b8] sm:$0xff]  ;;  %v637_v2 = vld [vmem:[%s4982_s11 + $0xaa8] sm:$0xff] }
 0x254   : > { %3511 = vmatpush.msra.mxu0 %v579_v44  ;;  %3530 = vmatpush.msra.mxu1 %v613_v37  ;;  %v671_v3 = vld [vmem:[%s4982_s11 + $0xbb8] sm:$0xff]  ;;  %v605_v28 = vld [vmem:[%s4982_s11 + $0x9a8] sm:$0xff] }
 0x255   : > { %3551 = vmatpush.msra.mxu2 %v643_v45  ;;  %3570 = vmatpush.msra.mxu3 %v677_v55  ;;  %v669_v43 = vld [vmem:[%s4982_s11 + $0xba8] sm:$0xff]  ;;  %v603_v58 = vld [vmem:[%s4982_s11 + $0x998] sm:$0xff] }
 0x256   : > { %3485 = vmatmul.f32.vlgmr.msrb.gmra.mxu2 %v5147_v4  ;;  %3512 = vmatpush.msra.mxu0 %v577_v59  ;;  %v573_v4 = vld [vmem:[%s4982_s11 + $0x8a8] sm:$0xff]  ;;  %v567_v44 = vld [vmem:[%s4982_s11 + $0x878] sm:$0xff] }
 0x257   : > { %3531 = vmatpush.msra.mxu1 %v611_v1  ;;  %3552 = vmatpush.msra.mxu2 %v641_v61  ;;  %v569_v48 = vld [vmem:[%s4982_s11 + $0x888] sm:$0xff]  ;;  %v631_v45 = vld [vmem:[%s4982_s11 + $0xa78] sm:$0xff] }
 0x258   : > { %3571 = vmatpush.msra.mxu3 %v675_v46  ;;  %3445 = vmatmul.f32.vlgmr.msrb.gmra.mxu0 %v5149_v5  ;;  %v571_v5 = vld [vmem:[%s4982_s11 + $0x898] sm:$0xff]  ;;  %v633_v51 = vld [vmem:[%s4982_s11 + $0xa88] sm:$0xff] }
 0x259   : > { %3505 = vmatmul.f32.vlgmr.msrb.gmra.mxu3 %v5151_v6  ;;  %3513 = vmatpush.msra.mxu0 %v575_v40  ;;  %v635_v6 = vld [vmem:[%s4982_s11 + $0xa98] sm:$0xff]  ;;  %v601_v37 = vld [vmem:[%s4982_s11 + $0x988] sm:$0xff] }
 0x25a   : > { %3532 = vmatpush.msra.mxu1 %v609_v62  ;;  %3553 = vmatpush.msra.mxu2 %v639_v0  ;;  %v665_v55 = vld [vmem:[%s4982_s11 + $0xb88] sm:$0xff]  ;;  %v599_v1 = vld [vmem:[%s4982_s11 + $0x978] sm:$0xff] }
 0x25b   : > { %3572 = vmatpush.msra.mxu3 %v673_v63  ;;  %3465 = vmatmul.f32.vlgmr.msrb.gmra.mxu1 %v5153_v7  ;;  %v667_v7 = vld [vmem:[%s4982_s11 + $0xb98] sm:$0xff]  ;;  %v565_v59 = vld [vmem:[%s4982_s11 + $0x868] sm:$0xff] }
 0x25c   : > { %3514 = vmatpush.msra.mxu0 %v573_v4  ;;  %3533 = vmatpush.msra.mxu1 %v607_v56  ;;  %v629_v61 = vld [vmem:[%s4982_s11 + $0xa68] sm:$0xff]  ;;  %v663_v46 = vld [vmem:[%s4982_s11 + $0xb78] sm:$0xff] }
 0x25d   : > { %3554 = vmatpush.msra.mxu2 %v637_v2  ;;  %3573 = vmatpush.msra.mxu3 %v671_v3  ;;  %v563_v40 = vld [vmem:[%s4982_s11 + $0x858] sm:$0xff]  ;;  %v597_v62 = vld [vmem:[%s4982_s11 + $0x968] sm:$0xff] }
 0x25e   : > { %3515 = vmatpush.msra.mxu0 %v571_v5  ;;  %3534 = vmatpush.msra.mxu1 %v605_v28  ;;  %v627_v0 = vld [vmem:[%s4982_s11 + $0xa58] sm:$0xff]  ;;  %v661_v63 = vld [vmem:[%s4982_s11 + $0xb68] sm:$0xff] }
 0x25f   : > { %3555 = vmatpush.msra.mxu2 %v635_v6  ;;  %3574 = vmatpush.msra.mxu3 %v669_v43  ;;  %v561_v4 = vld [vmem:[%s4982_s11 + $0x848] sm:$0xff]  ;;  %v595_v56 = vld [vmem:[%s4982_s11 + $0x958] sm:$0xff] }
 0x260   : > { %3516 = vmatpush.msra.mxu0 %v569_v48  ;;  %3535 = vmatpush.msra.mxu1 %v603_v58  ;;  %v625_v2 = vld [vmem:[%s4982_s11 + $0xa48] sm:$0xff]  ;;  %v659_v3 = vld [vmem:[%s4982_s11 + $0xb58] sm:$0xff] }
 0x261   : > { %3556 = vmatpush.msra.mxu2 %v633_v51  ;;  %3575 = vmatpush.msra.mxu3 %v667_v7  ;;  %v559_v5 = vld [vmem:[%s4982_s11 + $0x838] sm:$0xff]  ;;  %v593_v28 = vld [vmem:[%s4982_s11 + $0x948] sm:$0xff] }
 0x262   : > { %3517 = vmatpush.msra.mxu0 %v567_v44  ;;  %3536 = vmatpush.msra.mxu1 %v601_v37  ;;  %v623_v43 = vld [vmem:[%s4982_s11 + $0xa38] sm:$0xff]  ;;  %v657_v48 = vld [vmem:[%s4982_s11 + $0xb48] sm:$0xff] }
 0x263   : > { %3557 = vmatpush.msra.mxu2 %v631_v45  ;;  %3576 = vmatpush.msra.mxu3 %v665_v55  ;;  %v557_v51 = vld [vmem:[%s4982_s11 + $0x828] sm:$0xff]  ;;  %v591_v7 = vld [vmem:[%s4982_s11 + $0x938] sm:$0xff] }
 0x264   : > { %3518 = vmatpush.msra.mxu0 %v565_v59  ;;  %3537 = vmatpush.msra.mxu1 %v599_v1  ;;  %v621_v44 = vld [vmem:[%s4982_s11 + $0xa28] sm:$0xff]  ;;  %v655_v37 = vld [vmem:[%s4982_s11 + $0xb38] sm:$0xff] }
 0x265   : > { %3558 = vmatpush.msra.mxu2 %v629_v61  ;;  %3577 = vmatpush.msra.mxu3 %v663_v46  ;;  %v555_v55 = vld [vmem:[%s4982_s11 + $0x818] sm:$0xff]  ;;  %v589_v59 = vld [vmem:[%s4982_s11 + $0x928] sm:$0xff] }
 0x266   : > { %3519 = vmatpush.msra.mxu0 %v563_v40  ;;  %3538 = vmatpush.msra.mxu1 %v597_v62  ;;  %v619_v1 = vld [vmem:[%s4982_s11 + $0xa18] sm:$0xff]  ;;  %v653_v61 = vld [vmem:[%s4982_s11 + $0xb28] sm:$0xff] }
 0x267   : > { %3559 = vmatpush.msra.mxu2 %v627_v0  ;;  %3578 = vmatpush.msra.mxu3 %v661_v63  ;;  %v3206_v6 = vpop.f32.mrf.mxu0  ;;  %v553_v46 = vld [vmem:[%s4982_s11 + $0x808] sm:$0xff]  ;;  %v587_v40 = vld [vmem:[%s4982_s11 + $0x918] sm:$0xff] }
 0x268   : > { %3520 = vmatpush.msra.mxu0 %v561_v4  ;;  %3539 = vmatpush.msra.mxu1 %v595_v56  ;;  %v3207_v58 = vadd.f32 %v3206_v6, %v6222_v49  ;;  %v617_v0 = vld [vmem:[%s4982_s11 + $0xa08] sm:$0xff]  ;;  %v651_v63 = vld [vmem:[%s4982_s11 + $0xb18] sm:$0xff] }
 0x269   : > { %3560 = vmatpush.msra.mxu2 %v625_v2  ;;  %3579 = vmatpush.msra.mxu3 %v659_v3  ;;  %v711_v56 = vld [vmem:[%s4982_s11 + $0xcf8] sm:$0xff] }
 0x26a   : > { %3521 = vmatpush.msra.mxu0 %v559_v5  ;;  %3540 = vmatpush.msra.mxu1 %v593_v28  ;;  %v3226_v45 = vpop.f32.mrf.mxu1  ;;  %v775_v2 = vld [vmem:[%s4982_s11 + $0xef8] sm:$0xff]  ;;  %v585_v5 = vld [vmem:[%s4982_s11 + $0x908] sm:$0xff] }
 0x26b   : > { %3561 = vmatpush.msra.mxu2 %v623_v43  ;;  %3580 = vmatpush.msra.mxu3 %v657_v48  ;;  %v3227_v49 = vadd.f32 %v3226_v45, %v3207_v58  ;;  %v649_v28 = vld [vmem:[%s4982_s11 + $0xb08] sm:$0xff]  ;;  %v743_v48 = vld [vmem:[%s4982_s11 + $0xdf8] sm:$0xff] }
 0x26c   : > { %3522 = vmatpush.msra.mxu0 %v557_v51  ;;  %3541 = vmatpush.msra.mxu1 %v591_v7  ;;  %v709_v43 = vld [vmem:[%s4982_s11 + $0xce8] sm:$0xff]  ;;  %v807_v51 = vld [vmem:[%s4982_s11 + $0xff8] sm:$0xff] }
 0x26d   : > { %3562 = vmatpush.msra.mxu2 %v621_v44  ;;  %3581 = vmatpush.msra.mxu3 %v655_v37  ;;  %v3246_v62 = vpop.f32.mrf.mxu2  ;;  %v773_v58 = vld [vmem:[%s4982_s11 + $0xee8] sm:$0xff]  ;;  %v771_v7 = vld [vmem:[%s4982_s11 + $0xed8] sm:$0xff] }
 0x26e   : > { %3523 = vmatpush.msra.mxu0 %v555_v55  ;;  %3542 = vmatpush.msra.mxu1 %v589_v59  ;;  %v3247_v4 = vadd.f32 %v3246_v62, %v3227_v49  ;;  %v805_v44 = vld [vmem:[%s4982_s11 + $0xfe8] sm:$0xff]  ;;  %v739_v45 = vld [vmem:[%s4982_s11 + $0xdd8] sm:$0xff] }
 0x26f   : > { %3563 = vmatpush.msra.mxu2 %v619_v1  ;;  %3582 = vmatpush.msra.mxu3 %v653_v61  ;;  %v705_v37 = vld [vmem:[%s4982_s11 + $0xcc8] sm:$0xff]  ;;  %v703_v55 = vld [vmem:[%s4982_s11 + $0xcb8] sm:$0xff] }
 0x270   : > { %3524 = vmatpush.msra.mxu0 %v553_v46  ;;  %3543 = vmatpush.msra.mxu1 %v587_v40  ;;  %v3266_v3 = vpop.f32.mrf.mxu3  ;;  %v737_v59 = vld [vmem:[%s4982_s11 + $0xdc8] sm:$0xff]  ;;  %v767_v49 = vld [vmem:[%s4982_s11 + $0xeb8] sm:$0xff] }
 0x271   : > { %3564 = vmatpush.msra.mxu2 %v617_v0  ;;  %3583 = vmatpush.msra.mxu3 %v651_v63  ;;  %v6292_v6 = vadd.f32 %v3266_v3, %v3247_v4  ;;  %v801_v1 = vld [vmem:[%s4982_s11 + $0xfc8] sm:$0xff]  ;;  %v735_v46 = vld [vmem:[%s4982_s11 + $0xdb8] sm:$0xff] }
 0x272   : > { %3525 = vmatmul.f32.vlgmr.msra.gmra.mxu0 %v5180_v29  ;;  %3565 = vmatmul.f32.vlgmr.msra.gmra.mxu2 %v5184_v31  ;;  %v707_v29 = vld [vmem:[%s4982_s11 + $0xcd8] sm:$0xff]  ;;  %v741_v31 = vld [vmem:[%s4982_s11 + $0xde8] sm:$0xff] }
 0x273   : > { %3589 = vmatpush.msrb.mxu0 %v711_v56  ;;  %3629 = vmatpush.msrb.mxu2 %v775_v2  ;;  %v701_v61 = vld [vmem:[%s4982_s11 + $0xca8] sm:$0xff]  ;;  %v799_v62 = vld [vmem:[%s4982_s11 + $0xfb8] sm:$0xff] }
 0x274   : > { %3544 = vmatpush.msra.mxu1 %v585_v5  ;;  %3584 = vmatpush.msra.mxu3 %v649_v28  ;;  %v765_v40 = vld [vmem:[%s4982_s11 + $0xea8] sm:$0xff]  ;;  %v699_v0 = vld [vmem:[%s4982_s11 + $0xc98] sm:$0xff] }
 0x275   : > { %3545 = vmatmul.f32.vlgmr.msra.gmra.mxu1 %v5187_v33  ;;  %3585 = vmatmul.f32.vlgmr.msra.gmra.mxu3 %v5189_v34  ;;  %v769_v33 = vld [vmem:[%s4982_s11 + $0xec8] sm:$0xff]  ;;  %v803_v34 = vld [vmem:[%s4982_s11 + $0xfd8] sm:$0xff] }
 0x276   : > { %3590 = vmatpush.msrb.mxu0 %v709_v43  ;;  %3609 = vmatpush.msrb.mxu1 %v743_v48  ;;  %v733_v63 = vld [vmem:[%s4982_s11 + $0xda8] sm:$0xff]  ;;  %v763_v4 = vld [vmem:[%s4982_s11 + $0xe98] sm:$0xff] }
 0x277   : > { %3630 = vmatpush.msrb.mxu2 %v773_v58  ;;  %3649 = vmatpush.msrb.mxu3 %v807_v51  ;;  %v797_v56 = vld [vmem:[%s4982_s11 + $0xfa8] sm:$0xff]  ;;  %v731_v3 = vld [vmem:[%s4982_s11 + $0xd98] sm:$0xff] }
 0x278   : > { %3591 = vmatpush.msrb.mxu0 %v707_v29  ;;  %3610 = vmatpush.msrb.mxu1 %v741_v31  ;;  %v697_v2 = vld [vmem:[%s4982_s11 + $0xc88] sm:$0xff]  ;;  %v795_v28 = vld [vmem:[%s4982_s11 + $0xf98] sm:$0xff] }
 0x279   : > { %3631 = vmatpush.msrb.mxu2 %v771_v7  ;;  %3650 = vmatpush.msrb.mxu3 %v805_v44  ;;  %v761_v5 = vld [vmem:[%s4982_s11 + $0xe88] sm:$0xff]  ;;  %v695_v43 = vld [vmem:[%s4982_s11 + $0xc78] sm:$0xff] }
 0x27a   : > { %3592 = vmatpush.msrb.mxu0 %v705_v37  ;;  %3611 = vmatpush.msrb.mxu1 %v739_v45  ;;  %v729_v48 = vld [vmem:[%s4982_s11 + $0xd88] sm:$0xff]  ;;  %v759_v58 = vld [vmem:[%s4982_s11 + $0xe78] sm:$0xff] }
 0x27b   : > { %3632 = vmatpush.msrb.mxu2 %v769_v33  ;;  %3651 = vmatpush.msrb.mxu3 %v803_v34  ;;  %v793_v51 = vld [vmem:[%s4982_s11 + $0xf88] sm:$0xff]  ;;  %v727_v31 = vld [vmem:[%s4982_s11 + $0xd78] sm:$0xff] }
 0x27c   : > { %3593 = vmatpush.msrb.mxu0 %v703_v55  ;;  %3612 = vmatpush.msrb.mxu1 %v737_v59  ;;  %v693_v29 = vld [vmem:[%s4982_s11 + $0xc68] sm:$0xff]  ;;  %v791_v44 = vld [vmem:[%s4982_s11 + $0xf78] sm:$0xff] }
 0x27d   : > { %3633 = vmatpush.msrb.mxu2 %v767_v49  ;;  %3652 = vmatpush.msrb.mxu3 %v801_v1  ;;  %v757_v7 = vld [vmem:[%s4982_s11 + $0xe68] sm:$0xff]  ;;  %v691_v37 = vld [vmem:[%s4982_s11 + $0xc58] sm:$0xff] }
 0x27e   : > { %3594 = vmatpush.msrb.mxu0 %v701_v61  ;;  %3613 = vmatpush.msrb.mxu1 %v735_v46  ;;  %v725_v45 = vld [vmem:[%s4982_s11 + $0xd68] sm:$0xff]  ;;  %v755_v33 = vld [vmem:[%s4982_s11 + $0xe58] sm:$0xff] }
 0x27f   : > { %3634 = vmatpush.msrb.mxu2 %v765_v40  ;;  %3653 = vmatpush.msrb.mxu3 %v799_v62  ;;  %v789_v34 = vld [vmem:[%s4982_s11 + $0xf68] sm:$0xff]  ;;  %v723_v59 = vld [vmem:[%s4982_s11 + $0xd58] sm:$0xff] }
 0x280   : > { %3595 = vmatpush.msrb.mxu0 %v699_v0  ;;  %3614 = vmatpush.msrb.mxu1 %v733_v63  ;;  %v689_v55 = vld [vmem:[%s4982_s11 + $0xc48] sm:$0xff]  ;;  %v787_v1 = vld [vmem:[%s4982_s11 + $0xf58] sm:$0xff] }
 0x281   : > { %3635 = vmatpush.msrb.mxu2 %v763_v4  ;;  %3654 = vmatpush.msrb.mxu3 %v797_v56  ;;  %v753_v49 = vld [vmem:[%s4982_s11 + $0xe48] sm:$0xff]  ;;  %v687_v61 = vld [vmem:[%s4982_s11 + $0xc38] sm:$0xff] }
 0x282   : > { %3596 = vmatpush.msrb.mxu0 %v697_v2  ;;  %3615 = vmatpush.msrb.mxu1 %v731_v3  ;;  %v721_v46 = vld [vmem:[%s4982_s11 + $0xd48] sm:$0xff]  ;;  %v751_v62 = vld [vmem:[%s4982_s11 + $0xe38] sm:$0xff] }
 0x283   : > { %3636 = vmatpush.msrb.mxu2 %v761_v5  ;;  %3655 = vmatpush.msrb.mxu3 %v795_v28  ;;  %v785_v0 = vld [vmem:[%s4982_s11 + $0xf48] sm:$0xff]  ;;  %v719_v56 = vld [vmem:[%s4982_s11 + $0xd38] sm:$0xff] }
 0x284   : > { %3597 = vmatpush.msrb.mxu0 %v695_v43  ;;  %3616 = vmatpush.msrb.mxu1 %v729_v48  ;;  %v685_v4 = vld [vmem:[%s4982_s11 + $0xc28] sm:$0xff]  ;;  %v783_v3 = vld [vmem:[%s4982_s11 + $0xf38] sm:$0xff] }
 0x285   : > { %3637 = vmatpush.msrb.mxu2 %v759_v58  ;;  %3656 = vmatpush.msrb.mxu3 %v793_v51  ;;  %v749_v2 = vld [vmem:[%s4982_s11 + $0xe28] sm:$0xff]  ;;  %v683_v28 = vld [vmem:[%s4982_s11 + $0xc18] sm:$0xff] }
 0x286   : > { %3598 = vmatpush.msrb.mxu0 %v693_v29  ;;  %3617 = vmatpush.msrb.mxu1 %v727_v31  ;;  %v717_v43 = vld [vmem:[%s4982_s11 + $0xd28] sm:$0xff]  ;;  %v715_v29 = vld [vmem:[%s4982_s11 + $0xd18] sm:$0xff] }
 0x287   : > { %3638 = vmatpush.msrb.mxu2 %v757_v7  ;;  %3657 = vmatpush.msrb.mxu3 %v791_v44  ;;  %v781_v48 = vld [vmem:[%s4982_s11 + $0xf28] sm:$0xff]  ;;  %v779_v44 = vld [vmem:[%s4982_s11 + $0xf18] sm:$0xff] }
 0x288   : > { %3599 = vmatpush.msrb.mxu0 %v691_v37  ;;  %3618 = vmatpush.msrb.mxu1 %v725_v45  ;;  %v681_v51 = vld [vmem:[%s4982_s11 + $0xc08] sm:$0xff]  ;;  %v839_v45 = vld [vmem:[%s4982_s11 + $0x10f8] sm:$0xff] }
 0x289   : > { %3639 = vmatpush.msrb.mxu2 %v755_v33  ;;  %3658 = vmatpush.msrb.mxu3 %v789_v34  ;;  %v3286_v40 = vpop.f32.mrf.mxu0  ;;  %v745_v7 = vld [vmem:[%s4982_s11 + $0xe08] sm:$0xff]  ;;  %v903_v33 = vld [vmem:[%s4982_s11 + $0x12f8] sm:$0xff] }
 0x28a   : > { %3600 = vmatpush.msrb.mxu0 %v689_v55  ;;  %3619 = vmatpush.msrb.mxu1 %v723_v59  ;;  %v3287_v63 = vadd.f32 %v3286_v40, %v6292_v6  ;;  %v747_v6 = vld [vmem:[%s4982_s11 + $0xe18] sm:$0xff]  ;;  %v713_v55 = vld [vmem:[%s4982_s11 + $0xd08] sm:$0xff] }
 0x28b   : > { %3640 = vmatpush.msrb.mxu2 %v753_v49  ;;  %3659 = vmatpush.msrb.mxu3 %v787_v1  ;;  %v777_v59 = vld [vmem:[%s4982_s11 + $0xf08] sm:$0xff]  ;;  %v935_v40 = vld [vmem:[%s4982_s11 + $0x13f8] sm:$0xff] }
 0x28c   : > { %3601 = vmatpush.msrb.mxu0 %v687_v61  ;;  %3620 = vmatpush.msrb.mxu1 %v721_v46  ;;  %v3306_v5 = vpop.f32.mrf.mxu1  ;;  %v837_v1 = vld [vmem:[%s4982_s11 + $0x10e8] sm:$0xff]  ;;  %v871_v61 = vld [vmem:[%s4982_s11 + $0x11f8] sm:$0xff] }
 0x28d   : > { %3641 = vmatpush.msrb.mxu2 %v751_v62  ;;  %3660 = vmatpush.msrb.mxu3 %v785_v0  ;;  %v3307_v58 = vadd.f32 %v3306_v5, %v3287_v63  ;;  %v901_v46 = vld [vmem:[%s4982_s11 + $0x12e8] sm:$0xff]  ;;  %v899_v62 = vld [vmem:[%s4982_s11 + $0x12d8] sm:$0xff] }
 0x28e   : > { %3602 = vmatpush.msrb.mxu0 %v685_v4  ;;  %3621 = vmatpush.msrb.mxu1 %v719_v56  ;;  %v933_v0 = vld [vmem:[%s4982_s11 + $0x13e8] sm:$0xff]  ;;  %v867_v4 = vld [vmem:[%s4982_s11 + $0x11d8] sm:$0xff] }
 0x28f   : > { %3642 = vmatpush.msrb.mxu2 %v749_v2  ;;  %3661 = vmatpush.msrb.mxu3 %v783_v3  ;;  %v3326_v31 = vpop.f32.mrf.mxu2  ;;  %v833_v63 = vld [vmem:[%s4982_s11 + $0x10c8] sm:$0xff]  ;;  %v831_v56 = vld [vmem:[%s4982_s11 + $0x10b8] sm:$0xff] }
 0x290   : > { %3603 = vmatpush.msrb.mxu0 %v683_v28  ;;  %3622 = vmatpush.msrb.mxu1 %v717_v43  ;;  %v3327_v37 = vadd.f32 %v3326_v31, %v3307_v58  ;;  %v865_v2 = vld [vmem:[%s4982_s11 + $0x11c8] sm:$0xff]  ;;  %v895_v3 = vld [vmem:[%s4982_s11 + $0x12b8] sm:$0xff] }
 0x291   : > { %3643 = vmatpush.msrb.mxu2 %v747_v6  ;;  %3662 = vmatpush.msrb.mxu3 %v781_v48  ;;  %v929_v5 = vld [vmem:[%s4982_s11 + $0x13c8] sm:$0xff]  ;;  %v863_v43 = vld [vmem:[%s4982_s11 + $0x11b8] sm:$0xff] }
 0x292   : > { %3604 = vmatpush.msrb.mxu0 %v681_v51  ;;  %3623 = vmatpush.msrb.mxu1 %v715_v29  ;;  %v3346_v34 = vpop.f32.mrf.mxu3  ;;  %v829_v28 = vld [vmem:[%s4982_s11 + $0x10a8] sm:$0xff]  ;;  %v927_v48 = vld [vmem:[%s4982_s11 + $0x13b8] sm:$0xff] }
 0x293   : > { %3644 = vmatpush.msrb.mxu2 %v745_v7  ;;  %3663 = vmatpush.msrb.mxu3 %v779_v44  ;;  %v6363_v49 = vadd.f32 %v3346_v34, %v3327_v37  ;;  %v893_v6 = vld [vmem:[%s4982_s11 + $0x12a8] sm:$0xff]  ;;  %v827_v58 = vld [vmem:[%s4982_s11 + $0x1098] sm:$0xff] }
 0x294   : > { %3605 = vmatmul.f32.vlgmr.msrb.gmra.mxu0 %v5256_v41  ;;  %3645 = vmatmul.f32.vlgmr.msrb.gmra.mxu2 %v5258_v42  ;;  %v835_v41 = vld [vmem:[%s4982_s11 + $0x10d8] sm:$0xff]  ;;  %v869_v42 = vld [vmem:[%s4982_s11 + $0x11e8] sm:$0xff] }
 0x295   : > { %3669 = vmatpush.msra.mxu0 %v839_v45  ;;  %3709 = vmatpush.msra.mxu2 %v903_v33  ;;  %v861_v51 = vld [vmem:[%s4982_s11 + $0x11a8] sm:$0xff]  ;;  %v891_v29 = vld [vmem:[%s4982_s11 + $0x1298] sm:$0xff] }
 0x296   : > { %3624 = vmatpush.msrb.mxu1 %v713_v55  ;;  %3664 = vmatpush.msrb.mxu3 %v777_v59  ;;  %v925_v31 = vld [vmem:[%s4982_s11 + $0x13a8] sm:$0xff]  ;;  %v859_v44 = vld [vmem:[%s4982_s11 + $0x1198] sm:$0xff] }
 0x297   : > { %3625 = vmatmul.f32.vlgmr.msrb.gmra.mxu1 %v5260_v47  ;;  %3665 = vmatmul.f32.vlgmr.msrb.gmra.mxu3 %v5264_v50  ;;  %v897_v47 = vld [vmem:[%s4982_s11 + $0x12c8] sm:$0xff]  ;;  %v931_v50 = vld [vmem:[%s4982_s11 + $0x13d8] sm:$0xff] }
 0x298   : > { %3670 = vmatpush.msra.mxu0 %v837_v1  ;;  %3689 = vmatpush.msra.mxu1 %v871_v61  ;;  %v825_v7 = vld [vmem:[%s4982_s11 + $0x1088] sm:$0xff]  ;;  %v923_v45 = vld [vmem:[%s4982_s11 + $0x1398] sm:$0xff] }
 0x299   : > { %3710 = vmatpush.msra.mxu2 %v901_v46  ;;  %3729 = vmatpush.msra.mxu3 %v935_v40  ;;  %v889_v37 = vld [vmem:[%s4982_s11 + $0x1288] sm:$0xff]  ;;  %v823_v33 = vld [vmem:[%s4982_s11 + $0x1078] sm:$0xff] }
 0x29a   : > { %3671 = vmatpush.msra.mxu0 %v835_v41  ;;  %3690 = vmatpush.msra.mxu1 %v869_v42  ;;  %v857_v34 = vld [vmem:[%s4982_s11 + $0x1188] sm:$0xff]  ;;  %v887_v55 = vld [vmem:[%s4982_s11 + $0x1278] sm:$0xff] }
 0x29b   : > { %3711 = vmatpush.msra.mxu2 %v899_v62  ;;  %3730 = vmatpush.msra.mxu3 %v933_v0  ;;  %v921_v59 = vld [vmem:[%s4982_s11 + $0x1388] sm:$0xff]  ;;  %v855_v61 = vld [vmem:[%s4982_s11 + $0x1178] sm:$0xff] }
 0x29c   : > { %3672 = vmatpush.msra.mxu0 %v833_v63  ;;  %3691 = vmatpush.msra.mxu1 %v867_v4  ;;  %v821_v1 = vld [vmem:[%s4982_s11 + $0x1068] sm:$0xff]  ;;  %v919_v40 = vld [vmem:[%s4982_s11 + $0x1378] sm:$0xff] }
 0x29d   : > { %3712 = vmatpush.msra.mxu2 %v897_v47  ;;  %3731 = vmatpush.msra.mxu3 %v931_v50  ;;  %v885_v46 = vld [vmem:[%s4982_s11 + $0x1268] sm:$0xff]  ;;  %v819_v41 = vld [vmem:[%s4982_s11 + $0x1058] sm:$0xff] }
 0x29e   : > { %3673 = vmatpush.msra.mxu0 %v831_v56  ;;  %3692 = vmatpush.msra.mxu1 %v865_v2  ;;  %v853_v42 = vld [vmem:[%s4982_s11 + $0x1168] sm:$0xff]  ;;  %v883_v62 = vld [vmem:[%s4982_s11 + $0x1258] sm:$0xff] }
 0x29f   : > { %3713 = vmatpush.msra.mxu2 %v895_v3  ;;  %3732 = vmatpush.msra.mxu3 %v929_v5  ;;  %v917_v0 = vld [vmem:[%s4982_s11 + $0x1368] sm:$0xff]  ;;  %v851_v4 = vld [vmem:[%s4982_s11 + $0x1158] sm:$0xff] }
 0x2a0   : > { %3674 = vmatpush.msra.mxu0 %v829_v28  ;;  %3693 = vmatpush.msra.mxu1 %v863_v43  ;;  %v817_v63 = vld [vmem:[%s4982_s11 + $0x1048] sm:$0xff]  ;;  %v915_v50 = vld [vmem:[%s4982_s11 + $0x1358] sm:$0xff] }
 0x2a1   : > { %3714 = vmatpush.msra.mxu2 %v893_v6  ;;  %3733 = vmatpush.msra.mxu3 %v927_v48  ;;  %v881_v47 = vld [vmem:[%s4982_s11 + $0x1248] sm:$0xff]  ;;  %v815_v56 = vld [vmem:[%s4982_s11 + $0x1038] sm:$0xff] }
 0x2a2   : > { %3675 = vmatpush.msra.mxu0 %v827_v58  ;;  %3694 = vmatpush.msra.mxu1 %v861_v51  ;;  %v849_v2 = vld [vmem:[%s4982_s11 + $0x1148] sm:$0xff]  ;;  %v879_v3 = vld [vmem:[%s4982_s11 + $0x1238] sm:$0xff] }
 0x2a3   : > { %3715 = vmatpush.msra.mxu2 %v891_v29  ;;  %3734 = vmatpush.msra.mxu3 %v925_v31  ;;  %v913_v5 = vld [vmem:[%s4982_s11 + $0x1348] sm:$0xff]  ;;  %v847_v43 = vld [vmem:[%s4982_s11 + $0x1138] sm:$0xff] }
 0x2a4   : > { %3676 = vmatpush.msra.mxu0 %v825_v7  ;;  %3695 = vmatpush.msra.mxu1 %v859_v44  ;;  %v813_v28 = vld [vmem:[%s4982_s11 + $0x1028] sm:$0xff]  ;;  %v911_v48 = vld [vmem:[%s4982_s11 + $0x1338] sm:$0xff] }
 0x2a5   : > { %3716 = vmatpush.msra.mxu2 %v889_v37  ;;  %3735 = vmatpush.msra.mxu3 %v923_v45  ;;  %v877_v6 = vld [vmem:[%s4982_s11 + $0x1228] sm:$0xff]  ;;  %v811_v58 = vld [vmem:[%s4982_s11 + $0x1018] sm:$0xff] }
 0x2a6   : > { %3677 = vmatpush.msra.mxu0 %v823_v33  ;;  %3696 = vmatpush.msra.mxu1 %v857_v34  ;;  %v845_v51 = vld [vmem:[%s4982_s11 + $0x1128] sm:$0xff]  ;;  %v875_v29 = vld [vmem:[%s4982_s11 + $0x1218] sm:$0xff] }
 0x2a7   : > { %3717 = vmatpush.msra.mxu2 %v887_v55  ;;  %3736 = vmatpush.msra.mxu3 %v921_v59  ;;  %v909_v31 = vld [vmem:[%s4982_s11 + $0x1328] sm:$0xff]  ;;  %v843_v44 = vld [vmem:[%s4982_s11 + $0x1118] sm:$0xff] }
 0x2a8   : > { %3678 = vmatpush.msra.mxu0 %v821_v1  ;;  %3697 = vmatpush.msra.mxu1 %v855_v61  ;;  %v809_v7 = vld [vmem:[%s4982_s11 + $0x1008] sm:$0xff]  ;;  %v907_v45 = vld [vmem:[%s4982_s11 + $0x1318] sm:$0xff] }
 0x2a9   : > { %3718 = vmatpush.msra.mxu2 %v885_v46  ;;  %3737 = vmatpush.msra.mxu3 %v919_v40  ;;  %v873_v37 = vld [vmem:[%s4982_s11 + $0x1208] sm:$0xff]  ;;  %v967_v33 = vld [vmem:[%s4982_s11 + $0x14f8] sm:$0xff] }
 0x2aa   : > { %3679 = vmatpush.msra.mxu0 %v819_v41  ;;  %3698 = vmatpush.msra.mxu1 %v853_v42  ;;  %v1031_v34 = vld [vmem:[%s4982_s11 + $0x16f8] sm:$0xff]  ;;  %v841_v55 = vld [vmem:[%s4982_s11 + $0x1108] sm:$0xff] }
 0x2ab   : > { %3719 = vmatpush.msra.mxu2 %v883_v62  ;;  %3738 = vmatpush.msra.mxu3 %v917_v0  ;;  %v905_v59 = vld [vmem:[%s4982_s11 + $0x1308] sm:$0xff]  ;;  %v999_v61 = vld [vmem:[%s4982_s11 + $0x15f8] sm:$0xff] }
 0x2ac   : > { %3680 = vmatpush.msra.mxu0 %v817_v63  ;;  %3699 = vmatpush.msra.mxu1 %v851_v4  ;;  %v965_v1 = vld [vmem:[%s4982_s11 + $0x14e8] sm:$0xff]  ;;  %v1063_v40 = vld [vmem:[%s4982_s11 + $0x17f8] sm:$0xff] }
 0x2ad   : > { %3720 = vmatpush.msra.mxu2 %v881_v47  ;;  %3739 = vmatpush.msra.mxu3 %v915_v50  ;;  %v1029_v46 = vld [vmem:[%s4982_s11 + $0x16e8] sm:$0xff]  ;;  %v1027_v41 = vld [vmem:[%s4982_s11 + $0x16d8] sm:$0xff] }
 0x2ae   : > { %3681 = vmatpush.msra.mxu0 %v815_v56  ;;  %3700 = vmatpush.msra.mxu1 %v849_v2  ;;  %v1061_v42 = vld [vmem:[%s4982_s11 + $0x17e8] sm:$0xff]  ;;  %v995_v0 = vld [vmem:[%s4982_s11 + $0x15d8] sm:$0xff] }
 0x2af   : > { %3721 = vmatpush.msra.mxu2 %v879_v3  ;;  %3740 = vmatpush.msra.mxu3 %v913_v5  ;;  %v961_v62 = vld [vmem:[%s4982_s11 + $0x14c8] sm:$0xff]  ;;  %v959_v63 = vld [vmem:[%s4982_s11 + $0x14b8] sm:$0xff] }
 0x2b0   : > { %3682 = vmatpush.msra.mxu0 %v813_v28  ;;  %3701 = vmatpush.msra.mxu1 %v847_v43  ;;  %v993_v4 = vld [vmem:[%s4982_s11 + $0x15c8] sm:$0xff]  ;;  %v1023_v47 = vld [vmem:[%s4982_s11 + $0x16b8] sm:$0xff] }
 0x2b1   : > { %3722 = vmatpush.msra.mxu2 %v877_v6  ;;  %3741 = vmatpush.msra.mxu3 %v911_v48  ;;  %v1057_v50 = vld [vmem:[%s4982_s11 + $0x17c8] sm:$0xff]  ;;  %v991_v2 = vld [vmem:[%s4982_s11 + $0x15b8] sm:$0xff] }
 0x2b2   : > { %3683 = vmatpush.msra.mxu0 %v811_v58  ;;  %3702 = vmatpush.msra.mxu1 %v845_v51  ;;  %v957_v56 = vld [vmem:[%s4982_s11 + $0x14a8] sm:$0xff]  ;;  %v1055_v5 = vld [vmem:[%s4982_s11 + $0x17b8] sm:$0xff] }
 0x2b3   : > { %3723 = vmatpush.msra.mxu2 %v875_v29  ;;  %3742 = vmatpush.msra.mxu3 %v909_v31  ;;  %v1021_v3 = vld [vmem:[%s4982_s11 + $0x16a8] sm:$0xff]  ;;  %v955_v28 = vld [vmem:[%s4982_s11 + $0x1498] sm:$0xff] }
 0x2b4   : > { %3684 = vmatpush.msra.mxu0 %v809_v7  ;;  %3703 = vmatpush.msra.mxu1 %v843_v44  ;;  %v989_v43 = vld [vmem:[%s4982_s11 + $0x15a8] sm:$0xff]  ;;  %v1019_v6 = vld [vmem:[%s4982_s11 + $0x1698] sm:$0xff] }
 0x2b5   : > { %3724 = vmatpush.msra.mxu2 %v873_v37  ;;  %3743 = vmatpush.msra.mxu3 %v907_v45  ;;  %v1053_v48 = vld [vmem:[%s4982_s11 + $0x17a8] sm:$0xff]  ;;  %v987_v51 = vld [vmem:[%s4982_s11 + $0x1598] sm:$0xff] }
 0x2b6   : > { %3685 = vmatmul.f32.vlgmr.msra.gmra.mxu0 %v5384_v9  ;;  %3725 = vmatmul.f32.vlgmr.msra.gmra.mxu2 %v5386_v10  ;;  %v963_v9 = vld [vmem:[%s4982_s11 + $0x14d8] sm:$0xff]  ;;  %v997_v10 = vld [vmem:[%s4982_s11 + $0x15e8] sm:$0xff] }
 0x2b7   : > { %3749 = vmatpush.msrb.mxu0 %v967_v33  ;;  %3789 = vmatpush.msrb.mxu2 %v1031_v34  ;;  %v953_v58 = vld [vmem:[%s4982_s11 + $0x1488] sm:$0xff]  ;;  %v1051_v31 = vld [vmem:[%s4982_s11 + $0x1798] sm:$0xff] }
 0x2b8   : > { %3704 = vmatpush.msra.mxu1 %v841_v55  ;;  %3744 = vmatpush.msra.mxu3 %v905_v59  ;;  %v1017_v29 = vld [vmem:[%s4982_s11 + $0x1688] sm:$0xff]  ;;  %v951_v7 = vld [vmem:[%s4982_s11 + $0x1478] sm:$0xff] }
 0x2b9   : > { %3705 = vmatmul.f32.vlgmr.msra.gmra.mxu1 %v5394_v15  ;;  %3745 = vmatmul.f32.vlgmr.msra.gmra.mxu3 %v5396_v16  ;;  %v1025_v15 = vld [vmem:[%s4982_s11 + $0x16c8] sm:$0xff]  ;;  %v1059_v16 = vld [vmem:[%s4982_s11 + $0x17d8] sm:$0xff] }
 0x2ba   : > { %3750 = vmatpush.msrb.mxu0 %v965_v1  ;;  %3769 = vmatpush.msrb.mxu1 %v999_v61  ;;  %v985_v44 = vld [vmem:[%s4982_s11 + $0x1588] sm:$0xff]  ;;  %v1015_v37 = vld [vmem:[%s4982_s11 + $0x1678] sm:$0xff] }
 0x2bb   : > { %3790 = vmatpush.msrb.mxu2 %v1029_v46  ;;  %3809 = vmatpush.msrb.mxu3 %v1063_v40  ;;  %v1049_v45 = vld [vmem:[%s4982_s11 + $0x1788] sm:$0xff]  ;;  %v983_v34 = vld [vmem:[%s4982_s11 + $0x1578] sm:$0xff] }
 0x2bc   : > { %3751 = vmatpush.msrb.mxu0 %v963_v9  ;;  %3770 = vmatpush.msrb.mxu1 %v997_v10  ;;  %v949_v33 = vld [vmem:[%s4982_s11 + $0x1468] sm:$0xff]  ;;  %v1047_v59 = vld [vmem:[%s4982_s11 + $0x1778] sm:$0xff] }
 0x2bd   : > { %3791 = vmatpush.msrb.mxu2 %v1027_v41  ;;  %3810 = vmatpush.msrb.mxu3 %v1061_v42  ;;  %v1013_v55 = vld [vmem:[%s4982_s11 + $0x1668] sm:$0xff]  ;;  %v947_v1 = vld [vmem:[%s4982_s11 + $0x1458] sm:$0xff] }
 0x2be   : > { %3752 = vmatpush.msrb.mxu0 %v961_v62  ;;  %3771 = vmatpush.msrb.mxu1 %v995_v0  ;;  %v981_v61 = vld [vmem:[%s4982_s11 + $0x1568] sm:$0xff]  ;;  %v1011_v46 = vld [vmem:[%s4982_s11 + $0x1658] sm:$0xff] }
 0x2bf   : > { %3792 = vmatpush.msrb.mxu2 %v1025_v15  ;;  %3811 = vmatpush.msrb.mxu3 %v1059_v16  ;;  %v1045_v40 = vld [vmem:[%s4982_s11 + $0x1768] sm:$0xff]  ;;  %v979_v10 = vld [vmem:[%s4982_s11 + $0x1558] sm:$0xff] }
 0x2c0   : > { %3753 = vmatpush.msrb.mxu0 %v959_v63  ;;  %3772 = vmatpush.msrb.mxu1 %v993_v4  ;;  %v945_v9 = vld [vmem:[%s4982_s11 + $0x1448] sm:$0xff]  ;;  %v1043_v42 = vld [vmem:[%s4982_s11 + $0x1758] sm:$0xff] }
 0x2c1   : > { %3793 = vmatpush.msrb.mxu2 %v1023_v47  ;;  %3812 = vmatpush.msrb.mxu3 %v1057_v50  ;;  %v1009_v41 = vld [vmem:[%s4982_s11 + $0x1648] sm:$0xff]  ;;  %v943_v62 = vld [vmem:[%s4982_s11 + $0x1438] sm:$0xff] }
 0x2c2   : > { %3754 = vmatpush.msrb.mxu0 %v957_v56  ;;  %3773 = vmatpush.msrb.mxu1 %v991_v2  ;;  %v977_v0 = vld [vmem:[%s4982_s11 + $0x1548] sm:$0xff]  ;;  %v1007_v15 = vld [vmem:[%s4982_s11 + $0x1638] sm:$0xff] }
 0x2c3   : > { %3794 = vmatpush.msrb.mxu2 %v1021_v3  ;;  %3813 = vmatpush.msrb.mxu3 %v1055_v5  ;;  %v1041_v16 = vld [vmem:[%s4982_s11 + $0x1748] sm:$0xff]  ;;  %v975_v4 = vld [vmem:[%s4982_s11 + $0x1538] sm:$0xff] }
 0x2c4   : > { %3755 = vmatpush.msrb.mxu0 %v955_v28  ;;  %3774 = vmatpush.msrb.mxu1 %v989_v43  ;;  %v941_v63 = vld [vmem:[%s4982_s11 + $0x1428] sm:$0xff]  ;;  %v1039_v50 = vld [vmem:[%s4982_s11 + $0x1738] sm:$0xff] }
 0x2c5   : > { %3795 = vmatpush.msrb.mxu2 %v1019_v6  ;;  %3814 = vmatpush.msrb.mxu3 %v1053_v48  ;;  %v1005_v47 = vld [vmem:[%s4982_s11 + $0x1628] sm:$0xff]  ;;  %v939_v56 = vld [vmem:[%s4982_s11 + $0x1418] sm:$0xff] }
 0x2c6   : > { %3756 = vmatpush.msrb.mxu0 %v953_v58  ;;  %3775 = vmatpush.msrb.mxu1 %v987_v51  ;;  %v973_v2 = vld [vmem:[%s4982_s11 + $0x1528] sm:$0xff]  ;;  %v1003_v3 = vld [vmem:[%s4982_s11 + $0x1618] sm:$0xff] }
 0x2c7   : > { %3796 = vmatpush.msrb.mxu2 %v1017_v29  ;;  %3815 = vmatpush.msrb.mxu3 %v1051_v31  ;;  %v1037_v5 = vld [vmem:[%s4982_s11 + $0x1728] sm:$0xff]  ;;  %v971_v43 = vld [vmem:[%s4982_s11 + $0x1518] sm:$0xff] }
 0x2c8   : > { %3757 = vmatpush.msrb.mxu0 %v951_v7  ;;  %3776 = vmatpush.msrb.mxu1 %v985_v44  ;;  %v937_v28 = vld [vmem:[%s4982_s11 + $0x1408] sm:$0xff]  ;;  %v1035_v48 = vld [vmem:[%s4982_s11 + $0x1718] sm:$0xff] }
 0x2c9   : > { %3797 = vmatpush.msrb.mxu2 %v1015_v37  ;;  %3816 = vmatpush.msrb.mxu3 %v1049_v45  ;;  %v1001_v6 = vld [vmem:[%s4982_s11 + $0x1608] sm:$0xff]  ;;  %v1095_v58 = vld [vmem:[%s4982_s11 + $0x18f8] sm:$0xff] }
 0x2ca   : > { %3758 = vmatpush.msrb.mxu0 %v949_v33  ;;  %3777 = vmatpush.msrb.mxu1 %v983_v34  ;;  %v1159_v51 = vld [vmem:[%s4982_s11 + $0x1af8] sm:$0xff]  ;;  %v969_v29 = vld [vmem:[%s4982_s11 + $0x1508] sm:$0xff] }
 0x2cb   : > { %3798 = vmatpush.msrb.mxu2 %v1013_v55  ;;  %3817 = vmatpush.msrb.mxu3 %v1047_v59  ;;  %v1033_v31 = vld [vmem:[%s4982_s11 + $0x1708] sm:$0xff]  ;;  %v1127_v44 = vld [vmem:[%s4982_s11 + $0x19f8] sm:$0xff] }
 0x2cc   : > { %3759 = vmatpush.msrb.mxu0 %v947_v1  ;;  %3778 = vmatpush.msrb.mxu1 %v981_v61  ;;  %v1093_v7 = vld [vmem:[%s4982_s11 + $0x18e8] sm:$0xff]  ;;  %v1191_v45 = vld [vmem:[%s4982_s11 + $0x1bf8] sm:$0xff] }
 0x2cd   : > { %3799 = vmatpush.msrb.mxu2 %v1011_v46  ;;  %3818 = vmatpush.msrb.mxu3 %v1045_v40  ;;  %v1157_v37 = vld [vmem:[%s4982_s11 + $0x1ae8] sm:$0xff]  ;;  %v1155_v33 = vld [vmem:[%s4982_s11 + $0x1ad8] sm:$0xff] }
 0x2ce   : > { %3760 = vmatpush.msrb.mxu0 %v945_v9  ;;  %3779 = vmatpush.msrb.mxu1 %v979_v10  ;;  %v1189_v34 = vld [vmem:[%s4982_s11 + $0x1be8] sm:$0xff]  ;;  %v1123_v59 = vld [vmem:[%s4982_s11 + $0x19d8] sm:$0xff] }
 0x2cf   : > { %3800 = vmatpush.msrb.mxu2 %v1009_v41  ;;  %3819 = vmatpush.msrb.mxu3 %v1043_v42  ;;  %v1089_v55 = vld [vmem:[%s4982_s11 + $0x18c8] sm:$0xff]  ;;  %v1087_v1 = vld [vmem:[%s4982_s11 + $0x18b8] sm:$0xff] }
 0x2d0   : > { %3761 = vmatpush.msrb.mxu0 %v943_v62  ;;  %3780 = vmatpush.msrb.mxu1 %v977_v0  ;;  %v1121_v61 = vld [vmem:[%s4982_s11 + $0x19c8] sm:$0xff]  ;;  %v1151_v46 = vld [vmem:[%s4982_s11 + $0x1ab8] sm:$0xff] }
 0x2d1   : > { %3801 = vmatpush.msrb.mxu2 %v1007_v15  ;;  %3820 = vmatpush.msrb.mxu3 %v1041_v16  ;;  %v1185_v40 = vld [vmem:[%s4982_s11 + $0x1bc8] sm:$0xff]  ;;  %v1119_v10 = vld [vmem:[%s4982_s11 + $0x19b8] sm:$0xff] }
 0x2d2   : > { %3762 = vmatpush.msrb.mxu0 %v941_v63  ;;  %3781 = vmatpush.msrb.mxu1 %v975_v4  ;;  %v1085_v9 = vld [vmem:[%s4982_s11 + $0x18a8] sm:$0xff]  ;;  %v1183_v42 = vld [vmem:[%s4982_s11 + $0x1bb8] sm:$0xff] }
 0x2d3   : > { %3802 = vmatpush.msrb.mxu2 %v1005_v47  ;;  %3821 = vmatpush.msrb.mxu3 %v1039_v50  ;;  %v1149_v41 = vld [vmem:[%s4982_s11 + $0x1aa8] sm:$0xff]  ;;  %v1083_v62 = vld [vmem:[%s4982_s11 + $0x1898] sm:$0xff] }
 0x2d4   : > { %3763 = vmatpush.msrb.mxu0 %v939_v56  ;;  %3782 = vmatpush.msrb.mxu1 %v973_v2  ;;  %v1117_v0 = vld [vmem:[%s4982_s11 + $0x19a8] sm:$0xff]  ;;  %v1147_v15 = vld [vmem:[%s4982_s11 + $0x1a98] sm:$0xff] }
 0x2d5   : > { %3803 = vmatpush.msrb.mxu2 %v1003_v3  ;;  %3822 = vmatpush.msrb.mxu3 %v1037_v5  ;;  %v1181_v16 = vld [vmem:[%s4982_s11 + $0x1ba8] sm:$0xff]  ;;  %v1115_v4 = vld [vmem:[%s4982_s11 + $0x1998] sm:$0xff] }
 0x2d6   : > { %3764 = vmatpush.msrb.mxu0 %v937_v28  ;;  %3783 = vmatpush.msrb.mxu1 %v971_v43  ;;  %v1081_v63 = vld [vmem:[%s4982_s11 + $0x1888] sm:$0xff]  ;;  %v1179_v50 = vld [vmem:[%s4982_s11 + $0x1b98] sm:$0xff] }
 0x2d7   : > { %3804 = vmatpush.msrb.mxu2 %v1001_v6  ;;  %3823 = vmatpush.msrb.mxu3 %v1035_v48  ;;  %v1145_v47 = vld [vmem:[%s4982_s11 + $0x1a88] sm:$0xff]  ;;  %v1079_v56 = vld [vmem:[%s4982_s11 + $0x1878] sm:$0xff] }
 0x2d8   : > { %3765 = vmatmul.f32.vlgmr.msrb.gmra.mxu0 %v5461_v38  ;;  %3805 = vmatmul.f32.vlgmr.msrb.gmra.mxu2 %v5463_v39  ;;  %v1091_v38 = vld [vmem:[%s4982_s11 + $0x18d8] sm:$0xff]  ;;  %v1125_v39 = vld [vmem:[%s4982_s11 + $0x19e8] sm:$0xff] }
 0x2d9   : > { %3829 = vmatpush.msra.mxu0 %v1095_v58  ;;  %3869 = vmatpush.msra.mxu2 %v1159_v51  ;;  %v1113_v2 = vld [vmem:[%s4982_s11 + $0x1988] sm:$0xff]  ;;  %v1143_v3 = vld [vmem:[%s4982_s11 + $0x1a78] sm:$0xff] }
 0x2da   : > { %3784 = vmatpush.msrb.mxu1 %v969_v29  ;;  %3824 = vmatpush.msrb.mxu3 %v1033_v31  ;;  %v1177_v5 = vld [vmem:[%s4982_s11 + $0x1b88] sm:$0xff]  ;;  %v1111_v43 = vld [vmem:[%s4982_s11 + $0x1978] sm:$0xff] }
 0x2db   : > { %3785 = vmatmul.f32.vlgmr.msrb.gmra.mxu1 %v5471_v52  ;;  %3825 = vmatmul.f32.vlgmr.msrb.gmra.mxu3 %v5473_v53  ;;  %v1153_v52 = vld [vmem:[%s4982_s11 + $0x1ac8] sm:$0xff]  ;;  %v1187_v53 = vld [vmem:[%s4982_s11 + $0x1bd8] sm:$0xff] }
 0x2dc   : > { %3830 = vmatpush.msra.mxu0 %v1093_v7  ;;  %3849 = vmatpush.msra.mxu1 %v1127_v44  ;;  %v1077_v28 = vld [vmem:[%s4982_s11 + $0x1868] sm:$0xff]  ;;  %v1175_v48 = vld [vmem:[%s4982_s11 + $0x1b78] sm:$0xff] }
 0x2dd   : > { %3870 = vmatpush.msra.mxu2 %v1157_v37  ;;  %3889 = vmatpush.msra.mxu3 %v1191_v45  ;;  %v1141_v6 = vld [vmem:[%s4982_s11 + $0x1a68] sm:$0xff]  ;;  %v1075_v58 = vld [vmem:[%s4982_s11 + $0x1858] sm:$0xff] }
 0x2de   : > { %3831 = vmatpush.msra.mxu0 %v1091_v38  ;;  %3850 = vmatpush.msra.mxu1 %v1125_v39  ;;  %v1109_v51 = vld [vmem:[%s4982_s11 + $0x1968] sm:$0xff]  ;;  %v1139_v29 = vld [vmem:[%s4982_s11 + $0x1a58] sm:$0xff] }
 0x2df   : > { %3871 = vmatpush.msra.mxu2 %v1155_v33  ;;  %3890 = vmatpush.msra.mxu3 %v1189_v34  ;;  %v1173_v31 = vld [vmem:[%s4982_s11 + $0x1b68] sm:$0xff]  ;;  %v1107_v44 = vld [vmem:[%s4982_s11 + $0x1958] sm:$0xff] }
 0x2e0   : > { %3832 = vmatpush.msra.mxu0 %v1089_v55  ;;  %3851 = vmatpush.msra.mxu1 %v1123_v59  ;;  %v1073_v7 = vld [vmem:[%s4982_s11 + $0x1848] sm:$0xff]  ;;  %v1171_v45 = vld [vmem:[%s4982_s11 + $0x1b58] sm:$0xff] }
 0x2e1   : > { %3872 = vmatpush.msra.mxu2 %v1153_v52  ;;  %3891 = vmatpush.msra.mxu3 %v1187_v53  ;;  %v1137_v37 = vld [vmem:[%s4982_s11 + $0x1a48] sm:$0xff]  ;;  %v1071_v38 = vld [vmem:[%s4982_s11 + $0x1838] sm:$0xff] }
 0x2e2   : > { %3833 = vmatpush.msra.mxu0 %v1087_v1  ;;  %3852 = vmatpush.msra.mxu1 %v1121_v61  ;;  %v1105_v39 = vld [vmem:[%s4982_s11 + $0x1948] sm:$0xff]  ;;  %v1135_v33 = vld [vmem:[%s4982_s11 + $0x1a38] sm:$0xff] }
 0x2e3   : > { %3873 = vmatpush.msra.mxu2 %v1151_v46  ;;  %3892 = vmatpush.msra.mxu3 %v1185_v40  ;;  %v1169_v34 = vld [vmem:[%s4982_s11 + $0x1b48] sm:$0xff]  ;;  %v1103_v59 = vld [vmem:[%s4982_s11 + $0x1938] sm:$0xff] }
 0x2e4   : > { %3834 = vmatpush.msra.mxu0 %v1085_v9  ;;  %3853 = vmatpush.msra.mxu1 %v1119_v10  ;;  %v1069_v55 = vld [vmem:[%s4982_s11 + $0x1828] sm:$0xff]  ;;  %v1167_v53 = vld [vmem:[%s4982_s11 + $0x1b38] sm:$0xff] }
 0x2e5   : > { %3874 = vmatpush.msra.mxu2 %v1149_v41  ;;  %3893 = vmatpush.msra.mxu3 %v1183_v42  ;;  %v1133_v52 = vld [vmem:[%s4982_s11 + $0x1a28] sm:$0xff]  ;;  %v1067_v1 = vld [vmem:[%s4982_s11 + $0x1818] sm:$0xff] }
 0x2e6   : > { %3835 = vmatpush.msra.mxu0 %v1083_v62  ;;  %3854 = vmatpush.msra.mxu1 %v1117_v0  ;;  %v1101_v61 = vld [vmem:[%s4982_s11 + $0x1928] sm:$0xff]  ;;  %v1131_v46 = vld [vmem:[%s4982_s11 + $0x1a18] sm:$0xff] }
 0x2e7   : > { %3875 = vmatpush.msra.mxu2 %v1147_v15  ;;  %3894 = vmatpush.msra.mxu3 %v1181_v16  ;;  %v1165_v40 = vld [vmem:[%s4982_s11 + $0x1b28] sm:$0xff]  ;;  %v1099_v10 = vld [vmem:[%s4982_s11 + $0x1918] sm:$0xff] }
 0x2e8   : > { %3836 = vmatpush.msra.mxu0 %v1081_v63  ;;  %3855 = vmatpush.msra.mxu1 %v1115_v4  ;;  %v1065_v9 = vld [vmem:[%s4982_s11 + $0x1808] sm:$0xff]  ;;  %v1163_v42 = vld [vmem:[%s4982_s11 + $0x1b18] sm:$0xff] }
 0x2e9   : > { %3876 = vmatpush.msra.mxu2 %v1145_v47  ;;  %3895 = vmatpush.msra.mxu3 %v1179_v50  ;;  %v1129_v41 = vld [vmem:[%s4982_s11 + $0x1a08] sm:$0xff]  ;;  %v1223_v62 = vld [vmem:[%s4982_s11 + $0x1cf8] sm:$0xff] }
 0x2ea   : > { %3837 = vmatpush.msra.mxu0 %v1079_v56  ;;  %3856 = vmatpush.msra.mxu1 %v1113_v2  ;;  %v1287_v0 = vld [vmem:[%s4982_s11 + $0x1ef8] sm:$0xff]  ;;  %v1097_v15 = vld [vmem:[%s4982_s11 + $0x1908] sm:$0xff] }
 0x2eb   : > { %3877 = vmatpush.msra.mxu2 %v1143_v3  ;;  %3896 = vmatpush.msra.mxu3 %v1177_v5  ;;  %v1161_v16 = vld [vmem:[%s4982_s11 + $0x1b08] sm:$0xff]  ;;  %v1255_v4 = vld [vmem:[%s4982_s11 + $0x1df8] sm:$0xff] }
 0x2ec   : > { %3838 = vmatpush.msra.mxu0 %v1077_v28  ;;  %3857 = vmatpush.msra.mxu1 %v1111_v43  ;;  %v1221_v63 = vld [vmem:[%s4982_s11 + $0x1ce8] sm:$0xff]  ;;  %v1319_v50 = vld [vmem:[%s4982_s11 + $0x1ff8] sm:$0xff] }
 0x2ed   : > { %3878 = vmatpush.msra.mxu2 %v1141_v6  ;;  %3897 = vmatpush.msra.mxu3 %v1175_v48  ;;  %v1285_v47 = vld [vmem:[%s4982_s11 + $0x1ee8] sm:$0xff]  ;;  %v1283_v56 = vld [vmem:[%s4982_s11 + $0x1ed8] sm:$0xff] }
 0x2ee   : > { %3839 = vmatpush.msra.mxu0 %v1075_v58  ;;  %3858 = vmatpush.msra.mxu1 %v1109_v51  ;;  %v1317_v2 = vld [vmem:[%s4982_s11 + $0x1fe8] sm:$0xff]  ;;  %v1251_v5 = vld [vmem:[%s4982_s11 + $0x1dd8] sm:$0xff] }
 0x2ef   : > { %3879 = vmatpush.msra.mxu2 %v1139_v29  ;;  %3898 = vmatpush.msra.mxu3 %v1173_v31  ;;  %v1217_v3 = vld [vmem:[%s4982_s11 + $0x1cc8] sm:$0xff]  ;;  %v1215_v28 = vld [vmem:[%s4982_s11 + $0x1cb8] sm:$0xff] }
 0x2f0   : > { %3840 = vmatpush.msra.mxu0 %v1073_v7  ;;  %3859 = vmatpush.msra.mxu1 %v1107_v44  ;;  %v1249_v43 = vld [vmem:[%s4982_s11 + $0x1dc8] sm:$0xff]  ;;  %v1279_v6 = vld [vmem:[%s4982_s11 + $0x1eb8] sm:$0xff] }
 0x2f1   : > { %3880 = vmatpush.msra.mxu2 %v1137_v37  ;;  %3899 = vmatpush.msra.mxu3 %v1171_v45  ;;  %v1313_v48 = vld [vmem:[%s4982_s11 + $0x1fc8] sm:$0xff]  ;;  %v1247_v51 = vld [vmem:[%s4982_s11 + $0x1db8] sm:$0xff] }
 0x2f2   : > { %3841 = vmatpush.msra.mxu0 %v1071_v38  ;;  %3860 = vmatpush.msra.mxu1 %v1105_v39  ;;  %v1213_v58 = vld [vmem:[%s4982_s11 + $0x1ca8] sm:$0xff]  ;;  %v1311_v31 = vld [vmem:[%s4982_s11 + $0x1fb8] sm:$0xff] }
 0x2f3   : > { %3881 = vmatpush.msra.mxu2 %v1135_v33  ;;  %3900 = vmatpush.msra.mxu3 %v1169_v34  ;;  %v1277_v29 = vld [vmem:[%s4982_s11 + $0x1ea8] sm:$0xff]  ;;  %v1211_v7 = vld [vmem:[%s4982_s11 + $0x1c98] sm:$0xff] }
 0x2f4   : > { %3842 = vmatpush.msra.mxu0 %v1069_v55  ;;  %3861 = vmatpush.msra.mxu1 %v1103_v59  ;;  %v1245_v44 = vld [vmem:[%s4982_s11 + $0x1da8] sm:$0xff]  ;;  %v1275_v37 = vld [vmem:[%s4982_s11 + $0x1e98] sm:$0xff] }
 0x2f5   : > { %3882 = vmatpush.msra.mxu2 %v1133_v52  ;;  %3901 = vmatpush.msra.mxu3 %v1167_v53  ;;  %v1309_v45 = vld [vmem:[%s4982_s11 + $0x1fa8] sm:$0xff]  ;;  %v1243_v39 = vld [vmem:[%s4982_s11 + $0x1d98] sm:$0xff] }
 0x2f6   : > { %3843 = vmatpush.msra.mxu0 %v1067_v1  ;;  %3862 = vmatpush.msra.mxu1 %v1101_v61  ;;  %v1209_v38 = vld [vmem:[%s4982_s11 + $0x1c88] sm:$0xff]  ;;  %v1307_v34 = vld [vmem:[%s4982_s11 + $0x1f98] sm:$0xff] }
 0x2f7   : > { %3883 = vmatpush.msra.mxu2 %v1131_v46  ;;  %3902 = vmatpush.msra.mxu3 %v1165_v40  ;;  %v1273_v33 = vld [vmem:[%s4982_s11 + $0x1e88] sm:$0xff]  ;;  %v1207_v55 = vld [vmem:[%s4982_s11 + $0x1c78] sm:$0xff] }
 0x2f8   : > { %3844 = vmatpush.msra.mxu0 %v1065_v9  ;;  %3863 = vmatpush.msra.mxu1 %v1099_v10  ;;  %v1241_v59 = vld [vmem:[%s4982_s11 + $0x1d88] sm:$0xff]  ;;  %v1271_v52 = vld [vmem:[%s4982_s11 + $0x1e78] sm:$0xff] }
 0x2f9   : > { %3884 = vmatpush.msra.mxu2 %v1129_v41  ;;  %3903 = vmatpush.msra.mxu3 %v1163_v42  ;;  %v1305_v53 = vld [vmem:[%s4982_s11 + $0x1f88] sm:$0xff]  ;;  %v1239_v61 = vld [vmem:[%s4982_s11 + $0x1d78] sm:$0xff] }
 0x2fa   : > { %3845 = vmatmul.f32.vlgmr.msra.gmra.mxu0 %v5538_v19  ;;  %3885 = vmatmul.f32.vlgmr.msra.gmra.mxu2 %v5540_v20  ;;  %v1219_v19 = vld [vmem:[%s4982_s11 + $0x1cd8] sm:$0xff]  ;;  %v1253_v20 = vld [vmem:[%s4982_s11 + $0x1de8] sm:$0xff] }
 0x2fb   : > { %3909 = vmatpush.msrb.mxu0 %v1223_v62  ;;  %3949 = vmatpush.msrb.mxu2 %v1287_v0  ;;  %v1205_v1 = vld [vmem:[%s4982_s11 + $0x1c68] sm:$0xff]  ;;  %v1303_v40 = vld [vmem:[%s4982_s11 + $0x1f78] sm:$0xff] }
 0x2fc   : > { %3864 = vmatpush.msra.mxu1 %v1097_v15  ;;  %3904 = vmatpush.msra.mxu3 %v1161_v16  ;;  %v1269_v46 = vld [vmem:[%s4982_s11 + $0x1e68] sm:$0xff]  ;;  %v1203_v9 = vld [vmem:[%s4982_s11 + $0x1c58] sm:$0xff] }
 0x2fd   : > { %3865 = vmatmul.f32.vlgmr.msra.gmra.mxu1 %v5548_v25  ;;  %3905 = vmatmul.f32.vlgmr.msra.gmra.mxu3 %v5550_v26  ;;  %v1281_v25 = vld [vmem:[%s4982_s11 + $0x1ec8] sm:$0xff]  ;;  %v1315_v26 = vld [vmem:[%s4982_s11 + $0x1fd8] sm:$0xff] }
 0x2fe   : > { %3910 = vmatpush.msrb.mxu0 %v1221_v63  ;;  %3929 = vmatpush.msrb.mxu1 %v1255_v4  ;;  %v1237_v10 = vld [vmem:[%s4982_s11 + $0x1d68] sm:$0xff]  ;;  %v1267_v41 = vld [vmem:[%s4982_s11 + $0x1e58] sm:$0xff] }
 0x2ff   : > { %3950 = vmatpush.msrb.mxu2 %v1285_v47  ;;  %3969 = vmatpush.msrb.mxu3 %v1319_v50  ;;  %v1301_v42 = vld [vmem:[%s4982_s11 + $0x1f68] sm:$0xff]  ;;  %v1235_v0 = vld [vmem:[%s4982_s11 + $0x1d58] sm:$0xff] }
 0x300   : > { %3911 = vmatpush.msrb.mxu0 %v1219_v19  ;;  %3930 = vmatpush.msrb.mxu1 %v1253_v20  ;;  %v1201_v62 = vld [vmem:[%s4982_s11 + $0x1c48] sm:$0xff]  ;;  %v1299_v16 = vld [vmem:[%s4982_s11 + $0x1f58] sm:$0xff] }
 0x301   : > { %3951 = vmatpush.msrb.mxu2 %v1283_v56  ;;  %3970 = vmatpush.msrb.mxu3 %v1317_v2  ;;  %v1265_v15 = vld [vmem:[%s4982_s11 + $0x1e48] sm:$0xff]  ;;  %v1199_v63 = vld [vmem:[%s4982_s11 + $0x1c38] sm:$0xff] }
 0x302   : > { %3912 = vmatpush.msrb.mxu0 %v1217_v3  ;;  %3931 = vmatpush.msrb.mxu1 %v1251_v5  ;;  %v1233_v4 = vld [vmem:[%s4982_s11 + $0x1d48] sm:$0xff]  ;;  %v1263_v47 = vld [vmem:[%s4982_s11 + $0x1e38] sm:$0xff] }
 0x303   : > { %3952 = vmatpush.msrb.mxu2 %v1281_v25  ;;  %3971 = vmatpush.msrb.mxu3 %v1315_v26  ;;  %v1297_v50 = vld [vmem:[%s4982_s11 + $0x1f48] sm:$0xff]  ;;  %v1231_v20 = vld [vmem:[%s4982_s11 + $0x1d38] sm:$0xff] }
 0x304   : > { %3913 = vmatpush.msrb.mxu0 %v1215_v28  ;;  %3932 = vmatpush.msrb.mxu1 %v1249_v43  ;;  %v1197_v19 = vld [vmem:[%s4982_s11 + $0x1c28] sm:$0xff]  ;;  %v1295_v2 = vld [vmem:[%s4982_s11 + $0x1f38] sm:$0xff] }
 0x305   : > { %3953 = vmatpush.msrb.mxu2 %v1279_v6  ;;  %3972 = vmatpush.msrb.mxu3 %v1313_v48  ;;  %v1261_v56 = vld [vmem:[%s4982_s11 + $0x1e28] sm:$0xff]  ;;  %v1195_v3 = vld [vmem:[%s4982_s11 + $0x1c18] sm:$0xff] }
 0x306   : > { %3914 = vmatpush.msrb.mxu0 %v1213_v58  ;;  %3933 = vmatpush.msrb.mxu1 %v1247_v51  ;;  %v1229_v5 = vld [vmem:[%s4982_s11 + $0x1d28] sm:$0xff]  ;;  %v1259_v25 = vld [vmem:[%s4982_s11 + $0x1e18] sm:$0xff] }
 0x307   : > { %3954 = vmatpush.msrb.mxu2 %v1277_v29  ;;  %3973 = vmatpush.msrb.mxu3 %v1311_v31  ;;  %v1293_v26 = vld [vmem:[%s4982_s11 + $0x1f28] sm:$0xff]  ;;  %v1227_v43 = vld [vmem:[%s4982_s11 + $0x1d18] sm:$0xff] }
 0x308   : > { %3915 = vmatpush.msrb.mxu0 %v1211_v7  ;;  %3934 = vmatpush.msrb.mxu1 %v1245_v44  ;;  %v1193_v28 = vld [vmem:[%s4982_s11 + $0x1c08] sm:$0xff]  ;;  %v1291_v48 = vld [vmem:[%s4982_s11 + $0x1f18] sm:$0xff] }
 0x309   : > { %3955 = vmatpush.msrb.mxu2 %v1275_v37  ;;  %3974 = vmatpush.msrb.mxu3 %v1309_v45  ;;  %v1257_v6 = vld [vmem:[%s4982_s11 + $0x1e08] sm:$0xff]  ;;  %v1351_v58 = vld [vmem:[%s4982_s11 + $0x20f8] sm:$0xff] }
 0x30a   : > { %3916 = vmatpush.msrb.mxu0 %v1209_v38  ;;  %3935 = vmatpush.msrb.mxu1 %v1243_v39  ;;  %v1415_v51 = vld [vmem:[%s4982_s11 + $0x22f8] sm:$0xff]  ;;  %v1225_v29 = vld [vmem:[%s4982_s11 + $0x1d08] sm:$0xff] }
 0x30b   : > { %3956 = vmatpush.msrb.mxu2 %v1273_v33  ;;  %3975 = vmatpush.msrb.mxu3 %v1307_v34  ;;  %v1289_v31 = vld [vmem:[%s4982_s11 + $0x1f08] sm:$0xff]  ;;  %v1383_v44 = vld [vmem:[%s4982_s11 + $0x21f8] sm:$0xff] }
 0x30c   : > { %3917 = vmatpush.msrb.mxu0 %v1207_v55  ;;  %3936 = vmatpush.msrb.mxu1 %v1241_v59  ;;  %v1349_v7 = vld [vmem:[%s4982_s11 + $0x20e8] sm:$0xff]  ;;  %v1447_v45 = vld [vmem:[%s4982_s11 + $0x23f8] sm:$0xff] }
 0x30d   : > { %3957 = vmatpush.msrb.mxu2 %v1271_v52  ;;  %3976 = vmatpush.msrb.mxu3 %v1305_v53  ;;  %v1413_v37 = vld [vmem:[%s4982_s11 + $0x22e8] sm:$0xff]  ;;  %v1411_v38 = vld [vmem:[%s4982_s11 + $0x22d8] sm:$0xff] }
 0x30e   : > { %3918 = vmatpush.msrb.mxu0 %v1205_v1  ;;  %3937 = vmatpush.msrb.mxu1 %v1239_v61  ;;  %v1445_v39 = vld [vmem:[%s4982_s11 + $0x23e8] sm:$0xff]  ;;  %v1379_v34 = vld [vmem:[%s4982_s11 + $0x21d8] sm:$0xff] }
 0x30f   : > { %3958 = vmatpush.msrb.mxu2 %v1269_v46  ;;  %3977 = vmatpush.msrb.mxu3 %v1303_v40  ;;  %v1345_v33 = vld [vmem:[%s4982_s11 + $0x20c8] sm:$0xff]  ;;  %v1343_v55 = vld [vmem:[%s4982_s11 + $0x20b8] sm:$0xff] }
 0x310   : > { %3919 = vmatpush.msrb.mxu0 %v1203_v9  ;;  %3938 = vmatpush.msrb.mxu1 %v1237_v10  ;;  %v1377_v59 = vld [vmem:[%s4982_s11 + $0x21c8] sm:$0xff]  ;;  %v1407_v52 = vld [vmem:[%s4982_s11 + $0x22b8] sm:$0xff] }
 0x311   : > { %3959 = vmatpush.msrb.mxu2 %v1267_v41  ;;  %3978 = vmatpush.msrb.mxu3 %v1301_v42  ;;  %v1441_v53 = vld [vmem:[%s4982_s11 + $0x23c8] sm:$0xff]  ;;  %v1375_v61 = vld [vmem:[%s4982_s11 + $0x21b8] sm:$0xff] }
 0x312   : > { %3920 = vmatpush.msrb.mxu0 %v1201_v62  ;;  %3939 = vmatpush.msrb.mxu1 %v1235_v0  ;;  %v1341_v1 = vld [vmem:[%s4982_s11 + $0x20a8] sm:$0xff]  ;;  %v1439_v40 = vld [vmem:[%s4982_s11 + $0x23b8] sm:$0xff] }
 0x313   : > { %3960 = vmatpush.msrb.mxu2 %v1265_v15  ;;  %3979 = vmatpush.msrb.mxu3 %v1299_v16  ;;  %v1405_v46 = vld [vmem:[%s4982_s11 + $0x22a8] sm:$0xff]  ;;  %v1339_v9 = vld [vmem:[%s4982_s11 + $0x2098] sm:$0xff] }
 0x314   : > { %3921 = vmatpush.msrb.mxu0 %v1199_v63  ;;  %3940 = vmatpush.msrb.mxu1 %v1233_v4  ;;  %v1373_v10 = vld [vmem:[%s4982_s11 + $0x21a8] sm:$0xff]  ;;  %v1403_v41 = vld [vmem:[%s4982_s11 + $0x2298] sm:$0xff] }
 0x315   : > { %3961 = vmatpush.msrb.mxu2 %v1263_v47  ;;  %3980 = vmatpush.msrb.mxu3 %v1297_v50  ;;  %v1437_v42 = vld [vmem:[%s4982_s11 + $0x23a8] sm:$0xff]  ;;  %v1371_v0 = vld [vmem:[%s4982_s11 + $0x2198] sm:$0xff] }
 0x316   : > { %3922 = vmatpush.msrb.mxu0 %v1197_v19  ;;  %3941 = vmatpush.msrb.mxu1 %v1231_v20  ;;  %v1337_v62 = vld [vmem:[%s4982_s11 + $0x2088] sm:$0xff]  ;;  %v1435_v16 = vld [vmem:[%s4982_s11 + $0x2398] sm:$0xff] }
 0x317   : > { %3962 = vmatpush.msrb.mxu2 %v1261_v56  ;;  %3981 = vmatpush.msrb.mxu3 %v1295_v2  ;;  %v1401_v15 = vld [vmem:[%s4982_s11 + $0x2288] sm:$0xff]  ;;  %v1335_v63 = vld [vmem:[%s4982_s11 + $0x2078] sm:$0xff] }
 0x318   : > { %3923 = vmatpush.msrb.mxu0 %v1195_v3  ;;  %3942 = vmatpush.msrb.mxu1 %v1229_v5  ;;  %v1369_v4 = vld [vmem:[%s4982_s11 + $0x2188] sm:$0xff]  ;;  %v1399_v47 = vld [vmem:[%s4982_s11 + $0x2278] sm:$0xff] }
 0x319   : > { %3963 = vmatpush.msrb.mxu2 %v1259_v25  ;;  %3982 = vmatpush.msrb.mxu3 %v1293_v26  ;;  %v1433_v50 = vld [vmem:[%s4982_s11 + $0x2388] sm:$0xff]  ;;  %v1367_v20 = vld [vmem:[%s4982_s11 + $0x2178] sm:$0xff] }
 0x31a   : > { %3924 = vmatpush.msrb.mxu0 %v1193_v28  ;;  %3943 = vmatpush.msrb.mxu1 %v1227_v43  ;;  %v1333_v19 = vld [vmem:[%s4982_s11 + $0x2068] sm:$0xff]  ;;  %v1431_v2 = vld [vmem:[%s4982_s11 + $0x2378] sm:$0xff] }
 0x31b   : > { %3964 = vmatpush.msrb.mxu2 %v1257_v6  ;;  %3983 = vmatpush.msrb.mxu3 %v1291_v48  ;;  %v1397_v56 = vld [vmem:[%s4982_s11 + $0x2268] sm:$0xff]  ;;  %v1331_v3 = vld [vmem:[%s4982_s11 + $0x2058] sm:$0xff] }
 0x31c   : > { %3925 = vmatmul.f32.vlgmr.msrb.gmra.mxu0 %v5615_v35  ;;  %3965 = vmatmul.f32.vlgmr.msrb.gmra.mxu2 %v5617_v36  ;;  %v1347_v35 = vld [vmem:[%s4982_s11 + $0x20d8] sm:$0xff]  ;;  %v1381_v36 = vld [vmem:[%s4982_s11 + $0x21e8] sm:$0xff] }
 0x31d   : > { %3989 = vmatpush.msra.mxu0 %v1351_v58  ;;  %4029 = vmatpush.msra.mxu2 %v1415_v51  ;;  %v1365_v5 = vld [vmem:[%s4982_s11 + $0x2168] sm:$0xff]  ;;  %v1395_v25 = vld [vmem:[%s4982_s11 + $0x2258] sm:$0xff] }
 0x31e   : > { %3944 = vmatpush.msrb.mxu1 %v1225_v29  ;;  %3984 = vmatpush.msrb.mxu3 %v1289_v31  ;;  %v1429_v26 = vld [vmem:[%s4982_s11 + $0x2368] sm:$0xff]  ;;  %v1363_v43 = vld [vmem:[%s4982_s11 + $0x2158] sm:$0xff] }
 0x31f   : > { %3945 = vmatmul.f32.vlgmr.msrb.gmra.mxu1 %v5623_v54  ;;  %3985 = vmatmul.f32.vlgmr.msrb.gmra.mxu3 %v5628_v57  ;;  %v1409_v54 = vld [vmem:[%s4982_s11 + $0x22c8] sm:$0xff]  ;;  %v1443_v57 = vld [vmem:[%s4982_s11 + $0x23d8] sm:$0xff] }
 0x320   : > { %3990 = vmatpush.msra.mxu0 %v1349_v7  ;;  %4009 = vmatpush.msra.mxu1 %v1383_v44  ;;  %v1329_v28 = vld [vmem:[%s4982_s11 + $0x2048] sm:$0xff]  ;;  %v1427_v48 = vld [vmem:[%s4982_s11 + $0x2358] sm:$0xff] }
 0x321   : > { %4030 = vmatpush.msra.mxu2 %v1413_v37  ;;  %4049 = vmatpush.msra.mxu3 %v1447_v45  ;;  %v1393_v6 = vld [vmem:[%s4982_s11 + $0x2248] sm:$0xff]  ;;  %v1327_v58 = vld [vmem:[%s4982_s11 + $0x2038] sm:$0xff] }
 0x322   : > { %3991 = vmatpush.msra.mxu0 %v1347_v35  ;;  %4010 = vmatpush.msra.mxu1 %v1381_v36  ;;  %v1361_v51 = vld [vmem:[%s4982_s11 + $0x2148] sm:$0xff]  ;;  %v1391_v29 = vld [vmem:[%s4982_s11 + $0x2238] sm:$0xff] }
 0x323   : > { %4031 = vmatpush.msra.mxu2 %v1411_v38  ;;  %4050 = vmatpush.msra.mxu3 %v1445_v39  ;;  %v1425_v31 = vld [vmem:[%s4982_s11 + $0x2348] sm:$0xff]  ;;  %v1359_v44 = vld [vmem:[%s4982_s11 + $0x2138] sm:$0xff] }
 0x324   : > { %3992 = vmatpush.msra.mxu0 %v1345_v33  ;;  %4011 = vmatpush.msra.mxu1 %v1379_v34  ;;  %v1325_v7 = vld [vmem:[%s4982_s11 + $0x2028] sm:$0xff]  ;;  %v1423_v45 = vld [vmem:[%s4982_s11 + $0x2338] sm:$0xff] }
 0x325   : > { %4032 = vmatpush.msra.mxu2 %v1409_v54  ;;  %4051 = vmatpush.msra.mxu3 %v1443_v57  ;;  %v1389_v37 = vld [vmem:[%s4982_s11 + $0x2228] sm:$0xff]  ;;  %v1323_v35 = vld [vmem:[%s4982_s11 + $0x2018] sm:$0xff] }
 0x326   : > { %3993 = vmatpush.msra.mxu0 %v1343_v55  ;;  %4012 = vmatpush.msra.mxu1 %v1377_v59  ;;  %v1357_v36 = vld [vmem:[%s4982_s11 + $0x2128] sm:$0xff]  ;;  %v1387_v38 = vld [vmem:[%s4982_s11 + $0x2218] sm:$0xff] }
 0x327   : > { %4033 = vmatpush.msra.mxu2 %v1407_v52  ;;  %4052 = vmatpush.msra.mxu3 %v1441_v53  ;;  %v1421_v39 = vld [vmem:[%s4982_s11 + $0x2328] sm:$0xff]  ;;  %v1355_v34 = vld [vmem:[%s4982_s11 + $0x2118] sm:$0xff] }
 0x328   : > { %3994 = vmatpush.msra.mxu0 %v1341_v1  ;;  %4013 = vmatpush.msra.mxu1 %v1375_v61  ;;  %v1321_v33 = vld [vmem:[%s4982_s11 + $0x2008] sm:$0xff]  ;;  %v1419_v57 = vld [vmem:[%s4982_s11 + $0x2318] sm:$0xff] }
 0x329   : > { %4034 = vmatpush.msra.mxu2 %v1405_v46  ;;  %4053 = vmatpush.msra.mxu3 %v1439_v40  ;;  %v1385_v54 = vld [vmem:[%s4982_s11 + $0x2208] sm:$0xff]  ;;  %v1479_v55 = vld [vmem:[%s4982_s11 + $0x24f8] sm:$0xff] }
 0x32a   : > { %3995 = vmatpush.msra.mxu0 %v1339_v9  ;;  %4014 = vmatpush.msra.mxu1 %v1373_v10  ;;  %v1543_v59 = vld [vmem:[%s4982_s11 + $0x26f8] sm:$0xff]  ;;  %v1353_v52 = vld [vmem:[%s4982_s11 + $0x2108] sm:$0xff] }
 0x32b   : > { %4035 = vmatpush.msra.mxu2 %v1403_v41  ;;  %4054 = vmatpush.msra.mxu3 %v1437_v42  ;;  %v1417_v53 = vld [vmem:[%s4982_s11 + $0x2308] sm:$0xff]  ;;  %v1511_v61 = vld [vmem:[%s4982_s11 + $0x25f8] sm:$0xff] }
 0x32c   : > { %3996 = vmatpush.msra.mxu0 %v1337_v62  ;;  %4015 = vmatpush.msra.mxu1 %v1371_v0  ;;  %v1477_v1 = vld [vmem:[%s4982_s11 + $0x24e8] sm:$0xff]  ;;  %v1575_v40 = vld [vmem:[%s4982_s11 + $0x27f8] sm:$0xff] }
 0x32d   : > { %4036 = vmatpush.msra.mxu2 %v1401_v15  ;;  %4055 = vmatpush.msra.mxu3 %v1435_v16  ;;  %v1541_v46 = vld [vmem:[%s4982_s11 + $0x26e8] sm:$0xff]  ;;  %v1539_v9 = vld [vmem:[%s4982_s11 + $0x26d8] sm:$0xff] }
 0x32e   : > { %3997 = vmatpush.msra.mxu0 %v1335_v63  ;;  %4016 = vmatpush.msra.mxu1 %v1369_v4  ;;  %v1573_v10 = vld [vmem:[%s4982_s11 + $0x27e8] sm:$0xff]  ;;  %v1507_v42 = vld [vmem:[%s4982_s11 + $0x25d8] sm:$0xff] }
 0x32f   : > { %4037 = vmatpush.msra.mxu2 %v1399_v47  ;;  %4056 = vmatpush.msra.mxu3 %v1433_v50  ;;  %v1473_v41 = vld [vmem:[%s4982_s11 + $0x24c8] sm:$0xff]  ;;  %v1471_v62 = vld [vmem:[%s4982_s11 + $0x24b8] sm:$0xff] }
 0x330   : > { %3998 = vmatpush.msra.mxu0 %v1333_v19  ;;  %4017 = vmatpush.msra.mxu1 %v1367_v20  ;;  %v1505_v0 = vld [vmem:[%s4982_s11 + $0x25c8] sm:$0xff]  ;;  %v1535_v15 = vld [vmem:[%s4982_s11 + $0x26b8] sm:$0xff] }
 0x331   : > { %4038 = vmatpush.msra.mxu2 %v1397_v56  ;;  %4057 = vmatpush.msra.mxu3 %v1431_v2  ;;  %v1569_v16 = vld [vmem:[%s4982_s11 + $0x27c8] sm:$0xff]  ;;  %v1503_v4 = vld [vmem:[%s4982_s11 + $0x25b8] sm:$0xff] }
 0x332   : > { %3999 = vmatpush.msra.mxu0 %v1331_v3  ;;  %4018 = vmatpush.msra.mxu1 %v1365_v5  ;;  %v1469_v63 = vld [vmem:[%s4982_s11 + $0x24a8] sm:$0xff]  ;;  %v1567_v50 = vld [vmem:[%s4982_s11 + $0x27b8] sm:$0xff] }
 0x333   : > { %4039 = vmatpush.msra.mxu2 %v1395_v25  ;;  %4058 = vmatpush.msra.mxu3 %v1429_v26  ;;  %v1533_v47 = vld [vmem:[%s4982_s11 + $0x26a8] sm:$0xff]  ;;  %v1467_v19 = vld [vmem:[%s4982_s11 + $0x2498] sm:$0xff] }
 0x334   : > { %4000 = vmatpush.msra.mxu0 %v1329_v28  ;;  %4019 = vmatpush.msra.mxu1 %v1363_v43  ;;  %v1501_v20 = vld [vmem:[%s4982_s11 + $0x25a8] sm:$0xff]  ;;  %v1531_v56 = vld [vmem:[%s4982_s11 + $0x2698] sm:$0xff] }
 0x335   : > { %4040 = vmatpush.msra.mxu2 %v1393_v6  ;;  %4059 = vmatpush.msra.mxu3 %v1427_v48  ;;  %v1565_v2 = vld [vmem:[%s4982_s11 + $0x27a8] sm:$0xff]  ;;  %v1499_v5 = vld [vmem:[%s4982_s11 + $0x2598] sm:$0xff] }
 0x336   : > { %4001 = vmatpush.msra.mxu0 %v1327_v58  ;;  %4020 = vmatpush.msra.mxu1 %v1361_v51  ;;  %v1465_v3 = vld [vmem:[%s4982_s11 + $0x2488] sm:$0xff]  ;;  %v1563_v26 = vld [vmem:[%s4982_s11 + $0x2798] sm:$0xff] }
 0x337   : > { %4041 = vmatpush.msra.mxu2 %v1391_v29  ;;  %4060 = vmatpush.msra.mxu3 %v1425_v31  ;;  %v1529_v25 = vld [vmem:[%s4982_s11 + $0x2688] sm:$0xff]  ;;  %v1463_v28 = vld [vmem:[%s4982_s11 + $0x2478] sm:$0xff] }
 0x338   : > { %4002 = vmatpush.msra.mxu0 %v1325_v7  ;;  %4021 = vmatpush.msra.mxu1 %v1359_v44  ;;  %v1497_v43 = vld [vmem:[%s4982_s11 + $0x2588] sm:$0xff]  ;;  %v1527_v6 = vld [vmem:[%s4982_s11 + $0x2678] sm:$0xff] }
 0x339   : > { %4042 = vmatpush.msra.mxu2 %v1389_v37  ;;  %4061 = vmatpush.msra.mxu3 %v1423_v45  ;;  %v1561_v48 = vld [vmem:[%s4982_s11 + $0x2788] sm:$0xff]  ;;  %v1495_v51 = vld [vmem:[%s4982_s11 + $0x2578] sm:$0xff] }
 0x33a   : > { %4003 = vmatpush.msra.mxu0 %v1323_v35  ;;  %4022 = vmatpush.msra.mxu1 %v1357_v36  ;;  %v1461_v58 = vld [vmem:[%s4982_s11 + $0x2468] sm:$0xff]  ;;  %v1559_v31 = vld [vmem:[%s4982_s11 + $0x2778] sm:$0xff] }
 0x33b   : > { %4043 = vmatpush.msra.mxu2 %v1387_v38  ;;  %4062 = vmatpush.msra.mxu3 %v1421_v39  ;;  %v1525_v29 = vld [vmem:[%s4982_s11 + $0x2668] sm:$0xff]  ;;  %v1459_v7 = vld [vmem:[%s4982_s11 + $0x2458] sm:$0xff] }
 0x33c   : > { %4004 = vmatpush.msra.mxu0 %v1321_v33  ;;  %4023 = vmatpush.msra.mxu1 %v1355_v34  ;;  %v1493_v44 = vld [vmem:[%s4982_s11 + $0x2568] sm:$0xff]  ;;  %v1523_v37 = vld [vmem:[%s4982_s11 + $0x2658] sm:$0xff] }
 0x33d   : > { %4044 = vmatpush.msra.mxu2 %v1385_v54  ;;  %4063 = vmatpush.msra.mxu3 %v1419_v57  ;;  %v1557_v45 = vld [vmem:[%s4982_s11 + $0x2768] sm:$0xff]  ;;  %v1491_v36 = vld [vmem:[%s4982_s11 + $0x2558] sm:$0xff] }
 0x33e   : > { %4005 = vmatmul.f32.vlgmr.msra.gmra.mxu0 %v5640_v8  ;;  %4045 = vmatmul.f32.vlgmr.msra.gmra.mxu2 %v5642_v11  ;;  %v1475_v8 = vld [vmem:[%s4982_s11 + $0x24d8] sm:$0xff]  ;;  %v1509_v11 = vld [vmem:[%s4982_s11 + $0x25e8] sm:$0xff] }
 0x33f   : > { %4069 = vmatpush.msrb.mxu0 %v1479_v55  ;;  %4109 = vmatpush.msrb.mxu2 %v1543_v59  ;;  %v1457_v35 = vld [vmem:[%s4982_s11 + $0x2448] sm:$0xff]  ;;  %v1555_v39 = vld [vmem:[%s4982_s11 + $0x2758] sm:$0xff] }
 0x340   : > { %4024 = vmatpush.msra.mxu1 %v1353_v52  ;;  %4064 = vmatpush.msra.mxu3 %v1417_v53  ;;  %v1521_v38 = vld [vmem:[%s4982_s11 + $0x2648] sm:$0xff]  ;;  %v1455_v33 = vld [vmem:[%s4982_s11 + $0x2438] sm:$0xff] }
 0x341   : > { %4025 = vmatmul.f32.vlgmr.msra.gmra.mxu1 %v5644_v13  ;;  %4065 = vmatmul.f32.vlgmr.msra.gmra.mxu3 %v5646_v14  ;;  %v1537_v13 = vld [vmem:[%s4982_s11 + $0x26c8] sm:$0xff]  ;;  %v1571_v14 = vld [vmem:[%s4982_s11 + $0x27d8] sm:$0xff] }
 0x342   : > { %4070 = vmatpush.msrb.mxu0 %v1477_v1  ;;  %4089 = vmatpush.msrb.mxu1 %v1511_v61  ;;  %v1489_v34 = vld [vmem:[%s4982_s11 + $0x2548] sm:$0xff]  ;;  %v1519_v54 = vld [vmem:[%s4982_s11 + $0x2638] sm:$0xff] }
 0x343   : > { %4110 = vmatpush.msrb.mxu2 %v1541_v46  ;;  %4129 = vmatpush.msrb.mxu3 %v1575_v40  ;;  %v1553_v57 = vld [vmem:[%s4982_s11 + $0x2748] sm:$0xff]  ;;  %v1487_v59 = vld [vmem:[%s4982_s11 + $0x2538] sm:$0xff] }
 0x344   : > { %4071 = vmatpush.msrb.mxu0 %v1475_v8  ;;  %4090 = vmatpush.msrb.mxu1 %v1509_v11  ;;  %v1453_v55 = vld [vmem:[%s4982_s11 + $0x2428] sm:$0xff]  ;;  %v1551_v53 = vld [vmem:[%s4982_s11 + $0x2738] sm:$0xff] }
 0x345   : > { %4111 = vmatpush.msrb.mxu2 %v1539_v9  ;;  %4130 = vmatpush.msrb.mxu3 %v1573_v10  ;;  %v1517_v52 = vld [vmem:[%s4982_s11 + $0x2628] sm:$0xff]  ;;  %v1451_v1 = vld [vmem:[%s4982_s11 + $0x2418] sm:$0xff] }
 0x346   : > { %4072 = vmatpush.msrb.mxu0 %v1473_v41  ;;  %4091 = vmatpush.msrb.mxu1 %v1507_v42  ;;  %v1485_v61 = vld [vmem:[%s4982_s11 + $0x2528] sm:$0xff]  ;;  %v1515_v46 = vld [vmem:[%s4982_s11 + $0x2618] sm:$0xff] }
 0x347   : > { %4112 = vmatpush.msrb.mxu2 %v1537_v13  ;;  %4131 = vmatpush.msrb.mxu3 %v1571_v14  ;;  %v1549_v40 = vld [vmem:[%s4982_s11 + $0x2728] sm:$0xff]  ;;  %v1483_v11 = vld [vmem:[%s4982_s11 + $0x2518] sm:$0xff] }
 0x348   : > { %4073 = vmatpush.msrb.mxu0 %v1471_v62  ;;  %4092 = vmatpush.msrb.mxu1 %v1505_v0  ;;  %v1449_v8 = vld [vmem:[%s4982_s11 + $0x2408] sm:$0xff]  ;;  %v1547_v10 = vld [vmem:[%s4982_s11 + $0x2718] sm:$0xff] }
 0x349   : > { %4113 = vmatpush.msrb.mxu2 %v1535_v15  ;;  %4132 = vmatpush.msrb.mxu3 %v1569_v16  ;;  %v1513_v9 = vld [vmem:[%s4982_s11 + $0x2608] sm:$0xff]  ;;  %v1607_v41 = vld [vmem:[%s4982_s11 + $0x28f8] sm:$0xff] }
 0x34a   : > { %4074 = vmatpush.msrb.mxu0 %v1469_v63  ;;  %4093 = vmatpush.msrb.mxu1 %v1503_v4  ;;  %v1671_v42 = vld [vmem:[%s4982_s11 + $0x2af8] sm:$0xff]  ;;  %v1481_v13 = vld [vmem:[%s4982_s11 + $0x2508] sm:$0xff] }
 0x34b   : > { %4114 = vmatpush.msrb.mxu2 %v1533_v47  ;;  %4133 = vmatpush.msrb.mxu3 %v1567_v50  ;;  %v1545_v14 = vld [vmem:[%s4982_s11 + $0x2708] sm:$0xff]  ;;  %v1639_v0 = vld [vmem:[%s4982_s11 + $0x29f8] sm:$0xff] }
 0x34c   : > { %4075 = vmatpush.msrb.mxu0 %v1467_v19  ;;  %4094 = vmatpush.msrb.mxu1 %v1501_v20  ;;  %v1605_v62 = vld [vmem:[%s4982_s11 + $0x28e8] sm:$0xff]  ;;  %v1703_v16 = vld [vmem:[%s4982_s11 + $0x2bf8] sm:$0xff] }
 0x34d   : > { %4115 = vmatpush.msrb.mxu2 %v1531_v56  ;;  %4134 = vmatpush.msrb.mxu3 %v1565_v2  ;;  %v1669_v15 = vld [vmem:[%s4982_s11 + $0x2ae8] sm:$0xff]  ;;  %v1667_v63 = vld [vmem:[%s4982_s11 + $0x2ad8] sm:$0xff] }
 0x34e   : > { %4076 = vmatpush.msrb.mxu0 %v1465_v3  ;;  %4095 = vmatpush.msrb.mxu1 %v1499_v5  ;;  %v1701_v4 = vld [vmem:[%s4982_s11 + $0x2be8] sm:$0xff]  ;;  %v1635_v50 = vld [vmem:[%s4982_s11 + $0x29d8] sm:$0xff] }
 0x34f   : > { %4116 = vmatpush.msrb.mxu2 %v1529_v25  ;;  %4135 = vmatpush.msrb.mxu3 %v1563_v26  ;;  %v1601_v47 = vld [vmem:[%s4982_s11 + $0x28c8] sm:$0xff]  ;;  %v1599_v19 = vld [vmem:[%s4982_s11 + $0x28b8] sm:$0xff] }
 0x350   : > { %4077 = vmatpush.msrb.mxu0 %v1463_v28  ;;  %4096 = vmatpush.msrb.mxu1 %v1497_v43  ;;  %v1633_v20 = vld [vmem:[%s4982_s11 + $0x29c8] sm:$0xff]  ;;  %v1663_v56 = vld [vmem:[%s4982_s11 + $0x2ab8] sm:$0xff] }
 0x351   : > { %4117 = vmatpush.msrb.mxu2 %v1527_v6  ;;  %4136 = vmatpush.msrb.mxu3 %v1561_v48  ;;  %v1697_v2 = vld [vmem:[%s4982_s11 + $0x2bc8] sm:$0xff]  ;;  %v1631_v5 = vld [vmem:[%s4982_s11 + $0x29b8] sm:$0xff] }
 0x352   : > { %4078 = vmatpush.msrb.mxu0 %v1461_v58  ;;  %4097 = vmatpush.msrb.mxu1 %v1495_v51  ;;  %v1597_v3 = vld [vmem:[%s4982_s11 + $0x28a8] sm:$0xff]  ;;  %v1695_v26 = vld [vmem:[%s4982_s11 + $0x2bb8] sm:$0xff] }
 0x353   : > { %4118 = vmatpush.msrb.mxu2 %v1525_v29  ;;  %4137 = vmatpush.msrb.mxu3 %v1559_v31  ;;  %v1661_v25 = vld [vmem:[%s4982_s11 + $0x2aa8] sm:$0xff]  ;;  %v1595_v28 = vld [vmem:[%s4982_s11 + $0x2898] sm:$0xff] }
 0x354   : > { %4079 = vmatpush.msrb.mxu0 %v1459_v7  ;;  %4098 = vmatpush.msrb.mxu1 %v1493_v44  ;;  %v1629_v43 = vld [vmem:[%s4982_s11 + $0x29a8] sm:$0xff]  ;;  %v1659_v6 = vld [vmem:[%s4982_s11 + $0x2a98] sm:$0xff] }
 0x355   : > { %4119 = vmatpush.msrb.mxu2 %v1523_v37  ;;  %4138 = vmatpush.msrb.mxu3 %v1557_v45  ;;  %v1693_v48 = vld [vmem:[%s4982_s11 + $0x2ba8] sm:$0xff]  ;;  %v1627_v51 = vld [vmem:[%s4982_s11 + $0x2998] sm:$0xff] }
 0x356   : > { %4080 = vmatpush.msrb.mxu0 %v1457_v35  ;;  %4099 = vmatpush.msrb.mxu1 %v1491_v36  ;;  %v1593_v58 = vld [vmem:[%s4982_s11 + $0x2888] sm:$0xff]  ;;  %v1691_v31 = vld [vmem:[%s4982_s11 + $0x2b98] sm:$0xff] }
 0x357   : > { %4120 = vmatpush.msrb.mxu2 %v1521_v38  ;;  %4139 = vmatpush.msrb.mxu3 %v1555_v39  ;;  %v1657_v29 = vld [vmem:[%s4982_s11 + $0x2a88] sm:$0xff]  ;;  %v1591_v7 = vld [vmem:[%s4982_s11 + $0x2878] sm:$0xff] }
 0x358   : > { %4081 = vmatpush.msrb.mxu0 %v1455_v33  ;;  %4100 = vmatpush.msrb.mxu1 %v1489_v34  ;;  %v1625_v44 = vld [vmem:[%s4982_s11 + $0x2988] sm:$0xff]  ;;  %v1655_v37 = vld [vmem:[%s4982_s11 + $0x2a78] sm:$0xff] }
 0x359   : > { %4121 = vmatpush.msrb.mxu2 %v1519_v54  ;;  %4140 = vmatpush.msrb.mxu3 %v1553_v57  ;;  %v1689_v45 = vld [vmem:[%s4982_s11 + $0x2b88] sm:$0xff]  ;;  %v1623_v36 = vld [vmem:[%s4982_s11 + $0x2978] sm:$0xff] }
 0x35a   : > { %4082 = vmatpush.msrb.mxu0 %v1453_v55  ;;  %4101 = vmatpush.msrb.mxu1 %v1487_v59  ;;  %v1589_v35 = vld [vmem:[%s4982_s11 + $0x2868] sm:$0xff]  ;;  %v1687_v39 = vld [vmem:[%s4982_s11 + $0x2b78] sm:$0xff] }
 0x35b   : > { %4122 = vmatpush.msrb.mxu2 %v1517_v52  ;;  %4141 = vmatpush.msrb.mxu3 %v1551_v53  ;;  %v1653_v38 = vld [vmem:[%s4982_s11 + $0x2a68] sm:$0xff]  ;;  %v1587_v33 = vld [vmem:[%s4982_s11 + $0x2858] sm:$0xff] }
 0x35c   : > { %4083 = vmatpush.msrb.mxu0 %v1451_v1  ;;  %4102 = vmatpush.msrb.mxu1 %v1485_v61  ;;  %v1621_v34 = vld [vmem:[%s4982_s11 + $0x2968] sm:$0xff]  ;;  %v1651_v54 = vld [vmem:[%s4982_s11 + $0x2a58] sm:$0xff] }
 0x35d   : > { %4123 = vmatpush.msrb.mxu2 %v1515_v46  ;;  %4142 = vmatpush.msrb.mxu3 %v1549_v40  ;;  %v1685_v57 = vld [vmem:[%s4982_s11 + $0x2b68] sm:$0xff]  ;;  %v1619_v59 = vld [vmem:[%s4982_s11 + $0x2958] sm:$0xff] }
 0x35e   : > { %4084 = vmatpush.msrb.mxu0 %v1449_v8  ;;  %4103 = vmatpush.msrb.mxu1 %v1483_v11  ;;  %v1585_v55 = vld [vmem:[%s4982_s11 + $0x2848] sm:$0xff]  ;;  %v1683_v53 = vld [vmem:[%s4982_s11 + $0x2b58] sm:$0xff] }
 0x35f   : > { %4124 = vmatpush.msrb.mxu2 %v1513_v9  ;;  %4143 = vmatpush.msrb.mxu3 %v1547_v10  ;;  %v1649_v52 = vld [vmem:[%s4982_s11 + $0x2a48] sm:$0xff]  ;;  %v1583_v1 = vld [vmem:[%s4982_s11 + $0x2838] sm:$0xff] }
 0x360   : > { %4085 = vmatmul.f32.vlgmr.msrb.gmra.mxu0 %v5720_v18  ;;  %4125 = vmatmul.f32.vlgmr.msrb.gmra.mxu2 %v5722_v21  ;;  %v1603_v18 = vld [vmem:[%s4982_s11 + $0x28d8] sm:$0xff]  ;;  %v1637_v21 = vld [vmem:[%s4982_s11 + $0x29e8] sm:$0xff] }
 0x361   : > { %4149 = vmatpush.msra.mxu0 %v1607_v41  ;;  %4189 = vmatpush.msra.mxu2 %v1671_v42  ;;  %v1617_v61 = vld [vmem:[%s4982_s11 + $0x2948] sm:$0xff]  ;;  %v1647_v46 = vld [vmem:[%s4982_s11 + $0x2a38] sm:$0xff] }
 0x362   : > { %4104 = vmatpush.msrb.mxu1 %v1481_v13  ;;  %4144 = vmatpush.msrb.mxu3 %v1545_v14  ;;  %v1681_v40 = vld [vmem:[%s4982_s11 + $0x2b48] sm:$0xff]  ;;  %v1615_v11 = vld [vmem:[%s4982_s11 + $0x2938] sm:$0xff] }
 0x363   : > { %4105 = vmatmul.f32.vlgmr.msrb.gmra.mxu1 %v5724_v22  ;;  %4145 = vmatmul.f32.vlgmr.msrb.gmra.mxu3 %v5726_v23  ;;  %v1665_v22 = vld [vmem:[%s4982_s11 + $0x2ac8] sm:$0xff]  ;;  %v1699_v23 = vld [vmem:[%s4982_s11 + $0x2bd8] sm:$0xff] }
 0x364   : > { %4150 = vmatpush.msra.mxu0 %v1605_v62  ;;  %4169 = vmatpush.msra.mxu1 %v1639_v0  ;;  %v1581_v8 = vld [vmem:[%s4982_s11 + $0x2828] sm:$0xff]  ;;  %v1679_v10 = vld [vmem:[%s4982_s11 + $0x2b38] sm:$0xff] }
 0x365   : > { %4190 = vmatpush.msra.mxu2 %v1669_v15  ;;  %4209 = vmatpush.msra.mxu3 %v1703_v16  ;;  %v1645_v9 = vld [vmem:[%s4982_s11 + $0x2a28] sm:$0xff]  ;;  %v1579_v41 = vld [vmem:[%s4982_s11 + $0x2818] sm:$0xff] }
 0x366   : > { %4151 = vmatpush.msra.mxu0 %v1603_v18  ;;  %4170 = vmatpush.msra.mxu1 %v1637_v21  ;;  %v1613_v42 = vld [vmem:[%s4982_s11 + $0x2928] sm:$0xff]  ;;  %v1643_v13 = vld [vmem:[%s4982_s11 + $0x2a18] sm:$0xff] }
 0x367   : > { %4191 = vmatpush.msra.mxu2 %v1667_v63  ;;  %4210 = vmatpush.msra.mxu3 %v1701_v4  ;;  %v1677_v14 = vld [vmem:[%s4982_s11 + $0x2b28] sm:$0xff]  ;;  %v1611_v0 = vld [vmem:[%s4982_s11 + $0x2918] sm:$0xff] }
 0x368   : > { %4152 = vmatpush.msra.mxu0 %v1601_v47  ;;  %4171 = vmatpush.msra.mxu1 %v1635_v50  ;;  %v1577_v62 = vld [vmem:[%s4982_s11 + $0x2808] sm:$0xff]  ;;  %v1675_v16 = vld [vmem:[%s4982_s11 + $0x2b18] sm:$0xff] }
 0x369   : > { %4192 = vmatpush.msra.mxu2 %v1665_v22  ;;  %4211 = vmatpush.msra.mxu3 %v1699_v23  ;;  %v1641_v15 = vld [vmem:[%s4982_s11 + $0x2a08] sm:$0xff]  ;;  %v1735_v18 = vld [vmem:[%s4982_s11 + $0x2cf8] sm:$0xff] }
 0x36a   : > { %4153 = vmatpush.msra.mxu0 %v1599_v19  ;;  %4172 = vmatpush.msra.mxu1 %v1633_v20  ;;  %v1799_v21 = vld [vmem:[%s4982_s11 + $0x2ef8] sm:$0xff]  ;;  %v1609_v63 = vld [vmem:[%s4982_s11 + $0x2908] sm:$0xff]  ;;  %v7112_v19 = vld [vmem:[#allocation7_spill] sm:$0xff] }
 0x36b   : > { %4193 = vmatpush.msra.mxu2 %v1663_v56  ;;  %4212 = vmatpush.msra.mxu3 %v1697_v2  ;;  %v1673_v4 = vld [vmem:[%s4982_s11 + $0x2b08] sm:$0xff]  ;;  %v1767_v50 = vld [vmem:[%s4982_s11 + $0x2df8] sm:$0xff] }
 0x36c   : > { %4154 = vmatpush.msra.mxu0 %v1597_v3  ;;  %4173 = vmatpush.msra.mxu1 %v1631_v5  ;;  %v1733_v47 = vld [vmem:[%s4982_s11 + $0x2ce8] sm:$0xff]  ;;  %v1831_v23 = vld [vmem:[%s4982_s11 + $0x2ff8] sm:$0xff] }
 0x36d   : > { %4194 = vmatpush.msra.mxu2 %v1661_v25  ;;  %4213 = vmatpush.msra.mxu3 %v1695_v26  ;;  %v1797_v22 = vld [vmem:[%s4982_s11 + $0x2ee8] sm:$0xff]  ;;  %v1795_v20 = vld [vmem:[%s4982_s11 + $0x2ed8] sm:$0xff] }
 0x36e   : > { %4155 = vmatpush.msra.mxu0 %v1595_v28  ;;  %4174 = vmatpush.msra.mxu1 %v1629_v43  ;;  %v1829_v56 = vld [vmem:[%s4982_s11 + $0x2fe8] sm:$0xff]  ;;  %v1763_v3 = vld [vmem:[%s4982_s11 + $0x2dd8] sm:$0xff] }
 0x36f   : > { %4195 = vmatpush.msra.mxu2 %v1659_v6  ;;  %4214 = vmatpush.msra.mxu3 %v1693_v48  ;;  %v1729_v2 = vld [vmem:[%s4982_s11 + $0x2cc8] sm:$0xff]  ;;  %v1827_v5 = vld [vmem:[%s4982_s11 + $0x2fd8] sm:$0xff] }
 0x370   : > { %4156 = vmatpush.msra.mxu0 %v1593_v58  ;;  %4175 = vmatpush.msra.mxu1 %v1627_v51  ;;  %v1727_v25 = vld [vmem:[%s4982_s11 + $0x2cb8] sm:$0xff]  ;;  %v1761_v26 = vld [vmem:[%s4982_s11 + $0x2dc8] sm:$0xff] }
 0x371   : > { %4196 = vmatpush.msra.mxu2 %v1657_v29  ;;  %4215 = vmatpush.msra.mxu3 %v1691_v31  ;;  %v1791_v28 = vld [vmem:[%s4982_s11 + $0x2eb8] sm:$0xff]  ;;  %v1825_v43 = vld [vmem:[%s4982_s11 + $0x2fc8] sm:$0xff] }
 0x372   : > { %4157 = vmatpush.msra.mxu0 %v1591_v7  ;;  %4176 = vmatpush.msra.mxu1 %v1625_v44  ;;  %v1725_v6 = vld [vmem:[%s4982_s11 + $0x2ca8] sm:$0xff]  ;;  %v1759_v48 = vld [vmem:[%s4982_s11 + $0x2db8] sm:$0xff] }
 0x373   : > { %4197 = vmatpush.msra.mxu2 %v1655_v37  ;;  %4216 = vmatpush.msra.mxu3 %v1689_v45  ;;  %v1789_v58 = vld [vmem:[%s4982_s11 + $0x2ea8] sm:$0xff]  ;;  %v1823_v51 = vld [vmem:[%s4982_s11 + $0x2fb8] sm:$0xff] }
 0x374   : > { %4158 = vmatpush.msra.mxu0 %v1589_v35  ;;  %4177 = vmatpush.msra.mxu1 %v1623_v36  ;;  %v1723_v29 = vld [vmem:[%s4982_s11 + $0x2c98] sm:$0xff]  ;;  %v1757_v31 = vld [vmem:[%s4982_s11 + $0x2da8] sm:$0xff] }
 0x375   : > { %4198 = vmatpush.msra.mxu2 %v1653_v38  ;;  %4217 = vmatpush.msra.mxu3 %v1687_v39  ;;  %v1787_v7 = vld [vmem:[%s4982_s11 + $0x2e98] sm:$0xff]  ;;  %v1821_v44 = vld [vmem:[%s4982_s11 + $0x2fa8] sm:$0xff] }
 0x376   : > { %4159 = vmatpush.msra.mxu0 %v1587_v33  ;;  %4178 = vmatpush.msra.mxu1 %v1621_v34  ;;  %v1721_v37 = vld [vmem:[%s4982_s11 + $0x2c88] sm:$0xff]  ;;  %v1755_v45 = vld [vmem:[%s4982_s11 + $0x2d98] sm:$0xff] }
 0x377   : > { %4199 = vmatpush.msra.mxu2 %v1651_v54  ;;  %4218 = vmatpush.msra.mxu3 %v1685_v57  ;;  %v1785_v35 = vld [vmem:[%s4982_s11 + $0x2e88] sm:$0xff]  ;;  %v1819_v36 = vld [vmem:[%s4982_s11 + $0x2f98] sm:$0xff] }
 0x378   : > { %4160 = vmatpush.msra.mxu0 %v1585_v55  ;;  %4179 = vmatpush.msra.mxu1 %v1619_v59  ;;  %v1719_v38 = vld [vmem:[%s4982_s11 + $0x2c78] sm:$0xff]  ;;  %v1753_v39 = vld [vmem:[%s4982_s11 + $0x2d88] sm:$0xff] }
 0x379   : > { %4200 = vmatpush.msra.mxu2 %v1649_v52  ;;  %4219 = vmatpush.msra.mxu3 %v1683_v53  ;;  %v1783_v33 = vld [vmem:[%s4982_s11 + $0x2e78] sm:$0xff]  ;;  %v1817_v34 = vld [vmem:[%s4982_s11 + $0x2f88] sm:$0xff] }
 0x37a   : > { %4161 = vmatpush.msra.mxu0 %v1583_v1  ;;  %4180 = vmatpush.msra.mxu1 %v1617_v61  ;;  %v1717_v54 = vld [vmem:[%s4982_s11 + $0x2c68] sm:$0xff]  ;;  %v1751_v57 = vld [vmem:[%s4982_s11 + $0x2d78] sm:$0xff] }
 0x37b   : > { %4201 = vmatpush.msra.mxu2 %v1647_v46  ;;  %4220 = vmatpush.msra.mxu3 %v1681_v40  ;;  %v1781_v55 = vld [vmem:[%s4982_s11 + $0x2e68] sm:$0xff]  ;;  %v1815_v59 = vld [vmem:[%s4982_s11 + $0x2f78] sm:$0xff] }
 0x37c   : > { %4162 = vmatpush.msra.mxu0 %v1581_v8  ;;  %4181 = vmatpush.msra.mxu1 %v1615_v11  ;;  %v1715_v52 = vld [vmem:[%s4982_s11 + $0x2c58] sm:$0xff]  ;;  %v1749_v53 = vld [vmem:[%s4982_s11 + $0x2d68] sm:$0xff] }
 0x37d   : > { %4202 = vmatpush.msra.mxu2 %v1645_v9  ;;  %4221 = vmatpush.msra.mxu3 %v1679_v10  ;;  %v1779_v1 = vld [vmem:[%s4982_s11 + $0x2e58] sm:$0xff]  ;;  %v1813_v61 = vld [vmem:[%s4982_s11 + $0x2f68] sm:$0xff] }
 0x37e   : > { %4163 = vmatpush.msra.mxu0 %v1579_v41  ;;  %4182 = vmatpush.msra.mxu1 %v1613_v42  ;;  %v1713_v46 = vld [vmem:[%s4982_s11 + $0x2c48] sm:$0xff]  ;;  %v1747_v40 = vld [vmem:[%s4982_s11 + $0x2d58] sm:$0xff] }
 0x37f   : > { %4203 = vmatpush.msra.mxu2 %v1643_v13  ;;  %4222 = vmatpush.msra.mxu3 %v1677_v14  ;;  %v1777_v8 = vld [vmem:[%s4982_s11 + $0x2e48] sm:$0xff]  ;;  %v1811_v11 = vld [vmem:[%s4982_s11 + $0x2f58] sm:$0xff] }
 0x380   : > { %4164 = vmatpush.msra.mxu0 %v1577_v62  ;;  %4183 = vmatpush.msra.mxu1 %v1611_v0  ;;  %v1711_v9 = vld [vmem:[%s4982_s11 + $0x2c38] sm:$0xff]  ;;  %v1745_v10 = vld [vmem:[%s4982_s11 + $0x2d48] sm:$0xff] }
 0x381   : > { %4204 = vmatpush.msra.mxu2 %v1641_v15  ;;  %4223 = vmatpush.msra.mxu3 %v1675_v16  ;;  %v1775_v41 = vld [vmem:[%s4982_s11 + $0x2e38] sm:$0xff]  ;;  %v1809_v42 = vld [vmem:[%s4982_s11 + $0x2f48] sm:$0xff] }
 0x382   : > { %4165 = vmatmul.f32.vlgmr.msra.gmra.mxu0 %v5800_v60  ;;  %4205 = vmatmul.f32.vlgmr.msra.gmra.mxu2 %v5802_v30  ;;  %v1731_v60 = vld [vmem:[%s4982_s11 + $0x2cd8] sm:$0xff]  ;;  %v1765_v30 = vld [vmem:[%s4982_s11 + $0x2de8] sm:$0xff] }
 0x383   : > { %4229 = vmatpush.msrb.mxu0 %v1735_v18  ;;  %4269 = vmatpush.msrb.mxu2 %v1799_v21  ;;  %v1709_v13 = vld [vmem:[%s4982_s11 + $0x2c28] sm:$0xff]  ;;  %v1743_v14 = vld [vmem:[%s4982_s11 + $0x2d38] sm:$0xff] }
 0x384   : > { %4184 = vmatpush.msra.mxu1 %v1609_v63  ;;  %4224 = vmatpush.msra.mxu3 %v1673_v4  ;;  %v1773_v62 = vld [vmem:[%s4982_s11 + $0x2e28] sm:$0xff]  ;;  %v1807_v0 = vld [vmem:[%s4982_s11 + $0x2f38] sm:$0xff] }
 0x385   : > { %4185 = vmatmul.f32.vlgmr.msra.gmra.mxu1 %v5804_v32  ;;  %4225 = vmatmul.f32.vlgmr.msra.gmra.mxu3 %v7112_v19  ;;  %v1793_v32 = vld [vmem:[%s4982_s11 + $0x2ec8] sm:$0xff]  ;;  %v1707_v15 = vld [vmem:[%s4982_s11 + $0x2c18] sm:$0xff] }
 0x386   : > { %4230 = vmatpush.msrb.mxu0 %v1733_v47  ;;  %4249 = vmatpush.msrb.mxu1 %v1767_v50  ;;  %v1741_v16 = vld [vmem:[%s4982_s11 + $0x2d28] sm:$0xff]  ;;  %v1771_v18 = vld [vmem:[%s4982_s11 + $0x2e18] sm:$0xff] }
 0x387   : > { %4270 = vmatpush.msrb.mxu2 %v1797_v22  ;;  %4289 = vmatpush.msrb.mxu3 %v1831_v23  ;;  %v1805_v21 = vld [vmem:[%s4982_s11 + $0x2f28] sm:$0xff]  ;;  %v1739_v4 = vld [vmem:[%s4982_s11 + $0x2d18] sm:$0xff] }
 0x388   : > { %4231 = vmatpush.msrb.mxu0 %v1731_v60  ;;  %4250 = vmatpush.msrb.mxu1 %v1765_v30  ;;  %v1705_v63 = vld [vmem:[%s4982_s11 + $0x2c08] sm:$0xff]  ;;  %v1803_v50 = vld [vmem:[%s4982_s11 + $0x2f18] sm:$0xff] }
 0x389   : > { %4271 = vmatpush.msrb.mxu2 %v1795_v20  ;;  %4290 = vmatpush.msrb.mxu3 %v1829_v56  ;;  %v1769_v47 = vld [vmem:[%s4982_s11 + $0x2e08] sm:$0xff]  ;;  %v1863_v22 = vld [vmem:[%s4982_s11 + $0x30f8] sm:$0xff] }
 0x38a   : > { %4232 = vmatpush.msrb.mxu0 %v1729_v2  ;;  %4251 = vmatpush.msrb.mxu1 %v1763_v3  ;;  %v1927_v23 = vld [vmem:[%s4982_s11 + $0x32f8] sm:$0xff]  ;;  %v1737_v19 = vld [vmem:[%s4982_s11 + $0x2d08] sm:$0xff] }
 0x38b   : > { %4272 = vmatpush.msrb.mxu2 %v1793_v32  ;;  %4291 = vmatpush.msrb.mxu3 %v1827_v5  ;;  %v1801_v60 = vld [vmem:[%s4982_s11 + $0x2f08] sm:$0xff]  ;;  %v1895_v20 = vld [vmem:[%s4982_s11 + $0x31f8] sm:$0xff] }
 0x38c   : > { %4233 = vmatpush.msrb.mxu0 %v1727_v25  ;;  %4252 = vmatpush.msrb.mxu1 %v1761_v26  ;;  %v1861_v30 = vld [vmem:[%s4982_s11 + $0x30e8] sm:$0xff]  ;;  %v1959_v2 = vld [vmem:[%s4982_s11 + $0x33f8] sm:$0xff] }
 0x38d   : > { %4273 = vmatpush.msrb.mxu2 %v1791_v28  ;;  %4292 = vmatpush.msrb.mxu3 %v1825_v43  ;;  %v1925_v56 = vld [vmem:[%s4982_s11 + $0x32e8] sm:$0xff]  ;;  %v1923_v3 = vld [vmem:[%s4982_s11 + $0x32d8] sm:$0xff] }
 0x38e   : > { %4234 = vmatpush.msrb.mxu0 %v1725_v6  ;;  %4253 = vmatpush.msrb.mxu1 %v1759_v48  ;;  %v1957_v32 = vld [vmem:[%s4982_s11 + $0x33e8] sm:$0xff]  ;;  %v1891_v25 = vld [vmem:[%s4982_s11 + $0x31d8] sm:$0xff] }
 0x38f   : > { %4274 = vmatpush.msrb.mxu2 %v1789_v58  ;;  %4293 = vmatpush.msrb.mxu3 %v1823_v51  ;;  %v1857_v5 = vld [vmem:[%s4982_s11 + $0x30c8] sm:$0xff]  ;;  %v1855_v26 = vld [vmem:[%s4982_s11 + $0x30b8] sm:$0xff] }
 0x390   : > { %4235 = vmatpush.msrb.mxu0 %v1723_v29  ;;  %4254 = vmatpush.msrb.mxu1 %v1757_v31  ;;  %v1889_v28 = vld [vmem:[%s4982_s11 + $0x31c8] sm:$0xff]  ;;  %v1919_v43 = vld [vmem:[%s4982_s11 + $0x32b8] sm:$0xff] }
 0x391   : > { %4275 = vmatpush.msrb.mxu2 %v1787_v7  ;;  %4294 = vmatpush.msrb.mxu3 %v1821_v44  ;;  %v1953_v6 = vld [vmem:[%s4982_s11 + $0x33c8] sm:$0xff]  ;;  %v1887_v58 = vld [vmem:[%s4982_s11 + $0x31b8] sm:$0xff] }
 0x392   : > { %4236 = vmatpush.msrb.mxu0 %v1721_v37  ;;  %4255 = vmatpush.msrb.mxu1 %v1755_v45  ;;  %v1853_v48 = vld [vmem:[%s4982_s11 + $0x30a8] sm:$0xff]  ;;  %v1951_v29 = vld [vmem:[%s4982_s11 + $0x33b8] sm:$0xff] }
 0x393   : > { %4276 = vmatpush.msrb.mxu2 %v1785_v35  ;;  %4295 = vmatpush.msrb.mxu3 %v1819_v36  ;;  %v1917_v51 = vld [vmem:[%s4982_s11 + $0x32a8] sm:$0xff]  ;;  %v1851_v31 = vld [vmem:[%s4982_s11 + $0x3098] sm:$0xff] }
 0x394   : > { %4237 = vmatpush.msrb.mxu0 %v1719_v38  ;;  %4256 = vmatpush.msrb.mxu1 %v1753_v39  ;;  %v1885_v7 = vld [vmem:[%s4982_s11 + $0x31a8] sm:$0xff]  ;;  %v1915_v44 = vld [vmem:[%s4982_s11 + $0x3298] sm:$0xff] }
 0x395   : > { %4277 = vmatpush.msrb.mxu2 %v1783_v33  ;;  %4296 = vmatpush.msrb.mxu3 %v1817_v34  ;;  %v1949_v37 = vld [vmem:[%s4982_s11 + $0x33a8] sm:$0xff]  ;;  %v1883_v35 = vld [vmem:[%s4982_s11 + $0x3198] sm:$0xff] }
 0x396   : > { %4238 = vmatpush.msrb.mxu0 %v1717_v54  ;;  %4257 = vmatpush.msrb.mxu1 %v1751_v57  ;;  %v1849_v45 = vld [vmem:[%s4982_s11 + $0x3088] sm:$0xff]  ;;  %v1947_v38 = vld [vmem:[%s4982_s11 + $0x3398] sm:$0xff] }
 0x397   : > { %4278 = vmatpush.msrb.mxu2 %v1781_v55  ;;  %4297 = vmatpush.msrb.mxu3 %v1815_v59  ;;  %v1913_v36 = vld [vmem:[%s4982_s11 + $0x3288] sm:$0xff]  ;;  %v1847_v39 = vld [vmem:[%s4982_s11 + $0x3078] sm:$0xff] }
 0x398   : > { %4239 = vmatpush.msrb.mxu0 %v1715_v52  ;;  %4258 = vmatpush.msrb.mxu1 %v1749_v53  ;;  %v1881_v33 = vld [vmem:[%s4982_s11 + $0x3188] sm:$0xff]  ;;  %v1911_v34 = vld [vmem:[%s4982_s11 + $0x3278] sm:$0xff] }
 0x399   : > { %4279 = vmatpush.msrb.mxu2 %v1779_v1  ;;  %4298 = vmatpush.msrb.mxu3 %v1813_v61  ;;  %v1945_v54 = vld [vmem:[%s4982_s11 + $0x3388] sm:$0xff]  ;;  %v1879_v55 = vld [vmem:[%s4982_s11 + $0x3178] sm:$0xff] }
 0x39a   : > { %4240 = vmatpush.msrb.mxu0 %v1713_v46  ;;  %4259 = vmatpush.msrb.mxu1 %v1747_v40  ;;  %v1845_v57 = vld [vmem:[%s4982_s11 + $0x3068] sm:$0xff]  ;;  %v1943_v52 = vld [vmem:[%s4982_s11 + $0x3378] sm:$0xff] }
 0x39b   : > { %4280 = vmatpush.msrb.mxu2 %v1777_v8  ;;  %4299 = vmatpush.msrb.mxu3 %v1811_v11  ;;  %v1909_v59 = vld [vmem:[%s4982_s11 + $0x3268] sm:$0xff]  ;;  %v1843_v53 = vld [vmem:[%s4982_s11 + $0x3058] sm:$0xff] }
 0x39c   : > { %4241 = vmatpush.msrb.mxu0 %v1711_v9  ;;  %4260 = vmatpush.msrb.mxu1 %v1745_v10  ;;  %v1877_v1 = vld [vmem:[%s4982_s11 + $0x3168] sm:$0xff]  ;;  %v1907_v61 = vld [vmem:[%s4982_s11 + $0x3258] sm:$0xff] }
 0x39d   : > { %4281 = vmatpush.msrb.mxu2 %v1775_v41  ;;  %4300 = vmatpush.msrb.mxu3 %v1809_v42  ;;  %v1941_v46 = vld [vmem:[%s4982_s11 + $0x3368] sm:$0xff]  ;;  %v1875_v8 = vld [vmem:[%s4982_s11 + $0x3158] sm:$0xff] }
 0x39e   : > { %4242 = vmatpush.msrb.mxu0 %v1709_v13  ;;  %4261 = vmatpush.msrb.mxu1 %v1743_v14  ;;  %v1841_v40 = vld [vmem:[%s4982_s11 + $0x3048] sm:$0xff]  ;;  %v1939_v9 = vld [vmem:[%s4982_s11 + $0x3358] sm:$0xff] }
 0x39f   : > { %4282 = vmatpush.msrb.mxu2 %v1773_v62  ;;  %4301 = vmatpush.msrb.mxu3 %v1807_v0  ;;  %v1905_v11 = vld [vmem:[%s4982_s11 + $0x3248] sm:$0xff]  ;;  %v1839_v10 = vld [vmem:[%s4982_s11 + $0x3038] sm:$0xff] }
 0x3a0   : > { %4243 = vmatpush.msrb.mxu0 %v1707_v15  ;;  %4262 = vmatpush.msrb.mxu1 %v1741_v16  ;;  %v1873_v41 = vld [vmem:[%s4982_s11 + $0x3148] sm:$0xff]  ;;  %v1903_v42 = vld [vmem:[%s4982_s11 + $0x3238] sm:$0xff] }
 0x3a1   : > { %4283 = vmatpush.msrb.mxu2 %v1771_v18  ;;  %4302 = vmatpush.msrb.mxu3 %v1805_v21  ;;  %v1937_v13 = vld [vmem:[%s4982_s11 + $0x3348] sm:$0xff]  ;;  %v1871_v62 = vld [vmem:[%s4982_s11 + $0x3138] sm:$0xff] }
 0x3a2   : > { %4244 = vmatpush.msrb.mxu0 %v1705_v63  ;;  %4263 = vmatpush.msrb.mxu1 %v1739_v4  ;;  %v1837_v14 = vld [vmem:[%s4982_s11 + $0x3028] sm:$0xff]  ;;  %v1935_v15 = vld [vmem:[%s4982_s11 + $0x3338] sm:$0xff] }
 0x3a3   : > { %4284 = vmatpush.msrb.mxu2 %v1769_v47  ;;  %4303 = vmatpush.msrb.mxu3 %v1803_v50  ;;  %v1901_v0 = vld [vmem:[%s4982_s11 + $0x3228] sm:$0xff]  ;;  %v1835_v16 = vld [vmem:[%s4982_s11 + $0x3018] sm:$0xff] }
 0x3a4   : > { %4245 = vmatmul.f32.vlgmr.msrb.gmra.mxu0 %v5880_v12  ;;  %4285 = vmatmul.f32.vlgmr.msrb.gmra.mxu2 %v5882_v17  ;;  %v1859_v12 = vld [vmem:[%s4982_s11 + $0x30d8] sm:$0xff]  ;;  %v1893_v17 = vld [vmem:[%s4982_s11 + $0x31e8] sm:$0xff] }
 0x3a5   : > { %4309 = vmatpush.msra.mxu0 %v1863_v22  ;;  %4349 = vmatpush.msra.mxu2 %v1927_v23  ;;  %v1869_v18 = vld [vmem:[%s4982_s11 + $0x3128] sm:$0xff]  ;;  %v1899_v21 = vld [vmem:[%s4982_s11 + $0x3218] sm:$0xff] }
 0x3a6   : > { %4264 = vmatpush.msrb.mxu1 %v1737_v19  ;;  %4304 = vmatpush.msrb.mxu3 %v1801_v60  ;;  %v1933_v63 = vld [vmem:[%s4982_s11 + $0x3328] sm:$0xff]  ;;  %v1867_v47 = vld [vmem:[%s4982_s11 + $0x3118] sm:$0xff]  ;;  %v3386_v60 = vpop.f32.mrf.mxu1 }
 0x3a7   : > { %4265 = vmatmul.f32.vlgmr.msrb.gmra.mxu1 %v5884_v24  ;;  %4305 = vmatmul.f32.vlgmr.msrb.gmra.mxu3 %v5886_v27  ;;  %v1921_v24 = vld [vmem:[%s4982_s11 + $0x32c8] sm:$0xff]  ;;  %v1955_v27 = vld [vmem:[%s4982_s11 + $0x33d8] sm:$0xff] }
 0x3a8   : > { %4310 = vmatpush.msra.mxu0 %v1861_v30  ;;  %4329 = vmatpush.msra.mxu1 %v1895_v20  ;;  %v1833_v4 = vld [vmem:[%s4982_s11 + $0x3008] sm:$0xff]  ;;  %v1931_v22 = vld [vmem:[%s4982_s11 + $0x3318] sm:$0xff] }
 0x3a9   : > { %4350 = vmatpush.msra.mxu2 %v1925_v56  ;;  %4369 = vmatpush.msra.mxu3 %v1959_v2  ;;  %v1897_v50 = vld [vmem:[%s4982_s11 + $0x3208] sm:$0xff]  ;;  %v1991_v23 = vld [vmem:[%s4982_s11 + $0x34f8] sm:$0xff] }
 0x3aa   : > { %4311 = vmatpush.msra.mxu0 %v1859_v12  ;;  %4330 = vmatpush.msra.mxu1 %v1893_v17  ;;  %v2055_v19 = vld [vmem:[%s4982_s11 + $0x36f8] sm:$0xff]  ;;  %v1865_v30 = vld [vmem:[%s4982_s11 + $0x3108] sm:$0xff]  ;;  %v3366_v12 = vpop.f32.mrf.mxu0 }
 0x3ab   : > { %4351 = vmatpush.msra.mxu2 %v1923_v3  ;;  %4370 = vmatpush.msra.mxu3 %v1957_v32  ;;  %v1929_v20 = vld [vmem:[%s4982_s11 + $0x3308] sm:$0xff]  ;;  %v4770_v56 = vld.sshfl [vmem:[#allocation1] sm:$0xff pattern:$0x73625140]  ;;  %v3387_v32 = vadd.f32 %v3386_v60, %v3366_v12 }
 0x3ac   : > { %4312 = vmatpush.msra.mxu0 %v1857_v5  ;;  %4331 = vmatpush.msra.mxu1 %v1891_v25  ;;  %v4771_v2 = vld.sshfl [vmem:[#allocation1 + $0x10] sm:$0xff pattern:$0x73625140]  ;;  %v2023_v3 = vld [vmem:[%s4982_s11 + $0x35f8] sm:$0xff] }
 0x3ad   : > { %4352 = vmatpush.msra.mxu2 %v1921_v24  ;;  %4371 = vmatpush.msra.mxu3 %v1955_v27  ;;  %v1989_v17 = vld [vmem:[%s4982_s11 + $0x34e8] sm:$0xff]  ;;  %v2087_v25 = vld [vmem:[%s4982_s11 + $0x37f8] sm:$0xff]  ;;  %v3406_v24 = vpop.f32.mrf.mxu2 }
 0x3ae   : > { %4313 = vmatpush.msra.mxu0 %v1855_v26  ;;  %4332 = vmatpush.msra.mxu1 %v1889_v28  ;;  %v2053_v5 = vld [vmem:[%s4982_s11 + $0x36e8] sm:$0xff]  ;;  %v4772_v27 = vld.sshfl [vmem:[#allocation1 + $0x8] sm:$0xff pattern:$0x73625140] }
 0x3af   : > { %4353 = vmatpush.msra.mxu2 %v1919_v43  ;;  %4372 = vmatpush.msra.mxu3 %v1953_v6  ;;  %v4773_v26 = vld.sshfl [vmem:[#allocation1 + $0x18] sm:$0xff pattern:$0x73625140]  ;;  %v1987_v28 = vld [vmem:[%s4982_s11 + $0x34d8] sm:$0xff] }
 0x3b0   : > { %4314 = vmatpush.msra.mxu0 %v1853_v48  ;;  %4333 = vmatpush.msra.mxu1 %v1887_v58  ;;  %v2021_v43 = vld [vmem:[%s4982_s11 + $0x35e8] sm:$0xff]  ;;  %v2051_v6 = vld [vmem:[%s4982_s11 + $0x36d8] sm:$0xff] }
 0x3b1   : > { %4354 = vmatpush.msra.mxu2 %v1917_v51  ;;  %4373 = vmatpush.msra.mxu3 %v1951_v29  ;;  %v2085_v48 = vld [vmem:[%s4982_s11 + $0x37e8] sm:$0xff]  ;;  %v2019_v51 = vld [vmem:[%s4982_s11 + $0x35d8] sm:$0xff]  ;;  %v3407_v29 = vadd.f32 %v3406_v24, %v3387_v32 }
 0x3b2   : > { %4315 = vmatpush.msra.mxu0 %v1851_v31  ;;  %4334 = vmatpush.msra.mxu1 %v1885_v7  ;;  %v1985_v58 = vld [vmem:[%s4982_s11 + $0x34c8] sm:$0xff]  ;;  %v2083_v7 = vld [vmem:[%s4982_s11 + $0x37d8] sm:$0xff] }
 0x3b3   : > { %4355 = vmatpush.msra.mxu2 %v1915_v44  ;;  %4374 = vmatpush.msra.mxu3 %v1949_v37  ;;  %v2049_v31 = vld [vmem:[%s4982_s11 + $0x36c8] sm:$0xff]  ;;  %v3426_v44 = vpop.f32.mrf.mxu3  ;;  %v1983_v37 = vld [vmem:[%s4982_s11 + $0x34b8] sm:$0xff] }
 0x3b4   : > { %4316 = vmatpush.msra.mxu0 %v1849_v45  ;;  %4335 = vmatpush.msra.mxu1 %v1883_v35  ;;  %v2017_v45 = vld [vmem:[%s4982_s11 + $0x35c8] sm:$0xff]  ;;  %v2047_v35 = vld [vmem:[%s4982_s11 + $0x36b8] sm:$0xff] }
 0x3b5   : > { %4356 = vmatpush.msra.mxu2 %v1913_v36  ;;  %4375 = vmatpush.msra.mxu3 %v1947_v38  ;;  %v2081_v36 = vld [vmem:[%s4982_s11 + $0x37c8] sm:$0xff]  ;;  %v1963_v24 = vld [vmem:[%s4982_s11 + $0x3418] sm:$0xff] }
 0x3b6   : > { %4317 = vmatpush.msra.mxu0 %v1847_v39  ;;  %4336 = vmatpush.msra.mxu1 %v1881_v33  ;;  %v1981_v38 = vld [vmem:[%s4982_s11 + $0x34a8] sm:$0xff]  ;;  %v2015_v39 = vld [vmem:[%s4982_s11 + $0x35b8] sm:$0xff]  ;;  %v3427_v33 = vadd.f32 %v3426_v44, %v3407_v29 }
 0x3b7   : > { %4357 = vmatpush.msra.mxu2 %v1911_v34  ;;  %4376 = vmatpush.msra.mxu3 %v1945_v54  ;;  %v2045_v34 = vld [vmem:[%s4982_s11 + $0x36a8] sm:$0xff]  ;;  %v2079_v54 = vld [vmem:[%s4982_s11 + $0x37b8] sm:$0xff] }
 0x3b8   : > { %4318 = vmatpush.msra.mxu0 %v1845_v57  ;;  %4337 = vmatpush.msra.mxu1 %v1879_v55  ;;  %v3446_v57 = vpop.f32.mrf.mxu0  ;;  %v1979_v55 = vld [vmem:[%s4982_s11 + $0x3498] sm:$0xff]  ;;  %v1993_v44 = vld [vmem:[%s4982_s11 + $0x3508] sm:$0xff] }
 0x3b9   : > { %4358 = vmatpush.msra.mxu2 %v1909_v59  ;;  %4377 = vmatpush.msra.mxu3 %v1943_v52  ;;  %v2013_v59 = vld [vmem:[%s4982_s11 + $0x35a8] sm:$0xff]  ;;  %v2043_v52 = vld [vmem:[%s4982_s11 + $0x3698] sm:$0xff] }
 0x3ba   : > { %4319 = vmatpush.msra.mxu0 %v1843_v53  ;;  %4338 = vmatpush.msra.mxu1 %v1877_v1  ;;  %v2077_v53 = vld [vmem:[%s4982_s11 + $0x37a8] sm:$0xff]  ;;  %v2059_v29 = vld [vmem:[%s4982_s11 + $0x3718] sm:$0xff] }
 0x3bb   : > { %4359 = vmatpush.msra.mxu2 %v1907_v61  ;;  %4378 = vmatpush.msra.mxu3 %v1941_v46  ;;  %v1977_v1 = vld [vmem:[%s4982_s11 + $0x3488] sm:$0xff]  ;;  %v2011_v61 = vld [vmem:[%s4982_s11 + $0x3598] sm:$0xff]  ;;  %v3447_v46 = vadd.f32 %v3446_v57, %v3427_v33  ;;  %v3506_v60 = vpop.f32.mrf.mxu3 }
 0x3bc   : > { %4320 = vmatpush.msra.mxu0 %v1841_v40  ;;  %4339 = vmatpush.msra.mxu1 %v1875_v8  ;;  %v2041_v40 = vld [vmem:[%s4982_s11 + $0x3688] sm:$0xff]  ;;  %v2075_v8 = vld [vmem:[%s4982_s11 + $0x3798] sm:$0xff] }
 0x3bd   : > { %4360 = vmatpush.msra.mxu2 %v1905_v11  ;;  %4379 = vmatpush.msra.mxu3 %v1939_v9  ;;  %v3466_v11 = vpop.f32.mrf.mxu1  ;;  %v1975_v9 = vld [vmem:[%s4982_s11 + $0x3478] sm:$0xff]  ;;  %v4777_v33 = vld.sshfl [vmem:[#allocation1 + $0x38] sm:$0xff pattern:$0x73625140] }
 0x3be   : > { %4321 = vmatpush.msra.mxu0 %v1839_v10  ;;  %4340 = vmatpush.msra.mxu1 %v1873_v41  ;;  %v2009_v10 = vld [vmem:[%s4982_s11 + $0x3588] sm:$0xff]  ;;  %v2039_v41 = vld [vmem:[%s4982_s11 + $0x3678] sm:$0xff] }
 0x3bf   : > { %4361 = vmatpush.msra.mxu2 %v1903_v42  ;;  %4380 = vmatpush.msra.mxu3 %v1937_v13  ;;  %v2073_v42 = vld [vmem:[%s4982_s11 + $0x3788] sm:$0xff] }
 0x3c0   : > { %4322 = vmatpush.msra.mxu0 %v1837_v14  ;;  %4341 = vmatpush.msra.mxu1 %v1871_v62  ;;  %v1973_v13 = vld [vmem:[%s4982_s11 + $0x3468] sm:$0xff]  ;;  %v2007_v14 = vld [vmem:[%s4982_s11 + $0x3578] sm:$0xff]  ;;  %v3467_v62 = vadd.f32 %v3466_v11, %v3447_v46  ;;  %v3526_v12 = vpop.f32.mrf.mxu0 }
 0x3c1   : > { %4362 = vmatpush.msra.mxu2 %v1901_v0  ;;  %4381 = vmatpush.msra.mxu3 %v1935_v15  ;;  %v2037_v0 = vld [vmem:[%s4982_s11 + $0x3668] sm:$0xff]  ;;  %v2071_v15 = vld [vmem:[%s4982_s11 + $0x3778] sm:$0xff] }
 0x3c2   : > { %4323 = vmatpush.msra.mxu0 %v1835_v16  ;;  %4342 = vmatpush.msra.mxu1 %v1869_v18  ;;  %v3486_v16 = vpop.f32.mrf.mxu2  ;;  %v1971_v18 = vld [vmem:[%s4982_s11 + $0x3458] sm:$0xff] }
 0x3c3   : > { %4363 = vmatpush.msra.mxu2 %v1899_v21  ;;  %4382 = vmatpush.msra.mxu3 %v1933_v63  ;;  %v2005_v21 = vld [vmem:[%s4982_s11 + $0x3568] sm:$0xff]  ;;  %v2035_v63 = vld [vmem:[%s4982_s11 + $0x3658] sm:$0xff] }
 0x3c4   : > { %4324 = vmatpush.msra.mxu0 %v1833_v4  ;;  %4343 = vmatpush.msra.mxu1 %v1867_v47  ;;  %v2069_v4 = vld [vmem:[%s4982_s11 + $0x3768] sm:$0xff] }
 0x3c5   : > { %4364 = vmatpush.msra.mxu2 %v1897_v50  ;;  %4383 = vmatpush.msra.mxu3 %v1931_v22  ;;  %v1969_v47 = vld [vmem:[%s4982_s11 + $0x3448] sm:$0xff]  ;;  %v2003_v50 = vld [vmem:[%s4982_s11 + $0x3558] sm:$0xff]  ;;  %v3487_v22 = vadd.f32 %v3486_v16, %v3467_v62 }
 0x3c6   : > { %4325 = vmatmul.f32.vlgmr.msra.gmra.mxu0 %v4770_v56  ;;  %4365 = vmatmul.f32.vlgmr.msra.gmra.mxu2 %v4771_v2  ;;  %v2031_v56 = vld [vmem:[%s4982_s11 + $0x3638] sm:$0xff]  ;;  %v2065_v2 = vld [vmem:[%s4982_s11 + $0x3748] sm:$0xff] }
 0x3c7   : > { %4389 = vmatpush.msrb.mxu0 %v1991_v23  ;;  %4429 = vmatpush.msrb.mxu2 %v2055_v19  ;;  %v2033_v23 = vld [vmem:[%s4982_s11 + $0x3648] sm:$0xff]  ;;  %v2067_v19 = vld [vmem:[%s4982_s11 + $0x3758] sm:$0xff]  ;;  %v3507_v32 = vadd.f32 %v3506_v60, %v3487_v22 }
 0x3c8   : > { %4344 = vmatpush.msra.mxu1 %v1865_v30  ;;  %4384 = vmatpush.msra.mxu3 %v1929_v20  ;;  %v1967_v30 = vld [vmem:[%s4982_s11 + $0x3438] sm:$0xff]  ;;  %v2001_v20 = vld [vmem:[%s4982_s11 + $0x3548] sm:$0xff] }
 0x3c9   : > { %4345 = vmatmul.f32.vlgmr.msra.gmra.mxu1 %v4772_v27  ;;  %4385 = vmatmul.f32.vlgmr.msra.gmra.mxu3 %v4773_v26  ;;  %v1997_v27 = vld [vmem:[%s4982_s11 + $0x3528] sm:$0xff]  ;;  %v3527_v26 = vadd.f32 %v3526_v12, %v3507_v32 }
 0x3ca   : > { %4390 = vmatpush.msrb.mxu0 %v1989_v17  ;;  %4409 = vmatpush.msrb.mxu1 %v2023_v3  ;;  %v1965_v17 = vld [vmem:[%s4982_s11 + $0x3428] sm:$0xff]  ;;  %v1999_v3 = vld [vmem:[%s4982_s11 + $0x3538] sm:$0xff] }
 0x3cb   : > { %4430 = vmatpush.msrb.mxu2 %v2053_v5  ;;  %4449 = vmatpush.msrb.mxu3 %v2087_v25  ;;  %v2029_v5 = vld [vmem:[%s4982_s11 + $0x3628] sm:$0xff]  ;;  %v2063_v25 = vld [vmem:[%s4982_s11 + $0x3738] sm:$0xff] }
 0x3cc   : > { %4391 = vmatpush.msrb.mxu0 %v1987_v28  ;;  %4410 = vmatpush.msrb.mxu1 %v2021_v43  ;;  %v2027_v28 = vld [vmem:[%s4982_s11 + $0x3618] sm:$0xff]  ;;  %v2061_v43 = vld [vmem:[%s4982_s11 + $0x3728] sm:$0xff] }
 0x3cd   : > { %4431 = vmatpush.msrb.mxu2 %v2051_v6  ;;  %4450 = vmatpush.msrb.mxu3 %v2085_v48  ;;  %v3546_v6 = vpop.f32.mrf.mxu1  ;;  %v1961_v48 = vld [vmem:[%s4982_s11 + $0x3408] sm:$0xff] }
 0x3ce   : > { %4392 = vmatpush.msrb.mxu0 %v1985_v58  ;;  %4411 = vmatpush.msrb.mxu1 %v2019_v51  ;;  %v1995_v58 = vld [vmem:[%s4982_s11 + $0x3518] sm:$0xff]  ;;  %v2025_v51 = vld [vmem:[%s4982_s11 + $0x3608] sm:$0xff] }
 0x3cf   : > { %4432 = vmatpush.msrb.mxu2 %v2049_v31  ;;  %4451 = vmatpush.msrb.mxu3 %v2083_v7  ;;  %v3566_v31 = vpop.f32.mrf.mxu2  ;;  %v3547_v7 = vadd.f32 %v3546_v6, %v3527_v26 }
 0x3d0   : > { %4393 = vmatpush.msrb.mxu0 %v1983_v37  ;;  %4412 = vmatpush.msrb.mxu1 %v2017_v45  ;;  %v2057_v37 = vld [vmem:[%s4982_s11 + $0x3708] sm:$0xff] }
 0x3d1   : > { %4433 = vmatpush.msrb.mxu2 %v2047_v35  ;;  %4452 = vmatpush.msrb.mxu3 %v2081_v36  ;;  %v3567_v45 = vadd.f32 %v3566_v31, %v3547_v7  ;;  %v4774_v35 = vld.sshfl [vmem:[#allocation1 + $0x20] sm:$0xff pattern:$0x73625140]  ;;  %v4775_v36 = vld.sshfl [vmem:[#allocation1 + $0x30] sm:$0xff pattern:$0x73625140] }
 0x3d2   : > { %4394 = vmatpush.msrb.mxu0 %v1981_v38  ;;  %4413 = vmatpush.msrb.mxu1 %v2015_v39  ;;  %v3586_v38 = vpop.f32.mrf.mxu3  ;;  %v4776_v39 = vld.sshfl [vmem:[#allocation1 + $0x28] sm:$0xff pattern:$0x73625140] }
 0x3d3   : > { %4434 = vmatpush.msrb.mxu2 %v2045_v34  ;;  %4453 = vmatpush.msrb.mxu3 %v2079_v54  ;;  %v3606_v34 = vpop.f32.mrf.mxu0  ;;  %v3587_v54 = vadd.f32 %v3586_v38, %v3567_v45 }
 0x3d4   : > { %4395 = vmatpush.msrb.mxu0 %v1979_v55  ;;  %4414 = vmatpush.msrb.mxu1 %v2013_v59 }
 0x3d5   : > { %4435 = vmatpush.msrb.mxu2 %v2043_v52  ;;  %4454 = vmatpush.msrb.mxu3 %v2077_v53  ;;  %v3607_v57 = vadd.f32 %v3606_v34, %v3587_v54  ;;  %v3626_v55 = vpop.f32.mrf.mxu1 }
 0x3d6   : > { %4396 = vmatpush.msrb.mxu0 %v1977_v1  ;;  %4415 = vmatpush.msrb.mxu1 %v2011_v61 }
 0x3d7   : > { %4436 = vmatpush.msrb.mxu2 %v2041_v40  ;;  %4455 = vmatpush.msrb.mxu3 %v2075_v8  ;;  %v3646_v59 = vpop.f32.mrf.mxu2  ;;  %v3627_v52 = vadd.f32 %v3626_v55, %v3607_v57 }
 0x3d8   : > { %4397 = vmatpush.msrb.mxu0 %v1975_v9  ;;  %4416 = vmatpush.msrb.mxu1 %v2009_v10 }
 0x3d9   : > { %4437 = vmatpush.msrb.mxu2 %v2039_v41  ;;  %4456 = vmatpush.msrb.mxu3 %v2073_v42  ;;  %v3647_v53 = vadd.f32 %v3646_v59, %v3627_v52 }
 0x3da   : > { %4398 = vmatpush.msrb.mxu0 %v1973_v13  ;;  %4417 = vmatpush.msrb.mxu1 %v2007_v14  ;;  %v3666_v1 = vpop.f32.mrf.mxu3 }
 0x3db   : > { %4438 = vmatpush.msrb.mxu2 %v2037_v0  ;;  %4457 = vmatpush.msrb.mxu3 %v2071_v15  ;;  %v3686_v61 = vpop.f32.mrf.mxu0  ;;  %v3667_v46 = vadd.f32 %v3666_v1, %v3647_v53 }
 0x3dc   : > { %4399 = vmatpush.msrb.mxu0 %v1971_v18  ;;  %4418 = vmatpush.msrb.mxu1 %v2005_v21 }
 0x3dd   : > { %4439 = vmatpush.msrb.mxu2 %v2035_v63  ;;  %4458 = vmatpush.msrb.mxu3 %v2069_v4  ;;  %v3687_v40 = vadd.f32 %v3686_v61, %v3667_v46  ;;  %v3706_v8 = vpop.f32.mrf.mxu1 }
 0x3de   : > { %4400 = vmatpush.msrb.mxu0 %v1969_v47  ;;  %4419 = vmatpush.msrb.mxu1 %v2003_v50 }
 0x3df   : > { %4440 = vmatpush.msrb.mxu2 %v2033_v23  ;;  %4459 = vmatpush.msrb.mxu3 %v2067_v19  ;;  %v3726_v11 = vpop.f32.mrf.mxu2  ;;  %v3707_v9 = vadd.f32 %v3706_v8, %v3687_v40 }
 0x3e0   : > { %4401 = vmatpush.msrb.mxu0 %v1967_v30  ;;  %4420 = vmatpush.msrb.mxu1 %v2001_v20 }
 0x3e1   : > { %4441 = vmatpush.msrb.mxu2 %v2031_v56  ;;  %4460 = vmatpush.msrb.mxu3 %v2065_v2  ;;  %v3727_v10 = vadd.f32 %v3726_v11, %v3707_v9 }
 0x3e2   : > { %4402 = vmatpush.msrb.mxu0 %v1965_v17  ;;  %4421 = vmatpush.msrb.mxu1 %v1999_v3  ;;  %v3746_v41 = vpop.f32.mrf.mxu3 }
 0x3e3   : > { %4442 = vmatpush.msrb.mxu2 %v2029_v5  ;;  %4461 = vmatpush.msrb.mxu3 %v2063_v25  ;;  %v3766_v42 = vpop.f32.mrf.mxu0  ;;  %v3747_v13 = vadd.f32 %v3746_v41, %v3727_v10 }
 0x3e4   : > { %4403 = vmatpush.msrb.mxu0 %v1963_v24  ;;  %4422 = vmatpush.msrb.mxu1 %v1997_v27 }
 0x3e5   : > { %4443 = vmatpush.msrb.mxu2 %v2027_v28  ;;  %4462 = vmatpush.msrb.mxu3 %v2061_v43  ;;  %v3767_v14 = vadd.f32 %v3766_v42, %v3747_v13  ;;  %v3786_v62 = vpop.f32.mrf.mxu1 }
 0x3e6   : > { %4404 = vmatpush.msrb.mxu0 %v1961_v48  ;;  %4423 = vmatpush.msrb.mxu1 %v1995_v58 }
 0x3e7   : > { %4444 = vmatpush.msrb.mxu2 %v2025_v51  ;;  %4463 = vmatpush.msrb.mxu3 %v2059_v29  ;;  %v3806_v0 = vpop.f32.mrf.mxu2  ;;  %v3787_v15 = vadd.f32 %v3786_v62, %v3767_v14 }
 0x3e8   : > { %4405 = vmatmul.f32.vlgmr.msrb.gmra.mxu0 %v4774_v35  ;;  %4445 = vmatmul.f32.vlgmr.msrb.gmra.mxu2 %v4775_v36 }
 0x3e9   : > { %4424 = vmatpush.msrb.mxu1 %v1993_v44  ;;  %4464 = vmatpush.msrb.mxu3 %v2057_v37  ;;  %v3807_v16 = vadd.f32 %v3806_v0, %v3787_v15 }
 0x3ea   : > { %4425 = vmatmul.f32.vlgmr.msrb.gmra.mxu1 %v4776_v39  ;;  %4465 = vmatmul.f32.vlgmr.msrb.gmra.mxu3 %v4777_v33  ;;  %v3826_v18 = vpop.f32.mrf.mxu3 }
 0x3eb   : > { %v3846_v21 = vpop.f32.mrf.mxu0  ;;  %v3827_v63 = vadd.f32 %v3826_v18, %v3807_v16 }
 0x3ed   : > { %v3847_v4 = vadd.f32 %v3846_v21, %v3827_v63  ;;  %v3866_v47 = vpop.f32.mrf.mxu1 }
 0x3ef   : > { %v3886_v50 = vpop.f32.mrf.mxu2  ;;  %v3867_v22 = vadd.f32 %v3866_v47, %v3847_v4  ;;  %v278_v4 = vld [vmem:[#allocation2] sm:$0xf] }
 0x3f1   : > { %v3887_v23 = vadd.f32 %v3886_v50, %v3867_v22 }
 0x3f2   : > { %v3906_v19 = vpop.f32.mrf.mxu3 }
 0x3f3   : > { %v3926_v60 = vpop.f32.mrf.mxu0  ;;  %v3907_v30 = vadd.f32 %v3906_v19, %v3887_v23 }
 0x3f5   : > { %v3927_v20 = vadd.f32 %v3926_v60, %v3907_v30  ;;  %v3946_v56 = vpop.f32.mrf.mxu1 }
 0x3f7   : > { %v3966_v2 = vpop.f32.mrf.mxu2  ;;  %v3947_v12 = vadd.f32 %v3946_v56, %v3927_v20 }
 0x3f9   : > { %v3967_v17 = vadd.f32 %v3966_v2, %v3947_v12 }
 0x3fa   : > { %v3986_v3 = vpop.f32.mrf.mxu3 }
 0x3fb   : > { %v4006_v32 = vpop.f32.mrf.mxu0  ;;  %v3987_v5 = vadd.f32 %v3986_v3, %v3967_v17 }
 0x3fd   : > { %v4007_v25 = vadd.f32 %v4006_v32, %v3987_v5  ;;  %v4026_v24 = vpop.f32.mrf.mxu1 }
 0x3ff   : > { %v4046_v27 = vpop.f32.mrf.mxu2  ;;  %v4027_v26 = vadd.f32 %v4026_v24, %v4007_v25 }
 0x401   : > { %v4047_v28 = vadd.f32 %v4046_v27, %v4027_v26 }
 0x402   : > { %v4066_v43 = vpop.f32.mrf.mxu3 }
 0x403   : > { %v4086_v6 = vpop.f32.mrf.mxu0  ;;  %v4067_v48 = vadd.f32 %v4066_v43, %v4047_v28 }
 0x405   : > { %v4087_v58 = vadd.f32 %v4086_v6, %v4067_v48  ;;  %v4106_v51 = vpop.f32.mrf.mxu1 }
 0x407   : > { %v4126_v29 = vpop.f32.mrf.mxu2  ;;  %v4107_v31 = vadd.f32 %v4106_v51, %v4087_v58 }
 0x409   : > { %v4127_v7 = vadd.f32 %v4126_v29, %v4107_v31 }
 0x40a   : > { %v4146_v44 = vpop.f32.mrf.mxu3 }
 0x40b   : > { %v4166_v37 = vpop.f32.mrf.mxu0  ;;  %v4147_v45 = vadd.f32 %v4146_v44, %v4127_v7 }
 0x40d   : > { %v4167_v35 = vadd.f32 %v4166_v37, %v4147_v45  ;;  %v4186_v36 = vpop.f32.mrf.mxu1 }
 0x40f   : > { %v4206_v38 = vpop.f32.mrf.mxu2  ;;  %v4187_v39 = vadd.f32 %v4186_v36, %v4167_v35 }
 0x411   : > { %v4207_v33 = vadd.f32 %v4206_v38, %v4187_v39 }
 0x412   : > { %v4226_v34 = vpop.f32.mrf.mxu3 }
 0x413   : > { %v4227_v57 = vadd.f32 %v4226_v34, %v4207_v33 }
 0x421   : > { %v4246_v54 = vpop.f32.mrf.mxu0 }
 0x422   : > { %v4247_v55 = vadd.f32 %v4246_v54, %v4227_v57 }
 0x424   : > { %v4266_v59 = vpop.f32.mrf.mxu1 }
 0x425   : > { %v4267_v53 = vadd.f32 %v4266_v59, %v4247_v55 }
 0x427   : > { %v4286_v52 = vpop.f32.mrf.mxu2 }
 0x428   : > { %v4287_v1 = vadd.f32 %v4286_v52, %v4267_v53 }
 0x42a   : > { %v4306_v61 = vpop.f32.mrf.mxu3 }
 0x42b   : > { %v4307_v40 = vadd.f32 %v4306_v61, %v4287_v1 }
 0x443   : > { %v4326_v46 = vpop.f32.mrf.mxu0 }
 0x444   : > { %v4327_v8 = vadd.f32 %v4326_v46, %v4307_v40 }
 0x446   : > { %v4346_v11 = vpop.f32.mrf.mxu1 }
 0x447   : > { %v4347_v10 = vadd.f32 %v4346_v11, %v4327_v8 }
 0x449   : > { %v4366_v9 = vpop.f32.mrf.mxu2 }
 0x44a   : > { %v4367_v41 = vadd.f32 %v4366_v9, %v4347_v10 }
 0x44c   : > { %v4386_v42 = vpop.f32.mrf.mxu3 }
 0x44d   : > { %v4387_v13 = vadd.f32 %v4386_v42, %v4367_v41 }
 0x465   : > { %v4406_v14 = vpop.f32.mrf.mxu0 }
 0x466   : > { %v4407_v62 = vadd.f32 %v4406_v14, %v4387_v13 }
 0x467   : > { %v4426_v0 = vpop.f32.mrf.mxu1 }
 0x468   : > { %v4427_v15 = vadd.f32 %v4426_v0, %v4407_v62 }
 0x46b   : > { %v4446_v16 = vpop.f32.mrf.mxu2 }
 0x46c   : > { %v4447_v18 = vadd.f32 %v4446_v16, %v4427_v15 }
 0x46d   : > { %v4466_v21 = vpop.f32.mrf.mxu3 }
 0x46e   : > { %v4467_v63 = vadd.f32 %v4466_v21, %v4447_v18 }
 0x470   : > { %v4471_v47 = vrot.slane %v4467_v63, 6 }
 0x471   : > { %4480 = sbr.rel (%p4687_p2) target bundleno = 1304 (0x518), region = 48 }
 0x472   : > { %v4473_v50 = vsel %vm4472_vm0, %v6363_v49, %v4471_v47 }
 0x473   : > { %v4475_v22 = vadd.f32 %v4473_v50, %v278_v4 }
 0x475   : > { %4476 = vst [vmem:[#allocation2] sm:$0xf] %v4475_v22 }
 0x476   : > { %v4505_v23 = vld [vmem:[%s4998_s23 + $0x78] sm:$0xff]  ;;  %v4504_v60 = vld [vmem:[%s4998_s23 + $0x70] sm:$0xff]  ;;  %v4503_v30 = vld [vmem:[%s4998_s23 + $0x68] sm:$0xff] }
 0x477   : > { %v4521_v19 = vld [vmem:[%s4998_s23 + $0xf8] sm:$0xff]  ;;  %4528 = vmatpush.msra.mxu0 %v4505_v23  ;;  %v4520_v49 = vld [vmem:[%s4998_s23 + $0xf0] sm:$0xff]  ;;  %v4519_v20 = vld [vmem:[%s4998_s23 + $0xe8] sm:$0xff] }
 0x478   : > { %4548 = vmatpush.msra.mxu1 %v4521_v19  ;;  %v4502_v56 = vld [vmem:[%s4998_s23 + $0x60] sm:$0xff]  ;;  %v4501_v12 = vld [vmem:[%s4998_s23 + $0x58] sm:$0xff]  ;;  %v4500_v3 = vld [vmem:[%s4998_s23 + $0x50] sm:$0xff] }
 0x479   : > { %4529 = vmatpush.msra.mxu0 %v4504_v60  ;;  %v4518_v2 = vld [vmem:[%s4998_s23 + $0xe0] sm:$0xff]  ;;  %v4517_v17 = vld [vmem:[%s4998_s23 + $0xd8] sm:$0xff]  ;;  %v4516_v32 = vld [vmem:[%s4998_s23 + $0xd0] sm:$0xff] }
 0x47a   : > { %4549 = vmatpush.msra.mxu1 %v4520_v49  ;;  %v4499_v5 = vld [vmem:[%s4998_s23 + $0x48] sm:$0xff]  ;;  %v4482_v24 = vld [vmem:[%s4993_s13] sm:$0x3]  ;;  %v4497_v6 = vld [vmem:[%s4998_s23 + $0x38] sm:$0xff] }
 0x47b   : > { %4530 = vmatpush.msra.mxu0 %v4503_v30  ;;  %v4515_v25 = vld [vmem:[%s4998_s23 + $0xc8] sm:$0xff]  ;;  %v4498_v27 = vld [vmem:[%s4998_s23 + $0x40] sm:$0xff]  ;;  %v4484_v28 = vperm.slane %v4482_v24, 0  ;;  %v4485_v43 = vperm.slane %v4482_v24, 1  ;;  %v4513_v48 = vld [vmem:[%s4998_s23 + $0xb8] sm:$0xff] }
 0x47c   : > { %4550 = vmatpush.msra.mxu1 %v4519_v20  ;;  %v4514_v26 = vld [vmem:[%s4998_s23 + $0xc0] sm:$0xff]  ;;  %v4481_v58 = vld [vmem:[#allocation2] sm:$0xf]  ;;  %v4496_v29 = vld [vmem:[%s4998_s23 + $0x30] sm:$0xff] }
 0x47d   : > { %4531 = vmatpush.msra.mxu0 %v4502_v56  ;;  %v4486_v51 = vrot.slane %v4485_v43, 6  ;;  %v4512_v31 = vld [vmem:[%s4998_s23 + $0xb0] sm:$0xff]  ;;  %v4495_v37 = vld [vmem:[%s4998_s23 + $0x28] sm:$0xff]  ;;  %v4494_v35 = vld [vmem:[%s4998_s23 + $0x20] sm:$0xff] }
 0x47e   : > { %4551 = vmatpush.msra.mxu1 %v4518_v2  ;;  %v4511_v45 = vld [vmem:[%s4998_s23 + $0xa8] sm:$0xff]  ;;  %v4510_v36 = vld [vmem:[%s4998_s23 + $0xa0] sm:$0xff]  ;;  %v4493_v38 = vld [vmem:[%s4998_s23 + $0x18] sm:$0xff] }
 0x47f   : > { %4532 = vmatpush.msra.mxu0 %v4501_v12  ;;  %v4487_v7 = vsel %vm4472_vm0, %v4484_v28, %v4486_v51  ;;  %v4509_v39 = vld [vmem:[%s4998_s23 + $0x98] sm:$0xff]  ;;  %v4492_v33 = vld [vmem:[%s4998_s23 + $0x10] sm:$0xff]  ;;  %v4491_v54 = vld [vmem:[%s4998_s23 + $0x8] sm:$0xff] }
 0x480   : > { %4552 = vmatpush.msra.mxu1 %v4517_v17  ;;  %v4489_v44 = vadd.f32 %v4487_v7, %v4481_v58  ;;  %v4508_v34 = vld [vmem:[%s4998_s23 + $0x90] sm:$0xff]  ;;  %v4507_v57 = vld [vmem:[%s4998_s23 + $0x88] sm:$0xff]  ;;  %v4490_v55 = vld [vmem:[%s4998_s23] sm:$0xff] }
 0x481   : > { %4533 = vmatpush.msra.mxu0 %v4500_v3  ;;  %v4506_v59 = vld [vmem:[%s4998_s23 + $0x80] sm:$0xff] }
 0x482   : > { %4553 = vmatpush.msra.mxu1 %v4516_v32  ;;  %4523 = vst [vmem:[#allocation1] ss:$4 sm:$0xff] %v4489_v44 }
 0x483   : > { %4534 = vmatpush.msra.mxu0 %v4499_v5 }
 0x484   : > { %4554 = vmatpush.msra.mxu1 %v4515_v25 }
 0x485   : > { %4535 = vmatpush.msra.mxu0 %v4498_v27 }
 0x486   : > { %4555 = vmatpush.msra.mxu1 %v4514_v26 }
 0x487   : > { %4536 = vmatpush.msra.mxu0 %v4497_v6 }
 0x488   : > { %4556 = vmatpush.msra.mxu1 %v4513_v48 }
 0x489   : > { %4537 = vmatpush.msra.mxu0 %v4496_v29  ;;  %v4524_v52 = vld.sshfl [vmem:[#allocation1] sm:$0xff pattern:$0x73625140]  ;;  %v4525_v53 = vld.sshfl [vmem:[#allocation1 + $0x8] sm:$0xff pattern:$0x73625140] }
 0x48a   : > { %4557 = vmatpush.msra.mxu1 %v4512_v31 }
 0x48b   : > { %4538 = vmatpush.msra.mxu0 %v4495_v37 }
 0x48c   : > { %4558 = vmatpush.msra.mxu1 %v4511_v45 }
 0x48d   : > { %4539 = vmatpush.msra.mxu0 %v4494_v35 }
 0x48e   : > { %4559 = vmatpush.msra.mxu1 %v4510_v36 }
 0x48f   : > { %4540 = vmatpush.msra.mxu0 %v4493_v38 }
 0x490   : > { %4560 = vmatpush.msra.mxu1 %v4509_v39 }
 0x491   : > { %4541 = vmatpush.msra.mxu0 %v4492_v33 }
 0x492   : > { %4561 = vmatpush.msra.mxu1 %v4508_v34 }
 0x493   : > { %4542 = vmatpush.msra.mxu0 %v4491_v54 }
 0x494   : > { %4562 = vmatpush.msra.mxu1 %v4507_v57 }
 0x495   : > { %4543 = vmatpush.msra.mxu0 %v4490_v55 }
 0x496   : > { %4563 = vmatpush.msra.mxu1 %v4506_v59  ;;  %4544 = vmatmul.f32.vlgmr.msra.gmra.mxu0 %v4524_v52 }
 0x497   : > { %4564 = vmatmul.f32.vlgmr.msra.gmra.mxu1 %v4525_v53 }
 0x513   : > { %v4545_v1 = vpop.f32.mrf.mxu0 }
 0x514   : > { %v4565_v61 = vpop.f32.mrf.mxu1 }
 0x515   : > { %v4566_v46 = vadd.f32 %v4565_v61, %v4545_v1 }
 0x517   : > { %4568 = vst [vmem:[%s5003_s28] sm:$0x3] %v4566_v46 }
 0x518 PF: > { %s17_s22 = sadd.s32 1, %s4874_s22   ;;  %s7113_s9 = sld [smem:[#allocation6_spill]] }
 0x519   : > { %p14_p3 = scmp.ge.s32.totalorder %s17_s22, 64   ;;  %s7114_s15 = smov %s4850_s16 }
 0x51a   : > { %s7115_s16 = smov %s4854_s17  ;;  %s7116_s17 = smov %s4970_s8 }
 0x51b   : > { %s7117_s18 = smov %s4866_s20  ;;  %s7118_s19 = smov %s4870_s21 }
 0x51c   : > { %s7119_s20 = smov %s7122_s24  ;;  %16 = sbr.rel (!%p14_p3) target bundleno = 5 (0x5), region = 92 }
 0x51e   : > { %s7120_s21 = smov %s7113_s9 }
 0x521   :  { %4588 = vsyncpa [#allocation4], 1 }
 0x522   :  { %4590 = vsyncpa [#allocation4 + $0x1], 1 }

</bundles_post_ra>
